<compile_context>
chip_gen: v5e
topology: v5e:2x2
jax: 0.10.0
libtpu: 0.0.40
codegen_flags: <defaults>
</compile_context>

<pallas_src>
import functools
import math

import jax
import jax.numpy as jnp
from jax.experimental import pallas as pl
from jax.experimental.pallas import tpu as pltpu


def _cdiv(a: int, b: int) -> int:
    return (a + b - 1) // b


def _round_up(x: int, m: int) -> int:
    return _cdiv(x, m) * m


def _choose_pack(emb: int) -> int:
    """Rows packed per lane-row so the packed row width is a big multiple of 128."""
    q = 128 // math.gcd(emb, 128)          # smallest q with (q*emb) % 128 == 0
    if q * emb > 1024:                     # pathological emb -> no packing
        return 1
    while q * emb < 512 and 2 * q * emb <= 1024:
        q *= 2                             # aim for ~512-lane rows
    return q


# ----------------------------- Pallas kernel ------------------------------ #
def _embedder_kernel(xp_ref, w1_ref, sel_ref, ccos_ref, csin_ref, b1_ref,
                     g1_ref, be1_ref, w2_ref, b2_ref, g2_ref, be2_ref,
                     mavg_ref, spread_ref, o_ref,
                     *, layer_norm: bool, eps: float = 1e-5):
    """One packed tile: xp [TMQ, Q*inp_dim] -> o [TMQ, Q*emb].

    Packed layout: packed row r, lane group i (of width emb) is original row
    Q*r + i.  All weights are Q-fold block-diagonal, so lane groups never mix.
    Layer 1:  h = xp @ W1x_bd + cos(theta) @ Ccos + sin(theta) @ Csin + b1
    where theta = xp @ Sel is an exact 0/1 gather of the theta column of every
    packed sub-row (2 transcendentals per original row instead of 2*inp_dim).
    """
    f32 = jnp.float32
    xp = xp_ref[...]

    th = jnp.dot(xp, sel_ref[...], preferred_element_type=f32)        # [TMQ, Q]
    h = (jnp.dot(xp, w1_ref[...], preferred_element_type=f32)
         + jnp.dot(jnp.cos(th), ccos_ref[...], preferred_element_type=f32)
         + jnp.dot(jnp.sin(th), csin_ref[...], preferred_element_type=f32)
         + b1_ref[...])

    def group_layer_norm(v, g_ref, be_ref):
        # Per-(row, lane-group) mean/var via block-diagonal reduce+spread
        # matmuls (MXU); rsqrt on the EUP.  Reuses (v - mu).
        mavg, spread = mavg_ref[...], spread_ref[...]
        mu = jnp.dot(jnp.dot(v, mavg, preferred_element_type=f32), spread,
                     preferred_element_type=f32)
        c = v - mu
        var = jnp.dot(jnp.dot(c * c, mavg, preferred_element_type=f32), spread,
                      preferred_element_type=f32)
        return c * jax.lax.rsqrt(var + eps) * g_ref[...] + be_ref[...]

    h = group_layer_norm(h, g1_ref, be1_ref) if layer_norm else jnp.maximum(h, 0.0)
    y = jnp.dot(h, w2_ref[...], preferred_element_type=f32) + b2_ref[...]
    y = group_layer_norm(y, g2_ref, be2_ref) if layer_norm else jnp.maximum(y, 0.0)

    o_ref[...] = y.astype(o_ref.dtype)                 # unmasked, lane-dense store


# -------------------------- Weight preparation ----------------------------- #
def _prepare_packed_weights(params, inp_dim: int, emb: int, q: int):
    """Build the Q-fold block-diagonal weights (tiny, done once per call)."""
    dt = jnp.float32
    w1, w2 = params["w1"], params["w2"]            # [inp_dim+1, emb], [emb, emb]

    # W1 rows re-mapped to x-column order [pos0, pos1, theta, feat...]; the
    # theta column contributes nothing linearly (handled by cos/sin terms).
    w1x = jnp.concatenate(
        [w1[0:2], jnp.zeros((1, emb), dt), w1[2:inp_dim - 1]], axis=0)  # [inp_dim, emb]
    w1cos = w1[inp_dim - 1][None, :]               # [1, emb]
    w1sin = w1[inp_dim][None, :]                   # [1, emb]
    sel = jnp.zeros((inp_dim, 1), dt).at[2, 0].set(1.0)   # picks the theta column

    eye = jnp.eye(q, dtype=dt)
    bd = lambda block: jnp.kron(eye, block)        # q-fold block-diagonal
    tile_cols = lambda v: jnp.tile(v.reshape(1, emb), (1, q))

    return [
        bd(w1x),                                   # w1_big   [q*inp_dim, q*emb]
        bd(sel),                                   # sel_big  [q*inp_dim, q]
        bd(w1cos),                                 # ccos_big [q, q*emb]
        bd(w1sin),                                 # csin_big [q, q*emb]
        tile_cols(params["b1"]),                   # b1_big   [1, q*emb]
        tile_cols(params["g1"]),                   # g1_big
        tile_cols(params["be1"]),                  # be1_big
        bd(w2),                                    # w2_big   [q*emb, q*emb]
        tile_cols(params["b2"]),                   # b2_big
        tile_cols(params["g2"]),                   # g2_big
        tile_cols(params["be2"]),                  # be2_big
        bd(jnp.full((emb, 1), 1.0 / emb, dt)),     # mavg_big [q*emb, q]
        bd(jnp.ones((1, emb), dt)),                # spread_big [q, q*emb]
    ]


# ------------------------------- Wrapper ----------------------------------- #
def _mlp_pallas(x2d, params, *, layer_norm: bool, tile_rows: int = 8192):
    """x2d: [M, inp_dim] float32. Returns [M, emb] float32."""
    m, inp_dim = x2d.shape
    assert inp_dim >= 3, "Embedder expects x = [pos(2), theta(1), features(...)]"
    emb = params["w1"].shape[1]
    q = _choose_pack(emb)
    row_quantum = 8 * q                     # packed sublane quantum in original rows

    # Balanced tiling (caps padding waste) and >=2 tiles when M allows so the
    # "parallel" grid axis can shard across v7x's two TensorCores.
    num_tiles = max(1, _cdiv(m, tile_rows), min(2, _cdiv(m, row_quantum)))
    tm = _round_up(_cdiv(m, num_tiles), row_quantum)
    m_pad = tm * num_tiles
    if m_pad != m:
        x2d = jnp.pad(x2d, ((0, m_pad - m), (0, 0)))

    # Free row-major views: [m_pad, inp_dim] == [m_pad/q, q*inp_dim] bitwise.
    xp = x2d.reshape(m_pad // q, q * inp_dim)
    weights = _prepare_packed_weights(params, inp_dim, emb, q)
    tmq = tm // q

    def const_spec(a):                      # DMA'd once, stays VMEM-resident
        return pl.BlockSpec(a.shape, lambda i: (0, 0))

    weight_elems = sum(int(a.size) for a in weights)
    flops = (2 * m_pad * emb * (inp_dim + emb + 2)
             + (8 * m_pad * emb if layer_norm else 0))
    transcendentals = 2 * m_pad * (2 if layer_norm else 1)   # cos,sin (+rsqrt x2)
    bytes_accessed = 4 * (m_pad * (inp_dim + emb) + weight_elems)

    kernel = functools.partial(_embedder_kernel, layer_norm=layer_norm, eps=1e-5)
    yp = pl.pallas_call(
        kernel,
        out_shape=jax.ShapeDtypeStruct((m_pad // q, q * emb), jnp.float32),
        grid=(num_tiles,),
        in_specs=[pl.BlockSpec((tmq, q * inp_dim), lambda i: (i, 0))]
                 + [const_spec(a) for a in weights],
        out_specs=pl.BlockSpec((tmq, q * emb), lambda i: (i, 0)),
        compiler_params=pltpu.CompilerParams(
            dimension_semantics=("parallel",)),             # 2 TCs on v7x
        cost_estimate=pl.CostEstimate(flops=flops,
                                      transcendentals=transcendentals,
                                      bytes_accessed=bytes_accessed),
    )(xp, *weights)

    # Free view back: [m_pad/q, q*emb] row-major == [m_pad, emb].
    return yp.reshape(m_pad, emb)[:m]


def embedder_forward(x, params, *, expand_theta: bool = True,
                     layer_norm: bool = False):
    """Mirrors Embedder.forward.  x: [..., inp_dim]."""
    if not expand_theta:
        # The PyTorch forward never assigns `inp` in this case (NameError).
        raise NotImplementedError(
            "Embedder.forward only defines `inp` when expand_theta=True")
    lead = x.shape[:-1]
    y2d = _mlp_pallas(x.reshape(-1, x.shape[-1]), params, layer_norm=layer_norm)
    return y2d.reshape(*lead, params["w1"].shape[1])


def make_params(key, inp_dim, emb_dim, *, expand_theta: bool):
    fin = inp_dim + 1 if expand_theta else inp_dim
    k1, k2, k3, k4 = jax.random.split(key, 4)
    s1 = 1.0 / jnp.sqrt(fin)
    s2 = 1.0 / jnp.sqrt(emb_dim)
    return {
        # Linear weights stored as (in, out): y = x @ W + b.  W1 rows correspond
        # to the expanded input order [pos(2), features(inp_dim-3), cos, sin].
        "w1": jax.random.uniform(k1, (fin, emb_dim), jnp.float32, -s1, s1),
        "b1": jax.random.uniform(k2, (1, emb_dim), jnp.float32, -s1, s1),
        "w2": jax.random.uniform(k3, (emb_dim, emb_dim), jnp.float32, -s2, s2),
        "b2": jax.random.uniform(k4, (1, emb_dim), jnp.float32, -s2, s2),
        # LayerNorm affine params (used only when layer_norm=True)
        "g1": jnp.ones((1, emb_dim), jnp.float32),
        "be1": jnp.zeros((1, emb_dim), jnp.float32),
        "g2": jnp.ones((1, emb_dim), jnp.float32),
        "be2": jnp.zeros((1, emb_dim), jnp.float32),
    }


# ---------------------------- JAX reference -------------------------------- #
def embedder_reference(x, params, *, layer_norm: bool, eps: float = 1e-5):
    pos = x[..., :2]
    theta = x[..., 2:3]
    features = x[..., 3:]
    inp = jnp.concatenate(
        [pos, features, jnp.cos(theta), jnp.sin(theta)], axis=-1)

    def ln(h, g, b):
        mu = jnp.mean(h, axis=-1, keepdims=True)
        var = jnp.mean((h - mu) ** 2, axis=-1, keepdims=True)
        return (h - mu) / jnp.sqrt(var + eps) * g + b

    h = inp @ params["w1"] + params["b1"]
    h = ln(h, params["g1"], params["be1"]) if layer_norm else jnp.maximum(h, 0.0)
    y = h @ params["w2"] + params["b2"]
    y = ln(y, params["g2"], params["be2"]) if layer_norm else jnp.maximum(y, 0.0)
    return y


# --------------------------------- Main ------------------------------------ #
if __name__ == "__main__":
    # Full-precision f32 matmuls on both the Pallas and the XLA reference side
    # so the correctness check is tight on real MXUs.
    jax.config.update("jax_default_matmul_precision", "highest")

    key = jax.random.PRNGKey(0)
    kx1, kx2, kp = jax.random.split(key, 3)

    inp_dim, emb_dim = 7, 32            # x last dim = inp_dim; Linear in = inp_dim+1
    params = make_params(kp, inp_dim, emb_dim, expand_theta=True)

    ok = True
    # Second case has M=210 rows -> exercises row padding + 2-tile grid.
    for kx, shape in ((kx1, (2, 8, inp_dim)), (kx2, (3, 70, inp_dim))):
        x = jax.random.normal(kx, shape, jnp.float32)
        for layer_norm in (False, True):
            y = embedder_forward(x, params, expand_theta=True,
                                 layer_norm=layer_norm)
            y = jax.block_until_ready(y)
            y_ref = embedder_reference(x, params, layer_norm=layer_norm)
            ok &= bool(jnp.allclose(y, y_ref, atol=1e-4, rtol=1e-4))
            assert y.shape == shape[:-1] + (emb_dim,)

    print("KERNEL_OK" if ok else "MISMATCH")
</pallas_src>

<mosaic_0001>
module attributes {stable_mosaic.version = 11 : i64} {
  func.func @_embedder_kernel(%arg0: i32, %arg1: memref<8x112xf32, #tpu.memory_space<vmem>>, %arg2: memref<112x512xf32, #tpu.memory_space<vmem>>, %arg3: memref<112x16xf32, #tpu.memory_space<vmem>>, %arg4: memref<16x512xf32, #tpu.memory_space<vmem>>, %arg5: memref<16x512xf32, #tpu.memory_space<vmem>>, %arg6: memref<1x512xf32, #tpu.memory_space<vmem>>, %arg7: memref<1x512xf32, #tpu.memory_space<vmem>>, %arg8: memref<1x512xf32, #tpu.memory_space<vmem>>, %arg9: memref<512x512xf32, #tpu.memory_space<vmem>>, %arg10: memref<1x512xf32, #tpu.memory_space<vmem>>, %arg11: memref<1x512xf32, #tpu.memory_space<vmem>>, %arg12: memref<1x512xf32, #tpu.memory_space<vmem>>, %arg13: memref<512x16xf32, #tpu.memory_space<vmem>>, %arg14: memref<16x512xf32, #tpu.memory_space<vmem>>, %arg15: memref<8x512xf32, #tpu.memory_space<vmem>>) attributes {dimension_semantics = [#tpu.dimension_semantics<parallel>], iteration_bounds = array<i64: 1>, scalar_prefetch = 0 : i64, scratch_operands = 0 : i64, tpu.core_type = #tpu.core_type<tc>, window_params = [{transform_indices = @transform_0, window_bounds = array<i64: 8, 112>}, {pipeline_mode = #tpu.pipeline_mode<synchronous>, transform_indices = @transform_1, window_bounds = array<i64: 112, 512>}, {pipeline_mode = #tpu.pipeline_mode<synchronous>, transform_indices = @transform_2, window_bounds = array<i64: 112, 16>}, {pipeline_mode = #tpu.pipeline_mode<synchronous>, transform_indices = @transform_3, window_bounds = array<i64: 16, 512>}, {pipeline_mode = #tpu.pipeline_mode<synchronous>, transform_indices = @transform_4, window_bounds = array<i64: 16, 512>}, {pipeline_mode = #tpu.pipeline_mode<synchronous>, transform_indices = @transform_5, window_bounds = array<i64: 1, 512>}, {pipeline_mode = #tpu.pipeline_mode<synchronous>, transform_indices = @transform_6, window_bounds = array<i64: 1, 512>}, {pipeline_mode = #tpu.pipeline_mode<synchronous>, transform_indices = @transform_7, window_bounds = array<i64: 1, 512>}, {pipeline_mode = #tpu.pipeline_mode<synchronous>, transform_indices = @transform_8, window_bounds = array<i64: 512, 512>}, {pipeline_mode = #tpu.pipeline_mode<synchronous>, transform_indices = @transform_9, window_bounds = array<i64: 1, 512>}, {pipeline_mode = #tpu.pipeline_mode<synchronous>, transform_indices = @transform_10, window_bounds = array<i64: 1, 512>}, {pipeline_mode = #tpu.pipeline_mode<synchronous>, transform_indices = @transform_11, window_bounds = array<i64: 1, 512>}, {pipeline_mode = #tpu.pipeline_mode<synchronous>, transform_indices = @transform_12, window_bounds = array<i64: 512, 16>}, {pipeline_mode = #tpu.pipeline_mode<synchronous>, transform_indices = @transform_13, window_bounds = array<i64: 16, 512>}, {transform_indices = @transform_14, window_bounds = array<i64: 8, 512>}]} {
    %c0 = arith.constant 0 : index
    %c0_0 = arith.constant 0 : index
    %0 = vector.load %arg1[%c0, %c0_0] : memref<8x112xf32, #tpu.memory_space<vmem>>, vector<8x112xf32>
    %c0_1 = arith.constant 0 : index
    %c0_2 = arith.constant 0 : index
    %1 = vector.load %arg3[%c0_1, %c0_2] : memref<112x16xf32, #tpu.memory_space<vmem>>, vector<112x16xf32>
    %cst = arith.constant dense<0.000000e+00> : vector<8x16xf32>
    %2 = tpu.matmul %0, %1, %cst {dimension_numbers = #tpu.dot_dimension_numbers<[1], [0], [0], [1], [0, 0, 1, 1], [], []>, precision = #tpu.contract_precision<fp32>} : vector<8x112xf32>, vector<112x16xf32>, vector<8x16xf32> -> vector<8x16xf32>
    %c0_3 = arith.constant 0 : index
    %c0_4 = arith.constant 0 : index
    %3 = vector.load %arg2[%c0_3, %c0_4] : memref<112x512xf32, #tpu.memory_space<vmem>>, vector<112x512xf32>
    %cst_5 = arith.constant dense<0.000000e+00> : vector<8x512xf32>
    %4 = tpu.matmul %0, %3, %cst_5 {dimension_numbers = #tpu.dot_dimension_numbers<[1], [0], [0], [1], [0, 0, 1, 1], [], []>, precision = #tpu.contract_precision<fp32>} : vector<8x112xf32>, vector<112x512xf32>, vector<8x512xf32> -> vector<8x512xf32>
    %5 = math.cos %2 : vector<8x16xf32>
    %c0_6 = arith.constant 0 : index
    %c0_7 = arith.constant 0 : index
    %6 = vector.load %arg4[%c0_6, %c0_7] : memref<16x512xf32, #tpu.memory_space<vmem>>, vector<16x512xf32>
    %cst_8 = arith.constant dense<0.000000e+00> : vector<8x512xf32>
    %7 = tpu.matmul %5, %6, %cst_8 {dimension_numbers = #tpu.dot_dimension_numbers<[1], [0], [0], [1], [0, 0, 1, 1], [], []>, precision = #tpu.contract_precision<fp32>} : vector<8x16xf32>, vector<16x512xf32>, vector<8x512xf32> -> vector<8x512xf32>
    %8 = arith.addf %4, %7 : vector<8x512xf32>
    %9 = math.sin %2 : vector<8x16xf32>
    %c0_9 = arith.constant 0 : index
    %c0_10 = arith.constant 0 : index
    %10 = vector.load %arg5[%c0_9, %c0_10] : memref<16x512xf32, #tpu.memory_space<vmem>>, vector<16x512xf32>
    %cst_11 = arith.constant dense<0.000000e+00> : vector<8x512xf32>
    %11 = tpu.matmul %9, %10, %cst_11 {dimension_numbers = #tpu.dot_dimension_numbers<[1], [0], [0], [1], [0, 0, 1, 1], [], []>, precision = #tpu.contract_precision<fp32>} : vector<8x16xf32>, vector<16x512xf32>, vector<8x512xf32> -> vector<8x512xf32>
    %12 = arith.addf %8, %11 : vector<8x512xf32>
    %c0_12 = arith.constant 0 : index
    %c0_13 = arith.constant 0 : index
    %13 = vector.load %arg6[%c0_12, %c0_13] : memref<1x512xf32, #tpu.memory_space<vmem>>, vector<1x512xf32>
    %14 = vector.broadcast %13 : vector<1x512xf32> to vector<8x512xf32>
    %15 = arith.addf %12, %14 : vector<8x512xf32>
    %cst_14 = arith.constant 0.000000e+00 : f32
    %16 = vector.broadcast %cst_14 : f32 to vector<8x512xf32>
    %17 = arith.maximumf %15, %16 : vector<8x512xf32>
    %c0_15 = arith.constant 0 : index
    %c0_16 = arith.constant 0 : index
    %18 = vector.load %arg9[%c0_15, %c0_16] : memref<512x512xf32, #tpu.memory_space<vmem>>, vector<512x512xf32>
    %cst_17 = arith.constant dense<0.000000e+00> : vector<8x512xf32>
    %19 = tpu.matmul %17, %18, %cst_17 {dimension_numbers = #tpu.dot_dimension_numbers<[1], [0], [0], [1], [0, 0, 1, 1], [], []>, precision = #tpu.contract_precision<fp32>} : vector<8x512xf32>, vector<512x512xf32>, vector<8x512xf32> -> vector<8x512xf32>
    %c0_18 = arith.constant 0 : index
    %c0_19 = arith.constant 0 : index
    %20 = vector.load %arg10[%c0_18, %c0_19] : memref<1x512xf32, #tpu.memory_space<vmem>>, vector<1x512xf32>
    %21 = vector.broadcast %20 : vector<1x512xf32> to vector<8x512xf32>
    %22 = arith.addf %19, %21 : vector<8x512xf32>
    %cst_20 = arith.constant 0.000000e+00 : f32
    %23 = vector.broadcast %cst_20 : f32 to vector<8x512xf32>
    %24 = arith.maximumf %22, %23 : vector<8x512xf32>
    %c0_21 = arith.constant 0 : index
    %c0_22 = arith.constant 0 : index
    %25 = vector.load %arg15[%c0_21, %c0_22] : memref<8x512xf32, #tpu.memory_space<vmem>>, vector<8x512xf32>
    tpu.vector_store %arg15[%c0_21, %c0_22], %24 {strides = array<i32>} : memref<8x512xf32, #tpu.memory_space<vmem>>, vector<8x512xf32>,
    return
  }
  func.func @transform_0(%arg0: i32) -> (i32, i32) {
    %c0_i32 = arith.constant 0 : i32
    %c0_i32_0 = arith.constant 0 : i32
    return %arg0, %c0_i32 : i32, i32
  }
  func.func @transform_1(%arg0: i32) -> (i32, i32) {
    %c0_i32 = arith.constant 0 : i32
    %c0_i32_0 = arith.constant 0 : i32
    %c0_i32_1 = arith.constant 0 : i32
    return %c0_i32, %c0_i32_0 : i32, i32
  }
  func.func @transform_2(%arg0: i32) -> (i32, i32) {
    %c0_i32 = arith.constant 0 : i32
    %c0_i32_0 = arith.constant 0 : i32
    %c0_i32_1 = arith.constant 0 : i32
    return %c0_i32, %c0_i32_0 : i32, i32
  }
  func.func @transform_3(%arg0: i32) -> (i32, i32) {
    %c0_i32 = arith.constant 0 : i32
    %c0_i32_0 = arith.constant 0 : i32
    %c0_i32_1 = arith.constant 0 : i32
    return %c0_i32, %c0_i32_0 : i32, i32
  }
  func.func @transform_4(%arg0: i32) -> (i32, i32) {
    %c0_i32 = arith.constant 0 : i32
    %c0_i32_0 = arith.constant 0 : i32
    %c0_i32_1 = arith.constant 0 : i32
    return %c0_i32, %c0_i32_0 : i32, i32
  }
  func.func @transform_5(%arg0: i32) -> (i32, i32) {
    %c0_i32 = arith.constant 0 : i32
    %c0_i32_0 = arith.constant 0 : i32
    %c0_i32_1 = arith.constant 0 : i32
    return %c0_i32, %c0_i32_0 : i32, i32
  }
  func.func @transform_6(%arg0: i32) -> (i32, i32) {
    %c0_i32 = arith.constant 0 : i32
    %c0_i32_0 = arith.constant 0 : i32
    %c0_i32_1 = arith.constant 0 : i32
    return %c0_i32, %c0_i32_0 : i32, i32
  }
  func.func @transform_7(%arg0: i32) -> (i32, i32) {
    %c0_i32 = arith.constant 0 : i32
    %c0_i32_0 = arith.constant 0 : i32
    %c0_i32_1 = arith.constant 0 : i32
    return %c0_i32, %c0_i32_0 : i32, i32
  }
  func.func @transform_8(%arg0: i32) -> (i32, i32) {
    %c0_i32 = arith.constant 0 : i32
    %c0_i32_0 = arith.constant 0 : i32
    %c0_i32_1 = arith.constant 0 : i32
    return %c0_i32, %c0_i32_0 : i32, i32
  }
  func.func @transform_9(%arg0: i32) -> (i32, i32) {
    %c0_i32 = arith.constant 0 : i32
    %c0_i32_0 = arith.constant 0 : i32
    %c0_i32_1 = arith.constant 0 : i32
    return %c0_i32, %c0_i32_0 : i32, i32
  }
  func.func @transform_10(%arg0: i32) -> (i32, i32) {
    %c0_i32 = arith.constant 0 : i32
    %c0_i32_0 = arith.constant 0 : i32
    %c0_i32_1 = arith.constant 0 : i32
    return %c0_i32, %c0_i32_0 : i32, i32
  }
  func.func @transform_11(%arg0: i32) -> (i32, i32) {
    %c0_i32 = arith.constant 0 : i32
    %c0_i32_0 = arith.constant 0 : i32
    %c0_i32_1 = arith.constant 0 : i32
    return %c0_i32, %c0_i32_0 : i32, i32
  }
  func.func @transform_12(%arg0: i32) -> (i32, i32) {
    %c0_i32 = arith.constant 0 : i32
    %c0_i32_0 = arith.constant 0 : i32
    %c0_i32_1 = arith.constant 0 : i32
    return %c0_i32, %c0_i32_0 : i32, i32
  }
  func.func @transform_13(%arg0: i32) -> (i32, i32) {
    %c0_i32 = arith.constant 0 : i32
    %c0_i32_0 = arith.constant 0 : i32
    %c0_i32_1 = arith.constant 0 : i32
    return %c0_i32, %c0_i32_0 : i32, i32
  }
  func.func @transform_14(%arg0: i32) -> (i32, i32) {
    %c0_i32 = arith.constant 0 : i32
    %c0_i32_0 = arith.constant 0 : i32
    return %arg0, %c0_i32 : i32, i32
  }
}

</mosaic_0001>

<bundles_post_ra>
// kernel: tpu_custom_call.1
= control target key start
LH: loop header
LB: loop body
LE: loop exit
PB: predicated region body
PF: predicated region fallthrough
CT: control target
= control target key end

     0   :  { %19 = vsyncpa [#allocation3], 0  ;;  %s15331_s0 = inlined_call_operand.hbm [shape: f32[8,112], index: 0, kind: input, shape index: {}]   ;;  %s15332_s1 = inlined_call_operand.vmem [shape: f32[112,512], index: 1, kind: input, shape index: {}]   ;;  %s15333_s2 = inlined_call_operand.vmem [shape: f32[112,16], index: 2, kind: input, shape index: {}]   ;;  %s15334_s3 = inlined_call_operand.vmem [shape: f32[16,512], index: 3, kind: input, shape index: {}]   ;;  %s15335_s4 = inlined_call_operand.vmem [shape: f32[16,512], index: 4, kind: input, shape index: {}]   ;;  %s15336_s5 = inlined_call_operand.hbm [shape: f32[1,512], index: 5, kind: input, shape index: {}]   ;;  %s15337_s6 = inlined_call_operand.hbm [shape: f32[1,512], index: 6, kind: input, shape index: {}]   ;;  %s15338_s7 = inlined_call_operand.hbm [shape: f32[1,512], index: 7, kind: input, shape index: {}]   ;;  %s15339_s8 = inlined_call_operand.hbm [shape: f32[512,512], index: 8, kind: input, shape index: {}]   ;;  %s15340_s9 = inlined_call_operand.vmem [shape: f32[1,512], index: 9, kind: input, shape index: {}]   ;;  %s15341_s10 = inlined_call_operand.hbm [shape: f32[1,512], index: 10, kind: input, shape index: {}]   ;;  %s15342_s11 = inlined_call_operand.hbm [shape: f32[1,512], index: 11, kind: input, shape index: {}]   ;;  %s15343_s12 = inlined_call_operand.vmem [shape: f32[512,16], index: 12, kind: input, shape index: {}]   ;;  %s15344_s13 = inlined_call_operand.vmem [shape: f32[16,512], index: 13, kind: input, shape index: {}]   ;;  %s15345_s14 = inlined_call_operand.hbm [shape: f32[8,512], index: 14, kind: output, shape index: {}]  }
   0x1   :  { %20 = vsyncpa [#allocation6], 0 }
   0x2   :  { %21 = vsyncpa [#allocation9], 0 }
   0x3   :  { %22 = vsyncpa [#allocation12], 0  ;;  %s48_s15 = sshll.u32 %s15336_s5, 4  ;;  %s49_s15 = int_to_ptr.hbm [resolvable:$true] %s48_s15 }
   0x4   :  { %23 = vsyncpa [#allocation4], 0  ;;  %s9399_s16 = smov [#allocation5]   ;;  %s70_s13 = sshll.u32 %s15338_s7, 4  ;;  %s71_s13 = int_to_ptr.hbm [resolvable:$true] %s70_s13 }
   0x5   :  { %s50_s17 = sshll.u32 %s9399_s16, 4  ;;  %s9400_s19 = smov [#allocation8]   ;;  %s51_s17 = int_to_ptr.vmem [resolvable:$true] %s50_s17 }
   0x6   :  { %53 = dma.hbm_to_vmem [thread:$0]  %s49_s15, 64, %s51_s17, [#allocation6]  }
   0x7   :  { %s72_s20 = sshll.u32 %s9400_s19, 4  ;;  %s96_s23 = sshll.u32 %s15341_s10, 4  ;;  %s73_s20 = int_to_ptr.vmem [resolvable:$true] %s72_s20  ;;  %s97_s23 = int_to_ptr.hbm [resolvable:$true] %s96_s23 }
   0x8   :  { %75 = dma.hbm_to_vmem [thread:$0]  %s71_s13, 64, %s73_s20, [#allocation9]  }
   0x9   :  { %s29_s25 = sshll.u32 %s15331_s0, 4  ;;  %s9401_s26 = smov [#allocation11]   ;;  %s30_s25 = int_to_ptr.hbm [resolvable:$true] %s29_s25 }
   0xa   :  { %s98_s27 = sshll.u32 %s9401_s26, 4  ;;  %s9402_s7 = smov [#allocation2]   ;;  %s99_s27 = int_to_ptr.vmem [resolvable:$true] %s98_s27 }
   0xb   :  { %101 = dma.hbm_to_vmem [thread:$0]  %s97_s23, 64, %s99_s27, [#allocation12]  }
   0xc   :  { %s31_s28 = sshll.u32 %s9402_s7, 4  ;;  %s59_s15 = sshll.u32 %s15337_s6, 4  ;;  %s32_s28 = int_to_ptr.vmem [resolvable:$true] %s31_s28  ;;  %s60_s15 = int_to_ptr.hbm [resolvable:$true] %s59_s15 }
   0xd   :  { %34 = dma.hbm_to_vmem [thread:$0]  %s30_s25, 128, %s32_s28, [#allocation3]  }
   0xe   :  { %s80_s17 = sshll.u32 %s15339_s8, 4  ;;  %s9403_s12 = smov [#allocation7]   ;;  %s81_s17 = int_to_ptr.hbm [resolvable:$true] %s80_s17 }
   0xf   :  { %s61_s0 = sshll.u32 %s9403_s12, 4  ;;  %s9404_s18 = smov [#allocation10]   ;;  %s62_s0 = int_to_ptr.vmem [resolvable:$true] %s61_s0 }
  0x10   :  { %64 = dma.hbm_to_vmem [thread:$0]  %s60_s15, 64, %s62_s0, [#allocation6]  }
  0x11   :  { %s82_s13 = sshll.u32 %s9404_s18, 4  ;;  %s9405_s19 = smov 512   ;;  %s83_s13 = int_to_ptr.vmem [resolvable:$true] %s82_s13 }
  0x12   :  { %s9406_s20 = smov 32   ;;  %s107_s22 = sshll.u32 %s15342_s11, 4  ;;  %s108_s22 = int_to_ptr.hbm [resolvable:$true] %s107_s22 }
  0x13   :  { %88 = dma.hbm_to_vmem [thread:$0]  %s81_s17, 32768, %s83_s13, [#allocation9], %s9405_s19, %s9405_s19, %s9406_s20  }
  0x14   :  { %s9407_s23 = smov [#allocation13]  }
  0x15   :  { %s109_s5 = sshll.u32 %s9407_s23, 4  ;;  %s110_s5 = int_to_ptr.vmem [resolvable:$true] %s109_s5 }
  0x16   :  { %112 = dma.hbm_to_vmem [thread:$0]  %s108_s22, 64, %s110_s5, [#allocation12]  }
  0x17   :  { %9389 = dma.done.wait [#allocation3], 128  }
  0x18   :  { %9390 = vsyncadd [#allocation3], 4294967168 }
  0x19   :  { %9391 = dma.done.wait [#allocation6], 128  }
  0x1a   :  { %9392 = vsyncadd [#allocation6], 4294967168 }
  0x1b   :  { %9393 = dma.done.wait [#allocation9], 32832  }
  0x1c   :  { %9394 = vsyncadd [#allocation9], 4294934464 }
  0x1d   :  { %9395 = dma.done.wait [#allocation12], 128  }
  0x1e   :  { %9396 = vsyncadd [#allocation12], 4294967168  ;;  %v159_v0 = vld [vmem:[%s15333_s2 + $0x68] sm:$0xff]  ;;  %v158_v1 = vld [vmem:[%s15333_s2 + $0x60] sm:$0xff]  ;;  %vm160_vm0 = vcmask 916480   ;;  %s9158_s21 = sshll.u32 %s15345_s14, 4  ;;  %s9159_s21 = int_to_ptr.hbm [resolvable:$true] %s9158_s21 }
  0x1f   :  { %v157_v2 = vld [vmem:[%s15333_s2 + $0x58] sm:$0xff]  ;;  %v9521_v3 = vand.u32 4294901760, %v159_v0  ;;  %v9523_v4 = vand.u32 4294901760, %v158_v1  ;;  %v156_v6 = vld [vmem:[%s15333_s2 + $0x50] sm:$0xff]  ;;  %v155_v7 = vld [vmem:[%s15333_s2 + $0x48] sm:$0xff] }
  0x20   :  { %v9525_v5 = vand.u32 4294901760, %v157_v2  ;;  %v154_v8 = vld [vmem:[%s15333_s2 + $0x40] sm:$0xff]  ;;  %v9536_v9 = vand.u32 4294901760, %v156_v6  ;;  %v9538_v10 = vand.u32 4294901760, %v155_v7  ;;  %v153_v12 = vld [vmem:[%s15333_s2 + $0x38] sm:$0xff]  ;;  %v152_v13 = vld [vmem:[%s15333_s2 + $0x30] sm:$0xff] }
  0x21   :  { %v9540_v11 = vand.u32 4294901760, %v154_v8  ;;  %167 = vmatpush.msra.mxu0 %v9521_v3  ;;  %v9550_v14 = vsub.f32 %v159_v0, %v9521_v3  ;;  %v9553_v15 = vsub.f32 %v158_v1, %v9523_v4  ;;  %v9558_v17 = vand.u32 4294901760, %v153_v12  ;;  %v151_v18 = vld [vmem:[%s15333_s2 + $0x28] sm:$0xff]  ;;  %347 = vmatpush.msra.mxu3 %v9521_v3  ;;  %v150_v26 = vld [vmem:[%s15333_s2 + $0x20] sm:$0xff]  ;;  %v149_v36 = vld [vmem:[%s15333_s2 + $0x18] sm:$0xff] }
  0x22   :  { %v9556_v16 = vsub.f32 %v157_v2, %v9525_v5  ;;  %v9565_v19 = vsub.f32 %v156_v6, %v9536_v9  ;;  %v9568_v20 = vsub.f32 %v155_v7, %v9538_v10  ;;  %v9577_v25 = vand.u32 4294901760, %v152_v13  ;;  %v148_v42 = vld [vmem:[%s15333_s2 + $0x10] sm:$0xff]  ;;  %v147_v48 = vld [vmem:[%s15333_s2 + $0x8] sm:$0xff]  ;;  %v146_v53 = vld [vmem:[%s15333_s2] sm:$0xff] }
  0x23   :  { %v9571_v21 = vsub.f32 %v154_v8, %v9540_v11  ;;  %169 = vmatpush.msra.mxu0 %v9523_v4  ;;  %v207_v22 = vand.u32 4294901760, %v9550_v14  ;;  %v213_v23 = vand.u32 4294901760, %v9553_v15  ;;  %298 = vmatpush.msra.mxu2 %v9550_v14  ;;  %v9584_v28 = vand.u32 4294901760, %v151_v18  ;;  %v145_v54 = vld [vmem:[#allocation2] sm:$0xff] }
  0x24   :  { %v219_v24 = vand.u32 4294901760, %v9556_v16  ;;  %v225_v27 = vand.u32 4294901760, %v9565_v19  ;;  %v9587_v29 = vsub.f32 %v153_v12, %v9558_v17  ;;  %349 = vmatpush.msra.mxu3 %v9523_v4  ;;  %v231_v33 = vand.u32 4294901760, %v9568_v20 }
  0x25   :  { %171 = vmatpush.msra.mxu0 %v9525_v5  ;;  %v208_v30 = vsub.f32 %v9550_v14, %v207_v22  ;;  %v214_v31 = vsub.f32 %v9553_v15, %v213_v23  ;;  %301 = vmatpush.msra.mxu2 %v9553_v15  ;;  %v237_v34 = vand.u32 4294901760, %v9571_v21  ;;  %v9603_v35 = vand.u32 4294901760, %v150_v26 }
  0x26   :  { %v220_v32 = vsub.f32 %v9556_v16, %v219_v24  ;;  %351 = vmatpush.msra.mxu3 %v9525_v5  ;;  %v226_v39 = vsub.f32 %v9565_v19, %v225_v27  ;;  %v9614_v40 = vsub.f32 %v152_v13, %v9577_v25  ;;  %v243_v41 = vand.u32 4294901760, %v9587_v29 }
  0x27   :  { %v209_v37 = vand.u32 4294901760, %v208_v30  ;;  %173 = vmatpush.msra.mxu0 %v9536_v9  ;;  %v215_v38 = vand.u32 4294901760, %v214_v31  ;;  %304 = vmatpush.msra.mxu2 %v9556_v16  ;;  %v232_v44 = vsub.f32 %v9568_v20, %v231_v33  ;;  %v9626_v45 = vand.u32 4294901760, %v149_v36 }
  0x28   :  { %353 = vmatpush.msra.mxu3 %v9536_v9  ;;  %v221_v43 = vand.u32 4294901760, %v220_v32  ;;  %v9629_v46 = vsub.f32 %v151_v18, %v9584_v28  ;;  %v238_v47 = vsub.f32 %v9571_v21, %v237_v34  ;;  %v227_v49 = vand.u32 4294901760, %v226_v39 }
  0x29   :  { %210 = vmatpush.msra.mxu1 %v209_v37  ;;  %175 = vmatpush.msra.mxu0 %v9538_v10  ;;  %v249_v50 = vand.u32 4294901760, %v9614_v40  ;;  %v9641_v51 = vand.u32 4294901760, %v148_v42  ;;  %v9644_v52 = vsub.f32 %v150_v26, %v9603_v35  ;;  %v244_v55 = vsub.f32 %v9587_v29, %v243_v41 }
  0x2a   :  { %307 = vmatpush.msra.mxu2 %v9565_v19  ;;  %355 = vmatpush.msra.mxu3 %v9538_v10  ;;  %v233_v56 = vand.u32 4294901760, %v232_v44  ;;  %v255_v57 = vand.u32 4294901760, %v9629_v46  ;;  %v9656_v58 = vand.u32 4294901760, %v147_v48  ;;  %v9659_v59 = vsub.f32 %v149_v36, %v9626_v45 }
  0x2b   :  { %216 = vmatpush.msra.mxu1 %v215_v38  ;;  %177 = vmatpush.msra.mxu0 %v9540_v11  ;;  %v239_v60 = vand.u32 4294901760, %v238_v47  ;;  %v9661_v61 = vand.u32 4294901760, %v146_v53  ;;  %v162_v62 = vsel %vm160_vm0, %v145_v54, 0  ;;  %v250_v63 = vsub.f32 %v9614_v40, %v249_v50 }
  0x2c   :  { %310 = vmatpush.msra.mxu2 %v9568_v20  ;;  %357 = vmatpush.msra.mxu3 %v9540_v11  ;;  %v261_v0 = vand.u32 4294901760, %v9644_v52  ;;  %v9671_v1 = vsub.f32 %v148_v42, %v9641_v51  ;;  %v9673_v2 = vand.u32 4294901760, %v162_v62  ;;  %v245_v6 = vand.u32 4294901760, %v244_v55 }
  0x2d   :  { %222 = vmatpush.msra.mxu1 %v221_v43  ;;  %179 = vmatpush.msra.mxu0 %v9558_v17  ;;  %v256_v7 = vsub.f32 %v9629_v46, %v255_v57  ;;  %v267_v8 = vand.u32 4294901760, %v9659_v59  ;;  %v9683_v12 = vsub.f32 %v147_v48, %v9656_v58  ;;  %v251_v18 = vand.u32 4294901760, %v250_v63 }
  0x2e   :  { %313 = vmatpush.msra.mxu2 %v9571_v21  ;;  %359 = vmatpush.msra.mxu3 %v9558_v17  ;;  %v9686_v13 = vsub.f32 %v162_v62, %v9673_v2  ;;  %v262_v26 = vsub.f32 %v9644_v52, %v261_v0  ;;  %v273_v30 = vand.u32 4294901760, %v9671_v1  ;;  %v9696_v31 = vsub.f32 %v146_v53, %v9661_v61 }
  0x2f   :  { %228 = vmatpush.msra.mxu1 %v227_v49  ;;  %181 = vmatpush.msra.mxu0 %v9577_v25  ;;  %v257_v32 = vand.u32 4294901760, %v256_v7  ;;  %v268_v36 = vsub.f32 %v9659_v59, %v267_v8  ;;  %v279_v37 = vand.u32 4294901760, %v9683_v12  ;;  %v9413_v63 = vmov 1326507024  }
  0x30   :  { %316 = vmatpush.msra.mxu2 %v9587_v29  ;;  %361 = vmatpush.msra.mxu3 %v9577_v25  ;;  %v9706_v38 = vand.u32 4294901760, %v9686_v13  ;;  %v263_v39 = vand.u32 4294901760, %v262_v26  ;;  %v274_v42 = vsub.f32 %v9671_v1, %v273_v30  ;;  %v285_v43 = vand.u32 4294901760, %v9696_v31 }
  0x31   :  { %234 = vmatpush.msra.mxu1 %v233_v56  ;;  %183 = vmatpush.msra.mxu0 %v9584_v28  ;;  %v269_v44 = vand.u32 4294901760, %v268_v36  ;;  %v280_v47 = vsub.f32 %v9683_v12, %v279_v37 }
  0x32   :  { %319 = vmatpush.msra.mxu2 %v9614_v40  ;;  %363 = vmatpush.msra.mxu3 %v9584_v28  ;;  %v197_v48 = vsub.f32 %v9686_v13, %v9706_v38  ;;  %v275_v49 = vand.u32 4294901760, %v274_v42  ;;  %v286_v53 = vsub.f32 %v9696_v31, %v285_v43 }
  0x33   :  { %240 = vmatpush.msra.mxu1 %v239_v60  ;;  %185 = vmatpush.msra.mxu0 %v9603_v35  ;;  %v281_v54 = vand.u32 4294901760, %v280_v47  ;;  %v9412_v60 = vmov 920167782  }
  0x34   :  { %322 = vmatpush.msra.mxu2 %v9629_v46  ;;  %365 = vmatpush.msra.mxu3 %v9603_v35  ;;  %v9727_v55 = vand.u32 4294901760, %v197_v48  ;;  %v287_v56 = vand.u32 4294901760, %v286_v53 }
  0x35   :  { %246 = vmatpush.msra.mxu1 %v245_v6  ;;  %187 = vmatpush.msra.mxu0 %v9626_v45 }
  0x36   :  { %325 = vmatpush.msra.mxu2 %v9644_v52  ;;  %367 = vmatpush.msra.mxu3 %v9626_v45 }
  0x37   :  { %252 = vmatpush.msra.mxu1 %v251_v18  ;;  %189 = vmatpush.msra.mxu0 %v9641_v51 }
  0x38   :  { %328 = vmatpush.msra.mxu2 %v9659_v59  ;;  %369 = vmatpush.msra.mxu3 %v9641_v51 }
  0x39   :  { %258 = vmatpush.msra.mxu1 %v257_v32  ;;  %191 = vmatpush.msra.mxu0 %v9656_v58 }
  0x3a   :  { %331 = vmatpush.msra.mxu2 %v9671_v1  ;;  %371 = vmatpush.msra.mxu3 %v9656_v58 }
  0x3b   :  { %264 = vmatpush.msra.mxu1 %v263_v39  ;;  %193 = vmatpush.msra.mxu0 %v9661_v61 }
  0x3c   :  { %334 = vmatpush.msra.mxu2 %v9683_v12  ;;  %373 = vmatpush.msra.mxu3 %v9661_v61 }
  0x3d   :  { %386 = vmatpush.msrb.mxu0 %v207_v22  ;;  %270 = vmatpush.msra.mxu1 %v269_v44 }
  0x3e   :  { %337 = vmatpush.msra.mxu2 %v9696_v31  ;;  %377 = vmatmul.f32.vlgmr.msra.gmra.mxu3 %v9706_v38 }
  0x3f   :  { %390 = vmatpush.msrb.mxu0 %v213_v23  ;;  %276 = vmatpush.msra.mxu1 %v275_v49 }
  0x40   :  { %340 = vmatmul.f32.vlgmr.msra.gmra.mxu2 %v9686_v13  ;;  %199 = vmatmul.f32.vlgmr.msra.gmra.mxu0 %v9727_v55 }
  0x41   :  { %394 = vmatpush.msrb.mxu0 %v219_v24  ;;  %282 = vmatpush.msra.mxu1 %v281_v54 }
  0x43   :  { %398 = vmatpush.msrb.mxu0 %v225_v27  ;;  %288 = vmatpush.msra.mxu1 %v287_v56 }
  0x44   :  { %290 = vmatmul.f32.vlgmr.msra.gmra.mxu1 %v9673_v2 }
  0x45   :  { %447 = vmatpush.msrb.mxu1 %v9521_v3  ;;  %402 = vmatpush.msrb.mxu0 %v231_v33 }
  0x47   :  { %449 = vmatpush.msrb.mxu1 %v9523_v4  ;;  %406 = vmatpush.msrb.mxu0 %v237_v34 }
  0x49   :  { %451 = vmatpush.msrb.mxu1 %v9525_v5  ;;  %410 = vmatpush.msrb.mxu0 %v243_v41  ;;  %v9409_v41 = vmov 2475754826  }
  0x4b   :  { %453 = vmatpush.msrb.mxu1 %v9536_v9  ;;  %414 = vmatpush.msrb.mxu0 %v249_v50  ;;  %v9410_v50 = vmov 2131351028  }
  0x4d   :  { %455 = vmatpush.msrb.mxu1 %v9538_v10  ;;  %418 = vmatpush.msrb.mxu0 %v255_v57  ;;  %v9411_v57 = vmov 2102212464  }
  0x4f   :  { %457 = vmatpush.msrb.mxu1 %v9540_v11  ;;  %422 = vmatpush.msrb.mxu0 %v261_v0 }
  0x51   :  { %459 = vmatpush.msrb.mxu1 %v9558_v17  ;;  %426 = vmatpush.msrb.mxu0 %v267_v8 }
  0x53   :  { %461 = vmatpush.msrb.mxu1 %v9577_v25  ;;  %430 = vmatpush.msrb.mxu0 %v273_v30 }
  0x55   :  { %463 = vmatpush.msrb.mxu1 %v9584_v28  ;;  %434 = vmatpush.msrb.mxu0 %v279_v37 }
  0x57   :  { %465 = vmatpush.msrb.mxu1 %v9603_v35  ;;  %438 = vmatpush.msrb.mxu0 %v285_v43  ;;  %v9408_v35 = vmov 683565275  }
  0x58   :  { %440 = vmatmul.f32.vlgmr.msrb.gmra.mxu0 %v9673_v2 }
  0x59   :  { %467 = vmatpush.msrb.mxu1 %v9626_v45 }
  0x5b   :  { %469 = vmatpush.msrb.mxu1 %v9641_v51 }
  0x5d   :  { %471 = vmatpush.msrb.mxu1 %v9656_v58 }
  0x5f   :  { %473 = vmatpush.msrb.mxu1 %v9661_v61 }
  0x60   :  { %475 = vmatmul.f32.vlgmr.msrb.gmra.mxu1 %v9673_v2 }
  0xbd   :  { %v200_v4 = vpop.f32.mrf.mxu0 }
  0xc1   :  { %v291_v3 = vpop.f32.mrf.mxu1  ;;  %v378_v11 = vpop.f32.mrf.mxu3 }
  0xc2   :  { %v292_v5 = vadd.f32 %v291_v3, %v200_v4 }
  0xc3   :  { %v341_v9 = vpop.f32.mrf.mxu2 }
  0xc4   :  { %v342_v10 = vadd.f32 %v341_v9, %v292_v5 }
  0xc6   :  { %v379_v14 = vadd.f32 %v378_v11, %v342_v10 }
  0xd5   :  { %v441_v15 = vpop.f32.mrf.mxu0 }
  0xd6   :  { %v442_v16 = vadd.f32 %v441_v15, %v379_v14 }
  0xdd   :  { %v476_v17 = vpop.f32.mrf.mxu1 }
  0xde   :  { %v9770_v19 = vadd.f32 %v476_v17, %v442_v16 }
  0xe0   :  { %v538_v20 = vand.u32 2139095040, %v9770_v19  ;;  %v535_v23 = vand.u32 2147483647, %v9770_v19  ;;  %vm537_vm13 = vcmp.lt.s32.totalorder %v9770_v19, 0 }
  0xe2   :  { %v539_v21 = vshrl.u32 %v538_v20, 23  ;;  %v542_v25 = vand.u32 8388607, %v535_v23  ;;  %v9414_v20 = vmov 0   ;;  %vm536_vm14 = vcmp.le.f32.partialorder %v535_v23, 0.7853982 }
  0xe4   :  { %v9171_v22 = vadd.s32 4294967169, %v539_v21  ;;  %v543_v33 = vor.u32 8388608, %v542_v25 }
  0xe6   :  { %v545_v24 = vadd.s32 1, %v9171_v22  ;;  %v9787_v18 = vshll.u32 %v543_v33, 8 }
  0xe8   :  { %vm546_vm1 = vcmp.gt.s32.totalorder %v545_v24, 0  ;;  %v584_v43 = vand.u32 65535, %v9787_v18  ;;  %v585_v44 = vshrl.u32 %v9787_v18, 16 }
  0xe9   :  { %v547_v27 = vsel %vm546_vm1, %v545_v24, 0 }
  0xea   :  { %v549_v28 = vand.u32 31, %v547_v27  ;;  %v9778_v34 = vshrl.u32 %v547_v27, 5 }
  0xec   :  { %v9776_v29 = vsub.s32 32, %v549_v28  ;;  %v552_v40 = vshll.u32 %v9408_v35, %v549_v28  ;;  %v555_v45 = vshll.u32 %v9409_v41, %v549_v28  ;;  %v558_v52 = vshll.u32 %v9410_v50, %v549_v28 }
  0xed   :  { %v561_v59 = vshll.u32 %v9411_v57, %v549_v28  ;;  %v564_v62 = vshll.u32 %v9412_v60, %v549_v28  ;;  %vm567_vm2 = vcmp.lt.s32.totalorder %v9778_v34, 1  ;;  %vm570_vm3 = vcmp.lt.s32.totalorder %v9778_v34, 4 }
  0xee   :  { %v553_v46 = vshrl.u32 %v9409_v41, %v9776_v29  ;;  %v556_v51 = vshrl.u32 %v9410_v50, %v9776_v29  ;;  %v559_v58 = vshrl.u32 %v9411_v57, %v9776_v29  ;;  %v562_v61 = vshrl.u32 %v9412_v60, %v9776_v29 }
  0xef   :  { %v565_v0 = vshrl.u32 %v9413_v63, %v9776_v29  ;;  %vm569_vm4 = vcmp.lt.s32.totalorder %v9778_v34, 3  ;;  %vm568_vm5 = vcmp.lt.s32.totalorder %v9778_v34, 2  ;;  %v551_v41 = vshrl.u32 %v9408_v35, %v9776_v29  ;;  %v693_v34 = vld [vmem:[%s15334_s3 + $0x20] sm:$0xff] }
  0xf0   :  { %v554_v1 = vor.u32 %v553_v46, %v552_v40  ;;  %v557_v6 = vor.u32 %v556_v51, %v555_v45  ;;  %v560_v7 = vor.u32 %v559_v58, %v558_v52  ;;  %v563_v8 = vor.u32 %v562_v61, %v561_v59 }
  0xf1   :  { %v566_v12 = vor.u32 %v565_v0, %v564_v62 }
  0xf2   :  { %v575_v26 = vsel %vm567_vm2, %v554_v1, %v557_v6  ;;  %v579_v30 = vsel %vm567_vm2, %v557_v6, %v560_v7  ;;  %v576_v31 = vsel %vm570_vm3, %v563_v8, 920167782  ;;  %v572_v28 = vsel %vm570_vm3, %v560_v7, 2102212464 }
  0xf3   :  { %v580_v32 = vsel %vm570_vm3, %v566_v12, 1326507024  ;;  %v577_v36 = vsel %vm569_vm4, %v560_v7, %v576_v31  ;;  %v571_v57 = vsel %vm567_vm2, %v551_v41, %v554_v1  ;;  %v573_v58 = vsel %vm569_vm4, %v557_v6, %v572_v28  ;;  %v695_v28 = vld [vmem:[%s15334_s3 + $0x30] sm:$0xff] }
  0xf4   :  { %v581_v37 = vsel %vm569_vm4, %v563_v8, %v580_v32  ;;  %v578_v39 = vsel %vm568_vm5, %v575_v26, %v577_v36  ;;  %v574_v29 = vsel %vm568_vm5, %v571_v57, %v573_v58 }
  0xf5   :  { %v582_v42 = vsel %vm568_vm5, %v579_v30, %v581_v37  ;;  %v608_v49 = vand.u32 65535, %v578_v39  ;;  %v609_v53 = vshrl.u32 %v578_v39, 16  ;;  %v628_v8 = vmul.u32 %v9787_v18, %v574_v29  ;;  %v689_v18 = vld [vmem:[%s15334_s3] sm:$0xff] }
  0xf6   :  { %v586_v47 = vand.u32 65535, %v582_v42  ;;  %v587_v48 = vshrl.u32 %v582_v42, 16  ;;  %v9827_v42 = vand.u32 4294901760, %v693_v34  ;;  %vm697_vm5 = vcmask 130048  }
  0xf7   :  { %v611_v3 = vmul.u32 %v609_v53, %v584_v43  ;;  %v612_v4 = vmul.u32 %v608_v49, %v585_v44  ;;  %v610_v11 = vmul.u32 %v608_v49, %v584_v43  ;;  %v613_v17 = vmul.u32 %v609_v53, %v585_v44 }
  0xf8   :  { %v589_v54 = vmul.u32 %v587_v48, %v584_v43  ;;  %v590_v56 = vmul.u32 %v586_v47, %v585_v44  ;;  %v588_v5 = vmul.u32 %v586_v47, %v584_v43  ;;  %v591_v10 = vmul.u32 %v587_v48, %v585_v44  ;;  %716 = vmatpush.msrb.mxu2 %v9827_v42 }
  0xf9   :  { %v614_v14 = vshll.u32 %v611_v3, 16  ;;  %v616_v22 = vshll.u32 %v612_v4, 16  ;;  %v615_v51 = vshrl.u32 %v611_v3, 16  ;;  %v617_v61 = vshrl.u32 %v612_v4, 16 }
  0xfa   :  { %v592_v9 = vshll.u32 %v589_v54, 16  ;;  %v594_v15 = vshll.u32 %v590_v56, 16  ;;  %v593_v45 = vshrl.u32 %v589_v54, 16  ;;  %v595_v59 = vshrl.u32 %v590_v56, 16 }
  0xfb   :  { %vm618_vm7 = vc.u32 %v610_v11, %v614_v14  ;;  %v620_v24 = vadd.s32 %v614_v14, %v610_v11  ;;  %v9832_v43 = vand.u32 4294901760, %v689_v18  ;;  %v9835_v47 = vsub.f32 %v693_v34, %v9827_v42  ;;  %v694_v11 = vld [vmem:[%s15334_s3 + $0x28] sm:$0xff] }
  0xfc   :  { %vm596_vm6 = vc.u32 %v588_v5, %v592_v9  ;;  %v598_v16 = vadd.s32 %v592_v9, %v588_v5  ;;  %v619_v27 = vsel %vm618_vm7, 1, %v9414_v20 }
  0xfd   :  { %v597_v21 = vsel %vm596_vm6, 1, %v9414_v20  ;;  %v621_v40 = vadd.s32 %v619_v27, %v613_v17  ;;  %vm622_vm9 = vc.u32 %v620_v24, %v616_v22  ;;  %v624_v0 = vadd.s32 %v620_v24, %v616_v22  ;;  %718 = vmatpush.msrb.mxu2 %v9832_v43 }
  0xfe   :  { %v599_v25 = vadd.s32 %v597_v21, %v591_v10  ;;  %vm600_vm8 = vc.u32 %v598_v16, %v594_v15  ;;  %v623_v50 = vsel %vm622_vm9, 1, %v9414_v20  ;;  %v9839_v54 = vsub.f32 %v689_v18, %v9832_v43  ;;  %v690_v21 = vld [vmem:[%s15334_s3 + $0x8] sm:$0xff] }
  0xff   :  { %v601_v33 = vsel %vm600_vm8, 1, %v9414_v20  ;;  %v625_v52 = vadd.s32 %v623_v50, %v621_v40  ;;  %v744_v56 = vand.u32 4294901760, %v9835_v47  ;;  %775 = vmatpush.msra.mxu2 %v9835_v47  ;;  %v9855_v20 = vand.u32 4294901760, %v694_v11 }
 0x100   :  { %v603_v46 = vadd.s32 %v601_v33, %v599_v25  ;;  %v750_v9 = vand.u32 4294901760, %v9839_v54  ;;  %v9860_v25 = vand.u32 4294901760, %v690_v21  ;;  %vm678_vm6 = vweird.f32 %v9770_v19 }
 0x101   :  { %v626_v62 = vadd.s32 %v625_v52, %v615_v51  ;;  %v745_v10 = vsub.f32 %v9835_v47, %v744_v56  ;;  %778 = vmatpush.msra.mxu2 %v9839_v54  ;;  %v9863_v27 = vsub.f32 %v694_v11, %v9855_v20  ;;  %959 = vmatpush.msra.mxu1 %v9855_v20 }
 0x102   :  { %v604_v60 = vadd.s32 %v603_v46, %v593_v45  ;;  %v751_v16 = vsub.f32 %v9839_v54, %v750_v9  ;;  %v9870_v41 = vsub.f32 %v690_v21, %v9860_v25  ;;  %v9872_v45 = vand.u32 4294901760, %v695_v28  ;;  %v691_v46 = vld [vmem:[%s15334_s3 + $0x10] sm:$0xff] }
 0x103   :  { %v627_v35 = vadd.s32 %v626_v62, %v617_v61  ;;  %v746_v17 = vand.u32 4294901760, %v745_v10  ;;  %934 = vmatpush.msra.mxu0 %v9863_v27  ;;  %961 = vmatpush.msra.mxu1 %v9860_v25  ;;  %v9883_v52 = vand.u32 4294901760, %v691_v46 }
 0x104   :  { %v605_v63 = vadd.s32 %v604_v60, %v595_v59  ;;  %v752_v24 = vand.u32 4294901760, %v751_v16  ;;  %v9881_v51 = vsub.f32 %v695_v28, %v9872_v45 }
 0x105   :  { %v631_v7 = vadd.s32 1, %v627_v35  ;;  %747 = vmatpush.msrb.mxu3 %v746_v17  ;;  %937 = vmatpush.msra.mxu0 %v9870_v41  ;;  %v9890_v59 = vsub.f32 %v691_v46, %v9883_v52  ;;  %v531_v46 = vld [vmem:[%s15332_s1 + $0x1a0] sm:$0xff] }
 0x106   :  { %vm630_vm10 = vc.u32 %v605_v63, %v624_v0  ;;  %v629_v48 = vadd.s32 %v624_v0, %v605_v63  ;;  %v1062_v58 = vand.u32 4294901760, %v9881_v51 }
 0x107   :  { %v632_v12 = vsel %vm630_vm10, %v631_v7, %v627_v35  ;;  %753 = vmatpush.msrb.mxu3 %v752_v24  ;;  %1034 = vmatpush.msrb.mxu0 %v9872_v45  ;;  %v1068_v63 = vand.u32 4294901760, %v9890_v59 }
 0x108   :  { %v633_v26 = vadd.s32 %v632_v12, %v628_v8  ;;  %v1063_v62 = vsub.f32 %v9881_v51, %v1062_v58 }
 0x109   :  { %800 = vmatpush.msra.mxu3 %v9827_v42  ;;  %1036 = vmatpush.msrb.mxu0 %v9883_v52  ;;  %v1069_v7 = vsub.f32 %v9890_v59, %v1068_v63 }
 0x10a   :  { %v634_v1 = vadd.s32 536870912, %v633_v26  ;;  %v1064_v35 = vand.u32 4294901760, %v1063_v62 }
 0x10b   :  { %802 = vmatpush.msra.mxu3 %v9832_v43 }
 0x10c   :  { %v9821_v30 = vshrl.u32 %v634_v1, 30  ;;  %1065 = vmatpush.msrb.mxu1 %v1064_v35  ;;  %v523_v35 = vld [vmem:[%s15332_s1 + $0x160] sm:$0xff] }
 0x10e   :  { %v636_v6 = vshll.u32 %v9821_v30, 30  ;;  %v659_v60 = vsub.s32 4, %v9821_v30 }
 0x110   :  { %v637_v31 = vsub.s32 %v633_v26, %v636_v6  ;;  %v660_v8 = vsel %vm537_vm13, %v659_v60, %v9821_v30  ;;  %v1070_v26 = vand.u32 4294901760, %v1069_v7  ;;  %v909_v60 = vand.u32 4294901760, %v9870_v41 }
 0x111   :  { %v662_v1 = vsel %vm536_vm14, 0, %v660_v8 }
 0x112   :  { %vm638_vm11 = vcmp.lt.s32.totalorder %v637_v31, 0  ;;  %v639_v32 = vsub.s32 0, %v637_v31  ;;  %1071 = vmatpush.msrb.mxu1 %v1070_v26 }
 0x114   :  { %v640_v36 = vsel %vm638_vm11, %v639_v32, %v637_v31 }
 0x115   :  { %v641_v37 = vclz %v640_v36 }
 0x117   :  { %v9172_v39 = vadd.s32 4294967294, %v641_v37  ;;  %v2741_v37 = vadd.s32 3, %v662_v1 }
 0x119   :  { %vm9173_vm12 = vcmp.lt.s32.totalorder %v9172_v39, 0 }
 0x11a   :  { %v644_v44 = vsel %vm9173_vm12, 0, %v9172_v39 }
 0x11b   :  { %v645_v49 = vsub.s32 32, %v644_v44  ;;  %v649_v53 = vsub.s32 4294967266, %v644_v44  ;;  %v646_v3 = vshll.u32 %v637_v31, %v644_v44 }
 0x11d   :  { %v647_v4 = vshrl.u32 %v629_v48, %v645_v49  ;;  %v650_v5 = vadd.s32 127, %v649_v53  ;;  %v2742_v48 = vand.u32 3, %v2741_v37  ;;  %v511_v37 = vld [vmem:[%s15332_s1 + $0x100] sm:$0xff] }
 0x11f   :  { %v648_v14 = vor.u32 %v647_v4, %v646_v3  ;;  %v651_v15 = vshll.u32 %v650_v5, 23  ;;  %v679_v3 = vand.u32 3, %v662_v1  ;;  %vm2747_vm15 = vcmp.eq.s32.totalorder %v2742_v48, 2 }
 0x120   :  { %vm2743_vm3 = vcmp.lt.s32.totalorder %v2742_v48, 2  ;;  %vm2744_vm4 = vcmp.eq.s32.totalorder %v2742_v48, 0  ;;  %v9966_v1 = vand.u32 4294901760, %v523_v35 }
 0x121   :  { %v652_v22 = vor.u32 4788187, %v651_v15  ;;  %v655_v40 = vcvt.s32.f32 %v648_v14  ;;  %vm680_vm0 = vcmp.lt.s32.totalorder %v679_v3, 2  ;;  %vm681_vm1 = vcmp.eq.s32.totalorder %v679_v3, 0 }
 0x122   :  { %vm684_vm2 = vcmp.eq.s32.totalorder %v679_v3, 2  ;;  %v9996_v48 = vsub.f32 %v523_v35, %v9966_v1 }
 0x123   :  { %v653_v33 = vand.u32 2147483647, %v652_v22 }
 0x125   :  { %v656_v50 = vmul.f32 %v655_v40, %v653_v33  ;;  %v903_v33 = vand.u32 4294901760, %v9863_v27 }
 0x127   :  { %v657_v57 = vxor.u32 2147483648, %v656_v50  ;;  %v904_v62 = vsub.f32 %v9863_v27, %v903_v33 }
 0x129   :  { %v658_v61 = vsel %vm537_vm13, %v657_v57, %v656_v50  ;;  %v527_v57 = vld [vmem:[%s15332_s1 + $0x180] sm:$0xff]  ;;  %v905_v26 = vand.u32 4294901760, %v904_v62 }
 0x12a   :  { %v661_v0 = vsel %vm536_vm14, %v9770_v19, %v658_v61  ;;  %v696_v19 = vld [vmem:[%s15334_s3 + $0x38] sm:$0xff]  ;;  %v9927_v61 = vand.u32 4294901760, %v531_v46  ;;  %v9947_v7 = vand.u32 4294901760, %v527_v57 }
 0x12b   :  { %v663_v29 = vmul.f32 %v661_v0, %v661_v0 }
 0x12d   :  { %v664_v23 = vmul.f32 -0.001358992, %v663_v29  ;;  %v671_v12 = vmul.f32 -0.00019511016, %v663_v29 }
 0x12f   :  { %v665_v6 = vadd.f32 0.041655596, %v664_v23  ;;  %v672_v31 = vadd.f32 0.008332121, %v671_v12  ;;  %v910_v23 = vsub.f32 %v9870_v41, %v909_v60  ;;  %v519_v12 = vld [vmem:[%s15332_s1 + $0x140] sm:$0xff] }
 0x131   :  { %v666_v32 = vmul.f32 %v665_v6, %v663_v29  ;;  %v673_v36 = vmul.f32 %v672_v31, %v663_v29  ;;  %v515_v6 = vld [vmem:[%s15332_s1 + $0x120] sm:$0xff] }
 0x133   :  { %v667_v34 = vadd.f32 -0.4999988, %v666_v32  ;;  %v674_v39 = vadd.f32 -0.16666654, %v673_v36  ;;  %v9980_v36 = vand.u32 4294901760, %v519_v12 }
 0x135   :  { %v668_v18 = vmul.f32 %v667_v34, %v663_v29  ;;  %v675_v44 = vmul.f32 %v674_v39, %v663_v29  ;;  %v692_v29 = vld [vmem:[%s15334_s3 + $0x18] sm:$0xff]  ;;  %v911_v34 = vand.u32 4294901760, %v910_v23  ;;  %v9987_v39 = vand.u32 4294901760, %v515_v6  ;;  %v487_v23 = vld [vmem:[%s15332_s1 + $0x40] sm:$0xff] }
 0x136   :  { %v10009_v47 = vsub.f32 %v519_v12, %v9980_v36 }
 0x137   :  { %v669_v49 = vadd.f32 1.0, %v668_v18  ;;  %v676_v53 = vadd.f32 1.0, %v675_v44 }
 0x139   :  { %v677_v30 = vmul.f32 %v676_v53, %v661_v0  ;;  %v685_v4 = vxor.u32 2147483648, %v669_v49  ;;  %v507_v53 = vld [vmem:[%s15332_s1 + $0xe0] sm:$0xff] }
 0x13b   :  { %v682_v5 = vxor.u32 2147483648, %v677_v30  ;;  %v2749_v10 = vsel %vm2747_vm15, %v685_v4, %v677_v30  ;;  %v686_v14 = vsel %vm684_vm2, %v685_v4, %v677_v30  ;;  %v503_v30 = vld [vmem:[%s15332_s1 + $0xc0] sm:$0xff]  ;;  %v10024_v4 = vand.u32 4294901760, %v507_v53 }
 0x13d   :  { %v683_v11 = vsel %vm681_vm1, %v669_v49, %v682_v5  ;;  %v2746_v15 = vsel %vm2744_vm4, %v669_v49, %v682_v5  ;;  %v9999_v49 = vand.u32 4294901760, %v511_v37 }
 0x13e   :  { %v687_v16 = vsel %vm680_vm0, %v683_v11, %v686_v14  ;;  %v2750_v17 = vsel %vm2743_vm3, %v2746_v15, %v2749_v10  ;;  %v499_v10 = vld [vmem:[%s15332_s1 + $0xa0] sm:$0xff]  ;;  %v15349_v14 = vand.u32 4294901760, %v10009_v47  ;;  %v10037_v15 = vand.u32 4294901760, %v503_v30 }
 0x13f   :  { %v688_v21 = vsel %vm678_vm6, nan, %v687_v16  ;;  %v2751_v22 = vsel %vm678_vm6, nan, %v2750_v17  ;;  %v10027_v5 = vsub.f32 %v511_v37, %v9999_v49  ;;  %v495_v17 = vld [vmem:[%s15332_s1 + $0x80] sm:$0xff] }
 0x140   :  { %v699_v24 = vsel %vm697_vm5, %v688_v21, 0  ;;  %v9907_v28 = vsel %vm697_vm5, %v2751_v22, 0  ;;  %v10068_v35 = vand.u32 4294901760, %v495_v17 }
 0x141   :  { %15624 = vst [vmem:[#allocation20_spill] sm:$0xff] %v9907_v28  ;;  %v9910_v40 = vand.u32 4294901760, %v699_v24  ;;  %v481_v28 = vld [vmem:[%s15332_s1 + $0x10] sm:$0xff] }
 0x143   :  { %v9916_v50 = vsub.f32 %v699_v24, %v9910_v40  ;;  %755 = vmatmul.f32.vlgmr.msrb.gmra.mxu3 %v9910_v40  ;;  %v10051_v24 = vsub.f32 %v507_v53, %v10024_v4  ;;  %v483_v53 = vld [vmem:[%s15332_s1 + $0x20] sm:$0xff] }
 0x144   :  { %852 = vmatpush.msrb.mxu3 %v9827_v42  ;;  %v9945_v42 = vand.u32 4294901760, %v696_v19 }
 0x145   :  { %940 = vmatmul.f32.vlgmr.msra.gmra.mxu0 %v9916_v50  ;;  %v9934_v0 = vand.u32 4294901760, %v9916_v50 }
 0x146   :  { %1145 = vmatpush.msra.mxu0 %v1062_v58  ;;  %854 = vmatpush.msrb.mxu3 %v9832_v43  ;;  %v9961_v43 = vand.u32 4294901760, %v692_v29  ;;  %v9964_v58 = vsub.f32 %v531_v46, %v9927_v61  ;;  %v9974_v32 = vsub.f32 %v696_v19, %v9945_v42  ;;  %v10053_v46 = vand.u32 4294901760, %v499_v10 }
 0x147   :  { %965 = vmatmul.f32.vlgmr.msra.gmra.mxu1 %v9934_v0  ;;  %v722_v8 = vsub.f32 %v9916_v50, %v9934_v0  ;;  %v15346_v19 = vand.u32 4294901760, %v10027_v5 }
 0x148   :  { %1149 = vmatpush.msra.mxu0 %v1068_v63  ;;  %1170 = vmatpush.msra.mxu1 %v9872_v45  ;;  %v9978_v63 = vsub.f32 %v527_v57, %v9947_v7  ;;  %v9990_v18 = vsub.f32 %v692_v29, %v9961_v43  ;;  %v1380_v44 = vand.u32 4294901760, %v9964_v58  ;;  %v491_v57 = vld [vmem:[%s15332_s1 + $0x60] sm:$0xff]  ;;  %v10066_v29 = vsub.f32 %v503_v30, %v10037_v15 }
 0x149   :  { %v9971_v31 = vand.u32 4294901760, %v722_v8  ;;  %v10083_v37 = vand.u32 4294901760, %v491_v57 }
 0x14a   :  { %1172 = vmatpush.msra.mxu1 %v9883_v52  ;;  %v1386_v3 = vand.u32 4294901760, %v9978_v63  ;;  %v1381_v54 = vsub.f32 %v9964_v58, %v1380_v44 }
 0x14b   :  { %724 = vmatmul.f32.vlgmr.msrb.gmra.mxu2 %v9971_v31  ;;  %806 = vmatmul.f32.vlgmr.msra.gmra.mxu3 %v9934_v0 }
 0x14c   :  { %827 = vmatpush.msrb.mxu2 %v744_v56  ;;  %906 = vmatpush.msra.mxu3 %v905_v26  ;;  %v10013_v56 = vsub.f32 %v515_v6, %v9987_v39  ;;  %v1387_v11 = vsub.f32 %v9978_v63, %v1386_v3  ;;  %v1382_v21 = vand.u32 4294901760, %v1381_v54  ;;  %v15348_v26 = vand.u32 4294901760, %v10051_v24 }
 0x14d   :  { %1042 = vmatmul.f32.vlgmr.msrb.gmra.mxu0 %v9971_v31  ;;  %v10081_v6 = vsub.f32 %v499_v10, %v10053_v46  ;;  %v15350_v54 = vand.u32 4294901760, %v10066_v29  ;;  %v10095_v10 = vsub.f32 %v495_v17, %v10068_v35 }
 0x14e   :  { %1252 = vmatpush.msrb.mxu0 %v9974_v32  ;;  %831 = vmatpush.msrb.mxu2 %v750_v9  ;;  %v1392_v9 = vand.u32 4294901760, %v9996_v48  ;;  %v15347_v16 = vand.u32 4294901760, %v10013_v56  ;;  %v1388_v62 = vand.u32 4294901760, %v1387_v11  ;;  %v10097_v11 = vand.u32 4294901760, %v487_v23 }
 0x14f   :  { %1073 = vmatmul.f32.vlgmr.msrb.gmra.mxu1 %v9910_v40  ;;  %912 = vmatpush.msra.mxu3 %v911_v34  ;;  %v1411_v34 = vsub.f32 %v10027_v5, %v15346_v19  ;;  %v479_v19 = vld [vmem:[%s15332_s1] sm:$0xff]  ;;  %v1417_v17 = vsub.f32 %v10051_v24, %v15348_v26  ;;  %v1434_v26 = vand.u32 4294901760, %v10095_v10 }
 0x150   :  { %1255 = vmatpush.msrb.mxu0 %v9990_v18  ;;  %1277 = vmatpush.msrb.mxu1 %v9945_v42  ;;  %v1393_v22 = vsub.f32 %v9996_v48, %v1392_v9  ;;  %v1405_v8 = vsub.f32 %v10013_v56, %v15347_v16  ;;  %v10113_v16 = vand.u32 4294901760, %v483_v53 }
 0x152   :  { %1279 = vmatpush.msrb.mxu1 %v9961_v43  ;;  %v1394_v12 = vand.u32 4294901760, %v1393_v22  ;;  %v15352_v22 = vand.u32 4294901760, %v9990_v18 }
 0x153   :  { %781 = vmatmul.f32.vlgmr.msra.gmra.mxu2 %v9916_v50  ;;  %856 = vmatmul.f32.vlgmr.msrb.gmra.mxu3 %v9910_v40 }
 0x154   :  { %875 = vmatpush.msra.mxu2 %v9855_v20  ;;  %1011 = vmatpush.msrb.mxu3 %v9855_v20  ;;  %v1399_v20 = vsub.f32 %v10009_v47, %v15349_v14  ;;  %v10127_v14 = vsub.f32 %v487_v23, %v10097_v11  ;;  %v1228_v27 = vsub.f32 %v9990_v18, %v15352_v22 }
 0x155   :  { %1151 = vmatmul.f32.vlgmr.msra.gmra.mxu0 %v9910_v40 }
 0x156   :  { %1340 = vmatpush.msra.mxu0 %v9927_v61  ;;  %877 = vmatpush.msra.mxu2 %v9860_v25  ;;  %v1400_v30 = vand.u32 4294901760, %v1399_v20  ;;  %v10111_v20 = vsub.f32 %v491_v57, %v10083_v37  ;;  %v1423_v57 = vsub.f32 %v10066_v29, %v15350_v54  ;;  %v10142_v54 = vsub.f32 %v483_v53, %v10113_v16 }
 0x157   :  { %1174 = vmatmul.f32.vlgmr.msra.gmra.mxu1 %v9910_v40  ;;  %1013 = vmatpush.msrb.mxu3 %v9860_v25  ;;  %v1221_v25 = vand.u32 4294901760, %v9974_v32  ;;  %v1229_v41 = vand.u32 4294901760, %v1228_v27 }
 0x158   :  { %1342 = vmatpush.msra.mxu0 %v9947_v7  ;;  %1383 = vmatpush.msra.mxu1 %v1382_v21  ;;  %v1406_v21 = vand.u32 4294901760, %v1405_v8  ;;  %v1412_v8 = vand.u32 4294901760, %v1411_v34  ;;  %v10129_v34 = vand.u32 4294901760, %v479_v19  ;;  %v1440_v23 = vand.u32 4294901760, %v10111_v20 }
 0x159   :  { %v1452_v53 = vand.u32 4294901760, %v10142_v54 }
 0x15a   :  { %1344 = vmatpush.msra.mxu0 %v9966_v1  ;;  %1389 = vmatpush.msra.mxu1 %v1388_v62  ;;  %v15351_v62 = vand.u32 4294901760, %v10081_v6  ;;  %v10153_v22 = vsub.f32 %v479_v19, %v10129_v34 }
 0x15b   :  { %833 = vmatmul.f32.vlgmr.msrb.gmra.mxu2 %v9910_v40  ;;  %914 = vmatmul.f32.vlgmr.msra.gmra.mxu3 %v9910_v40 }
 0x15c   :  { %1346 = vmatpush.msra.mxu0 %v9980_v36  ;;  %1395 = vmatpush.msra.mxu1 %v1394_v12  ;;  %v1222_v12 = vsub.f32 %v9974_v32, %v1221_v25  ;;  %v524_v32 = vld [vmem:[%s15332_s1 + $0x168] sm:$0xff] }
 0x15d   :  { %1258 = vmatmul.f32.vlgmr.msrb.gmra.mxu0 %v9916_v50  ;;  %986 = vmatpush.msrb.mxu2 %v903_v33  ;;  %v1418_v33 = vand.u32 4294901760, %v1417_v17  ;;  %v1435_v17 = vsub.f32 %v10095_v10, %v1434_v26 }
 0x15e   :  { %1348 = vmatpush.msra.mxu0 %v9987_v39  ;;  %1401 = vmatpush.msra.mxu1 %v1400_v30  ;;  %v1429_v30 = vsub.f32 %v10081_v6, %v15351_v62  ;;  %v1446_v62 = vand.u32 4294901760, %v10127_v14 }
 0x15f   :  { %1283 = vmatmul.f32.vlgmr.msrb.gmra.mxu1 %v9934_v0  ;;  %1118 = vmatpush.msra.mxu3 %v9872_v45  ;;  %v1223_v45 = vand.u32 4294901760, %v1222_v12  ;;  %v1436_v19 = vand.u32 4294901760, %v1435_v17  ;;  %v1458_v12 = vand.u32 4294901760, %v10153_v22 }
 0x160   :  { %1350 = vmatpush.msra.mxu0 %v9999_v49  ;;  %1407 = vmatpush.msra.mxu1 %v1406_v21  ;;  %v1424_v21 = vand.u32 4294901760, %v1423_v57 }
 0x161   :  { %990 = vmatpush.msrb.mxu2 %v909_v60  ;;  %1120 = vmatpush.msra.mxu3 %v9883_v52  ;;  %v1430_v52 = vand.u32 4294901760, %v1429_v30  ;;  %v1441_v60 = vsub.f32 %v10111_v20, %v1440_v23 }
 0x162   :  { %1352 = vmatpush.msra.mxu0 %v10024_v4  ;;  %1413 = vmatpush.msra.mxu1 %v1412_v8  ;;  %v1447_v8 = vsub.f32 %v10127_v14, %v1446_v62 }
 0x163   :  { %883 = vmatmul.f32.vlgmr.msra.gmra.mxu2 %v9971_v31  ;;  %1015 = vmatmul.f32.vlgmr.msrb.gmra.mxu3 %v9910_v40  ;;  %v1442_v57 = vand.u32 4294901760, %v1441_v60 }
 0x164   :  { %1354 = vmatpush.msra.mxu0 %v10037_v15  ;;  %1419 = vmatpush.msra.mxu1 %v1418_v33  ;;  %v1448_v27 = vand.u32 4294901760, %v1447_v8  ;;  %v1459_v33 = vsub.f32 %v10153_v22, %v1458_v12 }
 0x165   :  { %1224 = vmatpush.msrb.mxu3 %v1223_v45  ;;  %1093 = vmatpush.msra.mxu2 %v9881_v51  ;;  %v1453_v51 = vsub.f32 %v10142_v54, %v1452_v53  ;;  %v500_v45 = vld [vmem:[%s15332_s1 + $0xa8] sm:$0xff] }
 0x166   :  { %1356 = vmatpush.msra.mxu0 %v10053_v46  ;;  %1425 = vmatpush.msra.mxu1 %v1424_v21  ;;  %v1460_v30 = vand.u32 4294901760, %v1459_v33 }
 0x167   :  { %1230 = vmatpush.msrb.mxu3 %v1229_v41  ;;  %1096 = vmatpush.msra.mxu2 %v9890_v59  ;;  %v1454_v59 = vand.u32 4294901760, %v1453_v51 }
 0x168   :  { %1358 = vmatpush.msra.mxu0 %v10068_v35  ;;  %1431 = vmatpush.msra.mxu1 %v1430_v52 }
 0x16a   :  { %1360 = vmatpush.msra.mxu0 %v10083_v37  ;;  %1437 = vmatpush.msra.mxu1 %v1436_v19 }
 0x16b   :  { %992 = vmatmul.f32.vlgmr.msrb.gmra.mxu2 %v9910_v40  ;;  %1124 = vmatmul.f32.vlgmr.msra.gmra.mxu3 %v9934_v0  ;;  %v15625_v0 = vand.u32 4294901760, %v9990_v18 }
 0x16c   :  { %1362 = vmatpush.msra.mxu0 %v10097_v11  ;;  %1443 = vmatpush.msra.mxu1 %v1442_v57  ;;  %v492_v57 = vld [vmem:[%s15332_s1 + $0x68] sm:$0xff] }
 0x16d   :  { %1329 = vmatpush.msra.mxu3 %v9945_v42  ;;  %1193 = vmatpush.msrb.mxu2 %v9945_v42  ;;  %v15627_v42 = vand.u32 4294901760, %v10013_v56 }
 0x16e   :  { %1364 = vmatpush.msra.mxu0 %v10113_v16  ;;  %1449 = vmatpush.msra.mxu1 %v1448_v27 }
 0x16f   :  { %1331 = vmatpush.msra.mxu3 %v9961_v43  ;;  %1195 = vmatpush.msrb.mxu2 %v9961_v43  ;;  %v528_v43 = vld [vmem:[%s15332_s1 + $0x188] sm:$0xff] }
 0x170   :  { %1366 = vmatpush.msra.mxu0 %v10129_v34  ;;  %1455 = vmatpush.msra.mxu1 %v1454_v59  ;;  %v488_v59 = vld [vmem:[%s15332_s1 + $0x48] sm:$0xff] }
 0x171   :  { %1372 = vmatmul.f32.vlgmr.msra.gmra.mxu0 %v9727_v55 }
 0x172   :  { %1559 = vmatpush.msrb.mxu0 %v1380_v44  ;;  %1461 = vmatpush.msra.mxu1 %v1460_v30  ;;  %v15631_v44 = vand.u32 4294901760, %v10081_v6 }
 0x173   :  { %1463 = vmatmul.f32.vlgmr.msra.gmra.mxu1 %v9673_v2  ;;  %1099 = vmatmul.f32.vlgmr.msra.gmra.mxu2 %v9916_v50  ;;  %v15626_v50 = vand.u32 4294901760, %v10009_v47 }
 0x174   :  { %1563 = vmatpush.msrb.mxu0 %v1386_v3  ;;  %1620 = vmatpush.msrb.mxu1 %v9927_v61  ;;  %v516_v3 = vld [vmem:[%s15332_s1 + $0x128] sm:$0xff] }
 0x175   :  { %1232 = vmatmul.f32.vlgmr.msrb.gmra.mxu3 %v9910_v40  ;;  %1304 = vmatpush.msra.mxu2 %v1221_v25 }
 0x176   :  { %1520 = vmatpush.msrb.mxu3 %v9927_v61  ;;  %1567 = vmatpush.msrb.mxu0 %v1392_v9  ;;  %v532_v61 = vld [vmem:[%s15332_s1 + $0x1a8] sm:$0xff] }
 0x177   :  { %1622 = vmatpush.msrb.mxu1 %v9947_v7  ;;  %1308 = vmatpush.msra.mxu2 %v15625_v0 }
 0x178   :  { %1522 = vmatpush.msrb.mxu3 %v9947_v7  ;;  %1571 = vmatpush.msrb.mxu0 %v15626_v50  ;;  %v15628_v7 = vand.u32 4294901760, %v10027_v5 }
 0x179   :  { %1624 = vmatpush.msrb.mxu1 %v9966_v1 }
 0x17a   :  { %1524 = vmatpush.msrb.mxu3 %v9966_v1  ;;  %1575 = vmatpush.msrb.mxu0 %v15627_v42  ;;  %v10225_v1 = vand.u32 4294901760, %v532_v61 }
 0x17b   :  { %1626 = vmatpush.msrb.mxu1 %v9980_v36  ;;  %1201 = vmatmul.f32.vlgmr.msrb.gmra.mxu2 %v9971_v31  ;;  %v15629_v31 = vand.u32 4294901760, %v10051_v24 }
 0x17c   :  { %1526 = vmatpush.msrb.mxu3 %v9980_v36  ;;  %1579 = vmatpush.msrb.mxu0 %v15628_v7  ;;  %v10235_v36 = vand.u32 4294901760, %v528_v43  ;;  %v10246_v18 = vsub.f32 %v532_v61, %v10225_v1  ;;  %v10391_v61 = vand.u32 4294901760, %v488_v59 }
 0x17d   :  { %1628 = vmatpush.msrb.mxu1 %v9987_v39  ;;  %1333 = vmatmul.f32.vlgmr.msra.gmra.mxu3 %v9910_v40 }
 0x17e   :  { %1471 = vmatpush.msrb.mxu2 %v9964_v58  ;;  %1528 = vmatpush.msrb.mxu3 %v9987_v39  ;;  %v15630_v58 = vand.u32 4294901760, %v10066_v29  ;;  %v520_v39 = vld [vmem:[%s15332_s1 + $0x148] sm:$0xff] }
 0x17f   :  { %1583 = vmatpush.msrb.mxu0 %v15629_v31  ;;  %1630 = vmatpush.msrb.mxu1 %v9999_v49  ;;  %v480_v31 = vld [vmem:[%s15332_s1 + $0x8] sm:$0xff] }
 0x180   :  { %1474 = vmatpush.msrb.mxu2 %v9978_v63  ;;  %1530 = vmatpush.msrb.mxu3 %v9999_v49  ;;  %v10248_v63 = vand.u32 4294901760, %v524_v32  ;;  %v10256_v49 = vsub.f32 %v528_v43, %v10235_v36 }
 0x181   :  { %1587 = vmatpush.msrb.mxu0 %v15630_v58  ;;  %1632 = vmatpush.msrb.mxu1 %v10024_v4  ;;  %v533_v58 = vld [vmem:[%s15332_s1 + $0x1b0] sm:$0xff] }
 0x182   :  { %1477 = vmatpush.msrb.mxu2 %v9996_v48  ;;  %1532 = vmatpush.msrb.mxu3 %v10024_v4  ;;  %v10258_v48 = vand.u32 4294901760, %v520_v39  ;;  %v10270_v9 = vsub.f32 %v524_v32, %v10248_v63  ;;  %v10275_v4 = vand.u32 4294901760, %v516_v3 }
 0x183   :  { %1591 = vmatpush.msrb.mxu0 %v15631_v44  ;;  %1634 = vmatpush.msrb.mxu1 %v10037_v15 }
 0x184   :  { %1480 = vmatpush.msrb.mxu2 %v10009_v47  ;;  %1534 = vmatpush.msrb.mxu3 %v10037_v15  ;;  %v15369_v47 = vand.u32 4294901760, %v10246_v18  ;;  %v512_v15 = vld [vmem:[%s15332_s1 + $0x108] sm:$0xff] }
 0x185   :  { %1595 = vmatpush.msrb.mxu0 %v1434_v26  ;;  %1636 = vmatpush.msrb.mxu1 %v10053_v46  ;;  %v15366_v26 = vand.u32 4294901760, %v10270_v9  ;;  %v10298_v25 = vand.u32 4294901760, %v512_v15 }
 0x186   :  { %1310 = vmatmul.f32.vlgmr.msra.gmra.mxu2 %v9910_v40  ;;  %1536 = vmatpush.msrb.mxu3 %v10053_v46  ;;  %v15368_v40 = vand.u32 4294901760, %v10256_v49  ;;  %v10284_v46 = vsub.f32 %v520_v39, %v10258_v48 }
 0x187   :  { %1483 = vmatpush.msrb.mxu2 %v10013_v56  ;;  %1599 = vmatpush.msrb.mxu0 %v1440_v23  ;;  %v508_v56 = vld [vmem:[%s15332_s1 + $0xe8] sm:$0xff]  ;;  %v1708_v21 = vsub.f32 %v10270_v9, %v15366_v26  ;;  %v10329_v17 = vsub.f32 %v512_v15, %v10298_v25  ;;  %v10421_v15 = vand.u32 4294901760, %v480_v31 }
 0x188   :  { %1638 = vmatpush.msrb.mxu1 %v10068_v35  ;;  %1538 = vmatpush.msrb.mxu3 %v10068_v35  ;;  %v1696_v35 = vsub.f32 %v10246_v18, %v15369_v47  ;;  %v10315_v23 = vand.u32 4294901760, %v508_v56  ;;  %v493_v47 = vld [vmem:[%s15332_s1 + $0x70] sm:$0xff] }
 0x189   :  { %1486 = vmatpush.msrb.mxu2 %v10027_v5  ;;  %1603 = vmatpush.msrb.mxu0 %v1446_v62  ;;  %v10304_v5 = vsub.f32 %v516_v3, %v10275_v4  ;;  %v1702_v62 = vsub.f32 %v10256_v49, %v15368_v40  ;;  %v1709_v19 = vand.u32 4294901760, %v1708_v21  ;;  %v10419_v3 = vsub.f32 %v488_v59, %v10391_v61  ;;  %v525_v21 = vld [vmem:[%s15332_s1 + $0x170] sm:$0xff] }
 0x18a   :  { %1640 = vmatpush.msrb.mxu1 %v10083_v37  ;;  %1540 = vmatpush.msrb.mxu3 %v10083_v37  ;;  %v504_v37 = vld [vmem:[%s15332_s1 + $0xc8] sm:$0xff] }
 0x18b   :  { %1489 = vmatpush.msrb.mxu2 %v10051_v24  ;;  %1607 = vmatpush.msrb.mxu0 %v1452_v53  ;;  %v15365_v24 = vand.u32 4294901760, %v10284_v46  ;;  %v15363_v41 = vand.u32 4294901760, %v10304_v5  ;;  %v1703_v52 = vand.u32 4294901760, %v1702_v62  ;;  %v10345_v53 = vsub.f32 %v508_v56, %v10315_v23  ;;  %v529_v56 = vld [vmem:[%s15332_s1 + $0x190] sm:$0xff] }
 0x18c   :  { %1642 = vmatpush.msrb.mxu1 %v10097_v11  ;;  %1542 = vmatpush.msrb.mxu3 %v10097_v11  ;;  %v1697_v11 = vand.u32 4294901760, %v1696_v35  ;;  %v10431_v62 = vand.u32 4294901760, %v533_v58 }
 0x18d   :  { %1492 = vmatpush.msrb.mxu2 %v10066_v29  ;;  %1611 = vmatpush.msrb.mxu0 %v1458_v12  ;;  %v10331_v29 = vand.u32 4294901760, %v504_v37  ;;  %v1714_v60 = vsub.f32 %v10284_v46, %v15365_v24  ;;  %v15360_v27 = vand.u32 4294901760, %v10345_v53 }
 0x18e   :  { %1644 = vmatpush.msrb.mxu1 %v10113_v16  ;;  %1544 = vmatpush.msrb.mxu3 %v10113_v16  ;;  %v496_v16 = vld [vmem:[%s15332_s1 + $0x88] sm:$0xff]  ;;  %v10459_v59 = vsub.f32 %v533_v58, %v10431_v62 }
 0x18f   :  { %1495 = vmatpush.msrb.mxu2 %v10081_v6  ;;  %1786 = vmatpush.msra.mxu0 %v10246_v18  ;;  %v10347_v6 = vand.u32 4294901760, %v500_v45  ;;  %v10354_v8 = vsub.f32 %v504_v37, %v10331_v29  ;;  %v10356_v12 = vand.u32 4294901760, %v496_v16  ;;  %v1715_v51 = vand.u32 4294901760, %v1714_v60 }
 0x190   :  { %1646 = vmatpush.msrb.mxu1 %v10129_v34  ;;  %1546 = vmatpush.msrb.mxu3 %v10129_v34  ;;  %v15362_v34 = vand.u32 4294901760, %v10329_v17  ;;  %v1732_v7 = vsub.f32 %v10345_v53, %v15360_v27  ;;  %v10446_v60 = vand.u32 4294901760, %v529_v56 }
 0x191   :  { %1498 = vmatpush.msrb.mxu2 %v10095_v10  ;;  %1789 = vmatpush.msra.mxu0 %v10256_v49  ;;  %v1720_v10 = vsub.f32 %v10304_v5, %v15363_v41  ;;  %v10369_v33 = vsub.f32 %v500_v45, %v10347_v6  ;;  %v15358_v0 = vand.u32 4294901760, %v10354_v8  ;;  %v10384_v50 = vsub.f32 %v496_v16, %v10356_v12 }
 0x192   :  { %1835 = vmatpush.msra.mxu1 %v10225_v1  ;;  %1698 = vmatpush.msra.mxu3 %v1697_v11  ;;  %v1726_v30 = vsub.f32 %v10329_v17, %v15362_v34  ;;  %v1733_v35 = vand.u32 4294901760, %v1732_v7  ;;  %v517_v7 = vld [vmem:[%s15332_s1 + $0x130] sm:$0xff]  ;;  %v10474_v58 = vsub.f32 %v529_v56, %v10446_v60  ;;  %v15361_v56 = vand.u32 4294901760, %v10459_v59 }
 0x193   :  { %1501 = vmatpush.msrb.mxu2 %v10111_v20  ;;  %1792 = vmatpush.msra.mxu0 %v10270_v9  ;;  %v10376_v20 = vand.u32 4294901760, %v492_v57  ;;  %v1721_v42 = vand.u32 4294901760, %v1720_v10  ;;  %v15356_v43 = vand.u32 4294901760, %v10369_v33  ;;  %v15355_v44 = vand.u32 4294901760, %v10384_v50  ;;  %v521_v10 = vld [vmem:[%s15332_s1 + $0x150] sm:$0xff] }
 0x194   :  { %1837 = vmatpush.msra.mxu1 %v10235_v36  ;;  %1704 = vmatpush.msra.mxu3 %v1703_v52  ;;  %v1727_v39 = vand.u32 4294901760, %v1726_v30  ;;  %v10461_v30 = vand.u32 4294901760, %v525_v21 }
 0x195   :  { %1504 = vmatpush.msrb.mxu2 %v10127_v14  ;;  %1795 = vmatpush.msra.mxu0 %v10284_v46  ;;  %v484_v14 = vld [vmem:[%s15332_s1 + $0x28] sm:$0xff]  ;;  %v1744_v37 = vsub.f32 %v10369_v33, %v15356_v43  ;;  %v1750_v52 = vsub.f32 %v10384_v50, %v15355_v44  ;;  %v509_v43 = vld [vmem:[%s15332_s1 + $0xf0] sm:$0xff] }
 0x196   :  { %1839 = vmatpush.msra.mxu1 %v10248_v63  ;;  %1710 = vmatpush.msra.mxu3 %v1709_v19  ;;  %v10406_v32 = vand.u32 4294901760, %v484_v14  ;;  %v15353_v19 = vand.u32 4294901760, %v10419_v3  ;;  %v10527_v27 = vand.u32 4294901760, %v509_v43 }
 0x197   :  { %1507 = vmatpush.msrb.mxu2 %v10142_v54  ;;  %1798 = vmatpush.msra.mxu0 %v10304_v5  ;;  %v10404_v54 = vsub.f32 %v492_v57, %v10376_v20  ;;  %v10452_v57 = vsub.f32 %v480_v31, %v10421_v15  ;;  %v1751_v31 = vand.u32 4294901760, %v1750_v52  ;;  %v10492_v52 = vand.u32 4294901760, %v517_v7 }
 0x198   :  { %1841 = vmatpush.msra.mxu1 %v10258_v48  ;;  %1716 = vmatpush.msra.mxu3 %v1715_v51  ;;  %v10437_v11 = vsub.f32 %v484_v14, %v10406_v32  ;;  %v1745_v51 = vand.u32 4294901760, %v1744_v37  ;;  %v513_v37 = vld [vmem:[%s15332_s1 + $0x110] sm:$0xff] }
 0x199   :  { %1510 = vmatpush.msrb.mxu2 %v10153_v22  ;;  %1801 = vmatpush.msra.mxu0 %v10329_v17  ;;  %v1738_v22 = vsub.f32 %v10354_v8, %v15358_v0  ;;  %v15354_v45 = vand.u32 4294901760, %v10404_v54  ;;  %v10521_v0 = vsub.f32 %v517_v7, %v10492_v52 }
 0x19a   :  { %1843 = vmatpush.msra.mxu1 %v10275_v4  ;;  %1513 = vmatmul.f32.vlgmr.msrb.gmra.mxu2 %v9686_v13 }
 0x19b   :  { %1655 = vmatpush.msra.mxu2 %v10225_v1  ;;  %1722 = vmatpush.msra.mxu3 %v1721_v42  ;;  %v1739_v16 = vand.u32 4294901760, %v1738_v22  ;;  %v1756_v14 = vsub.f32 %v10404_v54, %v15354_v45  ;;  %v15357_v42 = vand.u32 4294901760, %v10437_v11  ;;  %v1762_v22 = vsub.f32 %v10419_v3, %v15353_v19 }
 0x19c   :  { %1804 = vmatpush.msra.mxu0 %v10345_v53  ;;  %1845 = vmatpush.msra.mxu1 %v10298_v25  ;;  %v15371_v24 = vand.u32 4294901760, %v10521_v0 }
 0x19d   :  { %1550 = vmatmul.f32.vlgmr.msrb.gmra.mxu3 %v9706_v38  ;;  %1657 = vmatpush.msra.mxu2 %v10235_v36  ;;  %v1757_v19 = vand.u32 4294901760, %v1756_v14  ;;  %v1768_v45 = vsub.f32 %v10437_v11, %v15357_v42  ;;  %v1763_v14 = vand.u32 4294901760, %v1762_v22  ;;  %v505_v22 = vld [vmem:[%s15332_s1 + $0xd0] sm:$0xff] }
 0x19e   :  { %1728 = vmatpush.msra.mxu3 %v1727_v39  ;;  %1807 = vmatpush.msra.mxu0 %v10354_v8  ;;  %v10476_v39 = vand.u32 4294901760, %v521_v10  ;;  %v10542_v41 = vand.u32 4294901760, %v505_v22 }
 0x19f   :  { %1847 = vmatpush.msra.mxu1 %v10315_v23  ;;  %1659 = vmatpush.msra.mxu2 %v10248_v63 }
 0x1a0   :  { %1734 = vmatpush.msra.mxu3 %v1733_v35  ;;  %1810 = vmatpush.msra.mxu0 %v10369_v33  ;;  %v15359_v35 = vand.u32 4294901760, %v10452_v57  ;;  %v10502_v44 = vsub.f32 %v521_v10, %v10476_v39  ;;  %v2011_v10 = vsub.f32 %v10459_v59, %v15361_v56 }
 0x1a1   :  { %1849 = vmatpush.msra.mxu1 %v10331_v29  ;;  %1661 = vmatpush.msra.mxu2 %v10258_v48 }
 0x1a2   :  { %1740 = vmatpush.msra.mxu3 %v1739_v16  ;;  %1813 = vmatpush.msra.mxu0 %v10384_v50  ;;  %v10490_v16 = vsub.f32 %v525_v21, %v10461_v30  ;;  %v10504_v21 = vand.u32 4294901760, %v513_v37  ;;  %v15370_v7 = vand.u32 4294901760, %v10502_v44 }
 0x1a3   :  { %1851 = vmatpush.msra.mxu1 %v10347_v6  ;;  %1663 = vmatpush.msra.mxu2 %v10275_v4 }
 0x1a4   :  { %1746 = vmatpush.msra.mxu3 %v1745_v51  ;;  %1816 = vmatpush.msra.mxu0 %v10404_v54  ;;  %v15364_v51 = vand.u32 4294901760, %v10474_v58  ;;  %15632 = vst [vmem:[#allocation21_spill] sm:$0xff] %v10504_v21  ;;  %v15367_v42 = vand.u32 4294901760, %v10490_v16  ;;  %v10536_v34 = vsub.f32 %v513_v37, %v10504_v21 }
 0x1a5   :  { %1853 = vmatpush.msra.mxu1 %v10356_v12  ;;  %1613 = vmatmul.f32.vlgmr.msrb.gmra.mxu0 %v9673_v2 }
 0x1a6   :  { %1665 = vmatpush.msra.mxu2 %v10298_v25  ;;  %1752 = vmatpush.msra.mxu3 %v1751_v31  ;;  %v1774_v31 = vsub.f32 %v10452_v57, %v15359_v35  ;;  %v1769_v35 = vand.u32 4294901760, %v1768_v45  ;;  %v2017_v56 = vsub.f32 %v10474_v58, %v15364_v51  ;;  %v2012_v51 = vand.u32 4294901760, %v2011_v10 }
 0x1a7   :  { %1819 = vmatpush.msra.mxu0 %v10419_v3  ;;  %1855 = vmatpush.msra.mxu1 %v10376_v20  ;;  %v2023_v37 = vsub.f32 %v10490_v16, %v15367_v42  ;;  %v2029_v42 = vsub.f32 %v10502_v44, %v15370_v7  ;;  %v15372_v40 = vand.u32 4294901760, %v10536_v34  ;;  %v2035_v7 = vsub.f32 %v10521_v0, %v15371_v24 }
 0x1a8   :  { %1648 = vmatmul.f32.vlgmr.msrb.gmra.mxu1 %v9673_v2  ;;  %1667 = vmatpush.msra.mxu2 %v10315_v23  ;;  %v1775_v45 = vand.u32 4294901760, %v1774_v31  ;;  %v10555_v31 = vsub.f32 %v509_v43, %v10527_v27  ;;  %v2018_v10 = vand.u32 4294901760, %v2017_v56  ;;  %v10591_v24 = vand.u32 4294901760, %v493_v47 }
 0x1a9   :  { %1758 = vmatpush.msra.mxu3 %v1757_v19  ;;  %1822 = vmatpush.msra.mxu0 %v10437_v11  ;;  %v501_v19 = vld [vmem:[%s15332_s1 + $0xb0] sm:$0xff]  ;;  %v2024_v56 = vand.u32 4294901760, %v2023_v37  ;;  %v2041_v37 = vsub.f32 %v10536_v34, %v15372_v40 }
 0x1aa   :  { %1857 = vmatpush.msra.mxu1 %v10391_v61  ;;  %1669 = vmatpush.msra.mxu2 %v10331_v29  ;;  %15633 = vst [vmem:[#allocation22_spill] sm:$0xff] %v10555_v31  ;;  %v10557_v26 = vand.u32 4294901760, %v501_v19  ;;  %v15634_v40 = vand.u32 4294901760, %v10555_v31 }
 0x1ab   :  { %1764 = vmatpush.msra.mxu3 %v1763_v14  ;;  %1825 = vmatpush.msra.mxu0 %v10452_v57  ;;  %v497_v14 = vld [vmem:[%s15332_s1 + $0x90] sm:$0xff] }
 0x1ac   :  { %1859 = vmatpush.msra.mxu1 %v10406_v32  ;;  %1671 = vmatpush.msra.mxu2 %v10347_v6  ;;  %v10569_v43 = vand.u32 4294901760, %v497_v14 }
 0x1ad   :  { %1770 = vmatpush.msra.mxu3 %v1769_v35  ;;  %1970 = vmatpush.msrb.mxu0 %v10431_v62  ;;  %v10567_v35 = vsub.f32 %v505_v22, %v10542_v41 }
 0x1ae   :  { %1861 = vmatpush.msra.mxu1 %v10421_v15  ;;  %1673 = vmatpush.msra.mxu2 %v10356_v12  ;;  %v10597_v22 = vsub.f32 %v497_v14, %v10569_v43 }
 0x1af   :  { %1776 = vmatpush.msra.mxu3 %v1775_v45  ;;  %1972 = vmatpush.msrb.mxu0 %v10446_v60  ;;  %v10582_v45 = vsub.f32 %v501_v19, %v10557_v26  ;;  %v2047_v19 = vsub.f32 %v10555_v31, %v15634_v40  ;;  %v15635_v40 = vand.u32 4294901760, %v10567_v35 }
 0x1b0   :  { %2013 = vmatpush.msrb.mxu1 %v2012_v51  ;;  %1675 = vmatpush.msra.mxu2 %v10376_v20  ;;  %v489_v51 = vld [vmem:[%s15332_s1 + $0x50] sm:$0xff]  ;;  %v2064_v31 = vand.u32 4294901760, %v10597_v22 }
 0x1b1   :  { %1935 = vmatpush.msrb.mxu3 %v10225_v1  ;;  %1974 = vmatpush.msrb.mxu0 %v10461_v30  ;;  %v2030_v1 = vand.u32 4294901760, %v2029_v42  ;;  %v2036_v42 = vand.u32 4294901760, %v2035_v7  ;;  %v10616_v7 = vsub.f32 %v493_v47, %v10591_v24  ;;  %v2053_v14 = vsub.f32 %v10567_v35, %v15635_v40 }
 0x1b2   :  { %2019 = vmatpush.msrb.mxu1 %v2018_v10  ;;  %1677 = vmatpush.msra.mxu2 %v10391_v61  ;;  %v10603_v10 = vand.u32 4294901760, %v489_v51  ;;  %v10630_v47 = vand.u32 4294901760, %v481_v28 }
 0x1b3   :  { %1937 = vmatpush.msrb.mxu3 %v10235_v36  ;;  %1976 = vmatpush.msrb.mxu0 %v10476_v39  ;;  %v485_v36 = vld [vmem:[%s15332_s1 + $0x30] sm:$0xff] }
 0x1b4   :  { %2025 = vmatpush.msrb.mxu1 %v2024_v56  ;;  %1679 = vmatpush.msra.mxu2 %v10406_v32  ;;  %v10618_v56 = vand.u32 4294901760, %v485_v36 }
 0x1b5   :  { %1939 = vmatpush.msrb.mxu3 %v10248_v63  ;;  %1978 = vmatpush.msrb.mxu0 %v10492_v52  ;;  %v2042_v63 = vand.u32 4294901760, %v2041_v37  ;;  %v2048_v37 = vand.u32 4294901760, %v2047_v19  ;;  %v10653_v19 = vsub.f32 %v481_v28, %v10630_v47 }
 0x1b6   :  { %2031 = vmatpush.msrb.mxu1 %v2030_v1  ;;  %1681 = vmatpush.msra.mxu2 %v10421_v15  ;;  %v15636_v1 = vand.u32 4294901760, %v10246_v18  ;;  %v15638_v18 = vand.u32 4294901760, %v10256_v49 }
 0x1b7   :  { %1941 = vmatpush.msrb.mxu3 %v10258_v48  ;;  %1980 = vmatpush.msrb.mxu0 %v10504_v21  ;;  %v10628_v48 = vsub.f32 %v489_v51, %v10603_v10  ;;  %v15637_v21 = vand.u32 4294901760, %v10582_v45  ;;  %v10641_v51 = vsub.f32 %v485_v36, %v10618_v56  ;;  %v15639_v36 = vand.u32 4294901760, %v10270_v9 }
 0x1b8   :  { %2037 = vmatpush.msrb.mxu1 %v2036_v42  ;;  %1687 = vmatmul.f32.vlgmr.msra.gmra.mxu2 %v9727_v55  ;;  %v2070_v42 = vand.u32 4294901760, %v10616_v7 }
 0x1b9   :  { %1874 = vmatpush.msrb.mxu2 %v15636_v1  ;;  %1943 = vmatpush.msrb.mxu3 %v10275_v4  ;;  %v2059_v40 = vsub.f32 %v10582_v45, %v15637_v21  ;;  %v2054_v1 = vand.u32 4294901760, %v2053_v14  ;;  %v2065_v4 = vsub.f32 %v10597_v22, %v2064_v31  ;;  %v2076_v21 = vand.u32 4294901760, %v10628_v48 }
 0x1ba   :  { %1982 = vmatpush.msrb.mxu0 %v10527_v27  ;;  %2043 = vmatpush.msrb.mxu1 %v2042_v63  ;;  %v2082_v14 = vand.u32 4294901760, %v10641_v51  ;;  %v15640_v63 = vand.u32 4294901760, %v10284_v46 }
 0x1bb   :  { %1778 = vmatmul.f32.vlgmr.msra.gmra.mxu3 %v9673_v2  ;;  %1878 = vmatpush.msrb.mxu2 %v15638_v18  ;;  %v2060_v49 = vand.u32 4294901760, %v2059_v40  ;;  %v2066_v28 = vand.u32 4294901760, %v2065_v4  ;;  %v2077_v9 = vsub.f32 %v10628_v48, %v2076_v21  ;;  %v15642_v40 = vand.u32 4294901760, %v10329_v17 }
 0x1bc   :  { %1945 = vmatpush.msrb.mxu3 %v10298_v25  ;;  %1984 = vmatpush.msrb.mxu0 %v10542_v41  ;;  %v2071_v25 = vsub.f32 %v10616_v7, %v2070_v42  ;;  %v15644_v17 = vand.u32 4294901760, %v10354_v8  ;;  %v15647_v8 = vand.u32 4294901760, %v10384_v50  ;;  %v15651_v50 = vand.u32 4294901760, %v10419_v3  ;;  %v534_v3 = vld [vmem:[%s15332_s1 + $0x1b8] sm:$0xff] }
 0x1bd   :  { %2049 = vmatpush.msrb.mxu1 %v2048_v37  ;;  %1882 = vmatpush.msrb.mxu2 %v15639_v36  ;;  %v15641_v37 = vand.u32 4294901760, %v10304_v5  ;;  %v2078_v18 = vand.u32 4294901760, %v2077_v9  ;;  %v15659_v36 = vld [vmem:[#allocation21_spill] sm:$0xff] }
 0x1be   :  { %1947 = vmatpush.msrb.mxu3 %v10315_v23  ;;  %1986 = vmatpush.msrb.mxu0 %v10557_v26  ;;  %v2088_v23 = vand.u32 4294901760, %v10653_v19  ;;  %v2072_v46 = vand.u32 4294901760, %v2071_v25 }
 0x1bf   :  { %2055 = vmatpush.msrb.mxu1 %v2054_v1  ;;  %1886 = vmatpush.msrb.mxu2 %v15640_v63 }
 0x1c0   :  { %1949 = vmatpush.msrb.mxu3 %v10331_v29  ;;  %1988 = vmatpush.msrb.mxu0 %v10569_v43  ;;  %v2083_v29 = vsub.f32 %v10641_v51, %v2082_v14  ;;  %v2089_v5 = vsub.f32 %v10653_v19, %v2088_v23 }
 0x1c1   :  { %2061 = vmatpush.msrb.mxu1 %v2060_v49  ;;  %1828 = vmatmul.f32.vlgmr.msra.gmra.mxu0 %v9686_v13  ;;  %v526_v49 = vld [vmem:[%s15332_s1 + $0x178] sm:$0xff] }
 0x1c2   :  { %1890 = vmatpush.msrb.mxu2 %v15641_v37  ;;  %1951 = vmatpush.msrb.mxu3 %v10347_v6  ;;  %v15643_v6 = vand.u32 4294901760, %v10345_v53  ;;  %v2084_v1 = vand.u32 4294901760, %v2083_v29  ;;  %v2090_v4 = vand.u32 4294901760, %v2089_v5  ;;  %v15646_v53 = vand.u32 4294901760, %v10459_v59 }
 0x1c3   :  { %1990 = vmatpush.msrb.mxu0 %v10591_v24  ;;  %2067 = vmatpush.msrb.mxu1 %v2066_v28  ;;  %v10764_v28 = vand.u32 4294901760, %v526_v49 }
 0x1c4   :  { %1865 = vmatmul.f32.vlgmr.msra.gmra.mxu1 %v9706_v38  ;;  %1894 = vmatpush.msrb.mxu2 %v15642_v40 }
 0x1c5   :  { %1953 = vmatpush.msrb.mxu3 %v10356_v12  ;;  %1992 = vmatpush.msrb.mxu0 %v10603_v10  ;;  %v15645_v12 = vand.u32 4294901760, %v10369_v33  ;;  %v15649_v33 = vand.u32 4294901760, %v10404_v54  ;;  %v15653_v54 = vand.u32 4294901760, %v10437_v11  ;;  %v530_v11 = vld [vmem:[%s15332_s1 + $0x198] sm:$0xff] }
 0x1c6   :  { %2073 = vmatpush.msrb.mxu1 %v2072_v46  ;;  %1898 = vmatpush.msrb.mxu2 %v15643_v6  ;;  %v10751_v25 = vand.u32 4294901760, %v530_v11 }
 0x1c7   :  { %1955 = vmatpush.msrb.mxu3 %v10376_v20  ;;  %1994 = vmatpush.msrb.mxu0 %v10618_v56  ;;  %v15648_v20 = vand.u32 4294901760, %v10474_v58 }
 0x1c8   :  { %2079 = vmatpush.msrb.mxu1 %v2078_v18  ;;  %1902 = vmatpush.msrb.mxu2 %v15644_v17  ;;  %v10772_v9 = vsub.f32 %v530_v11, %v10751_v25 }
 0x1c9   :  { %1957 = vmatpush.msrb.mxu3 %v10391_v61  ;;  %1996 = vmatpush.msrb.mxu0 %v10630_v47  ;;  %v15650_v61 = vand.u32 4294901760, %v10490_v16 }
 0x1ca   :  { %2085 = vmatpush.msrb.mxu1 %v2084_v1  ;;  %1906 = vmatpush.msrb.mxu2 %v15645_v12 }
 0x1cb   :  { %1959 = vmatpush.msrb.mxu3 %v10406_v32  ;;  %2002 = vmatmul.f32.vlgmr.msrb.gmra.mxu0 %v9727_v55  ;;  %v15652_v32 = vand.u32 4294901760, %v10502_v44 }
 0x1cc   :  { %2189 = vmatpush.msra.mxu0 %v15646_v53  ;;  %2091 = vmatpush.msrb.mxu1 %v2090_v4 }
 0x1cd   :  { %1910 = vmatpush.msrb.mxu2 %v15647_v8  ;;  %1961 = vmatpush.msrb.mxu3 %v10421_v15  ;;  %v15654_v15 = vand.u32 4294901760, %v10521_v0  ;;  %v494_v8 = vld [vmem:[%s15332_s1 + $0x78] sm:$0xff] }
 0x1ce   :  { %2093 = vmatmul.f32.vlgmr.msrb.gmra.mxu1 %v9673_v2  ;;  %2193 = vmatpush.msra.mxu0 %v15648_v20 }
 0x1cf   :  { %2250 = vmatpush.msra.mxu1 %v10431_v62  ;;  %2150 = vmatpush.msra.mxu3 %v10431_v62  ;;  %v15655_v62 = vand.u32 4294901760, %v10452_v57 }
 0x1d0   :  { %1914 = vmatpush.msrb.mxu2 %v15649_v33  ;;  %2197 = vmatpush.msra.mxu0 %v15650_v61 }
 0x1d1   :  { %2252 = vmatpush.msra.mxu1 %v10446_v60  ;;  %2152 = vmatpush.msra.mxu3 %v10446_v60  ;;  %v15656_v60 = vand.u32 4294901760, %v10536_v34 }
 0x1d2   :  { %1918 = vmatpush.msrb.mxu2 %v15651_v50  ;;  %2201 = vmatpush.msra.mxu0 %v15652_v32  ;;  %v10892_v32 = vand.u32 4294901760, %v494_v8 }
 0x1d3   :  { %2254 = vmatpush.msra.mxu1 %v10461_v30  ;;  %2154 = vmatpush.msra.mxu3 %v10461_v30  ;;  %v10741_v30 = vand.u32 4294901760, %v534_v3 }
 0x1d4   :  { %1922 = vmatpush.msrb.mxu2 %v15653_v54  ;;  %2205 = vmatpush.msra.mxu0 %v15654_v15 }
 0x1d5   :  { %2256 = vmatpush.msra.mxu1 %v10476_v39  ;;  %2156 = vmatpush.msra.mxu3 %v10476_v39  ;;  %v15657_v39 = vld [vmem:[#allocation22_spill] sm:$0xff]  ;;  %v10762_v63 = vsub.f32 %v534_v3, %v10741_v30  ;;  %v486_v3 = vld [vmem:[%s15332_s1 + $0x38] sm:$0xff] }
 0x1d6   :  { %1926 = vmatpush.msrb.mxu2 %v15655_v62  ;;  %2209 = vmatpush.msra.mxu0 %v15656_v60  ;;  %v15658_v57 = vand.u32 4294901760, %v15657_v39 }
 0x1d7   :  { %2258 = vmatpush.msra.mxu1 %v10492_v52  ;;  %1928 = vmatmul.f32.vlgmr.msrb.gmra.mxu2 %v9673_v2 }
 0x1d8   :  { %2101 = vmatpush.msra.mxu2 %v10459_v59  ;;  %2158 = vmatpush.msra.mxu3 %v10492_v52  ;;  %v15660_v59 = vand.u32 4294901760, %v10567_v35  ;;  %v522_v52 = vld [vmem:[%s15332_s1 + $0x158] sm:$0xff] }
 0x1d9   :  { %2213 = vmatpush.msra.mxu0 %v15658_v57  ;;  %2260 = vmatpush.msra.mxu1 %v15659_v36  ;;  %v10774_v37 = vand.u32 4294901760, %v522_v52  ;;  %v10920_v57 = vsub.f32 %v494_v8, %v10892_v32 }
 0x1da   :  { %1963 = vmatmul.f32.vlgmr.msrb.gmra.mxu3 %v9673_v2  ;;  %2104 = vmatpush.msra.mxu2 %v10474_v58  ;;  %v15661_v58 = vand.u32 4294901760, %v10582_v45 }
 0x1db   :  { %2160 = vmatpush.msra.mxu3 %v15659_v36  ;;  %2217 = vmatpush.msra.mxu0 %v15660_v59  ;;  %v10922_v36 = vand.u32 4294901760, %v486_v3 }
 0x1dc   :  { %2262 = vmatpush.msra.mxu1 %v10527_v27  ;;  %2107 = vmatpush.msra.mxu2 %v10490_v16  ;;  %v518_v16 = vld [vmem:[%s15332_s1 + $0x138] sm:$0xff] }
 0x1dd   :  { %2162 = vmatpush.msra.mxu3 %v10527_v27  ;;  %2221 = vmatpush.msra.mxu0 %v15661_v58  ;;  %v2325_v27 = vand.u32 4294901760, %v10762_v63  ;;  %v10791_v46 = vand.u32 4294901760, %v518_v16 }
 0x1de   :  { %2264 = vmatpush.msra.mxu1 %v10542_v41  ;;  %2110 = vmatpush.msra.mxu2 %v10502_v44  ;;  %v10786_v44 = vsub.f32 %v526_v49, %v10764_v28 }
 0x1df   :  { %2164 = vmatpush.msra.mxu3 %v10542_v41  ;;  %2225 = vmatpush.msra.mxu0 %v2064_v31  ;;  %v514_v41 = vld [vmem:[%s15332_s1 + $0x118] sm:$0xff]  ;;  %v10800_v31 = vsub.f32 %v522_v52, %v10774_v37 }
 0x1e0   :  { %2266 = vmatpush.msra.mxu1 %v10557_v26  ;;  %2113 = vmatpush.msra.mxu2 %v10521_v0  ;;  %v2331_v0 = vand.u32 4294901760, %v10772_v9  ;;  %v10814_v29 = vand.u32 4294901760, %v514_v41 }
 0x1e1   :  { %2166 = vmatpush.msra.mxu3 %v10557_v26  ;;  %2229 = vmatpush.msra.mxu0 %v2070_v42  ;;  %v510_v26 = vld [vmem:[%s15332_s1 + $0xf8] sm:$0xff]  ;;  %v2337_v42 = vand.u32 4294901760, %v10786_v44 }
 0x1e2   :  { %2268 = vmatpush.msra.mxu1 %v10569_v43  ;;  %2116 = vmatpush.msra.mxu2 %v10536_v34  ;;  %v2326_v34 = vsub.f32 %v10762_v63, %v2325_v27  ;;  %v2332_v40 = vsub.f32 %v10772_v9, %v2331_v0  ;;  %v10831_v18 = vand.u32 4294901760, %v510_v26  ;;  %v10845_v6 = vsub.f32 %v514_v41, %v10814_v29 }
 0x1e3   :  { %2168 = vmatpush.msra.mxu3 %v10569_v43  ;;  %2233 = vmatpush.msra.mxu0 %v2076_v21  ;;  %v10820_v43 = vsub.f32 %v518_v16, %v10791_v46  ;;  %v506_v21 = vld [vmem:[%s15332_s1 + $0xd8] sm:$0xff]  ;;  %v2338_v5 = vsub.f32 %v10786_v44, %v2337_v42 }
 0x1e4   :  { %2270 = vmatpush.msra.mxu1 %v10591_v24  ;;  %2119 = vmatpush.msra.mxu2 %v15657_v39  ;;  %v10858_v17 = vsub.f32 %v510_v26, %v10831_v18  ;;  %v2355_v12 = vand.u32 4294901760, %v10845_v6 }
 0x1e5   :  { %2170 = vmatpush.msra.mxu3 %v10591_v24  ;;  %2237 = vmatpush.msra.mxu0 %v2082_v14  ;;  %v2343_v24 = vand.u32 4294901760, %v10800_v31  ;;  %v502_v14 = vld [vmem:[%s15332_s1 + $0xb8] sm:$0xff] }
 0x1e6   :  { %2272 = vmatpush.msra.mxu1 %v10603_v10  ;;  %2122 = vmatpush.msra.mxu2 %v10567_v35  ;;  %v2327_v35 = vand.u32 4294901760, %v2326_v34  ;;  %v10860_v4 = vand.u32 4294901760, %v502_v14  ;;  %v2361_v61 = vand.u32 4294901760, %v10858_v17  ;;  %v2356_v54 = vsub.f32 %v10845_v6, %v2355_v12  ;;  %v2752_v34 = vld [vmem:[%s15335_s4] sm:$0xff] }
 0x1e7   :  { %2172 = vmatpush.msra.mxu3 %v10603_v10  ;;  %2241 = vmatpush.msra.mxu0 %v2088_v23  ;;  %v10847_v10 = vand.u32 4294901760, %v506_v21  ;;  %v2349_v23 = vand.u32 4294901760, %v10820_v43  ;;  %v2344_v1 = vsub.f32 %v10800_v31, %v2343_v24 }
 0x1e8   :  { %2274 = vmatpush.msra.mxu1 %v10618_v56  ;;  %2125 = vmatpush.msra.mxu2 %v10582_v45  ;;  %v2333_v45 = vand.u32 4294901760, %v2332_v40  ;;  %v10885_v50 = vsub.f32 %v502_v14, %v10860_v4  ;;  %v2362_v11 = vsub.f32 %v10858_v17, %v2361_v61  ;;  %v2357_v49 = vand.u32 4294901760, %v2356_v54 }
 0x1e9   :  { %2174 = vmatpush.msra.mxu3 %v10618_v56  ;;  %2416 = vmatpush.msrb.mxu0 %v10762_v63  ;;  %v498_v56 = vld [vmem:[%s15332_s1 + $0x98] sm:$0xff]  ;;  %v10870_v53 = vsub.f32 %v506_v21, %v10847_v10  ;;  %v2345_v33 = vand.u32 4294901760, %v2344_v1  ;;  %v2385_v21 = vand.u32 4294901760, %v10920_v57  ;;  %v10951_v40 = vsub.f32 %v486_v3, %v10922_v36 }
 0x1ea   :  { %2276 = vmatpush.msra.mxu1 %v10630_v47  ;;  %2128 = vmatpush.msra.mxu2 %v10597_v22  ;;  %v2339_v22 = vand.u32 4294901760, %v2338_v5  ;;  %v10880_v20 = vand.u32 4294901760, %v498_v56  ;;  %v2373_v39 = vand.u32 4294901760, %v10885_v50  ;;  %v2363_v41 = vand.u32 4294901760, %v2362_v11 }
 0x1eb   :  { %2176 = vmatpush.msra.mxu3 %v10630_v47  ;;  %2419 = vmatpush.msrb.mxu0 %v10772_v9  ;;  %v2350_v47 = vsub.f32 %v10820_v43, %v2349_v23  ;;  %v2367_v15 = vand.u32 4294901760, %v10870_v53  ;;  %v2386_v8 = vsub.f32 %v10920_v57, %v2385_v21 }
 0x1ec   :  { %2465 = vmatpush.msrb.mxu1 %v10741_v30  ;;  %2131 = vmatpush.msra.mxu2 %v10616_v7  ;;  %v490_v7 = vld [vmem:[%s15332_s1 + $0x58] sm:$0xff]  ;;  %v10905_v62 = vsub.f32 %v498_v56, %v10880_v20  ;;  %v2374_v26 = vsub.f32 %v10885_v50, %v2373_v39  ;;  %v10965_v56 = vand.u32 4294901760, %v2752_v34 }
 0x1ed   :  { %2328 = vmatpush.msrb.mxu3 %v2327_v35  ;;  %2422 = vmatpush.msrb.mxu0 %v10786_v44  ;;  %v10907_v60 = vand.u32 4294901760, %v490_v7  ;;  %v2368_v59 = vsub.f32 %v10870_v53, %v2367_v15 }
 0x1ee   :  { %2467 = vmatpush.msrb.mxu1 %v10751_v25  ;;  %2134 = vmatpush.msra.mxu2 %v10628_v48  ;;  %v2351_v48 = vand.u32 4294901760, %v2350_v47  ;;  %v2379_v52 = vand.u32 4294901760, %v10905_v62  ;;  %v2397_v47 = vand.u32 4294901760, %v10951_v40 }
 0x1ef   :  { %2334 = vmatpush.msrb.mxu3 %v2333_v45  ;;  %2425 = vmatpush.msrb.mxu0 %v10800_v31  ;;  %v10935_v58 = vsub.f32 %v490_v7, %v10907_v60  ;;  %v2369_v35 = vand.u32 4294901760, %v2368_v59  ;;  %v15662_v7 = vld [vmem:[#allocation20_spill] sm:$0xff] }
 0x1f0   :  { %2469 = vmatpush.msrb.mxu1 %v10764_v28  ;;  %2137 = vmatpush.msra.mxu2 %v10641_v51  ;;  %v482_v51 = vld [vmem:[%s15332_s1 + $0x18] sm:$0xff]  ;;  %v2380_v5 = vsub.f32 %v10905_v62, %v2379_v52  ;;  %v10978_v54 = vand.u32 4294901760, %v15662_v7  ;;  %v2398_v59 = vsub.f32 %v10951_v40, %v2397_v47 }
 0x1f1   :  { %2340 = vmatpush.msrb.mxu3 %v2339_v22  ;;  %2428 = vmatpush.msrb.mxu0 %v10820_v43  ;;  %v10937_v16 = vand.u32 4294901760, %v482_v51  ;;  %v2391_v45 = vand.u32 4294901760, %v10935_v58  ;;  %v2375_v22 = vand.u32 4294901760, %v2374_v26  ;;  %v2755_v43 = vld [vmem:[%s15335_s4 + $0x18] sm:$0xff] }
 0x1f2   :  { %2471 = vmatpush.msrb.mxu1 %v10774_v37  ;;  %2140 = vmatpush.msra.mxu2 %v10653_v19  ;;  %v2756_v19 = vld [vmem:[%s15335_s4 + $0x20] sm:$0xff]  ;;  %v2381_v3 = vand.u32 4294901760, %v2380_v5  ;;  %v2399_v5 = vand.u32 4294901760, %v2398_v59  ;;  %v2754_v59 = vld [vmem:[%s15335_s4 + $0x10] sm:$0xff] }
 0x1f3   :  { %2346 = vmatpush.msrb.mxu3 %v2345_v33  ;;  %2431 = vmatpush.msrb.mxu0 %v10845_v6  ;;  %v10953_v14 = vand.u32 4294901760, %v2756_v19  ;;  %v10963_v1 = vsub.f32 %v482_v51, %v10937_v16  ;;  %v10988_v51 = vsub.f32 %v2752_v34, %v10965_v56  ;;  %v3256_v6 = vand.u32 4294901760, %v2755_v43 }
 0x1f4   :  { %2473 = vmatpush.msrb.mxu1 %v10791_v46  ;;  %2143 = vmatmul.f32.vlgmr.msra.gmra.mxu2 %v9686_v13 }
 0x1f5   :  { %2285 = vmatpush.msrb.mxu2 %v10741_v30  ;;  %2352 = vmatpush.msrb.mxu3 %v2351_v48  ;;  %v10975_v33 = vsub.f32 %v2756_v19, %v10953_v14  ;;  %v2392_v48 = vsub.f32 %v10935_v58, %v2391_v45  ;;  %v15378_v11 = vand.u32 4294901760, %v10963_v1 }
 0x1f6   :  { %2434 = vmatpush.msrb.mxu0 %v10858_v17  ;;  %2475 = vmatpush.msrb.mxu1 %v10814_v29 }
 0x1f7   :  { %2180 = vmatmul.f32.vlgmr.msra.gmra.mxu3 %v9706_v38  ;;  %2287 = vmatpush.msrb.mxu2 %v10751_v25  ;;  %v2806_v19 = vand.u32 4294901760, %v10975_v33  ;;  %v2393_v26 = vand.u32 4294901760, %v2392_v48  ;;  %v2404_v34 = vsub.f32 %v10963_v1, %v15378_v11  ;;  %v2758_v48 = vld [vmem:[%s15335_s4 + $0x30] sm:$0xff] }
 0x1f8   :  { %2358 = vmatpush.msrb.mxu3 %v2357_v49  ;;  %2437 = vmatpush.msrb.mxu0 %v10870_v53  ;;  %v2387_v49 = vand.u32 4294901760, %v2386_v8  ;;  %v11033_v11 = vand.u32 4294901760, %v2758_v48 }
 0x1f9   :  { %2477 = vmatpush.msrb.mxu1 %v10831_v18  ;;  %2289 = vmatpush.msrb.mxu2 %v10764_v28  ;;  %v2405_v8 = vand.u32 4294901760, %v2404_v34 }
 0x1fa   :  { %2364 = vmatpush.msrb.mxu3 %v2363_v41  ;;  %2440 = vmatpush.msrb.mxu0 %v10885_v50  ;;  %v11001_v41 = vsub.f32 %v15662_v7, %v10978_v54 }
 0x1fb   :  { %2479 = vmatpush.msrb.mxu1 %v10847_v10  ;;  %2291 = vmatpush.msrb.mxu2 %v10774_v37 }
 0x1fc   :  { %2370 = vmatpush.msrb.mxu3 %v2369_v35  ;;  %2443 = vmatpush.msrb.mxu0 %v10905_v62  ;;  %v2812_v35 = vand.u32 4294901760, %v10988_v51  ;;  %v11016_v7 = vand.u32 4294901760, %v11001_v41 }
 0x1fd   :  { %2481 = vmatpush.msrb.mxu1 %v10860_v4  ;;  %2243 = vmatmul.f32.vlgmr.msra.gmra.mxu0 %v9673_v2 }
 0x1fe   :  { %2293 = vmatpush.msrb.mxu2 %v10791_v46  ;;  %2376 = vmatpush.msrb.mxu3 %v2375_v22  ;;  %v2807_v22 = vsub.f32 %v10975_v33, %v2806_v19 }
 0x1ff   :  { %2446 = vmatpush.msrb.mxu0 %v10920_v57  ;;  %2483 = vmatpush.msrb.mxu1 %v10880_v20 }
 0x200   :  { %2278 = vmatmul.f32.vlgmr.msra.gmra.mxu1 %v9673_v2  ;;  %2295 = vmatpush.msrb.mxu2 %v10814_v29 }
 0x201   :  { %2382 = vmatpush.msrb.mxu3 %v2381_v3  ;;  %2449 = vmatpush.msrb.mxu0 %v10935_v58  ;;  %v2813_v3 = vsub.f32 %v10988_v51, %v2812_v35 }
 0x202   :  { %2485 = vmatpush.msrb.mxu1 %v10892_v32  ;;  %2297 = vmatpush.msrb.mxu2 %v10831_v18 }
 0x203   :  { %2388 = vmatpush.msrb.mxu3 %v2387_v49  ;;  %2452 = vmatpush.msrb.mxu0 %v10951_v40  ;;  %v2808_v49 = vand.u32 4294901760, %v2807_v22  ;;  %v2814_v34 = vand.u32 4294901760, %v2813_v3 }
 0x204   :  { %2487 = vmatpush.msrb.mxu1 %v10907_v60  ;;  %2299 = vmatpush.msrb.mxu2 %v10847_v10 }
 0x205   :  { %2394 = vmatpush.msrb.mxu3 %v2393_v26  ;;  %2455 = vmatpush.msrb.mxu0 %v10963_v1  ;;  %v2784_v26 = vsub.f32 %v11001_v41, %v11016_v7 }
 0x206   :  { %2489 = vmatpush.msrb.mxu1 %v10922_v36  ;;  %2301 = vmatpush.msrb.mxu2 %v10860_v4 }
 0x207   :  { %2400 = vmatpush.msrb.mxu3 %v2399_v5  ;;  %2458 = vmatmul.f32.vlgmr.msrb.gmra.mxu0 %v9686_v13  ;;  %v11038_v13 = vand.u32 4294901760, %v2754_v59  ;;  %v11046_v5 = vsub.f32 %v2758_v48, %v11033_v11  ;;  %v3469_v48 = vld [vmem:[#allocation10 + $0x180] sm:$0xff] }
 0x208   :  { %2491 = vmatpush.msrb.mxu1 %v10937_v16  ;;  %2303 = vmatpush.msrb.mxu2 %v10880_v20 }
 0x209   :  { %2406 = vmatpush.msrb.mxu3 %v2405_v8  ;;  %2495 = vmatmul.f32.vlgmr.msrb.gmra.mxu1 %v9706_v38  ;;  %v11043_v38 = vand.u32 4294901760, %v2784_v26  ;;  %v3124_v8 = vand.u32 4294901760, %v11046_v5 }
 0x20a   :  { %2305 = vmatpush.msrb.mxu2 %v10892_v32  ;;  %2778 = vmatpush.msra.mxu0 %v10953_v14 }
 0x20b   :  { %2565 = vmatpush.msra.mxu3 %v10741_v30  ;;  %2809 = vmatpush.msra.mxu1 %v2808_v49  ;;  %v2757_v30 = vld [vmem:[%s15335_s4 + $0x28] sm:$0xff]  ;;  %v3125_v63 = vsub.f32 %v11046_v5, %v3124_v8 }
 0x20c   :  { %2307 = vmatpush.msrb.mxu2 %v10907_v60  ;;  %2780 = vmatpush.msra.mxu0 %v10965_v56  ;;  %v11065_v22 = vand.u32 4294901760, %v2757_v30 }
 0x20d   :  { %2567 = vmatpush.msra.mxu3 %v10751_v25  ;;  %2815 = vmatpush.msra.mxu1 %v2814_v34  ;;  %v11056_v25 = vsub.f32 %v2754_v59, %v11038_v13  ;;  %v3126_v44 = vand.u32 4294901760, %v3125_v63  ;;  %v11235_v34 = vand.u32 4294901760, %v3469_v48 }
 0x20e   :  { %2309 = vmatpush.msrb.mxu2 %v10922_v36  ;;  %2408 = vmatmul.f32.vlgmr.msrb.gmra.mxu3 %v9673_v2 }
 0x20f   :  { %2569 = vmatpush.msra.mxu3 %v10764_v28  ;;  %2786 = vmatmul.f32.vlgmr.msra.gmra.mxu0 %v11043_v38  ;;  %v2753_v28 = vld [vmem:[%s15335_s4 + $0x8] sm:$0xff]  ;;  %v3130_v3 = vand.u32 4294901760, %v11056_v25 }
 0x210   :  { %2311 = vmatpush.msrb.mxu2 %v10937_v16  ;;  %2889 = vmatpush.msrb.mxu0 %v2806_v19 }
 0x211   :  { %2571 = vmatpush.msra.mxu3 %v10774_v37  ;;  %2817 = vmatmul.f32.vlgmr.msra.gmra.mxu1 %v10978_v54  ;;  %v11072_v37 = vand.u32 4294901760, %v2753_v28 }
 0x212   :  { %2317 = vmatmul.f32.vlgmr.msrb.gmra.mxu2 %v9727_v55  ;;  %2914 = vmatpush.msrb.mxu1 %v10953_v14  ;;  %v11080_v55 = vsub.f32 %v2757_v30, %v11065_v22 }
 0x213   :  { %2504 = vmatpush.msra.mxu2 %v2325_v27  ;;  %2573 = vmatpush.msra.mxu3 %v10791_v46  ;;  %v11088_v9 = vsub.f32 %v2753_v28, %v11072_v37  ;;  %v3131_v27 = vsub.f32 %v11056_v25, %v3130_v3  ;;  %v11246_v28 = vsub.f32 %v3469_v48, %v11235_v34 }
 0x214   :  { %2893 = vmatpush.msrb.mxu0 %v2812_v35  ;;  %2916 = vmatpush.msrb.mxu1 %v10965_v56 }
 0x215   :  { %2508 = vmatpush.msra.mxu2 %v2331_v0  ;;  %2575 = vmatpush.msra.mxu3 %v10814_v29  ;;  %v3132_v46 = vand.u32 4294901760, %v3131_v27  ;;  %v2965_v0 = vand.u32 4294901760, %v11080_v55  ;;  %v2971_v31 = vand.u32 4294901760, %v11088_v9  ;;  %v15386_v63 = vand.u32 4294901760, %v11246_v28 }
 0x216   :  { %3021 = vmatpush.msra.mxu1 %v11065_v22  ;;  %2996 = vmatpush.msra.mxu0 %v11080_v55 }
 0x217   :  { %2512 = vmatpush.msra.mxu2 %v2337_v42  ;;  %2577 = vmatpush.msra.mxu3 %v10831_v18  ;;  %v2759_v42 = vld [vmem:[%s15335_s4 + $0x38] sm:$0xff]  ;;  %v2966_v29 = vsub.f32 %v11080_v55, %v2965_v0  ;;  %v2972_v18 = vsub.f32 %v11088_v9, %v2971_v31 }
 0x218   :  { %2895 = vmatmul.f32.vlgmr.msrb.gmra.mxu0 %v10978_v54  ;;  %3023 = vmatpush.msra.mxu1 %v11072_v37 }
 0x219   :  { %2516 = vmatpush.msra.mxu2 %v2343_v24  ;;  %2579 = vmatpush.msra.mxu3 %v10847_v10  ;;  %v11127_v24 = vand.u32 4294901760, %v2759_v42  ;;  %v2967_v10 = vand.u32 4294901760, %v2966_v29  ;;  %v2973_v17 = vand.u32 4294901760, %v2972_v18 }
 0x21a   :  { %2918 = vmatmul.f32.vlgmr.msrb.gmra.mxu1 %v10978_v54  ;;  %2999 = vmatpush.msra.mxu0 %v11088_v9 }
 0x21b   :  { %2520 = vmatpush.msra.mxu2 %v2349_v23  ;;  %2581 = vmatpush.msra.mxu3 %v10860_v4  ;;  %v3282_v23 = vsub.f32 %v2759_v42, %v11127_v24  ;;  %v3288_v4 = vsub.f32 %v2755_v43, %v3256_v6 }
 0x21c   :  { %3096 = vmatpush.msrb.mxu0 %v11033_v11  ;;  %3127 = vmatpush.msrb.mxu1 %v3126_v44 }
 0x21d   :  { %2524 = vmatpush.msra.mxu2 %v2355_v12  ;;  %2583 = vmatpush.msra.mxu3 %v10880_v20  ;;  %v15663_v12 = vand.u32 4294901760, %v10963_v1  ;;  %v3283_v53 = vand.u32 4294901760, %v3282_v23  ;;  %v11162_v20 = vpop.f32.mrf.mxu3  ;;  %v3481_v1 = vld [vmem:[#allocation10 + $0x1e0] sm:$0xff] }
 0x21e   :  { %3133 = vmatpush.msrb.mxu1 %v3132_v46  ;;  %3098 = vmatpush.msrb.mxu0 %v11038_v13  ;;  %v3457_v46 = vld [vmem:[#allocation10 + $0x120] sm:$0xff] }
 0x21f   :  { %2528 = vmatpush.msra.mxu2 %v2361_v61  ;;  %2585 = vmatpush.msra.mxu3 %v10892_v32  ;;  %v3284_v61 = vsub.f32 %v3282_v23, %v3283_v53  ;;  %v11168_v32 = vpop.f32.mrf.mxu2  ;;  %v11275_v29 = vand.u32 4294901760, %v3457_v46 }
 0x220   :  { %3002 = vmatmul.f32.vlgmr.msra.gmra.mxu0 %v11001_v41 }
 0x221   :  { %2532 = vmatpush.msra.mxu2 %v2367_v15  ;;  %2587 = vmatpush.msra.mxu3 %v10907_v60  ;;  %v3285_v15 = vand.u32 4294901760, %v3284_v61 }
 0x222   :  { %3027 = vmatmul.f32.vlgmr.msra.gmra.mxu1 %v11016_v7  ;;  %3207 = vmatpush.msra.mxu0 %v3124_v8 }
 0x223   :  { %2536 = vmatpush.msra.mxu2 %v2373_v39  ;;  %2589 = vmatpush.msra.mxu3 %v10922_v36 }
 0x224   :  { %3232 = vmatpush.msra.mxu1 %v11033_v11  ;;  %3211 = vmatpush.msra.mxu0 %v3130_v3 }
 0x225   :  { %2540 = vmatpush.msra.mxu2 %v2379_v52  ;;  %2591 = vmatpush.msra.mxu3 %v10937_v16  ;;  %v11173_v60 = vpop.f32.mrf.mxu3  ;;  %v11188_v52 = vpop.f32.mrf.mxu0 }
 0x226   :  { %2593 = vmatmul.f32.vlgmr.msra.gmra.mxu3 %v9673_v2  ;;  %3234 = vmatpush.msra.mxu1 %v11038_v13  ;;  %v11194_v16 = vpop.f32.mrf.mxu1 }
 0x227   :  { %2544 = vmatpush.msra.mxu2 %v2385_v21  ;;  %2862 = vmatpush.msrb.mxu3 %v10953_v14  ;;  %v11176_v39 = vpop.f32.mrf.mxu2 }
 0x228   :  { %3104 = vmatmul.f32.vlgmr.msrb.gmra.mxu0 %v11043_v38 }
 0x229   :  { %2548 = vmatpush.msra.mxu2 %v2391_v45  ;;  %2864 = vmatpush.msrb.mxu3 %v10965_v56  ;;  %v11205_v56 = vand.u32 4294901760, %v3481_v1 }
 0x22a   :  { %3135 = vmatmul.f32.vlgmr.msrb.gmra.mxu1 %v10978_v54  ;;  %3314 = vmatpush.msrb.mxu0 %v3282_v23 }
 0x22b   :  { %2968 = vmatpush.msra.mxu3 %v2967_v10  ;;  %2552 = vmatpush.msra.mxu2 %v2397_v47  ;;  %v11282_v10 = vsub.f32 %v3457_v46, %v11275_v29 }
 0x22c   :  { %3339 = vmatpush.msrb.mxu1 %v11127_v24  ;;  %3317 = vmatpush.msrb.mxu0 %v3288_v4 }
 0x22d   :  { %2974 = vmatpush.msra.mxu3 %v2973_v17  ;;  %2556 = vmatpush.msra.mxu2 %v15663_v12  ;;  %v11182_v57 = vpop.f32.mrf.mxu3  ;;  %v11198_v40 = vpop.f32.mrf.mxu0  ;;  %v3449_v12 = vld [vmem:[#allocation10 + $0xe0] sm:$0xff] }
 0x22e   :  { %2558 = vmatmul.f32.vlgmr.msra.gmra.mxu2 %v9673_v2  ;;  %2868 = vmatmul.f32.vlgmr.msrb.gmra.mxu3 %v11016_v7  ;;  %v3289_v2 = vand.u32 4294901760, %v3288_v4  ;;  %15664 = vst [vmem:[#allocation22_spill] sm:$0xff] %v11198_v40  ;;  %v11203_v45 = vpop.f32.mrf.mxu1 }
 0x22f   :  { %2837 = vmatpush.msrb.mxu2 %v10975_v33  ;;  %3341 = vmatpush.msrb.mxu1 %v3256_v6  ;;  %v11186_v36 = vpop.f32.mrf.mxu2  ;;  %15665 = vst [vmem:[#allocation21_spill] sm:$0xff] %v11203_v45  ;;  %v3477_v33 = vld [vmem:[#allocation10 + $0x1c0] sm:$0xff] }
 0x230   :  { %3213 = vmatmul.f32.vlgmr.msra.gmra.mxu0 %v10978_v54  ;;  %3073 = vmatpush.msrb.mxu3 %v11065_v22  ;;  %v3290_v50 = vsub.f32 %v3288_v4, %v3289_v2 }
 0x231   :  { %2840 = vmatpush.msrb.mxu2 %v10988_v51  ;;  %v11212_v51 = vand.u32 4294901760, %v3477_v33  ;;  %3688 = vmatpush.msra.mxu0 %v11205_v56 }
 0x232   :  { %3236 = vmatmul.f32.vlgmr.msra.gmra.mxu1 %v10978_v54  ;;  %3075 = vmatpush.msrb.mxu3 %v11072_v37  ;;  %v3291_v62 = vand.u32 4294901760, %v3290_v50  ;;  %v11301_v50 = vand.u32 4294901760, %v3449_v12 }
 0x233   :  { %2937 = vmatpush.msra.mxu2 %v11065_v22  ;;  %3690 = vmatpush.msra.mxu0 %v11212_v51 }
 0x235   :  { %2939 = vmatpush.msra.mxu2 %v11072_v37  ;;  %v11190_v58 = vpop.f32.mrf.mxu3  ;;  %v3461_v37 = vld [vmem:[#allocation10 + $0x140] sm:$0xff] }
 0x236   :  { %2843 = vmatmul.f32.vlgmr.msrb.gmra.mxu2 %v11001_v41  ;;  %2976 = vmatmul.f32.vlgmr.msra.gmra.mxu3 %v10978_v54  ;;  %v11250_v22 = vpop.f32.mrf.mxu1  ;;  %v11260_v9 = vand.u32 4294901760, %v3461_v37 }
 0x237   :  { %3048 = vmatpush.msrb.mxu2 %v2965_v0  ;;  %3180 = vmatpush.msra.mxu3 %v11033_v11  ;;  %v11196_v21 = vpop.f32.mrf.mxu2  ;;  %v11210_v11 = vsub.f32 %v3481_v1, %v11205_v56  ;;  %15668 = vst [vmem:[#allocation24_spill] sm:$0xff] %v11250_v22  ;;  %v3445_v1 = vld [vmem:[#allocation10 + $0xc0] sm:$0xff] }
 0x238   :  { %3320 = vmatmul.f32.vlgmr.msrb.gmra.mxu0 %v11001_v41  ;;  %v11273_v42 = vsub.f32 %v3461_v37, %v11260_v9  ;;  %v3541_v22 = vld [vmem:[#allocation10 + $0x3c0] sm:$0xff] }
 0x239   :  { %3052 = vmatpush.msrb.mxu2 %v2971_v31  ;;  %3182 = vmatpush.msra.mxu3 %v11038_v13  ;;  %v15390_v19 = vand.u32 4294901760, %v11210_v11  ;;  %v3749_v31 = vsub.f32 %v11246_v28, %v15386_v63 }
 0x23a   :  { %3345 = vmatmul.f32.vlgmr.msrb.gmra.mxu1 %v11016_v7 }
 0x23b   :  { %v3731_v49 = vsub.f32 %v11210_v11, %v15390_v19  ;;  %v3750_v18 = vand.u32 4294901760, %v3749_v31 }
 0x23d   :  { %v11201_v14 = vpop.f32.mrf.mxu3 }
 0x23e   :  { %2945 = vmatmul.f32.vlgmr.msra.gmra.mxu2 %v11043_v38  ;;  %3077 = vmatmul.f32.vlgmr.msrb.gmra.mxu3 %v10978_v54 }
 0x23f   :  { %3155 = vmatpush.msra.mxu2 %v11046_v5  ;;  %3286 = vmatpush.msrb.mxu3 %v3285_v15  ;;  %v11207_v47 = vpop.f32.mrf.mxu2  ;;  %v3732_v5 = vand.u32 4294901760, %v3731_v49  ;;  %v11313_v49 = vsub.f32 %v3449_v12, %v11301_v50 }
 0x241   :  { %3158 = vmatpush.msra.mxu2 %v11056_v25  ;;  %3292 = vmatpush.msrb.mxu3 %v3291_v62 }
 0x242   :  { %3733 = vmatpush.msra.mxu1 %v3732_v5  ;;  %v11319_v5 = vand.u32 4294901760, %v3445_v1 }
 0x244   :  { %v11332_v31 = vsub.f32 %v3445_v1, %v11319_v5 }
 0x245   :  { %v11238_v13 = vpop.f32.mrf.mxu3 }
 0x246   :  { %3054 = vmatmul.f32.vlgmr.msrb.gmra.mxu2 %v10978_v54  ;;  %3186 = vmatmul.f32.vlgmr.msra.gmra.mxu3 %v11016_v7  ;;  %v11224_v7 = vpop.f32.mrf.mxu0  ;;  %15667 = vst [vmem:[#allocation23_spill] sm:$0xff] %v11238_v13  ;;  %v15383_v1 = vand.u32 4294901760, %v11332_v31 }
 0x247   :  { %3255 = vmatpush.msrb.mxu2 %v11127_v24  ;;  %3391 = vmatpush.msra.mxu3 %v11127_v24  ;;  %15666 = vst [vmem:[#allocation20_spill] sm:$0xff] %v11224_v7  ;;  %v11262_v27 = vpop.f32.mrf.mxu2  ;;  %v3453_v24 = vld [vmem:[#allocation10 + $0x100] sm:$0xff]  ;;  %v15676_v7 = vand.u32 4294901760, %v11210_v11 }
 0x248   :  { %15669 = vst [vmem:[#allocation25_spill] sm:$0xff] %v11262_v27  ;;  %v11284_v23 = vand.u32 4294901760, %v3453_v24  ;;  %v3537_v27 = vld [vmem:[#allocation10 + $0x3a0] sm:$0xff] }
 0x249   :  { %3257 = vmatpush.msrb.mxu2 %v3256_v6  ;;  %3393 = vmatpush.msra.mxu3 %v3256_v6  ;;  %v15382_v6 = vand.u32 4294901760, %v11273_v42 }
 0x24a   :  { %v11299_v61 = vsub.f32 %v3453_v24, %v11284_v23  ;;  %v3437_v24 = vld [vmem:[#allocation10 + $0x80] sm:$0xff] }
 0x24c   :  { %v15380_v48 = vand.u32 4294901760, %v11299_v61 }
 0x24d   :  { %v11304_v15 = vpop.f32.mrf.mxu3 }
 0x24e   :  { %3161 = vmatmul.f32.vlgmr.msra.gmra.mxu2 %v11001_v41  ;;  %3294 = vmatmul.f32.vlgmr.msrb.gmra.mxu3 %v10978_v54  ;;  %v11218_v41 = vsub.f32 %v3477_v33, %v11212_v51  ;;  %v11287_v17 = vpop.f32.mrf.mxu0  ;;  %15671 = vst [vmem:[#allocation27_spill] sm:$0xff] %v11304_v15 }
 0x24f   :  { %3366 = vmatpush.msra.mxu2 %v3283_v53  ;;  %3884 = vmatpush.msrb.mxu3 %v11205_v56  ;;  %15670 = vst [vmem:[#allocation26_spill] sm:$0xff] %v11287_v17  ;;  %v3761_v53 = vsub.f32 %v11273_v42, %v15382_v6  ;;  %v3545_v17 = vld [vmem:[#allocation10 + $0x3e0] sm:$0xff] }
 0x250   :  { %v15388_v59 = vand.u32 4294901760, %v11218_v41  ;;  %v11426_v15 = vand.u32 4294901760, %v3545_v17  ;;  %v15679_v45 = vand.u32 4294901760, %v11218_v41 }
 0x251   :  { %3370 = vmatpush.msra.mxu2 %v3289_v2  ;;  %3886 = vmatpush.msrb.mxu3 %v11212_v51  ;;  %v15381_v2 = vand.u32 4294901760, %v11282_v10  ;;  %v3762_v33 = vand.u32 4294901760, %v3761_v53  ;;  %v11341_v53 = vand.u32 4294901760, %v3437_v24 }
 0x252   :  { %v3737_v30 = vsub.f32 %v11218_v41, %v15388_v59  ;;  %v3421_v59 = vld [vmem:[#allocation10] sm:$0xff] }
 0x253   :  { %v11392_v19 = vand.u32 4294901760, %v3421_v59 }
 0x254   :  { %v3738_v3 = vand.u32 4294901760, %v3737_v30  ;;  %v3441_v30 = vld [vmem:[#allocation10 + $0xa0] sm:$0xff] }
 0x255   :  { %v11325_v46 = vand.u32 4294901760, %v3441_v30  ;;  %v11372_v6 = vpop.f32.mrf.mxu3 }
 0x256   :  { %3263 = vmatmul.f32.vlgmr.msrb.gmra.mxu2 %v11043_v38  ;;  %3395 = vmatmul.f32.vlgmr.msra.gmra.mxu3 %v10978_v54  ;;  %v3465_v38 = vld [vmem:[#allocation10 + $0x160] sm:$0xff]  ;;  %15674 = vst [vmem:[#allocation30_spill] sm:$0xff] %v11372_v6 }
 0x257   :  { %3831 = vmatpush.msrb.mxu2 %v11210_v11  ;;  %v11252_v8 = vand.u32 4294901760, %v3465_v38  ;;  %3739 = vmatpush.msra.mxu1 %v3738_v3  ;;  %v3773_v3 = vsub.f32 %v11299_v61, %v15380_v48  ;;  %v11339_v12 = vsub.f32 %v3441_v30, %v11325_v46  ;;  %v11351_v30 = vsub.f32 %v3437_v24, %v11341_v53  ;;  %v3429_v48 = vld [vmem:[#allocation10 + $0x40] sm:$0xff] }
 0x259   :  { %3834 = vmatpush.msrb.mxu2 %v11218_v41  ;;  %v11265_v44 = vsub.f32 %v3465_v38, %v11252_v8  ;;  %v11316_v38 = vpop.f32.mrf.mxu1  ;;  %v15389_v24 = vand.u32 4294901760, %v11351_v30 }
 0x25a   :  { %15672 = vst [vmem:[#allocation28_spill] sm:$0xff] %v11316_v38 }
 0x25b   :  { %v15384_v43 = vand.u32 4294901760, %v11265_v44 }
 0x25d   :  { %v3755_v4 = vsub.f32 %v11265_v44, %v15384_v43  ;;  %v11375_v43 = vand.u32 4294901760, %v3429_v48 }
 0x25e   :  { %3372 = vmatmul.f32.vlgmr.msra.gmra.mxu2 %v10978_v54  ;;  %v3473_v54 = vld [vmem:[#allocation10 + $0x1a0] sm:$0xff] }
 0x25f   :  { %v11221_v35 = vand.u32 4294901760, %v3473_v54  ;;  %v3756_v62 = vand.u32 4294901760, %v3755_v4 }
 0x261   :  { %v11232_v26 = vsub.f32 %v3473_v54, %v11221_v35  ;;  %3888 = vmatpush.msrb.mxu3 %v11221_v35  ;;  %3692 = vmatpush.msra.mxu0 %v11221_v35  ;;  %v3767_v54 = vsub.f32 %v11282_v10, %v15381_v2 }
 0x263   :  { %v15387_v25 = vand.u32 4294901760, %v11232_v26  ;;  %3837 = vmatpush.msrb.mxu2 %v11232_v26  ;;  %3890 = vmatpush.msrb.mxu3 %v11235_v34  ;;  %v3768_v37 = vand.u32 4294901760, %v3767_v54 }
 0x264   :  { %3694 = vmatpush.msra.mxu0 %v11235_v34 }
 0x265   :  { %v3743_v55 = vsub.f32 %v11232_v26, %v15387_v25  ;;  %3840 = vmatpush.msrb.mxu2 %v11246_v28  ;;  %3892 = vmatpush.msrb.mxu3 %v11252_v8 }
 0x266   :  { %3696 = vmatpush.msra.mxu0 %v11252_v8 }
 0x267   :  { %v3744_v0 = vand.u32 4294901760, %v3743_v55  ;;  %3843 = vmatpush.msrb.mxu2 %v11265_v44  ;;  %3894 = vmatpush.msrb.mxu3 %v11260_v9  ;;  %v15379_v55 = vand.u32 4294901760, %v11313_v49 }
 0x268   :  { %3698 = vmatpush.msra.mxu0 %v11260_v9 }
 0x269   :  { %3745 = vmatpush.msra.mxu1 %v3744_v0  ;;  %3846 = vmatpush.msrb.mxu2 %v11273_v42  ;;  %v11329_v0 = vpop.f32.mrf.mxu2  ;;  %v3779_v4 = vsub.f32 %v11313_v49, %v15379_v55 }
 0x26a   :  { %3896 = vmatpush.msrb.mxu3 %v11275_v29  ;;  %3700 = vmatpush.msra.mxu0 %v11275_v29  ;;  %15673 = vst [vmem:[#allocation29_spill] sm:$0xff] %v11329_v0 }
 0x26b   :  { %3751 = vmatpush.msra.mxu1 %v3750_v18  ;;  %3849 = vmatpush.msrb.mxu2 %v11282_v10  ;;  %v3774_v18 = vand.u32 4294901760, %v3773_v3  ;;  %v3780_v54 = vand.u32 4294901760, %v3779_v4  ;;  %v15385_v3 = vand.u32 4294901760, %v11339_v12 }
 0x26c   :  { %3898 = vmatpush.msrb.mxu3 %v11284_v23  ;;  %3702 = vmatpush.msra.mxu0 %v11284_v23 }
 0x26d   :  { %3757 = vmatpush.msra.mxu1 %v3756_v62  ;;  %3852 = vmatpush.msrb.mxu2 %v11299_v61  ;;  %v11345_v62 = vpop.f32.mrf.mxu0  ;;  %v3791_v4 = vsub.f32 %v11339_v12, %v15385_v3  ;;  %v3425_v3 = vld [vmem:[#allocation10 + $0x20] sm:$0xff] }
 0x26e   :  { %3900 = vmatpush.msrb.mxu3 %v11301_v50  ;;  %3704 = vmatpush.msra.mxu0 %v11301_v50 }
 0x26f   :  { %3763 = vmatpush.msra.mxu1 %v3762_v33  ;;  %3855 = vmatpush.msrb.mxu2 %v11313_v49  ;;  %v3433_v33 = vld [vmem:[#allocation10 + $0x60] sm:$0xff]  ;;  %v3792_v63 = vand.u32 4294901760, %v3791_v4 }
 0x270   :  { %3902 = vmatpush.msrb.mxu3 %v11319_v5  ;;  %3706 = vmatpush.msra.mxu0 %v11319_v5  ;;  %v11353_v55 = vand.u32 4294901760, %v3433_v33 }
 0x271   :  { %3769 = vmatpush.msra.mxu1 %v3768_v37  ;;  %3858 = vmatpush.msrb.mxu2 %v11332_v31  ;;  %v3785_v37 = vsub.f32 %v11332_v31, %v15383_v1 }
 0x272   :  { %3904 = vmatpush.msrb.mxu3 %v11325_v46  ;;  %3708 = vmatpush.msra.mxu0 %v11325_v46  ;;  %v11366_v2 = vsub.f32 %v3433_v33, %v11353_v55  ;;  %v3797_v33 = vsub.f32 %v11351_v30, %v15389_v24 }
 0x273   :  { %3775 = vmatpush.msra.mxu1 %v3774_v18  ;;  %3861 = vmatpush.msrb.mxu2 %v11339_v12  ;;  %v11370_v18 = vpop.f32.mrf.mxu1  ;;  %v3786_v1 = vand.u32 4294901760, %v3785_v37  ;;  %v11387_v37 = vand.u32 4294901760, %v3425_v3 }
 0x274   :  { %3906 = vmatpush.msrb.mxu3 %v11341_v53  ;;  %3710 = vmatpush.msra.mxu0 %v11341_v53  ;;  %v15391_v25 = vand.u32 4294901760, %v11366_v2  ;;  %v3798_v4 = vand.u32 4294901760, %v3797_v33 }
 0x275   :  { %3781 = vmatpush.msra.mxu1 %v3780_v54  ;;  %3864 = vmatpush.msrb.mxu2 %v11351_v30  ;;  %v11384_v54 = vsub.f32 %v3429_v48, %v11375_v43  ;;  %v11398_v48 = vpop.f32.mrf.mxu0  ;;  %v11402_v38 = vsub.f32 %v3425_v3, %v11387_v37 }
 0x276   :  { %3908 = vmatpush.msrb.mxu3 %v11353_v55  ;;  %3712 = vmatpush.msra.mxu0 %v11353_v55  ;;  %v3803_v24 = vsub.f32 %v11366_v2, %v15391_v25  ;;  %v11406_v25 = vsub.f32 %v3421_v59, %v11392_v19  ;;  %v11418_v59 = vpop.f32.mrf.mxu3 }
 0x277   :  { %3787 = vmatpush.msra.mxu1 %v3786_v1  ;;  %3867 = vmatpush.msrb.mxu2 %v11366_v2  ;;  %v11396_v1 = vpop.f32.mrf.mxu2  ;;  %v15392_v6 = vand.u32 4294901760, %v11384_v54 }
 0x278   :  { %3910 = vmatpush.msrb.mxu3 %v11375_v43  ;;  %3714 = vmatpush.msra.mxu0 %v11375_v43  ;;  %15675 = vst [vmem:[#allocation31_spill] sm:$0xff] %v11396_v1  ;;  %v3804_v33 = vand.u32 4294901760, %v3803_v24  ;;  %v15393_v1 = vand.u32 4294901760, %v11402_v38  ;;  %v15394_v3 = vand.u32 4294901760, %v11406_v25 }
 0x279   :  { %3793 = vmatpush.msra.mxu1 %v3792_v63  ;;  %3870 = vmatpush.msrb.mxu2 %v11384_v54  ;;  %v3809_v63 = vsub.f32 %v11384_v54, %v15392_v6 }
 0x27a   :  { %3912 = vmatpush.msrb.mxu3 %v11387_v37  ;;  %3716 = vmatpush.msra.mxu0 %v11387_v37  ;;  %v3815_v6 = vsub.f32 %v11402_v38, %v15393_v1  ;;  %v3821_v0 = vsub.f32 %v11406_v25, %v15394_v3 }
 0x27b   :  { %3799 = vmatpush.msra.mxu1 %v3798_v4  ;;  %3873 = vmatpush.msrb.mxu2 %v11402_v38  ;;  %v11420_v24 = vpop.f32.mrf.mxu1  ;;  %v3810_v4 = vand.u32 4294901760, %v3809_v63  ;;  %v11437_v63 = vand.u32 4294901760, %v3541_v22 }
 0x27c   :  { %3914 = vmatpush.msrb.mxu3 %v11392_v19  ;;  %3718 = vmatpush.msra.mxu0 %v11392_v19  ;;  %v3816_v13 = vand.u32 4294901760, %v3815_v6  ;;  %v3822_v1 = vand.u32 4294901760, %v3821_v0  ;;  %v15682_v0 = vand.u32 4294901760, %v11232_v26  ;;  %v15683_v26 = vand.u32 4294901760, %v11246_v28  ;;  %v3525_v28 = vld [vmem:[#allocation10 + $0x340] sm:$0xff] }
 0x27d   :  { %3805 = vmatpush.msra.mxu1 %v3804_v33  ;;  %3876 = vmatpush.msrb.mxu2 %v11406_v25  ;;  %v11435_v33 = vsub.f32 %v3545_v17, %v11426_v15  ;;  %15678 = vst [vmem:[#allocation33_spill] sm:$0xff] %v11437_v63  ;;  %v11443_v3 = vpop.f32.mrf.mxu0  ;;  %v11450_v6 = vsub.f32 %v3541_v22, %v11437_v63  ;;  %v3533_v17 = vld [vmem:[#allocation10 + $0x380] sm:$0xff] }
 0x27e   :  { %3925 = vmatpush.msrb.mxu0 %v15676_v7  ;;  %v11447_v7 = vand.u32 4294901760, %v3537_v27  ;;  %v3529_v22 = vld [vmem:[#allocation10 + $0x360] sm:$0xff] }
 0x27f   :  { %3811 = vmatpush.msra.mxu1 %v3810_v4  ;;  %4029 = vmatpush.msra.mxu2 %v11426_v15  ;;  %15677 = vst [vmem:[#allocation32_spill] sm:$0xff] %v11435_v33  ;;  %v11441_v40 = vpop.f32.mrf.mxu2  ;;  %v15395_v11 = vand.u32 4294901760, %v11435_v33  ;;  %v15400_v41 = vand.u32 4294901760, %v11450_v6 }
 0x280   :  { %3929 = vmatpush.msrb.mxu0 %v15679_v45  ;;  %15680 = vst [vmem:[#allocation34_spill] sm:$0xff] %v11447_v7  ;;  %v11462_v4 = vsub.f32 %v3537_v27, %v11447_v7 }
 0x281   :  { %3817 = vmatpush.msra.mxu1 %v3816_v13  ;;  %4031 = vmatpush.msra.mxu2 %v11437_v63  ;;  %15681 = vst [vmem:[#allocation35_spill] sm:$0xff] %v11450_v6  ;;  %v4072_v45 = vsub.f32 %v11435_v33, %v15395_v11  ;;  %v11459_v13 = vand.u32 4294901760, %v3533_v17  ;;  %v4078_v33 = vsub.f32 %v11450_v6, %v15400_v41  ;;  %v11488_v6 = vand.u32 4294901760, %v3525_v28 }
 0x282   :  { %3933 = vmatpush.msrb.mxu0 %v15682_v0  ;;  %v15405_v27 = vand.u32 4294901760, %v11462_v4 }
 0x283   :  { %3823 = vmatpush.msra.mxu1 %v3822_v1  ;;  %4033 = vmatpush.msra.mxu2 %v11447_v7  ;;  %v11467_v1 = vpop.f32.mrf.mxu3  ;;  %v11469_v0 = vpop.f32.mrf.mxu1  ;;  %v4073_v11 = vand.u32 4294901760, %v4072_v45  ;;  %v11476_v7 = vand.u32 4294901760, %v3529_v22  ;;  %v4079_v45 = vand.u32 4294901760, %v4078_v33  ;;  %15685 = vst [vmem:[#allocation36_spill] sm:$0xff] %v11488_v6 }
 0x284   :  { %3937 = vmatpush.msrb.mxu0 %v15683_v26  ;;  %v15684_v26 = vand.u32 4294901760, %v11265_v44  ;;  %v4084_v41 = vsub.f32 %v11462_v4, %v15405_v27  ;;  %v15687_v44 = vand.u32 4294901760, %v11273_v42  ;;  %v3517_v42 = vld [vmem:[#allocation10 + $0x300] sm:$0xff] }
 0x285   :  { %3992 = vmatpush.msrb.mxu1 %v11205_v56  ;;  %4035 = vmatpush.msra.mxu2 %v11459_v13  ;;  %v11480_v56 = vsub.f32 %v3533_v17, %v11459_v13  ;;  %v11491_v63 = vsub.f32 %v3529_v22, %v11476_v7  ;;  %v3521_v17 = vld [vmem:[#allocation10 + $0x320] sm:$0xff]  ;;  %v11504_v22 = vsub.f32 %v3525_v28, %v11488_v6 }
 0x286   :  { %3941 = vmatpush.msrb.mxu0 %v15684_v26  ;;  %4074 = vmatpush.msra.mxu3 %v4073_v11  ;;  %v4085_v11 = vand.u32 4294901760, %v4084_v41  ;;  %v11501_v27 = vand.u32 4294901760, %v3521_v17  ;;  %v11512_v41 = vpop.f32.mrf.mxu0 }
 0x287   :  { %3994 = vmatpush.msrb.mxu1 %v11212_v51  ;;  %4037 = vmatpush.msra.mxu2 %v11476_v7  ;;  %15686 = vst [vmem:[#allocation37_spill] sm:$0xff] %v11491_v63  ;;  %v15408_v51 = vand.u32 4294901760, %v11480_v56  ;;  %v11497_v33 = vpop.f32.mrf.mxu2  ;;  %v15409_v26 = vand.u32 4294901760, %v11491_v63  ;;  %v15412_v28 = vand.u32 4294901760, %v11504_v22 }
 0x288   :  { %3945 = vmatpush.msrb.mxu0 %v15687_v44  ;;  %4080 = vmatpush.msra.mxu3 %v4079_v45  ;;  %15688 = vst [vmem:[#allocation38_spill] sm:$0xff] %v11504_v22  ;;  %v15689_v44 = vand.u32 4294901760, %v11282_v10 }
 0x289   :  { %3996 = vmatpush.msrb.mxu1 %v11221_v35  ;;  %4039 = vmatpush.msra.mxu2 %v11488_v6  ;;  %v4090_v35 = vsub.f32 %v11480_v56, %v15408_v51  ;;  %15690 = vst [vmem:[#allocation39_spill] sm:$0xff] %v11512_v41  ;;  %v4096_v45 = vsub.f32 %v11491_v63, %v15409_v26  ;;  %v15692_v51 = vand.u32 4294901760, %v11299_v61  ;;  %v3509_v61 = vld [vmem:[#allocation10 + $0x2c0] sm:$0xff] }
 0x28a   :  { %3949 = vmatpush.msrb.mxu0 %v15689_v44  ;;  %4086 = vmatpush.msra.mxu3 %v4085_v11  ;;  %v11522_v6 = vsub.f32 %v3521_v17, %v11501_v27  ;;  %v3513_v44 = vld [vmem:[#allocation10 + $0x2e0] sm:$0xff]  ;;  %v4102_v26 = vsub.f32 %v11504_v22, %v15412_v28  ;;  %v11546_v28 = vand.u32 4294901760, %v3509_v61 }
 0x28b   :  { %3998 = vmatpush.msrb.mxu1 %v11235_v34  ;;  %4041 = vmatpush.msra.mxu2 %v11501_v27  ;;  %v11519_v34 = vand.u32 4294901760, %v3517_v42  ;;  %v4091_v10 = vand.u32 4294901760, %v4090_v35  ;;  %v11527_v11 = vpop.f32.mrf.mxu3  ;;  %v4097_v41 = vand.u32 4294901760, %v4096_v45  ;;  %v11534_v17 = vand.u32 4294901760, %v3513_v44 }
 0x28c   :  { %15691 = vst [vmem:[#allocation40_spill] sm:$0xff] %v11522_v6  ;;  %3953 = vmatpush.msrb.mxu0 %v15692_v51  ;;  %v15415_v63 = vand.u32 4294901760, %v11522_v6  ;;  %v11540_v51 = vpop.f32.mrf.mxu1  ;;  %v4103_v35 = vand.u32 4294901760, %v4102_v26  ;;  %v3505_v26 = vld [vmem:[#allocation10 + $0x2a0] sm:$0xff] }
 0x28d   :  { %4000 = vmatpush.msrb.mxu1 %v11252_v8  ;;  %4043 = vmatpush.msra.mxu2 %v11519_v34  ;;  %v11538_v8 = vsub.f32 %v3517_v42, %v11519_v34  ;;  %15693 = vst [vmem:[#allocation41_spill] sm:$0xff] %v11540_v51  ;;  %v11549_v22 = vsub.f32 %v3513_v44, %v11534_v17 }
 0x28e   :  { %4092 = vmatpush.msra.mxu3 %v4091_v10  ;;  %v4108_v45 = vsub.f32 %v11522_v6, %v15415_v63  ;;  %v11559_v6 = vand.u32 4294901760, %v3505_v26  ;;  %v11562_v44 = vsub.f32 %v3509_v61, %v11546_v28 }
 0x28f   :  { %4002 = vmatpush.msrb.mxu1 %v11260_v9  ;;  %4045 = vmatpush.msra.mxu2 %v11534_v17  ;;  %15694 = vst [vmem:[#allocation42_spill] sm:$0xff] %v11549_v22  ;;  %v15695_v9 = vand.u32 4294901760, %v11313_v49  ;;  %v15418_v42 = vand.u32 4294901760, %v11538_v8  ;;  %v11555_v10 = vpop.f32.mrf.mxu2  ;;  %v15419_v63 = vand.u32 4294901760, %v11549_v22  ;;  %v15697_v49 = vand.u32 4294901760, %v11332_v31 }
 0x290   :  { %4098 = vmatpush.msra.mxu3 %v4097_v41  ;;  %v4109_v51 = vand.u32 4294901760, %v4108_v45  ;;  %15696 = vst [vmem:[#allocation43_spill] sm:$0xff] %v11559_v6  ;;  %v3501_v41 = vld [vmem:[#allocation10 + $0x280] sm:$0xff]  ;;  %v11570_v45 = vpop.f32.mrf.mxu0  ;;  %v15424_v61 = vand.u32 4294901760, %v11562_v44 }
 0x291   :  { %3957 = vmatpush.msrb.mxu0 %v15695_v9  ;;  %4004 = vmatpush.msrb.mxu1 %v11275_v29  ;;  %v4114_v29 = vsub.f32 %v11538_v8, %v15418_v42  ;;  %15698 = vst [vmem:[#allocation44_spill] sm:$0xff] %v11570_v45  ;;  %v4120_v9 = vsub.f32 %v11549_v22, %v15419_v63  ;;  %v11577_v31 = vand.u32 4294901760, %v3501_v41  ;;  %v3497_v42 = vld [vmem:[#allocation10 + $0x260] sm:$0xff] }
 0x292   :  { %4047 = vmatpush.msra.mxu2 %v11546_v28  ;;  %4104 = vmatpush.msra.mxu3 %v4103_v35  ;;  %v15699_v35 = vand.u32 4294901760, %v11339_v12  ;;  %v4126_v22 = vsub.f32 %v11562_v44, %v15424_v61  ;;  %v15700_v12 = vand.u32 4294901760, %v11351_v30 }
 0x293   :  { %3961 = vmatpush.msrb.mxu0 %v15697_v49  ;;  %4006 = vmatpush.msrb.mxu1 %v11284_v23  ;;  %v11580_v23 = vsub.f32 %v3505_v26, %v11559_v6  ;;  %v4115_v49 = vand.u32 4294901760, %v4114_v29  ;;  %v11585_v45 = vpop.f32.mrf.mxu3  ;;  %v4121_v63 = vand.u32 4294901760, %v4120_v9 }
 0x294   :  { %4049 = vmatpush.msra.mxu2 %v11559_v6  ;;  %4110 = vmatpush.msra.mxu3 %v4109_v51  ;;  %v11592_v6 = vand.u32 4294901760, %v3497_v42  ;;  %v3493_v51 = vld [vmem:[#allocation10 + $0x240] sm:$0xff]  ;;  %v11600_v29 = vpop.f32.mrf.mxu1  ;;  %v4127_v9 = vand.u32 4294901760, %v4126_v22 }
 0x295   :  { %3965 = vmatpush.msrb.mxu0 %v15699_v35  ;;  %4008 = vmatpush.msrb.mxu1 %v11301_v50  ;;  %v15425_v26 = vand.u32 4294901760, %v11580_v23  ;;  %v11598_v50 = vsub.f32 %v3501_v41, %v11577_v31  ;;  %15701 = vst [vmem:[#allocation45_spill] sm:$0xff] %v11600_v29  ;;  %v11606_v61 = vand.u32 4294901760, %v3493_v51  ;;  %v757_v41 = vadd.f32 %v11162_v20, %v11168_v32 }
 0x296   :  { %4051 = vmatpush.msra.mxu2 %v11577_v31  ;;  %4116 = vmatpush.msra.mxu3 %v4115_v49  ;;  %v11609_v30 = vsub.f32 %v3497_v42, %v11592_v6  ;;  %v3489_v49 = vld [vmem:[#allocation10 + $0x220] sm:$0xff]  ;;  %v15703_v20 = vand.u32 4294901760, %v11384_v54  ;;  %v15704_v54 = vand.u32 4294901760, %v11402_v38  ;;  %v15705_v38 = vand.u32 4294901760, %v11406_v25 }
 0x297   :  { %3969 = vmatpush.msrb.mxu0 %v15700_v12  ;;  %4010 = vmatpush.msrb.mxu1 %v11319_v5  ;;  %v4132_v35 = vsub.f32 %v11580_v23, %v15425_v26  ;;  %v15702_v5 = vand.u32 4294901760, %v11366_v2  ;;  %v4137_v22 = vand.u32 4294901760, %v11598_v50  ;;  %v11617_v12 = vpop.f32.mrf.mxu2  ;;  %v11621_v29 = vand.u32 4294901760, %v3489_v49 }
 0x298   :  { %4053 = vmatpush.msra.mxu2 %v11592_v6  ;;  %4122 = vmatpush.msra.mxu3 %v4121_v63  ;;  %v15426_v42 = vand.u32 4294901760, %v11609_v30  ;;  %v11624_v2 = vsub.f32 %v3493_v51, %v11606_v61  ;;  %v783_v32 = vadd.f32 %v11176_v39, %v757_v41 }
 0x299   :  { %3973 = vmatpush.msrb.mxu0 %v15702_v5  ;;  %4012 = vmatpush.msrb.mxu1 %v11325_v46  ;;  %v4133_v26 = vand.u32 4294901760, %v4132_v35  ;;  %v4138_v46 = vsub.f32 %v11598_v50, %v4137_v22  ;;  %v3485_v35 = vld [vmem:[#allocation10 + $0x200] sm:$0xff]  ;;  %v11646_v5 = vpop.f32.mrf.mxu0 }
 0x29a   :  { %4055 = vmatpush.msra.mxu2 %v11606_v61  ;;  %4128 = vmatpush.msra.mxu3 %v4127_v9  ;;  %v4144_v63 = vsub.f32 %v11609_v30, %v15426_v42  ;;  %v4149_v51 = vand.u32 4294901760, %v11624_v2  ;;  %v11644_v9 = vsub.f32 %v3489_v49, %v11621_v29 }
 0x29b   :  { %3977 = vmatpush.msrb.mxu0 %v15703_v20  ;;  %4014 = vmatpush.msrb.mxu1 %v11341_v53  ;;  %v4139_v39 = vand.u32 4294901760, %v4138_v46  ;;  %v11641_v53 = vand.u32 4294901760, %v3485_v35  ;;  %v11648_v41 = vpop.f32.mrf.mxu3 }
 0x29c   :  { %4057 = vmatpush.msra.mxu2 %v11621_v29  ;;  %4134 = vmatpush.msra.mxu3 %v4133_v26  ;;  %v4145_v20 = vand.u32 4294901760, %v4144_v63  ;;  %v4150_v42 = vsub.f32 %v11624_v2, %v4149_v51  ;;  %v4155_v26 = vand.u32 4294901760, %v11644_v9 }
 0x29d   :  { %3981 = vmatpush.msrb.mxu0 %v15704_v54  ;;  %4016 = vmatpush.msrb.mxu1 %v11353_v55  ;;  %v808_v55 = vadd.f32 %v11173_v60, %v783_v32  ;;  %v11659_v49 = vsub.f32 %v3485_v35, %v11641_v53 }
 0x29e   :  { %4140 = vmatpush.msra.mxu3 %v4139_v39  ;;  %v4151_v46 = vand.u32 4294901760, %v4150_v42  ;;  %4059 = vmatpush.msra.mxu2 %v11641_v53  ;;  %v4156_v60 = vsub.f32 %v11644_v9, %v4155_v26  ;;  %v916_v42 = vadd.f32 %v11190_v58, %v11196_v21 }
 0x29f   :  { %3985 = vmatpush.msrb.mxu0 %v15705_v38  ;;  %4018 = vmatpush.msrb.mxu1 %v11375_v43  ;;  %v835_v63 = vadd.f32 %v11186_v36, %v808_v55  ;;  %v4161_v25 = vand.u32 4294901760, %v11659_v49  ;;  %v11668_v43 = vpop.f32.mrf.mxu1  ;;  %v11670_v32 = vpop.f32.mrf.mxu2 }
 0x2a0   :  { %4146 = vmatpush.msra.mxu3 %v4145_v20  ;;  %v4157_v36 = vand.u32 4294901760, %v4156_v60  ;;  %v942_v20 = vadd.f32 %v11188_v52, %v916_v42 }
 0x2a1   :  { %4020 = vmatpush.msrb.mxu1 %v11387_v37  ;;  %v4162_v37 = vsub.f32 %v11659_v49, %v4161_v25  ;;  %v858_v35 = vadd.f32 %v11182_v57, %v835_v63  ;;  %v2787_v58 = vpop.f32.mrf.mxu0 }
 0x2a2   :  { %4152 = vmatpush.msra.mxu3 %v4151_v46 }
 0x2a3   :  { %4022 = vmatpush.msrb.mxu1 %v11392_v19  ;;  %v4163_v54 = vand.u32 4294901760, %v4162_v37  ;;  %v1374_v38 = vadd.f32 %v11345_v62, %v858_v35  ;;  %v967_v19 = vadd.f32 %v11194_v16, %v942_v20 }
 0x2a4   :  { %4158 = vmatpush.msra.mxu3 %v4157_v36 }
 0x2a5   :  { %v1465_v55 = vadd.f32 %v11370_v18, %v1374_v38  ;;  %v994_v60 = vadd.f32 %v11207_v47, %v967_v19  ;;  %v11693_v38 = vld [vmem:[#allocation5] sm:$0xf] }
 0x2a6   :  { %4164 = vmatpush.msra.mxu3 %v4163_v54 }
 0x2a7   :  { %v2818_v46 = vpop.f32.mrf.mxu1  ;;  %v1515_v57 = vadd.f32 %v11441_v40, %v1465_v55  ;;  %v1017_v52 = vadd.f32 %v11201_v14, %v994_v60  ;;  %v3405_v14 = vperm.slane %v11693_v38, 0 }
 0x2a8   :  { %v2819_v42 = vadd.f32 %v2818_v46, %v2787_v58 }
 0x2a9   :  { %v11679_v39 = vpop.f32.mrf.mxu3  ;;  %v1552_v36 = vadd.f32 %v11418_v59, %v1515_v57  ;;  %v2896_v62 = vpop.f32.mrf.mxu0  ;;  %v1689_v35 = vadd.f32 %v11497_v33, %v1017_v52 }
 0x2ab   :  { %v1615_v16 = vadd.f32 %v11398_v48, %v1552_v36  ;;  %v1780_v47 = vadd.f32 %v11467_v1, %v1689_v35 }
 0x2ad   :  { %v1650_v19 = vadd.f32 %v11420_v24, %v1615_v16  ;;  %v1830_v46 = vadd.f32 %v11443_v3, %v1780_v47  ;;  %v15710_v47 = vld [vmem:[#allocation32_spill] sm:$0xff] }
 0x2af   :  { %v2919_v18 = vpop.f32.mrf.mxu1  ;;  %v1867_v36 = vadd.f32 %v11469_v0, %v1830_v46 }
 0x2b1   :  { %v11683_v21 = vpop.f32.mrf.mxu2  ;;  %v2869_v63 = vpop.f32.mrf.mxu3  ;;  %v1930_v1 = vadd.f32 %v11555_v10, %v1867_v36 }
 0x2b2   :  { %v3003_v57 = vpop.f32.mrf.mxu0 }
 0x2b3   :  { %v1965_v16 = vadd.f32 %v11527_v11, %v1930_v1  ;;  %v15712_v11 = vld [vmem:[#allocation34_spill] sm:$0xff]  ;;  %v15723_v1 = vld [vmem:[#allocation37_spill] sm:$0xff] }
 0x2b9   :  { %v2844_v37 = vpop.f32.mrf.mxu2  ;;  %v2977_v58 = vpop.f32.mrf.mxu3 }
 0x2ba   :  { %v2845_v54 = vadd.f32 %v2844_v37, %v2819_v42  ;;  %v3028_v42 = vpop.f32.mrf.mxu1 }
 0x2bc   :  { %v2870_v20 = vadd.f32 %v2869_v63, %v2845_v54 }
 0x2be   :  { %v2897_v40 = vadd.f32 %v2896_v62, %v2870_v20  ;;  %v3406_v20 = vperm.slane %v11693_v38, 1 }
 0x2c0   :  { %v2920_v59 = vadd.f32 %v2919_v18, %v2897_v40  ;;  %v15709_v18 = vld [vmem:[#allocation33_spill] sm:$0xff]  ;;  %v15711_v40 = vand.u32 4294901760, %v15710_v47 }
 0x2c1   :  { %v2946_v55 = vpop.f32.mrf.mxu2  ;;  %v3078_v3 = vpop.f32.mrf.mxu3 }
 0x2c2   :  { %v3399_v33 = vadd.f32 %v2920_v59, %v1650_v19  ;;  %v2978_v60 = vadd.f32 %v2977_v58, %v2946_v55 }
 0x2c4   :  { %v3413_v48 = vadd.f32 %v3405_v14, %v3399_v33  ;;  %v3004_v63 = vadd.f32 %v3003_v57, %v2978_v60  ;;  %v15713_v14 = vld [vmem:[#allocation35_spill] sm:$0xff]  ;;  %v15716_v33 = vand.u32 4294901760, %v11462_v4 }
 0x2c5   :  { %v15714_v58 = vand.u32 4294901760, %v15713_v14 }
 0x2c6   :  { %v3417_v52 = vmax.f32 %v3413_v48, 0.0  ;;  %v3029_v24 = vadd.f32 %v3028_v42, %v3004_v63  ;;  %v15719_v48 = vld [vmem:[#allocation22_spill] sm:$0xff]  ;;  %v15720_v63 = vld [vmem:[#allocation21_spill] sm:$0xff]  ;;  %v15722_v42 = vld [vmem:[#allocation36_spill] sm:$0xff] }
 0x2c7   :  { %v1075_v36 = vadd.f32 %v15720_v63, %v15719_v48  ;;  %v15735_v48 = vld [vmem:[#allocation42_spill] sm:$0xff] }
 0x2c8   :  { %v11701_v62 = vand.u32 4294901760, %v3417_v52  ;;  %v15736_v63 = vand.u32 4294901760, %v15735_v48 }
 0x2c9   :  { %v3055_v37 = vpop.f32.mrf.mxu2 }
 0x2ca   :  { %15706 = vst [vmem:[#allocation46_spill] sm:$0xff] %v11701_v62  ;;  %v11704_v35 = vsub.f32 %v3417_v52, %v11701_v62  ;;  %v3056_v54 = vadd.f32 %v3055_v37, %v3029_v24  ;;  %3825 = vmatmul.f32.vlgmr.msra.gmra.mxu1 %v11701_v62  ;;  %v15724_v24 = vand.u32 4294901760, %v15723_v1  ;;  %v3609_v37 = vld [vmem:[#allocation10 + $0x5e0] sm:$0xff] }
 0x2cb   :  { %4225 = vmatpush.msra.mxu1 %v11426_v15 }
 0x2cc   :  { %15707 = vst [vmem:[#allocation47_spill] sm:$0xff] %v11704_v35  ;;  %v3079_v0 = vadd.f32 %v3078_v3, %v3056_v54  ;;  %3879 = vmatmul.f32.vlgmr.msrb.gmra.mxu2 %v11704_v35  ;;  %v11712_v10 = vand.u32 4294901760, %v11704_v35  ;;  %v15725_v54 = vld [vmem:[#allocation25_spill] sm:$0xff] }
 0x2cd   :  { %4227 = vmatpush.msra.mxu1 %v15709_v18  ;;  %4266 = vmatpush.msrb.mxu2 %v15711_v40  ;;  %v1101_v3 = vadd.f32 %v15725_v54, %v1075_v36  ;;  %v3593_v36 = vld [vmem:[#allocation10 + $0x560] sm:$0xff] }
 0x2ce   :  { %15708 = vst [vmem:[#allocation48_spill] sm:$0xff] %v11712_v10  ;;  %v3400_v19 = vadd.f32 %v3079_v0, %v1965_v16  ;;  %3918 = vmatmul.f32.vlgmr.msrb.gmra.mxu3 %v11712_v10  ;;  %v3722_v59 = vsub.f32 %v11704_v35, %v11712_v10  ;;  %v15727_v0 = vld [vmem:[#allocation38_spill] sm:$0xff]  ;;  %v11805_v54 = vand.u32 4294901760, %v3593_v36 }
 0x2cf   :  { %4229 = vmatpush.msra.mxu1 %v15712_v11  ;;  %4270 = vmatpush.msrb.mxu2 %v15714_v58 }
 0x2d0   :  { %v3414_v55 = vadd.f32 %v3406_v20, %v3400_v19  ;;  %4333 = vmatpush.msrb.mxu3 %v11426_v15  ;;  %v11724_v46 = vand.u32 4294901760, %v3722_v59  ;;  %v15718_v15 = vand.u32 4294901760, %v11480_v56  ;;  %v15728_v20 = vand.u32 4294901760, %v15727_v0  ;;  %v15730_v19 = vld [vmem:[#allocation40_spill] sm:$0xff] }
 0x2d1   :  { %4231 = vmatpush.msra.mxu1 %v11459_v13  ;;  %4274 = vmatpush.msrb.mxu2 %v15716_v33  ;;  %v15731_v59 = vand.u32 4294901760, %v15730_v19 }
 0x2d2   :  { %15715 = vst [vmem:[#allocation33_spill] sm:$0xff] %v11724_v46  ;;  %v3418_v60 = vmax.f32 %v3414_v55, 0.0  ;;  %4335 = vmatpush.msrb.mxu3 %v15709_v18  ;;  %3724 = vmatmul.f32.vlgmr.msra.gmra.mxu0 %v11724_v46  ;;  %v11759_v18 = vand.u32 4294901760, %v3609_v37  ;;  %v3597_v55 = vld [vmem:[#allocation10 + $0x580] sm:$0xff] }
 0x2d3   :  { %4024 = vmatmul.f32.vlgmr.msrb.gmra.mxu1 %v11701_v62  ;;  %4172 = vmatpush.msra.mxu0 %v15710_v47  ;;  %v3605_v47 = vld [vmem:[#allocation10 + $0x5c0] sm:$0xff] }
 0x2d4   :  { %v11733_v57 = vand.u32 4294901760, %v3418_v60  ;;  %4233 = vmatpush.msra.mxu1 %v11476_v7  ;;  %4278 = vmatpush.msrb.mxu2 %v15718_v15  ;;  %v11779_v58 = vsub.f32 %v3609_v37, %v11759_v18  ;;  %v15738_v37 = vand.u32 4294901760, %v11562_v44  ;;  %v3649_v46 = vld [vmem:[#allocation10 + $0x720] sm:$0xff] }
 0x2d5   :  { %4337 = vmatpush.msrb.mxu3 %v15712_v11  ;;  %4175 = vmatpush.msra.mxu0 %v15713_v14  ;;  %v3601_v11 = vld [vmem:[#allocation10 + $0x5a0] sm:$0xff]  ;;  %v15733_v14 = vand.u32 4294901760, %v11538_v8 }
 0x2d6   :  { %15717 = vst [vmem:[#allocation32_spill] sm:$0xff] %v11733_v57  ;;  %v11743_v52 = vsub.f32 %v3418_v60, %v11733_v57  ;;  %4235 = vmatpush.msra.mxu1 %v15722_v42  ;;  %4282 = vmatpush.msrb.mxu2 %v15724_v24  ;;  %v11783_v33 = vand.u32 4294901760, %v3601_v11  ;;  %v15734_v60 = vld [vmem:[#allocation20_spill] sm:$0xff]  ;;  %v15435_v24 = vand.u32 4294901760, %v11779_v58 }
 0x2d7   :  { %4339 = vmatpush.msrb.mxu3 %v11459_v13  ;;  %4178 = vmatpush.msra.mxu0 %v11462_v4  ;;  %v15729_v4 = vld [vmem:[#allocation23_spill] sm:$0xff] }
 0x2d8   :  { %15721 = vst [vmem:[#allocation34_spill] sm:$0xff] %v11743_v52  ;;  %4166 = vmatmul.f32.vlgmr.msra.gmra.mxu3 %v11733_v57  ;;  %4237 = vmatpush.msra.mxu1 %v11501_v27  ;;  %v11754_v16 = vand.u32 4294901760, %v11743_v52  ;;  %v1126_v40 = vadd.f32 %v15729_v4, %v1101_v3  ;;  %v3589_v3 = vld [vmem:[#allocation10 + $0x540] sm:$0xff] }
 0x2d9   :  { %4286 = vmatpush.msrb.mxu2 %v15728_v20  ;;  %4341 = vmatpush.msrb.mxu3 %v11476_v7 }
 0x2da   :  { %15726 = vst [vmem:[#allocation35_spill] sm:$0xff] %v11754_v16  ;;  %4181 = vmatpush.msra.mxu0 %v11480_v56  ;;  %4239 = vmatpush.msra.mxu1 %v11519_v34  ;;  %v4063_v13 = vsub.f32 %v11743_v52, %v11754_v16  ;;  %v11773_v56 = vand.u32 4294901760, %v3605_v47  ;;  %v1153_v15 = vadd.f32 %v15734_v60, %v1126_v40  ;;  %v15741_v40 = vld [vmem:[#allocation39_spill] sm:$0xff] }
 0x2db   :  { %4290 = vmatpush.msrb.mxu2 %v15731_v59  ;;  %4343 = vmatpush.msrb.mxu3 %v15722_v42  ;;  %v3136_v59 = vpop.f32.mrf.mxu1 }
 0x2dc   :  { %3987 = vmatmul.f32.vlgmr.msrb.gmra.mxu0 %v11701_v62  ;;  %4241 = vmatpush.msra.mxu1 %v11534_v17  ;;  %v11771_v7 = vand.u32 4294901760, %v4063_v13  ;;  %v11792_v42 = vsub.f32 %v3605_v47, %v11773_v56  ;;  %v3585_v47 = vld [vmem:[#allocation10 + $0x520] sm:$0xff]  ;;  %v15740_v13 = vand.u32 4294901760, %v11580_v23 }
 0x2dd   :  { %4184 = vmatpush.msra.mxu0 %v15723_v1  ;;  %4294 = vmatpush.msrb.mxu2 %v15733_v14  ;;  %v15737_v1 = vld [vmem:[#allocation43_spill] sm:$0xff]  ;;  %v11832_v60 = vand.u32 4294901760, %v3585_v47 }
 0x2de   :  { %15732 = vst [vmem:[#allocation22_spill] sm:$0xff] %v11771_v7  ;;  %4345 = vmatpush.msrb.mxu3 %v11501_v27  ;;  %4243 = vmatpush.msra.mxu1 %v11546_v28  ;;  %v11794_v27 = vand.u32 4294901760, %v3597_v55  ;;  %v3581_v14 = vld [vmem:[#allocation10 + $0x500] sm:$0xff] }
 0x2df   :  { %4187 = vmatpush.msra.mxu0 %v15727_v0  ;;  %4298 = vmatpush.msrb.mxu2 %v15736_v63  ;;  %v15739_v0 = vld [vmem:[#allocation24_spill] sm:$0xff] }
 0x2e0   :  { %4347 = vmatpush.msrb.mxu3 %v11519_v34  ;;  %4065 = vmatmul.f32.vlgmr.msra.gmra.mxu2 %v11771_v7  ;;  %v11803_v34 = vsub.f32 %v3601_v11, %v11783_v33  ;;  %v1176_v20 = vadd.f32 %v15739_v0, %v1153_v15  ;;  %v11815_v4 = vsub.f32 %v3597_v55, %v11794_v27  ;;  %v11823_v11 = vand.u32 4294901760, %v3589_v3  ;;  %v3105_v15 = vpop.f32.mrf.mxu0  ;;  %v3577_v0 = vld [vmem:[#allocation10 + $0x4e0] sm:$0xff] }
 0x2e1   :  { %4190 = vmatpush.msra.mxu0 %v15730_v19  ;;  %4245 = vmatpush.msra.mxu1 %v15737_v1  ;;  %v11830_v55 = vsub.f32 %v3593_v36, %v11805_v54  ;;  %v3137_v63 = vadd.f32 %v3136_v59, %v3105_v15  ;;  %v3573_v15 = vld [vmem:[#allocation10 + $0x4c0] sm:$0xff] }
 0x2e2   :  { %4302 = vmatpush.msrb.mxu2 %v15738_v37  ;;  %4349 = vmatpush.msrb.mxu3 %v11534_v17  ;;  %v15434_v17 = vand.u32 4294901760, %v11792_v42  ;;  %v2004_v19 = vadd.f32 %v15741_v40, %v1176_v20  ;;  %v15742_v37 = vand.u32 4294901760, %v11609_v30  ;;  %v15430_v36 = vand.u32 4294901760, %v11815_v4  ;;  %v15743_v20 = vld [vmem:[#allocation41_spill] sm:$0xff]  ;;  %v3653_v7 = vld [vmem:[#allocation10 + $0x740] sm:$0xff] }
 0x2e3   :  { %4193 = vmatpush.msra.mxu0 %v11538_v8  ;;  %4247 = vmatpush.msra.mxu1 %v11577_v31  ;;  %v4413_v8 = vsub.f32 %v11779_v58, %v15435_v24  ;;  %v11849_v40 = vsub.f32 %v3589_v3, %v11823_v11  ;;  %v11863_v3 = vand.u32 4294901760, %v3577_v0  ;;  %v3407_v24 = vperm.slane %v11693_v38, 2 }
 0x2e4   :  { %4306 = vmatpush.msrb.mxu2 %v15740_v13  ;;  %4351 = vmatpush.msrb.mxu3 %v11546_v28  ;;  %v15431_v28 = vand.u32 4294901760, %v11803_v34  ;;  %v2095_v13 = vadd.f32 %v15743_v20, %v2004_v19  ;;  %v15427_v19 = vand.u32 4294901760, %v11830_v55 }
 0x2e5   :  { %4196 = vmatpush.msra.mxu0 %v15735_v48  ;;  %4249 = vmatpush.msra.mxu1 %v11592_v6  ;;  %v3162_v48 = vpop.f32.mrf.mxu2 }
 0x2e6   :  { %4310 = vmatpush.msrb.mxu2 %v4137_v22  ;;  %4353 = vmatpush.msrb.mxu3 %v15737_v1  ;;  %v4419_v22 = vsub.f32 %v11792_v42, %v15434_v17  ;;  %v11843_v1 = vand.u32 4294901760, %v3581_v14  ;;  %v4425_v59 = vsub.f32 %v11803_v34, %v15431_v28 }
 0x2e7   :  { %4199 = vmatpush.msra.mxu0 %v11562_v44  ;;  %4251 = vmatpush.msra.mxu1 %v11606_v61  ;;  %v4414_v44 = vand.u32 4294901760, %v4413_v8 }
 0x2e8   :  { %4314 = vmatpush.msrb.mxu2 %v15742_v37  ;;  %4355 = vmatpush.msrb.mxu3 %v11577_v31  ;;  %v3163_v31 = vadd.f32 %v3162_v48, %v3137_v63  ;;  %v11873_v8 = vsub.f32 %v3581_v14, %v11843_v1  ;;  %v3187_v48 = vpop.f32.mrf.mxu3  ;;  %v11878_v63 = vand.u32 4294901760, %v3573_v15  ;;  %v4437_v14 = vsub.f32 %v11830_v55, %v15427_v19  ;;  %v3561_v19 = vld [vmem:[#allocation10 + $0x460] sm:$0xff] }
 0x2e9   :  { %4202 = vmatpush.msra.mxu0 %v11580_v23  ;;  %4253 = vmatpush.msra.mxu1 %v11621_v29  ;;  %v11859_v23 = vsub.f32 %v3585_v47, %v11832_v60  ;;  %v4431_v47 = vsub.f32 %v11815_v4, %v15430_v36  ;;  %v3237_v36 = vpop.f32.mrf.mxu1 }
 0x2ea   :  { %4318 = vmatpush.msrb.mxu2 %v4149_v51  ;;  %4357 = vmatpush.msrb.mxu3 %v11592_v6  ;;  %v2145_v51 = vadd.f32 %v11617_v12, %v2095_v13  ;;  %v4420_v6 = vand.u32 4294901760, %v4419_v22  ;;  %v15429_v12 = vand.u32 4294901760, %v11849_v40  ;;  %v3565_v22 = vld [vmem:[#allocation10 + $0x480] sm:$0xff]  ;;  %v15744_v13 = vld [vmem:[#allocation29_spill] sm:$0xff] }
 0x2eb   :  { %4205 = vmatpush.msra.mxu0 %v11598_v50  ;;  %4255 = vmatpush.msra.mxu1 %v11641_v53  ;;  %v3569_v50 = vld [vmem:[#allocation10 + $0x4a0] sm:$0xff]  ;;  %v15428_v37 = vand.u32 4294901760, %v11859_v23 }
 0x2ec   :  { %4322 = vmatpush.msrb.mxu2 %v4155_v26  ;;  %4359 = vmatpush.msrb.mxu3 %v11606_v61  ;;  %v3188_v26 = vadd.f32 %v3187_v48, %v3163_v31  ;;  %v4426_v61 = vand.u32 4294901760, %v4425_v59  ;;  %v11891_v20 = vand.u32 4294901760, %v3569_v50  ;;  %v2182_v31 = vadd.f32 %v11585_v45, %v2145_v51 }
 0x2ed   :  { %4259 = vmatmul.f32.vlgmr.msra.gmra.mxu1 %v11754_v16  ;;  %4208 = vmatpush.msra.mxu0 %v11609_v30  ;;  %v11889_v30 = vsub.f32 %v3577_v0, %v11863_v3  ;;  %v4432_v59 = vand.u32 4294901760, %v4431_v47  ;;  %v15432_v48 = vand.u32 4294901760, %v11873_v8  ;;  %v4443_v0 = vsub.f32 %v11849_v40, %v15429_v12  ;;  %v3557_v47 = vld [vmem:[#allocation10 + $0x440] sm:$0xff] }
 0x2ee   :  { %4415 = vmatpush.msrb.mxu1 %v4414_v44  ;;  %4326 = vmatpush.msrb.mxu2 %v4161_v25  ;;  %v15745_v44 = vld [vmem:[#allocation27_spill] sm:$0xff]  ;;  %v11906_v45 = vand.u32 4294901760, %v3565_v22 }
 0x2ef   :  { %4361 = vmatpush.msrb.mxu3 %v11621_v29  ;;  %4328 = vmatmul.f32.vlgmr.msrb.gmra.mxu2 %v11733_v57  ;;  %v1234_v25 = vadd.f32 %v15745_v44, %v15744_v13  ;;  %v3214_v29 = vpop.f32.mrf.mxu0  ;;  %v11904_v13 = vsub.f32 %v3573_v15, %v11878_v63  ;;  %v11916_v15 = vsub.f32 %v3569_v50, %v11891_v20  ;;  %v11918_v44 = vand.u32 4294901760, %v3561_v19  ;;  %v3553_v12 = vld [vmem:[#allocation10 + $0x420] sm:$0xff] }
 0x2f0   :  { %4421 = vmatpush.msrb.mxu1 %v4420_v6  ;;  %4513 = vmatpush.msra.mxu2 %v11779_v58  ;;  %v3215_v51 = vadd.f32 %v3214_v29, %v3188_v26  ;;  %v4438_v6 = vand.u32 4294901760, %v4437_v14  ;;  %v15746_v26 = vld [vmem:[#allocation26_spill] sm:$0xff]  ;;  %v4444_v50 = vand.u32 4294901760, %v4443_v0 }
 0x2f1   :  { %4211 = vmatpush.msra.mxu0 %v11624_v2  ;;  %4363 = vmatpush.msrb.mxu3 %v11641_v53  ;;  %v4449_v2 = vsub.f32 %v11859_v23, %v15428_v37  ;;  %v15433_v53 = vand.u32 4294901760, %v11889_v30  ;;  %v1260_v29 = vadd.f32 %v15746_v26, %v1234_v25  ;;  %v4455_v37 = vsub.f32 %v11873_v8, %v15432_v48  ;;  %v3549_v26 = vld [vmem:[#allocation10 + $0x400] sm:$0xff] }
 0x2f2   :  { %4365 = vmatmul.f32.vlgmr.msrb.gmra.mxu3 %v11733_v57  ;;  %4427 = vmatpush.msrb.mxu1 %v4426_v61  ;;  %v15747_v61 = vld [vmem:[#allocation44_spill] sm:$0xff]  ;;  %v15436_v28 = vand.u32 4294901760, %v11904_v13  ;;  %v11930_v25 = vsub.f32 %v3565_v22, %v11906_v45  ;;  %v11942_v22 = vsub.f32 %v3561_v19, %v11918_v44  ;;  %v11944_v48 = vand.u32 4294901760, %v3553_v12 }
 0x2f3   :  { %4516 = vmatpush.msra.mxu2 %v11792_v42  ;;  %4566 = vmatpush.msra.mxu3 %v11759_v18  ;;  %v2245_v14 = vadd.f32 %v15747_v61, %v2182_v31  ;;  %v11932_v31 = vand.u32 4294901760, %v3557_v47  ;;  %v4461_v0 = vsub.f32 %v11889_v30, %v15433_v53  ;;  %v15437_v61 = vand.u32 4294901760, %v11916_v15 }
 0x2f4   :  { %4214 = vmatpush.msra.mxu0 %v11644_v9  ;;  %4433 = vmatpush.msrb.mxu1 %v4432_v59  ;;  %v3238_v9 = vadd.f32 %v3237_v36, %v3215_v51  ;;  %v4450_v59 = vand.u32 4294901760, %v4449_v2  ;;  %v15748_v36 = vld [vmem:[#allocation28_spill] sm:$0xff]  ;;  %v15749_v51 = vld [vmem:[#allocation45_spill] sm:$0xff]  ;;  %v4456_v2 = vand.u32 4294901760, %v4455_v37  ;;  %v4467_v53 = vsub.f32 %v11904_v13, %v15436_v28 }
 0x2f5   :  { %4519 = vmatpush.msra.mxu2 %v11803_v34  ;;  %4568 = vmatpush.msra.mxu3 %v11773_v56  ;;  %v15438_v19 = vand.u32 4294901760, %v11930_v25  ;;  %v11956_v17 = vsub.f32 %v3557_v47, %v11932_v31  ;;  %v4462_v37 = vand.u32 4294901760, %v4461_v0  ;;  %v4473_v47 = vsub.f32 %v11916_v15, %v15437_v61  ;;  %v3264_v61 = vpop.f32.mrf.mxu2 }
 0x2f6   :  { %4217 = vmatpush.msra.mxu0 %v11659_v49  ;;  %4439 = vmatpush.msrb.mxu1 %v4438_v6  ;;  %v1285_v49 = vadd.f32 %v15748_v36, %v1260_v29  ;;  %v2280_v6 = vadd.f32 %v15749_v51, %v2245_v14  ;;  %v11958_v29 = vand.u32 4294901760, %v3549_v26  ;;  %v15750_v14 = vld [vmem:[#allocation31_spill] sm:$0xff]  ;;  %v11970_v28 = vsub.f32 %v3553_v12, %v11944_v48 }
 0x2f7   :  { %4220 = vmatmul.f32.vlgmr.msra.gmra.mxu0 %v11743_v52  ;;  %4522 = vmatpush.msra.mxu2 %v11815_v4  ;;  %v15440_v0 = vand.u32 4294901760, %v11956_v17 }
 0x2f8   :  { %4370 = vmatpush.msrb.mxu0 %v11759_v18  ;;  %4570 = vmatpush.msra.mxu3 %v11783_v33  ;;  %v1312_v36 = vadd.f32 %v15750_v14, %v1285_v49  ;;  %v3401_v51 = vadd.f32 %v3238_v9, %v2280_v6  ;;  %15751 = vst [vmem:[#allocation21_spill] sm:$0xff] %v11970_v28  ;;  %v4468_v9 = vand.u32 4294901760, %v4467_v53  ;;  %v15753_v6 = vld [vmem:[#allocation30_spill] sm:$0xff]  ;;  %v3673_v14 = vld [vmem:[#allocation10 + $0x7e0] sm:$0xff]  ;;  %v4474_v53 = vand.u32 4294901760, %v4473_v47 }
 0x2f9   :  { %4445 = vmatpush.msrb.mxu1 %v4444_v50  ;;  %4525 = vmatpush.msra.mxu2 %v11830_v55  ;;  %v15439_v50 = vand.u32 4294901760, %v11942_v22  ;;  %v11980_v49 = vsub.f32 %v3549_v26, %v11958_v29  ;;  %v3665_v47 = vld [vmem:[#allocation10 + $0x7a0] sm:$0xff] }
 0x2fa   :  { %4372 = vmatpush.msrb.mxu0 %v11773_v56  ;;  %4572 = vmatpush.msra.mxu3 %v11794_v27  ;;  %v1335_v12 = vadd.f32 %v15753_v6, %v1312_v36  ;;  %v3669_v6 = vld [vmem:[#allocation10 + $0x7c0] sm:$0xff] }
 0x2fb   :  { %4451 = vmatpush.msrb.mxu1 %v4450_v59  ;;  %4528 = vmatpush.msra.mxu2 %v11849_v40  ;;  %v4479_v59 = vsub.f32 %v11930_v25, %v15438_v19  ;;  %15752 = vst [vmem:[#allocation36_spill] sm:$0xff] %v11980_v49  ;;  %v4485_v19 = vsub.f32 %v11942_v22, %v15439_v50  ;;  %v12000_v50 = vand.u32 4294901760, %v3673_v14 }
 0x2fc   :  { %4374 = vmatpush.msrb.mxu0 %v11783_v33  ;;  %4574 = vmatpush.msra.mxu3 %v11805_v54  ;;  %v2319_v36 = vadd.f32 %v11670_v32, %v1335_v12 }
 0x2fd   :  { %4457 = vmatpush.msrb.mxu1 %v4456_v2  ;;  %4531 = vmatpush.msra.mxu2 %v11859_v23  ;;  %v11985_v2 = vadd.f32 %v3407_v24, %v3401_v51  ;;  %v3295_v24 = vpop.f32.mrf.mxu3  ;;  %v4480_v51 = vand.u32 4294901760, %v4479_v59  ;;  %v15754_v59 = vand.u32 4294901760, %v11970_v28 }
 0x2fe   :  { %4376 = vmatpush.msrb.mxu0 %v11794_v27  ;;  %4576 = vmatpush.msra.mxu3 %v11823_v11  ;;  %v3296_v26 = vadd.f32 %v3295_v24, %v3264_v61  ;;  %v2410_v52 = vadd.f32 %v11648_v41, %v2319_v36  ;;  %v3661_v24 = vld [vmem:[#allocation10 + $0x780] sm:$0xff]  ;;  %v12023_v41 = vand.u32 4294901760, %v3665_v47 }
 0x2ff   :  { %4463 = vmatpush.msrb.mxu1 %v4462_v37  ;;  %4534 = vmatpush.msra.mxu2 %v11873_v8  ;;  %v4491_v37 = vsub.f32 %v11956_v17, %v15440_v0  ;;  %v3419_v32 = vmax.f32 %v11985_v2, 0.0  ;;  %v4497_v12 = vsub.f32 %v11970_v28, %v15754_v59  ;;  %v12009_v0 = vand.u32 4294901760, %v3669_v6  ;;  %v3321_v59 = vpop.f32.mrf.mxu0  ;;  %v3657_v36 = vld [vmem:[#allocation10 + $0x760] sm:$0xff] }
 0x300   :  { %4378 = vmatpush.msrb.mxu0 %v11805_v54  ;;  %4578 = vmatpush.msra.mxu3 %v11832_v60  ;;  %v15755_v2 = vand.u32 4294901760, %v11980_v49  ;;  %v3322_v16 = vadd.f32 %v3321_v59, %v3296_v26  ;;  %v12034_v57 = vand.u32 4294901760, %v3661_v24  ;;  %v12038_v59 = vand.u32 4294901760, %v3657_v36 }
 0x301   :  { %4469 = vmatpush.msrb.mxu1 %v4468_v9  ;;  %4537 = vmatpush.msra.mxu2 %v11889_v30  ;;  %v4486_v9 = vand.u32 4294901760, %v4485_v19  ;;  %v4492_v61 = vand.u32 4294901760, %v4491_v37  ;;  %v4498_v37 = vand.u32 4294901760, %v4497_v12  ;;  %v3346_v12 = vpop.f32.mrf.mxu1 }
 0x302   :  { %4380 = vmatpush.msrb.mxu0 %v11823_v11  ;;  %4580 = vmatpush.msra.mxu3 %v11843_v1  ;;  %v4503_v19 = vsub.f32 %v11980_v49, %v15755_v2  ;;  %v12029_v2 = vsub.f32 %v3669_v6, %v12009_v0  ;;  %v3373_v6 = vpop.f32.mrf.mxu2 }
 0x303   :  { %4475 = vmatpush.msrb.mxu1 %v4474_v53  ;;  %4540 = vmatpush.msra.mxu2 %v11904_v13  ;;  %v12019_v53 = vsub.f32 %v3673_v14, %v12000_v50  ;;  %v2460_v14 = vadd.f32 %v11646_v5, %v2410_v52  ;;  %v12043_v5 = vsub.f32 %v3665_v47, %v12023_v41 }
 0x304   :  { %4382 = vmatpush.msrb.mxu0 %v11832_v60  ;;  %4582 = vmatpush.msra.mxu3 %v11863_v3  ;;  %v4504_v26 = vand.u32 4294901760, %v4503_v19  ;;  %v12056_v47 = vsub.f32 %v3661_v24, %v12034_v57  ;;  %v3645_v19 = vld [vmem:[#allocation10 + $0x700] sm:$0xff]  ;;  %v12068_v24 = vand.u32 4294901760, %v3649_v46 }
 0x305   :  { %4481 = vmatpush.msrb.mxu1 %v4480_v51  ;;  %4543 = vmatpush.msra.mxu2 %v11916_v15  ;;  %v12025_v51 = vand.u32 4294901760, %v3419_v32  ;;  %15757 = vst [vmem:[#allocation25_spill] sm:$0xff] %v12043_v5  ;;  %v2497_v10 = vadd.f32 %v11668_v43, %v2460_v14  ;;  %v3396_v43 = vpop.f32.mrf.mxu3 }
 0x306   :  { %4384 = vmatpush.msrb.mxu0 %v11843_v1  ;;  %4584 = vmatpush.msra.mxu3 %v11878_v63 }
 0x307   :  { %15756 = vst [vmem:[#allocation37_spill] sm:$0xff] %v12025_v51  ;;  %4487 = vmatpush.msrb.mxu1 %v4486_v9  ;;  %4546 = vmatpush.msra.mxu2 %v11930_v25  ;;  %v12046_v52 = vsub.f32 %v3419_v32, %v12025_v51  ;;  %v12050_v9 = vand.u32 4294901760, %v3653_v7  ;;  %v2560_v14 = vadd.f32 %v11683_v21, %v2497_v10  ;;  %v12085_v10 = vand.u32 4294901760, %v3645_v19 }
 0x308   :  { %4386 = vmatpush.msrb.mxu0 %v11863_v3  ;;  %4586 = vmatpush.msra.mxu3 %v11891_v20  ;;  %v12096_v21 = vsub.f32 %v3649_v46, %v12068_v24  ;;  %v15764_v46 = vand.u32 4294901760, %v12056_v47 }
 0x309   :  { %4493 = vmatpush.msrb.mxu1 %v4492_v61  ;;  %4549 = vmatpush.msra.mxu2 %v11942_v22  ;;  %15758 = vst [vmem:[#allocation38_spill] sm:$0xff] %v12046_v52  ;;  %v3347_v61 = vadd.f32 %v3346_v12, %v3322_v16  ;;  %v15759_v16 = vand.u32 4294901760, %v12019_v53  ;;  %v12063_v12 = vsub.f32 %v3657_v36, %v12038_v59  ;;  %v15761_v36 = vand.u32 4294901760, %v12029_v2 }
 0x30a   :  { %4388 = vmatpush.msrb.mxu0 %v11878_v63  ;;  %4588 = vmatpush.msra.mxu3 %v11906_v45 }
 0x30b   :  { %4499 = vmatpush.msrb.mxu1 %v4498_v37  ;;  %4552 = vmatpush.msra.mxu2 %v11956_v17  ;;  %v3374_v32 = vadd.f32 %v3373_v6, %v3347_v61  ;;  %v4754_v37 = vsub.f32 %v12019_v53, %v15759_v16  ;;  %v4760_v6 = vsub.f32 %v12029_v2, %v15761_v36  ;;  %v3641_v16 = vld [vmem:[#allocation10 + $0x6e0] sm:$0xff]  ;;  %v15765_v36 = vand.u32 4294901760, %v12063_v12 }
 0x30c   :  { %4390 = vmatpush.msrb.mxu0 %v11891_v20  ;;  %4590 = vmatpush.msra.mxu3 %v11918_v44  ;;  %v12080_v61 = vsub.f32 %v3653_v7, %v12050_v9  ;;  %v3637_v7 = vld [vmem:[#allocation10 + $0x6c0] sm:$0xff] }
 0x30d   :  { %4505 = vmatpush.msrb.mxu1 %v4504_v26  ;;  %4555 = vmatpush.msra.mxu2 %v11970_v28  ;;  %v12074_v26 = vand.u32 4294901760, %v12046_v52  ;;  %v3397_v35 = vadd.f32 %v3396_v43, %v3374_v32  ;;  %v4755_v62 = vand.u32 4294901760, %v4754_v37  ;;  %v12098_v32 = vand.u32 4294901760, %v3641_v16  ;;  %v3633_v28 = vld [vmem:[#allocation10 + $0x6a0] sm:$0xff] }
 0x30e   :  { %4392 = vmatpush.msrb.mxu0 %v11906_v45  ;;  %4592 = vmatpush.msra.mxu3 %v11932_v31  ;;  %15762 = vst [vmem:[#allocation40_spill] sm:$0xff] %v12080_v61  ;;  %v2595_v43 = vadd.f32 %v11679_v39, %v2560_v14  ;;  %v4761_v37 = vand.u32 4294901760, %v4760_v6  ;;  %v12112_v39 = vsub.f32 %v3645_v19, %v12085_v10  ;;  %v12114_v14 = vand.u32 4294901760, %v3637_v7 }
 0x30f   :  { %4507 = vmatmul.f32.vlgmr.msrb.gmra.mxu1 %v12025_v51  ;;  %4558 = vmatpush.msra.mxu2 %v11980_v49  ;;  %15760 = vst [vmem:[#allocation23_spill] sm:$0xff] %v12074_v26 }
 0x310   :  { %4674 = vmatpush.msra.mxu1 %v11759_v18  ;;  %4394 = vmatpush.msrb.mxu0 %v11918_v44  ;;  %v15763_v18 = vand.u32 4294901760, %v12043_v5  ;;  %v3402_v6 = vadd.f32 %v3397_v35, %v2595_v43  ;;  %v12127_v35 = vand.u32 4294901760, %v3633_v28  ;;  %v3625_v43 = vld [vmem:[#allocation10 + $0x660] sm:$0xff] }
 0x311   :  { %4594 = vmatpush.msra.mxu3 %v11944_v48  ;;  %4561 = vmatmul.f32.vlgmr.msra.gmra.mxu2 %v12046_v52 }
 0x312   :  { %4676 = vmatpush.msra.mxu1 %v11773_v56  ;;  %4711 = vmatpush.msrb.mxu2 %v12000_v50  ;;  %v4766_v49 = vsub.f32 %v12043_v5, %v15763_v18  ;;  %v4404_v56 = vsub.f32 %v12046_v52, %v12074_v26  ;;  %v4772_v18 = vsub.f32 %v12056_v47, %v15764_v46  ;;  %v3408_v5 = vperm.slane %v11693_v38, 3 }
 0x313   :  { %4396 = vmatpush.msrb.mxu0 %v11932_v31  ;;  %4596 = vmatpush.msra.mxu3 %v11958_v29  ;;  %v12125_v52 = vsub.f32 %v3641_v16, %v12098_v32  ;;  %v12139_v16 = vsub.f32 %v3637_v7, %v12114_v14  ;;  %v3617_v7 = vld [vmem:[#allocation10 + $0x620] sm:$0xff] }
 0x314   :  { %4600 = vmatmul.f32.vlgmr.msra.gmra.mxu3 %v12074_v26  ;;  %4678 = vmatpush.msra.mxu1 %v11783_v33  ;;  %v4778_v26 = vsub.f32 %v12063_v12, %v15765_v36  ;;  %v3629_v33 = vld [vmem:[#allocation10 + $0x680] sm:$0xff]  ;;  %v4767_v46 = vand.u32 4294901760, %v4766_v49  ;;  %v12130_v38 = vand.u32 4294901760, %v4404_v56  ;;  %v12152_v49 = vsub.f32 %v3633_v28, %v12127_v35 }
 0x315   :  { %4713 = vmatpush.msrb.mxu2 %v12009_v0  ;;  %4756 = vmatpush.msrb.mxu3 %v4755_v62  ;;  %v15767_v62 = vand.u32 4294901760, %v12080_v61  ;;  %v12141_v19 = vand.u32 4294901760, %v3629_v33 }
 0x316   :  { %4398 = vmatpush.msrb.mxu0 %v11944_v48  ;;  %4680 = vmatpush.msra.mxu1 %v11794_v27  ;;  %15766 = vst [vmem:[#allocation20_spill] sm:$0xff] %v12130_v38  ;;  %v4773_v27 = vand.u32 4294901760, %v4772_v18  ;;  %v4779_v56 = vand.u32 4294901760, %v4778_v26 }
 0x317   :  { %4715 = vmatpush.msrb.mxu2 %v12023_v41  ;;  %4762 = vmatpush.msrb.mxu3 %v4761_v37  ;;  %v4784_v36 = vsub.f32 %v12080_v61, %v15767_v62  ;;  %v3416_v37 = vadd.f32 %v3408_v5, %v3402_v6  ;;  %v3621_v62 = vld [vmem:[#allocation10 + $0x640] sm:$0xff]  ;;  %v15768_v61 = vand.u32 4294901760, %v11779_v58  ;;  %v12154_v5 = vand.u32 4294901760, %v3625_v43 }
 0x318   :  { %4400 = vmatpush.msrb.mxu0 %v11958_v29  ;;  %4682 = vmatpush.msra.mxu1 %v11805_v54  ;;  %v15769_v54 = vand.u32 4294901760, %v12096_v21  ;;  %v15770_v58 = vand.u32 4294901760, %v11792_v42  ;;  %v12165_v28 = vsub.f32 %v3629_v33, %v12141_v19  ;;  %v15772_v42 = vand.u32 4294901760, %v11803_v34 }
 0x319   :  { %4406 = vmatmul.f32.vlgmr.msrb.gmra.mxu0 %v12130_v38  ;;  %4717 = vmatpush.msrb.mxu2 %v12034_v57  ;;  %v4785_v26 = vand.u32 4294901760, %v4784_v36  ;;  %v4813_v33 = vand.u32 4294901760, %v12152_v49  ;;  %v15774_v34 = vand.u32 4294901760, %v11815_v4  ;;  %v15777_v4 = vand.u32 4294901760, %v11830_v55  ;;  %v3498_v38 = vld [vmem:[#allocation10 + $0x268] sm:$0xff] }
 0x31a   :  { %4607 = vmatpush.msra.mxu0 %v15768_v61  ;;  %4768 = vmatpush.msrb.mxu3 %v4767_v46  ;;  %v4790_v18 = vsub.f32 %v12096_v21, %v15769_v54  ;;  %v15771_v61 = vand.u32 4294901760, %v12112_v39  ;;  %v12167_v54 = vand.u32 4294901760, %v3621_v62  ;;  %v3613_v46 = vld [vmem:[#allocation10 + $0x600] sm:$0xff] }
 0x31b   :  { %4684 = vmatpush.msra.mxu1 %v11823_v11  ;;  %4719 = vmatpush.msrb.mxu2 %v12038_v59  ;;  %v3420_v11 = vmax.f32 %v3416_v37, 0.0 }
 0x31c   :  { %4611 = vmatpush.msra.mxu0 %v15770_v58  ;;  %4774 = vmatpush.msrb.mxu3 %v4773_v27  ;;  %v4796_v6 = vsub.f32 %v12112_v39, %v15771_v61  ;;  %v4791_v36 = vand.u32 4294901760, %v4790_v18  ;;  %v15773_v27 = vand.u32 4294901760, %v12125_v52  ;;  %v12178_v61 = vsub.f32 %v3625_v43, %v12154_v5 }
 0x31d   :  { %4686 = vmatpush.msra.mxu1 %v11832_v60  ;;  %4721 = vmatpush.msrb.mxu2 %v12050_v9  ;;  %v12182_v60 = vand.u32 4294901760, %v3617_v7  ;;  %v12191_v43 = vsub.f32 %v3621_v62, %v12167_v54 }
 0x31e   :  { %4615 = vmatpush.msra.mxu0 %v15772_v42  ;;  %4780 = vmatpush.msrb.mxu3 %v4779_v56  ;;  %v4802_v58 = vsub.f32 %v12125_v52, %v15773_v27  ;;  %v4797_v37 = vand.u32 4294901760, %v4796_v6  ;;  %v15775_v56 = vand.u32 4294901760, %v12139_v16  ;;  %v4819_v42 = vand.u32 4294901760, %v12165_v28 }
 0x31f   :  { %4688 = vmatpush.msra.mxu1 %v11843_v1  ;;  %4723 = vmatpush.msrb.mxu2 %v12068_v24  ;;  %v12193_v27 = vand.u32 4294901760, %v3420_v11  ;;  %v12197_v1 = vand.u32 4294901760, %v3613_v46  ;;  %v4814_v6 = vsub.f32 %v12152_v49, %v4813_v33  ;;  %v4825_v62 = vand.u32 4294901760, %v12178_v61 }
 0x320   :  { %4619 = vmatpush.msra.mxu0 %v15774_v34  ;;  %4786 = vmatpush.msrb.mxu3 %v4785_v26  ;;  %v4808_v18 = vsub.f32 %v12139_v16, %v15775_v56  ;;  %v4803_v26 = vand.u32 4294901760, %v4802_v58  ;;  %v15778_v34 = vand.u32 4294901760, %v11849_v40  ;;  %v4831_v58 = vand.u32 4294901760, %v12191_v43 }
 0x321   :  { %15776 = vst [vmem:[#allocation42_spill] sm:$0xff] %v12193_v27  ;;  %4690 = vmatpush.msra.mxu1 %v11863_v3  ;;  %4725 = vmatpush.msrb.mxu2 %v12085_v10  ;;  %v12208_v3 = vsub.f32 %v3617_v7, %v12182_v60  ;;  %v12217_v56 = vsub.f32 %v3420_v11, %v12193_v27  ;;  %v15780_v40 = vand.u32 4294901760, %v11859_v23  ;;  %v4815_v7 = vand.u32 4294901760, %v4814_v6 }
 0x322   :  { %4623 = vmatpush.msra.mxu0 %v15777_v4  ;;  %4792 = vmatpush.msrb.mxu3 %v4791_v36  ;;  %v4809_v55 = vand.u32 4294901760, %v4808_v18  ;;  %v4820_v36 = vsub.f32 %v12165_v28, %v4819_v42  ;;  %v15781_v11 = vand.u32 4294901760, %v11873_v8  ;;  %v4832_v23 = vsub.f32 %v12191_v43, %v4831_v58 }
 0x323   :  { %4692 = vmatpush.msra.mxu1 %v11878_v63  ;;  %4727 = vmatpush.msrb.mxu2 %v12098_v32  ;;  %15779 = vst [vmem:[#allocation43_spill] sm:$0xff] %v12217_v56  ;;  %v12222_v63 = vsub.f32 %v3613_v46, %v12197_v1  ;;  %v12240_v18 = vand.u32 4294901760, %v12217_v56  ;;  %v15783_v4 = vand.u32 4294901760, %v11889_v30 }
 0x324   :  { %4627 = vmatpush.msra.mxu0 %v15778_v34  ;;  %4798 = vmatpush.msrb.mxu3 %v4797_v37  ;;  %v4826_v37 = vsub.f32 %v12178_v61, %v4825_v62  ;;  %v4821_v46 = vand.u32 4294901760, %v4820_v36  ;;  %v4833_v6 = vand.u32 4294901760, %v4832_v23  ;;  %v15785_v34 = vand.u32 4294901760, %v11916_v15 }
 0x325   :  { %4694 = vmatpush.msra.mxu1 %v11891_v20  ;;  %4729 = vmatpush.msrb.mxu2 %v12114_v14  ;;  %v4837_v20 = vand.u32 4294901760, %v12208_v3  ;;  %15782 = vst [vmem:[#allocation24_spill] sm:$0xff] %v12240_v18  ;;  %v4745_v30 = vsub.f32 %v12217_v56, %v12240_v18  ;;  %v15788_v15 = vand.u32 4294901760, %v11942_v22  ;;  %v15792_v22 = vld [vmem:[#allocation21_spill] sm:$0xff]  ;;  %v15798_v23 = vand.u32 4294901760, %v12056_v47 }
 0x326   :  { %4631 = vmatpush.msra.mxu0 %v15780_v40  ;;  %4804 = vmatpush.msrb.mxu3 %v4803_v26  ;;  %v4827_v8 = vand.u32 4294901760, %v4826_v37  ;;  %v15784_v26 = vand.u32 4294901760, %v11904_v13  ;;  %v15791_v40 = vand.u32 4294901760, %v12029_v2  ;;  %v15794_v37 = vld [vmem:[#allocation25_spill] sm:$0xff] }
 0x327   :  { %4696 = vmatpush.msra.mxu1 %v11906_v45  ;;  %4731 = vmatpush.msrb.mxu2 %v12127_v35  ;;  %v4843_v45 = vand.u32 4294901760, %v12222_v63 }
 0x328   :  { %4635 = vmatpush.msra.mxu0 %v15781_v11  ;;  %4810 = vmatpush.msrb.mxu3 %v4809_v55  ;;  %v12267_v55 = vand.u32 4294901760, %v4745_v30  ;;  %v15795_v11 = vand.u32 4294901760, %v15794_v37 }
 0x329   :  { %4698 = vmatpush.msra.mxu1 %v11918_v44  ;;  %4733 = vmatpush.msrb.mxu2 %v12141_v19  ;;  %v4838_v44 = vsub.f32 %v12208_v3, %v4837_v20 }
 0x32a   :  { %4639 = vmatpush.msra.mxu0 %v15783_v4  ;;  %4816 = vmatpush.msrb.mxu3 %v4815_v7  ;;  %15787 = vst [vmem:[#allocation39_spill] sm:$0xff] %v12267_v55  ;;  %v15793_v7 = vand.u32 4294901760, %v15792_v22  ;;  %v15800_v4 = vld [vmem:[#allocation40_spill] sm:$0xff] }
 0x32b   :  { %4700 = vmatpush.msra.mxu1 %v11932_v31  ;;  %4735 = vmatpush.msrb.mxu2 %v12154_v5  ;;  %v4844_v31 = vsub.f32 %v12222_v63, %v4843_v45  ;;  %v4839_v13 = vand.u32 4294901760, %v4838_v44  ;;  %v3478_v44 = vld [vmem:[#allocation10 + $0x1c8] sm:$0xff] }
 0x32c   :  { %4643 = vmatpush.msra.mxu0 %v15784_v26  ;;  %4822 = vmatpush.msrb.mxu3 %v4821_v46  ;;  %v15803_v26 = vand.u32 4294901760, %v12112_v39 }
 0x32d   :  { %4702 = vmatpush.msra.mxu1 %v11944_v48  ;;  %4737 = vmatpush.msrb.mxu2 %v12167_v54  ;;  %v15786_v48 = vand.u32 4294901760, %v11930_v25  ;;  %v4845_v36 = vand.u32 4294901760, %v4844_v31  ;;  %v15789_v25 = vand.u32 4294901760, %v12019_v53 }
 0x32e   :  { %4647 = vmatpush.msra.mxu0 %v15785_v34  ;;  %4828 = vmatpush.msrb.mxu3 %v4827_v8  ;;  %v15801_v8 = vand.u32 4294901760, %v15800_v4 }
 0x32f   :  { %4704 = vmatpush.msra.mxu1 %v11958_v29  ;;  %4739 = vmatpush.msrb.mxu2 %v12182_v60  ;;  %v15790_v29 = vand.u32 4294901760, %v11956_v17  ;;  %v15796_v17 = vld [vmem:[#allocation36_spill] sm:$0xff] }
 0x330   :  { %4651 = vmatpush.msra.mxu0 %v15786_v48  ;;  %4834 = vmatpush.msrb.mxu3 %v4833_v6  ;;  %v15797_v46 = vand.u32 4294901760, %v15796_v17  ;;  %v3462_v48 = vld [vmem:[#allocation10 + $0x148] sm:$0xff] }
 0x331   :  { %4706 = vmatmul.f32.vlgmr.msra.gmra.mxu1 %v12025_v51  ;;  %4741 = vmatpush.msrb.mxu2 %v12197_v1  ;;  %v3442_v17 = vld [vmem:[#allocation10 + $0xa8] sm:$0xff] }
 0x332   :  { %4907 = vmatpush.msrb.mxu1 %v12000_v50  ;;  %4655 = vmatpush.msra.mxu0 %v15788_v15  ;;  %v12359_v15 = vand.u32 4294901760, %v3462_v48 }
 0x333   :  { %4840 = vmatpush.msrb.mxu3 %v4839_v13  ;;  %4747 = vmatmul.f32.vlgmr.msrb.gmra.mxu2 %v12267_v55  ;;  %v3502_v55 = vld [vmem:[#allocation10 + $0x288] sm:$0xff] }
 0x334   :  { %4909 = vmatpush.msrb.mxu1 %v12009_v0  ;;  %4948 = vmatpush.msra.mxu2 %v15789_v25  ;;  %v3454_v25 = vld [vmem:[#allocation10 + $0x108] sm:$0xff] }
 0x335   :  { %4659 = vmatpush.msra.mxu0 %v15790_v29  ;;  %4846 = vmatpush.msrb.mxu3 %v4845_v36  ;;  %v3458_v36 = vld [vmem:[#allocation10 + $0x128] sm:$0xff] }
 0x336   :  { %4848 = vmatmul.f32.vlgmr.msrb.gmra.mxu3 %v12193_v27  ;;  %4911 = vmatpush.msrb.mxu1 %v12023_v41  ;;  %v12370_v29 = vand.u32 4294901760, %v3458_v36 }
 0x337   :  { %4952 = vmatpush.msra.mxu2 %v15791_v40  ;;  %5015 = vmatpush.msra.mxu3 %v12000_v50  ;;  %v15799_v50 = vand.u32 4294901760, %v12063_v12  ;;  %v3450_v40 = vld [vmem:[#allocation10 + $0xe8] sm:$0xff] }
 0x338   :  { %4663 = vmatpush.msra.mxu0 %v15793_v7  ;;  %4913 = vmatpush.msrb.mxu1 %v12034_v57  ;;  %v12396_v7 = vsub.f32 %v3458_v36, %v12370_v29 }
 0x339   :  { %4956 = vmatpush.msra.mxu2 %v15795_v11  ;;  %5017 = vmatpush.msra.mxu3 %v12009_v0  ;;  %v3482_v0 = vld [vmem:[#allocation10 + $0x1e8] sm:$0xff] }
 0x33a   :  { %4667 = vmatpush.msra.mxu0 %v15797_v46  ;;  %4915 = vmatpush.msrb.mxu1 %v12038_v59 }
 0x33b   :  { %4669 = vmatmul.f32.vlgmr.msra.gmra.mxu0 %v12025_v51  ;;  %4960 = vmatpush.msra.mxu2 %v15798_v23  ;;  %v15476_v23 = vand.u32 4294901760, %v12396_v7  ;;  %v15815_v51 = vld [vmem:[#allocation33_spill] sm:$0xff] }
 0x33c   :  { %4854 = vmatpush.msrb.mxu0 %v12019_v53  ;;  %5019 = vmatpush.msra.mxu3 %v12023_v41  ;;  %v12307_v53 = vand.u32 4294901760, %v3482_v0  ;;  %v15802_v41 = vand.u32 4294901760, %v12096_v21 }
 0x33d   :  { %4917 = vmatpush.msrb.mxu1 %v12050_v9  ;;  %4964 = vmatpush.msra.mxu2 %v15799_v50  ;;  %v3438_v50 = vld [vmem:[#allocation10 + $0x88] sm:$0xff] }
 0x33e   :  { %4857 = vmatpush.msrb.mxu0 %v12029_v2  ;;  %5021 = vmatpush.msra.mxu3 %v12034_v57  ;;  %v3474_v2 = vld [vmem:[#allocation10 + $0x1a8] sm:$0xff]  ;;  %v12314_v57 = vand.u32 4294901760, %v3478_v44  ;;  %v12322_v6 = vsub.f32 %v3482_v0, %v12307_v53  ;;  %v12427_v0 = vand.u32 4294901760, %v3442_v17 }
 0x33f   :  { %4919 = vmatpush.msrb.mxu1 %v12068_v24  ;;  %4968 = vmatpush.msra.mxu2 %v15801_v8  ;;  %v12324_v30 = vand.u32 4294901760, %v3474_v2  ;;  %v3434_v8 = vld [vmem:[#allocation10 + $0x68] sm:$0xff] }
 0x340   :  { %4860 = vmatpush.msrb.mxu0 %v15794_v37  ;;  %5023 = vmatpush.msra.mxu3 %v12038_v59  ;;  %v3470_v59 = vld [vmem:[#allocation10 + $0x188] sm:$0xff]  ;;  %v12332_v31 = vsub.f32 %v3478_v44, %v12314_v57  ;;  %v15483_v34 = vand.u32 4294901760, %v12322_v6 }
 0x341   :  { %4921 = vmatpush.msrb.mxu1 %v12085_v10  ;;  %4972 = vmatpush.msra.mxu2 %v15802_v41  ;;  %v12343_v13 = vsub.f32 %v3474_v2, %v12324_v30  ;;  %v3446_v37 = vld [vmem:[#allocation10 + $0xc8] sm:$0xff]  ;;  %v12439_v41 = vand.u32 4294901760, %v3438_v50 }
 0x342   :  { %4863 = vmatpush.msrb.mxu0 %v12056_v47  ;;  %5025 = vmatpush.msra.mxu3 %v12050_v9  ;;  %v15804_v9 = vand.u32 4294901760, %v12125_v52  ;;  %v3466_v47 = vld [vmem:[#allocation10 + $0x168] sm:$0xff]  ;;  %v12415_v46 = vand.u32 4294901760, %v3446_v37 }
 0x343   :  { %4923 = vmatpush.msrb.mxu1 %v12098_v32  ;;  %4976 = vmatpush.msra.mxu2 %v15803_v26  ;;  %v5131_v26 = vsub.f32 %v12396_v7, %v15476_v23  ;;  %v3518_v23 = vld [vmem:[#allocation10 + $0x308] sm:$0xff] }
 0x344   :  { %4866 = vmatpush.msrb.mxu0 %v12063_v12  ;;  %5027 = vmatpush.msra.mxu3 %v12068_v24  ;;  %v12334_v12 = vand.u32 4294901760, %v3470_v59  ;;  %v15805_v24 = vand.u32 4294901760, %v12139_v16  ;;  %v12437_v44 = vsub.f32 %v3446_v37, %v12415_v46 }
 0x345   :  { %4925 = vmatpush.msrb.mxu1 %v12114_v14  ;;  %4980 = vmatpush.msra.mxu2 %v15804_v9  ;;  %v12451_v9 = vand.u32 4294901760, %v3434_v8 }
 0x346   :  { %4869 = vmatpush.msrb.mxu0 %v15800_v4  ;;  %5029 = vmatpush.msra.mxu3 %v12085_v10  ;;  %v12345_v10 = vand.u32 4294901760, %v3466_v47  ;;  %v15473_v36 = vand.u32 4294901760, %v12437_v44 }
 0x347   :  { %4927 = vmatpush.msrb.mxu1 %v12127_v35  ;;  %4984 = vmatpush.msra.mxu2 %v15805_v24  ;;  %v3426_v24 = vld [vmem:[#allocation10 + $0x28] sm:$0xff] }
 0x348   :  { %4872 = vmatpush.msrb.mxu0 %v12096_v21  ;;  %5031 = vmatpush.msra.mxu3 %v12098_v32  ;;  %v15482_v21 = vand.u32 4294901760, %v12332_v31  ;;  %v12354_v32 = vsub.f32 %v3470_v59, %v12334_v12  ;;  %v12449_v59 = vsub.f32 %v3442_v17, %v12427_v0  ;;  %v12475_v37 = vand.u32 4294901760, %v3426_v24 }
 0x349   :  { %4929 = vmatpush.msrb.mxu1 %v12141_v19  ;;  %4988 = vmatpush.msra.mxu2 %v4813_v33  ;;  %v12368_v33 = vsub.f32 %v3466_v47, %v12345_v10 }
 0x34a   :  { %4875 = vmatpush.msrb.mxu0 %v12112_v39  ;;  %5033 = vmatpush.msra.mxu3 %v12114_v14  ;;  %v5095_v39 = vsub.f32 %v12322_v6, %v15483_v34  ;;  %v15481_v14 = vand.u32 4294901760, %v12343_v13 }
 0x34b   :  { %4931 = vmatpush.msrb.mxu1 %v12154_v5  ;;  %4992 = vmatpush.msra.mxu2 %v4819_v42  ;;  %v12381_v42 = vand.u32 4294901760, %v3454_v25  ;;  %v15478_v22 = vand.u32 4294901760, %v12368_v33 }
 0x34c   :  { %4878 = vmatpush.msrb.mxu0 %v12125_v52  ;;  %5035 = vmatpush.msra.mxu3 %v12127_v35  ;;  %v5101_v52 = vsub.f32 %v12332_v31, %v15482_v21  ;;  %v15480_v35 = vand.u32 4294901760, %v12354_v32  ;;  %v15809_v21 = vld [vmem:[#allocation47_spill] sm:$0xff] }
 0x34d   :  { %4933 = vmatpush.msrb.mxu1 %v12167_v54  ;;  %4996 = vmatpush.msra.mxu2 %v4825_v62  ;;  %v12387_v62 = vsub.f32 %v3462_v48, %v12359_v15  ;;  %v12409_v11 = vsub.f32 %v3454_v25, %v12381_v42  ;;  %v12461_v25 = vsub.f32 %v3438_v50, %v12439_v41 }
 0x34e   :  { %4881 = vmatpush.msrb.mxu0 %v12139_v16  ;;  %5037 = vmatpush.msra.mxu3 %v12141_v19  ;;  %v5096_v19 = vand.u32 4294901760, %v5095_v39  ;;  %v5107_v16 = vsub.f32 %v12343_v13, %v15481_v14  ;;  %v12595_v14 = vand.u32 4294901760, %v3518_v23 }
 0x34f   :  { %4935 = vmatpush.msrb.mxu1 %v12182_v60  ;;  %5000 = vmatpush.msra.mxu2 %v4831_v58  ;;  %v12401_v58 = vand.u32 4294901760, %v3450_v40  ;;  %v15475_v4 = vand.u32 4294901760, %v12409_v11 }
 0x350   :  { %4884 = vmatpush.msrb.mxu0 %v12152_v49  ;;  %5039 = vmatpush.msra.mxu3 %v12154_v5  ;;  %v5102_v49 = vand.u32 4294901760, %v5101_v52  ;;  %v5113_v5 = vsub.f32 %v12354_v32, %v15480_v35  ;;  %v3422_v52 = vld [vmem:[#allocation10 + $0x8] sm:$0xff] }
 0x351   :  { %4937 = vmatpush.msrb.mxu1 %v12197_v1  ;;  %5004 = vmatpush.msra.mxu2 %v4837_v20  ;;  %v15477_v20 = vand.u32 4294901760, %v12387_v62  ;;  %v5137_v47 = vsub.f32 %v12409_v11, %v15475_v4  ;;  %v3522_v4 = vld [vmem:[#allocation10 + $0x328] sm:$0xff] }
 0x352   :  { %4887 = vmatpush.msrb.mxu0 %v12165_v28  ;;  %5041 = vmatpush.msra.mxu3 %v12167_v54  ;;  %v5108_v28 = vand.u32 4294901760, %v5107_v16  ;;  %v5119_v54 = vsub.f32 %v12368_v33, %v15478_v22  ;;  %v12473_v16 = vsub.f32 %v3434_v8, %v12451_v9  ;;  %v12497_v8 = vsub.f32 %v3426_v24, %v12475_v37 }
 0x353   :  { %4941 = vmatmul.f32.vlgmr.msrb.gmra.mxu1 %v12240_v18  ;;  %5008 = vmatpush.msra.mxu2 %v4843_v45  ;;  %v12425_v45 = vsub.f32 %v3450_v40, %v12401_v58  ;;  %v12582_v22 = vand.u32 4294901760, %v3522_v4 }
 0x354   :  { %5097 = vmatpush.msra.mxu1 %v5096_v19  ;;  %4890 = vmatpush.msrb.mxu0 %v12178_v61  ;;  %v5114_v61 = vand.u32 4294901760, %v5113_v5  ;;  %v5120_v2 = vand.u32 4294901760, %v5119_v54  ;;  %v15471_v19 = vand.u32 4294901760, %v12449_v59  ;;  %v15469_v5 = vand.u32 4294901760, %v12461_v25 }
 0x355   :  { %5043 = vmatpush.msra.mxu3 %v12182_v60  ;;  %5010 = vmatmul.f32.vlgmr.msra.gmra.mxu2 %v12193_v27  ;;  %v5125_v60 = vsub.f32 %v12387_v62, %v15477_v20  ;;  %v12606_v35 = vsub.f32 %v3522_v4, %v12582_v22  ;;  %v12619_v4 = vsub.f32 %v3518_v23, %v12595_v14 }
 0x356   :  { %5103 = vmatpush.msra.mxu1 %v5102_v49  ;;  %5195 = vmatpush.msrb.mxu2 %v12322_v6  ;;  %v5149_v49 = vsub.f32 %v12437_v44, %v15473_v36  ;;  %v5155_v50 = vsub.f32 %v12449_v59, %v15471_v19  ;;  %v3530_v19 = vld [vmem:[#allocation10 + $0x368] sm:$0xff] }
 0x357   :  { %4893 = vmatpush.msrb.mxu0 %v12191_v43  ;;  %5045 = vmatpush.msra.mxu3 %v12197_v1  ;;  %v3430_v43 = vld [vmem:[#allocation10 + $0x48] sm:$0xff]  ;;  %v15474_v1 = vand.u32 4294901760, %v12425_v45  ;;  %v5126_v48 = vand.u32 4294901760, %v5125_v60 }
 0x358   :  { %5047 = vmatmul.f32.vlgmr.msra.gmra.mxu3 %v12193_v27  ;;  %5109 = vmatpush.msra.mxu1 %v5108_v28  ;;  %v12463_v39 = vand.u32 4294901760, %v3430_v43  ;;  %v12487_v28 = vand.u32 4294901760, %v3422_v52  ;;  %v5150_v60 = vand.u32 4294901760, %v5149_v49  ;;  %v5156_v24 = vand.u32 4294901760, %v5155_v50 }
 0x359   :  { %5198 = vmatpush.msrb.mxu2 %v12332_v31  ;;  %5248 = vmatpush.msrb.mxu3 %v12307_v53  ;;  %v5143_v40 = vsub.f32 %v12425_v45, %v15474_v1 }
 0x35a   :  { %4896 = vmatpush.msrb.mxu0 %v12208_v3  ;;  %5115 = vmatpush.msra.mxu1 %v5114_v61  ;;  %v5132_v3 = vand.u32 4294901760, %v5131_v26  ;;  %v12485_v17 = vsub.f32 %v3430_v43, %v12463_v39  ;;  %v15467_v61 = vand.u32 4294901760, %v12473_v16  ;;  %v12507_v43 = vsub.f32 %v3422_v52, %v12487_v28  ;;  %v3542_v52 = vld [vmem:[#allocation10 + $0x3c8] sm:$0xff] }
 0x35b   :  { %5201 = vmatpush.msrb.mxu2 %v12343_v13  ;;  %5250 = vmatpush.msrb.mxu3 %v12314_v57  ;;  %v5144_v54 = vand.u32 4294901760, %v5143_v40 }
 0x35c   :  { %4899 = vmatpush.msrb.mxu0 %v12222_v63  ;;  %5121 = vmatpush.msra.mxu1 %v5120_v2  ;;  %v5138_v63 = vand.u32 4294901760, %v5137_v47  ;;  %v5161_v2 = vsub.f32 %v12461_v25, %v15469_v5  ;;  %v15468_v26 = vand.u32 4294901760, %v12485_v17  ;;  %v3546_v47 = vld [vmem:[#allocation10 + $0x3e8] sm:$0xff]  ;;  %v15472_v49 = vand.u32 4294901760, %v12507_v43 }
 0x35d   :  { %4902 = vmatmul.f32.vlgmr.msrb.gmra.mxu0 %v12217_v56  ;;  %5204 = vmatpush.msrb.mxu2 %v12354_v32  ;;  %v3534_v5 = vld [vmem:[#allocation10 + $0x388] sm:$0xff] }
 0x35e   :  { %5052 = vmatpush.msra.mxu0 %v12307_v53  ;;  %5252 = vmatpush.msrb.mxu3 %v12324_v30  ;;  %v5162_v40 = vand.u32 4294901760, %v5161_v2  ;;  %v12531_v2 = vand.u32 4294901760, %v3542_v52 }
 0x35f   :  { %5127 = vmatpush.msra.mxu1 %v5126_v48  ;;  %5207 = vmatpush.msrb.mxu2 %v12368_v33  ;;  %v5167_v48 = vsub.f32 %v12473_v16, %v15467_v61  ;;  %v3538_v61 = vld [vmem:[#allocation10 + $0x3a8] sm:$0xff] }
 0x360   :  { %5054 = vmatpush.msra.mxu0 %v12314_v57  ;;  %5254 = vmatpush.msrb.mxu3 %v12334_v12 }
 0x361   :  { %5133 = vmatpush.msra.mxu1 %v5132_v3  ;;  %5210 = vmatpush.msrb.mxu2 %v12387_v62  ;;  %v15470_v3 = vand.u32 4294901760, %v12497_v8  ;;  %v5168_v50 = vand.u32 4294901760, %v5167_v48 }
 0x362   :  { %5056 = vmatpush.msra.mxu0 %v12324_v30  ;;  %5256 = vmatpush.msrb.mxu3 %v12345_v10 }
 0x363   :  { %5139 = vmatpush.msra.mxu1 %v5138_v63  ;;  %5213 = vmatpush.msrb.mxu2 %v12396_v7  ;;  %v5173_v63 = vsub.f32 %v12485_v17, %v15468_v26 }
 0x364   :  { %5058 = vmatpush.msra.mxu0 %v12334_v12  ;;  %5258 = vmatpush.msrb.mxu3 %v12359_v15 }
 0x365   :  { %5145 = vmatpush.msra.mxu1 %v5144_v54  ;;  %5216 = vmatpush.msrb.mxu2 %v12409_v11  ;;  %v12523_v54 = vand.u32 4294901760, %v3546_v47  ;;  %v5174_v26 = vand.u32 4294901760, %v5173_v63  ;;  %v12548_v63 = vsub.f32 %v3542_v52, %v12531_v2 }
 0x366   :  { %5060 = vmatpush.msra.mxu0 %v12345_v10  ;;  %5260 = vmatpush.msrb.mxu3 %v12370_v29 }
 0x367   :  { %5151 = vmatpush.msra.mxu1 %v5150_v60  ;;  %5219 = vmatpush.msrb.mxu2 %v12425_v45  ;;  %v5179_v60 = vsub.f32 %v12497_v8, %v15470_v3  ;;  %v12540_v48 = vsub.f32 %v3546_v47, %v12523_v54  ;;  %v12544_v3 = vand.u32 4294901760, %v3538_v61  ;;  %v12552_v47 = vand.u32 4294901760, %v3534_v5 }
 0x368   :  { %5062 = vmatpush.msra.mxu0 %v12359_v15  ;;  %5262 = vmatpush.msrb.mxu3 %v12381_v42 }
 0x369   :  { %5157 = vmatpush.msra.mxu1 %v5156_v24  ;;  %5222 = vmatpush.msrb.mxu2 %v12437_v44  ;;  %v5185_v24 = vsub.f32 %v12507_v43, %v15472_v49  ;;  %v3526_v49 = vld [vmem:[#allocation10 + $0x348] sm:$0xff]  ;;  %v15479_v1 = vand.u32 4294901760, %v12540_v48  ;;  %v12561_v52 = vsub.f32 %v3538_v61, %v12544_v3 }
 0x36a   :  { %5064 = vmatpush.msra.mxu0 %v12370_v29  ;;  %5264 = vmatpush.msrb.mxu3 %v12401_v58 }
 0x36b   :  { %5163 = vmatpush.msra.mxu1 %v5162_v40  ;;  %5225 = vmatpush.msrb.mxu2 %v12449_v59  ;;  %v5180_v40 = vand.u32 4294901760, %v5179_v60  ;;  %v5186_v36 = vand.u32 4294901760, %v5185_v24  ;;  %v15484_v60 = vand.u32 4294901760, %v12548_v63  ;;  %v12570_v24 = vsub.f32 %v3534_v5, %v12552_v47  ;;  %v15807_v5 = vld [vmem:[#allocation46_spill] sm:$0xff] }
 0x36c   :  { %5066 = vmatpush.msra.mxu0 %v12381_v42  ;;  %5266 = vmatpush.msrb.mxu3 %v12415_v46  ;;  %v5436_v61 = vsub.f32 %v12540_v48, %v15479_v1  ;;  %v3514_v1 = vld [vmem:[#allocation10 + $0x2e8] sm:$0xff] }
 0x36d   :  { %5169 = vmatpush.msra.mxu1 %v5168_v50  ;;  %5228 = vmatpush.msrb.mxu2 %v12461_v25  ;;  %v12556_v50 = vand.u32 4294901760, %v3530_v19  ;;  %v12608_v56 = vand.u32 4294901760, %v3514_v1  ;;  %v15812_v18 = vand.u32 4294901760, %v12570_v24 }
 0x36e   :  { %5068 = vmatpush.msra.mxu0 %v12401_v58  ;;  %5268 = vmatpush.msrb.mxu3 %v12427_v0  ;;  %v5437_v34 = vand.u32 4294901760, %v5436_v61 }
 0x36f   :  { %5175 = vmatpush.msra.mxu1 %v5174_v26  ;;  %5231 = vmatpush.msrb.mxu2 %v12473_v16  ;;  %v12565_v26 = vand.u32 4294901760, %v3526_v49  ;;  %v12631_v23 = vsub.f32 %v3514_v1, %v12608_v56 }
 0x370   :  { %5070 = vmatpush.msra.mxu0 %v12415_v46  ;;  %5270 = vmatpush.msrb.mxu3 %v12439_v41 }
 0x371   :  { %5181 = vmatpush.msra.mxu1 %v5180_v40  ;;  %5234 = vmatpush.msrb.mxu2 %v12485_v17  ;;  %v12577_v40 = vsub.f32 %v3530_v19, %v12556_v50  ;;  %v12590_v19 = vsub.f32 %v3526_v49, %v12565_v26 }
 0x372   :  { %5072 = vmatpush.msra.mxu0 %v12427_v0  ;;  %5272 = vmatpush.msrb.mxu3 %v12451_v9 }
 0x373   :  { %5187 = vmatpush.msra.mxu1 %v5186_v36  ;;  %5237 = vmatpush.msrb.mxu2 %v12497_v8  ;;  %15806 = vst [vmem:[#allocation41_spill] sm:$0xff] %v12577_v40  ;;  %v5442_v36 = vsub.f32 %v12548_v63, %v15484_v60  ;;  %v3510_v60 = vld [vmem:[#allocation10 + $0x2c8] sm:$0xff] }
 0x374   :  { %5074 = vmatpush.msra.mxu0 %v12439_v41  ;;  %5274 = vmatpush.msrb.mxu3 %v12463_v39  ;;  %15808 = vst [vmem:[#allocation29_spill] sm:$0xff] %v12590_v19  ;;  %v12621_v27 = vand.u32 4294901760, %v3510_v60 }
 0x375   :  { %5189 = vmatmul.f32.vlgmr.msra.gmra.mxu1 %v15807_v5  ;;  %5240 = vmatpush.msrb.mxu2 %v12507_v43  ;;  %v5443_v61 = vand.u32 4294901760, %v5442_v36  ;;  %v15813_v36 = vand.u32 4294901760, %v12577_v40 }
 0x376   :  { %5356 = vmatpush.msrb.mxu1 %v12307_v53  ;;  %5076 = vmatpush.msra.mxu0 %v12451_v9  ;;  %v15810_v53 = vand.u32 4294901760, %v12561_v52  ;;  %v12643_v1 = vsub.f32 %v3510_v60, %v12621_v27 }
 0x377   :  { %5276 = vmatpush.msrb.mxu3 %v12475_v37  ;;  %5243 = vmatmul.f32.vlgmr.msrb.gmra.mxu2 %v15809_v21  ;;  %v3506_v21 = vld [vmem:[#allocation10 + $0x2a8] sm:$0xff]  ;;  %v5460_v20 = vsub.f32 %v12577_v40, %v15813_v36 }
 0x378   :  { %5358 = vmatpush.msrb.mxu1 %v12314_v57  ;;  %5393 = vmatpush.msra.mxu2 %v12523_v54  ;;  %v5448_v49 = vsub.f32 %v12561_v52, %v15810_v53  ;;  %v15811_v57 = vld [vmem:[#allocation48_spill] sm:$0xff]  ;;  %v5454_v53 = vsub.f32 %v12570_v24, %v15812_v18  ;;  %v12645_v18 = vand.u32 4294901760, %v3502_v55 }
 0x379   :  { %5078 = vmatpush.msra.mxu0 %v12463_v39  ;;  %5278 = vmatpush.msrb.mxu3 %v12487_v28  ;;  %v3494_v40 = vld [vmem:[#allocation10 + $0x248] sm:$0xff] }
 0x37a   :  { %5282 = vmatmul.f32.vlgmr.msrb.gmra.mxu3 %v15811_v57  ;;  %5360 = vmatpush.msrb.mxu1 %v12324_v30  ;;  %v5449_v30 = vand.u32 4294901760, %v5448_v49  ;;  %v12633_v57 = vand.u32 4294901760, %v3506_v21  ;;  %v12671_v49 = vand.u32 4294901760, %v3494_v40 }
 0x37b   :  { %5395 = vmatpush.msra.mxu2 %v12531_v2  ;;  %5438 = vmatpush.msra.mxu3 %v5437_v34  ;;  %v15814_v34 = vand.u32 4294901760, %v12590_v19 }
 0x37c   :  { %5080 = vmatpush.msra.mxu0 %v12475_v37  ;;  %5362 = vmatpush.msrb.mxu1 %v12334_v12  ;;  %v5455_v12 = vand.u32 4294901760, %v5454_v53  ;;  %v12656_v60 = vsub.f32 %v3506_v21, %v12633_v57  ;;  %v12669_v21 = vsub.f32 %v3502_v55, %v12645_v18 }
 0x37d   :  { %5397 = vmatpush.msra.mxu2 %v12544_v3  ;;  %5444 = vmatpush.msra.mxu3 %v5443_v61  ;;  %v5466_v36 = vsub.f32 %v12590_v19, %v15814_v34  ;;  %v5461_v61 = vand.u32 4294901760, %v5460_v20  ;;  %v15816_v34 = vand.u32 4294901760, %v12322_v6  ;;  %v12658_v19 = vand.u32 4294901760, %v3498_v38 }
 0x37e   :  { %5082 = vmatpush.msra.mxu0 %v12487_v28  ;;  %5364 = vmatpush.msrb.mxu1 %v12345_v10  ;;  %v15817_v10 = vand.u32 4294901760, %v12606_v35  ;;  %v15818_v6 = vand.u32 4294901760, %v12332_v31  ;;  %v15820_v31 = vand.u32 4294901760, %v12343_v13  ;;  %v15822_v13 = vand.u32 4294901760, %v12354_v32 }
 0x37f   :  { %5088 = vmatmul.f32.vlgmr.msra.gmra.mxu0 %v15815_v51  ;;  %5399 = vmatpush.msra.mxu2 %v12552_v47  ;;  %v5467_v20 = vand.u32 4294901760, %v5466_v36  ;;  %v3490_v51 = vld [vmem:[#allocation10 + $0x228] sm:$0xff]  ;;  %v15821_v36 = vand.u32 4294901760, %v12631_v23  ;;  %v12682_v55 = vsub.f32 %v3498_v38, %v12658_v19  ;;  %v12695_v38 = vsub.f32 %v3494_v40, %v12671_v49 }
 0x380   :  { %5289 = vmatpush.msrb.mxu0 %v15816_v34  ;;  %5450 = vmatpush.msra.mxu3 %v5449_v30  ;;  %v5472_v53 = vsub.f32 %v12606_v35, %v15817_v10  ;;  %v15819_v30 = vand.u32 4294901760, %v12619_v4  ;;  %v5489_v10 = vand.u32 4294901760, %v12643_v1  ;;  %v15823_v32 = vand.u32 4294901760, %v12368_v33 }
 0x381   :  { %5366 = vmatpush.msrb.mxu1 %v12359_v15  ;;  %5401 = vmatpush.msra.mxu2 %v12556_v50  ;;  %v15824_v40 = vand.u32 4294901760, %v12387_v62 }
 0x382   :  { %5293 = vmatpush.msrb.mxu0 %v15818_v6  ;;  %5456 = vmatpush.msra.mxu3 %v5455_v12  ;;  %v5478_v34 = vsub.f32 %v12619_v4, %v15819_v30  ;;  %v5473_v15 = vand.u32 4294901760, %v5472_v53  ;;  %v5484_v12 = vsub.f32 %v12631_v23, %v15821_v36  ;;  %v5495_v6 = vand.u32 4294901760, %v12656_v60  ;;  %v3486_v30 = vld [vmem:[#allocation10 + $0x208] sm:$0xff] }
 0x383   :  { %5368 = vmatpush.msrb.mxu1 %v12370_v29  ;;  %5403 = vmatpush.msra.mxu2 %v12565_v26  ;;  %v12686_v29 = vand.u32 4294901760, %v3490_v51  ;;  %v5490_v53 = vsub.f32 %v12643_v1, %v5489_v10  ;;  %v5507_v36 = vand.u32 4294901760, %v12682_v55 }
 0x384   :  { %5297 = vmatpush.msrb.mxu0 %v15820_v31  ;;  %5462 = vmatpush.msra.mxu3 %v5461_v61  ;;  %v5479_v61 = vand.u32 4294901760, %v5478_v34  ;;  %v5501_v31 = vand.u32 4294901760, %v12669_v21  ;;  %v5496_v34 = vsub.f32 %v12656_v60, %v5495_v6 }
 0x385   :  { %5370 = vmatpush.msrb.mxu1 %v12381_v42  ;;  %5405 = vmatpush.msra.mxu2 %v12582_v22  ;;  %v12699_v42 = vand.u32 4294901760, %v3486_v30  ;;  %v5491_v33 = vand.u32 4294901760, %v5490_v53 }
 0x386   :  { %5301 = vmatpush.msrb.mxu0 %v15822_v13  ;;  %5468 = vmatpush.msra.mxu3 %v5467_v20  ;;  %v5485_v20 = vand.u32 4294901760, %v5484_v12  ;;  %v5513_v12 = vand.u32 4294901760, %v12695_v38  ;;  %v5497_v62 = vand.u32 4294901760, %v5496_v34  ;;  %v5508_v13 = vsub.f32 %v12682_v55, %v5507_v36 }
 0x387   :  { %5372 = vmatpush.msrb.mxu1 %v12401_v58  ;;  %5407 = vmatpush.msra.mxu2 %v12595_v14  ;;  %v12710_v58 = vsub.f32 %v3490_v51, %v12686_v29  ;;  %v15825_v51 = vand.u32 4294901760, %v12396_v7 }
 0x388   :  { %5305 = vmatpush.msrb.mxu0 %v15823_v32  ;;  %5474 = vmatpush.msra.mxu3 %v5473_v15  ;;  %v5502_v15 = vsub.f32 %v12669_v21, %v5501_v31  ;;  %v5514_v53 = vsub.f32 %v12695_v38, %v5513_v12  ;;  %v5509_v34 = vand.u32 4294901760, %v5508_v13 }
 0x389   :  { %5374 = vmatpush.msrb.mxu1 %v12415_v46  ;;  %5409 = vmatpush.msra.mxu2 %v12608_v56  ;;  %v12721_v46 = vsub.f32 %v3486_v30, %v12699_v42  ;;  %v15826_v30 = vand.u32 4294901760, %v12409_v11  ;;  %v3725_v11 = vpop.f32.mrf.mxu0 }
 0x38a   :  { %5309 = vmatpush.msrb.mxu0 %v15824_v40  ;;  %5480 = vmatpush.msra.mxu3 %v5479_v61  ;;  %v3677_v61 = vld [vmem:[%s15340_s9] sm:$0xf]  ;;  %v5503_v7 = vand.u32 4294901760, %v5502_v15  ;;  %v15829_v15 = vand.u32 4294901760, %v12449_v59  ;;  %v15831_v59 = vand.u32 4294901760, %v12473_v16  ;;  %v15836_v16 = vand.u32 4294901760, %v12548_v63 }
 0x38b   :  { %5376 = vmatpush.msrb.mxu1 %v12427_v0  ;;  %5411 = vmatpush.msra.mxu2 %v12621_v27  ;;  %v5519_v0 = vand.u32 4294901760, %v12710_v58  ;;  %v5525_v32 = vand.u32 4294901760, %v12721_v46 }
 0x38c   :  { %5313 = vmatpush.msrb.mxu0 %v15825_v51  ;;  %5486 = vmatpush.msra.mxu3 %v5485_v20  ;;  %v15827_v20 = vand.u32 4294901760, %v12425_v45  ;;  %v15830_v51 = vand.u32 4294901760, %v12461_v25  ;;  %v15833_v25 = vand.u32 4294901760, %v12540_v48 }
 0x38d   :  { %5378 = vmatpush.msrb.mxu1 %v12439_v41  ;;  %5413 = vmatpush.msra.mxu2 %v12633_v57  ;;  %v3679_v41 = vperm.slane %v3677_v61, 0  ;;  %v5520_v40 = vsub.f32 %v12710_v58, %v5519_v0  ;;  %v5526_v45 = vsub.f32 %v12721_v46, %v5525_v32  ;;  %v3880_v61 = vpop.f32.mrf.mxu2 }
 0x38e   :  { %5317 = vmatpush.msrb.mxu0 %v15826_v30  ;;  %5492 = vmatpush.msra.mxu3 %v5491_v33  ;;  %v5515_v33 = vand.u32 4294901760, %v5514_v53  ;;  %v15834_v30 = vand.u32 4294901760, %v12485_v17  ;;  %v15835_v53 = vld [vmem:[#allocation32_spill] sm:$0xff]  ;;  %v15838_v17 = vand.u32 4294901760, %v12561_v52 }
 0x38f   :  { %5380 = vmatpush.msrb.mxu1 %v12451_v9  ;;  %5415 = vmatpush.msra.mxu2 %v12645_v18  ;;  %v15828_v9 = vand.u32 4294901760, %v12437_v44  ;;  %v5521_v44 = vand.u32 4294901760, %v5520_v40 }
 0x390   :  { %5321 = vmatpush.msrb.mxu0 %v15827_v20  ;;  %5498 = vmatpush.msra.mxu3 %v5497_v62  ;;  %v5527_v62 = vand.u32 4294901760, %v5526_v45  ;;  %v3919_v20 = vpop.f32.mrf.mxu3 }
 0x391   :  { %5382 = vmatpush.msrb.mxu1 %v12463_v39  ;;  %5417 = vmatpush.msra.mxu2 %v12658_v19  ;;  %v3726_v39 = vadd.f32 %v3725_v11, %v3679_v41  ;;  %v15837_v41 = vand.u32 4294901760, %v12497_v8  ;;  %v15839_v11 = vand.u32 4294901760, %v12507_v43  ;;  %v3988_v40 = vpop.f32.mrf.mxu0  ;;  %v15840_v8 = vand.u32 4294901760, %v12570_v24 }
 0x392   :  { %5325 = vmatpush.msrb.mxu0 %v15828_v9  ;;  %5504 = vmatpush.msra.mxu3 %v5503_v7  ;;  %v3610_v9 = vld [vmem:[#allocation10 + $0x5e8] sm:$0xff] }
 0x393   :  { %5384 = vmatpush.msrb.mxu1 %v12475_v37  ;;  %5419 = vmatpush.msra.mxu2 %v12671_v49  ;;  %v3826_v37 = vpop.f32.mrf.mxu1 }
 0x394   :  { %5329 = vmatpush.msrb.mxu0 %v15829_v15  ;;  %5510 = vmatpush.msra.mxu3 %v5509_v34  ;;  %v3827_v13 = vadd.f32 %v3826_v37, %v3726_v39  ;;  %v3606_v39 = vld [vmem:[#allocation10 + $0x5c8] sm:$0xff] }
 0x395   :  { %5386 = vmatpush.msrb.mxu1 %v12487_v28  ;;  %5421 = vmatpush.msra.mxu2 %v12686_v29  ;;  %v15832_v28 = vld [vmem:[#allocation22_spill] sm:$0xff]  ;;  %v4066_v15 = vpop.f32.mrf.mxu2 }
 0x396   :  { %5333 = vmatpush.msrb.mxu0 %v15830_v51  ;;  %5516 = vmatpush.msra.mxu3 %v5515_v33  ;;  %v3881_v7 = vadd.f32 %v3880_v61, %v3827_v13  ;;  %v15843_v33 = vld [vmem:[#allocation29_spill] sm:$0xff]  ;;  %v12809_v51 = vand.u32 4294901760, %v3606_v39 }
 0x397   :  { %5388 = vmatmul.f32.vlgmr.msrb.gmra.mxu1 %v15807_v5  ;;  %5423 = vmatpush.msra.mxu2 %v12699_v42  ;;  %v15844_v45 = vand.u32 4294901760, %v15843_v33 }
 0x398   :  { %5589 = vmatpush.msra.mxu1 %v12523_v54  ;;  %5337 = vmatpush.msrb.mxu0 %v15831_v59  ;;  %v3920_v34 = vadd.f32 %v3919_v20, %v3881_v7  ;;  %v12827_v59 = vsub.f32 %v3606_v39, %v12809_v51  ;;  %v3586_v20 = vld [vmem:[#allocation10 + $0x528] sm:$0xff] }
 0x399   :  { %5522 = vmatpush.msra.mxu3 %v5521_v44  ;;  %5429 = vmatmul.f32.vlgmr.msra.gmra.mxu2 %v15832_v28  ;;  %v4221_v61 = vpop.f32.mrf.mxu0  ;;  %v3570_v39 = vld [vmem:[#allocation10 + $0x4a8] sm:$0xff] }
 0x39a   :  { %5591 = vmatpush.msra.mxu1 %v12531_v2  ;;  %5630 = vmatpush.msrb.mxu2 %v15833_v25  ;;  %v3989_v43 = vadd.f32 %v3988_v40, %v3920_v34  ;;  %v12865_v34 = vand.u32 4294901760, %v3586_v20 }
 0x39b   :  { %5341 = vmatpush.msrb.mxu0 %v15834_v30  ;;  %5528 = vmatpush.msra.mxu3 %v5527_v62 }
 0x39c   :  { %5530 = vmatmul.f32.vlgmr.msra.gmra.mxu3 %v15835_v53  ;;  %5593 = vmatpush.msra.mxu1 %v12544_v3 }
 0x39d   :  { %5634 = vmatpush.msrb.mxu2 %v15836_v16  ;;  %5697 = vmatpush.msrb.mxu3 %v12523_v54  ;;  %v15841_v54 = vld [vmem:[#allocation41_spill] sm:$0xff] }
 0x39e   :  { %5345 = vmatpush.msrb.mxu0 %v15837_v41  ;;  %5595 = vmatpush.msra.mxu1 %v12552_v47  ;;  %v3590_v41 = vld [vmem:[#allocation10 + $0x548] sm:$0xff] }
 0x39f   :  { %5638 = vmatpush.msrb.mxu2 %v15838_v17  ;;  %5699 = vmatpush.msrb.mxu3 %v12531_v2  ;;  %v15842_v2 = vand.u32 4294901760, %v15841_v54  ;;  %v12854_v17 = vand.u32 4294901760, %v3590_v41 }
 0x3a0   :  { %5349 = vmatpush.msrb.mxu0 %v15839_v11  ;;  %5597 = vmatpush.msra.mxu1 %v12556_v50  ;;  %v3582_v11 = vld [vmem:[#allocation10 + $0x508] sm:$0xff] }
 0x3a1   :  { %5351 = vmatmul.f32.vlgmr.msrb.gmra.mxu0 %v15807_v5  ;;  %5642 = vmatpush.msrb.mxu2 %v15840_v8  ;;  %v3578_v8 = vld [vmem:[#allocation10 + $0x4e8] sm:$0xff] }
 0x3a2   :  { %5536 = vmatpush.msra.mxu0 %v12540_v48  ;;  %5701 = vmatpush.msrb.mxu3 %v12544_v3  ;;  %v12802_v3 = vand.u32 4294901760, %v3610_v9  ;;  %v4025_v48 = vpop.f32.mrf.mxu1 }
 0x3a3   :  { %5599 = vmatpush.msra.mxu1 %v12565_v26  ;;  %5646 = vmatpush.msrb.mxu2 %v15842_v2  ;;  %v4026_v44 = vadd.f32 %v4025_v48, %v3989_v43  ;;  %v4329_v43 = vpop.f32.mrf.mxu2  ;;  %v15848_v48 = vld [vmem:[#allocation35_spill] sm:$0xff] }
 0x3a4   :  { %5539 = vmatpush.msra.mxu0 %v12548_v63  ;;  %5703 = vmatpush.msrb.mxu3 %v12552_v47  ;;  %v15845_v63 = vand.u32 4294901760, %v12606_v35  ;;  %v3602_v47 = vld [vmem:[#allocation10 + $0x5a8] sm:$0xff]  ;;  %v12817_v62 = vsub.f32 %v3610_v9, %v12802_v3  ;;  %v12891_v9 = vsub.f32 %v3586_v20, %v12865_v34 }
 0x3a5   :  { %5601 = vmatpush.msra.mxu1 %v12582_v22  ;;  %5650 = vmatpush.msrb.mxu2 %v15844_v45  ;;  %v4067_v37 = vadd.f32 %v4066_v15, %v4026_v44  ;;  %v12819_v13 = vand.u32 4294901760, %v3602_v47 }
 0x3a6   :  { %5542 = vmatpush.msra.mxu0 %v12561_v52  ;;  %5705 = vmatpush.msrb.mxu3 %v12556_v50  ;;  %v15846_v50 = vand.u32 4294901760, %v12619_v4  ;;  %v3598_v52 = vld [vmem:[#allocation10 + $0x588] sm:$0xff]  ;;  %v15517_v7 = vand.u32 4294901760, %v12817_v62  ;;  %v15510_v44 = vand.u32 4294901760, %v12891_v9 }
 0x3a7   :  { %5603 = vmatpush.msra.mxu1 %v12595_v14  ;;  %5654 = vmatpush.msrb.mxu2 %v15845_v63  ;;  %v12829_v25 = vand.u32 4294901760, %v3598_v52 }
 0x3a8   :  { %5545 = vmatpush.msra.mxu0 %v12570_v24  ;;  %5707 = vmatpush.msrb.mxu3 %v12565_v26  ;;  %v15847_v26 = vand.u32 4294901760, %v12631_v23  ;;  %v3594_v24 = vld [vmem:[#allocation10 + $0x568] sm:$0xff] }
 0x3a9   :  { %5605 = vmatpush.msra.mxu1 %v12608_v56  ;;  %5658 = vmatpush.msrb.mxu2 %v15846_v50  ;;  %v12840_v16 = vand.u32 4294901760, %v3594_v24 }
 0x3aa   :  { %5548 = vmatpush.msra.mxu0 %v15841_v54  ;;  %5709 = vmatpush.msrb.mxu3 %v12582_v22  ;;  %v4167_v22 = vpop.f32.mrf.mxu3  ;;  %v4260_v40 = vpop.f32.mrf.mxu1  ;;  %v12880_v54 = vsub.f32 %v3590_v41, %v12854_v17 }
 0x3ab   :  { %5607 = vmatpush.msra.mxu1 %v12621_v27  ;;  %5662 = vmatpush.msrb.mxu2 %v15847_v26  ;;  %v4168_v30 = vadd.f32 %v4167_v22, %v4067_v37  ;;  %v12922_v37 = vand.u32 4294901760, %v3570_v39  ;;  %v3562_v22 = vld [vmem:[#allocation10 + $0x468] sm:$0xff] }
 0x3ac   :  { %5551 = vmatpush.msra.mxu0 %v15843_v33  ;;  %5711 = vmatpush.msrb.mxu3 %v12595_v14  ;;  %v12838_v14 = vsub.f32 %v3602_v47, %v12819_v13 }
 0x3ad   :  { %5609 = vmatpush.msra.mxu1 %v12633_v57  ;;  %5666 = vmatpush.msrb.mxu2 %v5489_v10  ;;  %v4222_v10 = vadd.f32 %v4221_v61, %v4168_v30 }
 0x3ae   :  { %5554 = vmatpush.msra.mxu0 %v12606_v35  ;;  %5713 = vmatpush.msrb.mxu3 %v12608_v56  ;;  %v15516_v56 = vand.u32 4294901760, %v12827_v59  ;;  %v12849_v35 = vsub.f32 %v3598_v52, %v12829_v25 }
 0x3af   :  { %5611 = vmatpush.msra.mxu1 %v12645_v18  ;;  %5670 = vmatpush.msrb.mxu2 %v5495_v6  ;;  %v12863_v6 = vsub.f32 %v3594_v24, %v12840_v16 }
 0x3b0   :  { %5557 = vmatpush.msra.mxu0 %v12619_v4  ;;  %5715 = vmatpush.msrb.mxu3 %v12621_v27  ;;  %v5777_v27 = vsub.f32 %v12817_v62, %v15517_v7  ;;  %v15514_v4 = vand.u32 4294901760, %v12838_v14 }
 0x3b1   :  { %5613 = vmatpush.msra.mxu1 %v12658_v19  ;;  %5674 = vmatpush.msrb.mxu2 %v5501_v31  ;;  %v15513_v31 = vand.u32 4294901760, %v12849_v35  ;;  %v15512_v2 = vand.u32 4294901760, %v12863_v6 }
 0x3b2   :  { %5560 = vmatpush.msra.mxu0 %v12631_v23  ;;  %5717 = vmatpush.msrb.mxu3 %v12633_v57  ;;  %v4261_v23 = vadd.f32 %v4260_v40, %v4222_v10  ;;  %v5783_v57 = vsub.f32 %v12827_v59, %v15516_v56  ;;  %v4366_v50 = vpop.f32.mrf.mxu3  ;;  %v3558_v10 = vld [vmem:[#allocation10 + $0x448] sm:$0xff] }
 0x3b3   :  { %5615 = vmatpush.msra.mxu1 %v12671_v49  ;;  %5678 = vmatpush.msrb.mxu2 %v5507_v36  ;;  %v12882_v36 = vand.u32 4294901760, %v3582_v11  ;;  %v5795_v45 = vsub.f32 %v12849_v35, %v15513_v31  ;;  %v5801_v47 = vsub.f32 %v12863_v6, %v15512_v2  ;;  %v3646_v2 = vld [vmem:[#allocation10 + $0x708] sm:$0xff] }
 0x3b4   :  { %5563 = vmatpush.msra.mxu0 %v12643_v1  ;;  %5719 = vmatpush.msrb.mxu3 %v12645_v18  ;;  %v5778_v18 = vand.u32 4294901760, %v5777_v27  ;;  %v5789_v1 = vsub.f32 %v12838_v14, %v15514_v4  ;;  %v5784_v33 = vand.u32 4294901760, %v5783_v57  ;;  %v12944_v27 = vsub.f32 %v3570_v39, %v12922_v37  ;;  %v4508_v57 = vpop.f32.mrf.mxu1 }
 0x3b5   :  { %5617 = vmatpush.msra.mxu1 %v12686_v29  ;;  %5682 = vmatpush.msrb.mxu2 %v5513_v12  ;;  %v3574_v12 = vld [vmem:[#allocation10 + $0x4c8] sm:$0xff]  ;;  %v12908_v15 = vsub.f32 %v3582_v11, %v12882_v36  ;;  %v5802_v20 = vand.u32 4294901760, %v5801_v47  ;;  %v12946_v11 = vand.u32 4294901760, %v3562_v22  ;;  %v4562_v47 = vpop.f32.mrf.mxu2  ;;  %v13090_v31 = vand.u32 4294901760, %v3646_v2 }
 0x3b6   :  { %5566 = vmatpush.msra.mxu0 %v12656_v60  ;;  %5721 = vmatpush.msrb.mxu3 %v12658_v19  ;;  %v12896_v60 = vand.u32 4294901760, %v3578_v8  ;;  %v4330_v19 = vadd.f32 %v4329_v43, %v4261_v23  ;;  %v12910_v63 = vand.u32 4294901760, %v3574_v12  ;;  %v3554_v23 = vld [vmem:[#allocation10 + $0x428] sm:$0xff]  ;;  %v15502_v39 = vand.u32 4294901760, %v12944_v27 }
 0x3b7   :  { %5619 = vmatpush.msra.mxu1 %v12699_v42  ;;  %5686 = vmatpush.msrb.mxu2 %v5519_v0  ;;  %v15511_v0 = vand.u32 4294901760, %v12880_v54  ;;  %v15509_v61 = vand.u32 4294901760, %v12908_v15  ;;  %v13114_v5 = vsub.f32 %v3646_v2, %v13090_v31 }
 0x3b8   :  { %5569 = vmatpush.msra.mxu0 %v12669_v21  ;;  %5723 = vmatpush.msrb.mxu3 %v12671_v49  ;;  %v3566_v21 = vld [vmem:[#allocation10 + $0x488] sm:$0xff]  ;;  %v5790_v49 = vand.u32 4294901760, %v5789_v1  ;;  %v12920_v52 = vsub.f32 %v3578_v8, %v12896_v60  ;;  %v4367_v26 = vadd.f32 %v4366_v50, %v4330_v19  ;;  %v12934_v30 = vsub.f32 %v3574_v12, %v12910_v63 }
 0x3b9   :  { %5623 = vmatmul.f32.vlgmr.msra.gmra.mxu1 %v15848_v48  ;;  %5690 = vmatpush.msrb.mxu2 %v5525_v32  ;;  %v4407_v32 = vpop.f32.mrf.mxu0  ;;  %v12925_v24 = vand.u32 4294901760, %v3566_v21  ;;  %v12958_v12 = vand.u32 4294901760, %v3558_v10  ;;  %v3550_v19 = vld [vmem:[#allocation10 + $0x408] sm:$0xff] }
 0x3ba   :  { %5779 = vmatpush.msrb.mxu1 %v5778_v18  ;;  %5572 = vmatpush.msra.mxu0 %v12682_v55  ;;  %v5796_v55 = vand.u32 4294901760, %v5795_v45  ;;  %v4408_v41 = vadd.f32 %v4407_v32, %v4367_v26  ;;  %v5819_v18 = vsub.f32 %v12908_v15, %v15509_v61  ;;  %v15506_v1 = vand.u32 4294901760, %v12934_v30 }
 0x3bb   :  { %5725 = vmatpush.msrb.mxu3 %v12686_v29  ;;  %5692 = vmatmul.f32.vlgmr.msrb.gmra.mxu2 %v15835_v53  ;;  %v5807_v29 = vsub.f32 %v12880_v54, %v15511_v0  ;;  %v12950_v40 = vsub.f32 %v3566_v21, %v12925_v24  ;;  %v12968_v21 = vsub.f32 %v3562_v22, %v12946_v11 }
 0x3bc   :  { %5785 = vmatpush.msrb.mxu1 %v5784_v33  ;;  %5877 = vmatpush.msra.mxu2 %v12817_v62  ;;  %v15849_v33 = vld [vmem:[#allocation34_spill] sm:$0xff]  ;;  %v5820_v50 = vand.u32 4294901760, %v5819_v18  ;;  %v5831_v32 = vsub.f32 %v12934_v30, %v15506_v1  ;;  %v12980_v26 = vsub.f32 %v3558_v10, %v12958_v12 }
 0x3bd   :  { %5575 = vmatpush.msra.mxu0 %v12695_v38  ;;  %5727 = vmatpush.msrb.mxu3 %v12699_v42  ;;  %v5813_v38 = vsub.f32 %v12891_v9, %v15510_v44  ;;  %v15507_v42 = vand.u32 4294901760, %v12920_v52  ;;  %v5808_v8 = vand.u32 4294901760, %v5807_v29 }
 0x3be   :  { %5729 = vmatmul.f32.vlgmr.msrb.gmra.mxu3 %v15835_v53  ;;  %5791 = vmatpush.msrb.mxu1 %v5790_v49  ;;  %v12970_v49 = vand.u32 4294901760, %v3554_v23 }
 0x3bf   :  { %5880 = vmatpush.msra.mxu2 %v12827_v59  ;;  %5930 = vmatpush.msra.mxu3 %v12802_v3  ;;  %v5814_v43 = vand.u32 4294901760, %v5813_v38  ;;  %v5825_v45 = vsub.f32 %v12920_v52, %v15507_v42  ;;  %v3658_v42 = vld [vmem:[#allocation10 + $0x768] sm:$0xff] }
 0x3c0   :  { %5578 = vmatpush.msra.mxu0 %v12710_v58  ;;  %5797 = vmatpush.msrb.mxu1 %v5796_v55  ;;  %v4509_v58 = vadd.f32 %v4508_v57, %v4408_v41  ;;  %v12982_v55 = vand.u32 4294901760, %v3550_v19  ;;  %v5837_v41 = vsub.f32 %v12944_v27, %v15502_v39  ;;  %v12992_v38 = vsub.f32 %v3554_v23, %v12970_v49 }
 0x3c1   :  { %5883 = vmatpush.msra.mxu2 %v12838_v14  ;;  %5932 = vmatpush.msra.mxu3 %v12809_v51  ;;  %v5826_v29 = vand.u32 4294901760, %v5825_v45  ;;  %v5832_v57 = vand.u32 4294901760, %v5831_v32  ;;  %v4670_v23 = vpop.f32.mrf.mxu0  ;;  %v13051_v44 = vand.u32 4294901760, %v3658_v42 }
 0x3c2   :  { %5581 = vmatpush.msra.mxu0 %v12721_v46  ;;  %5803 = vmatpush.msrb.mxu1 %v5802_v20  ;;  %v15501_v46 = vand.u32 4294901760, %v12950_v40  ;;  %v4563_v22 = vadd.f32 %v4562_v47, %v4509_v58  ;;  %v15504_v20 = vand.u32 4294901760, %v12968_v21  ;;  %v13002_v18 = vsub.f32 %v3550_v19, %v12982_v55  ;;  %v4601_v58 = vpop.f32.mrf.mxu3 }
 0x3c3   :  { %5584 = vmatmul.f32.vlgmr.msra.gmra.mxu0 %v15849_v33  ;;  %5886 = vmatpush.msra.mxu2 %v12849_v35  ;;  %v5838_v47 = vand.u32 4294901760, %v5837_v41  ;;  %v15505_v32 = vand.u32 4294901760, %v12992_v38  ;;  %v15854_v33 = vld [vmem:[#allocation38_spill] sm:$0xff] }
 0x3c4   :  { %5734 = vmatpush.msrb.mxu0 %v12802_v3  ;;  %5934 = vmatpush.msra.mxu3 %v12819_v13  ;;  %v5843_v10 = vsub.f32 %v12950_v40, %v15501_v46  ;;  %15850 = vst [vmem:[#allocation27_spill] sm:$0xff] %v13002_v18  ;;  %v4602_v45 = vadd.f32 %v4601_v58, %v4563_v22  ;;  %v3670_v46 = vld [vmem:[#allocation10 + $0x7c8] sm:$0xff] }
 0x3c5   :  { %5809 = vmatpush.msrb.mxu1 %v5808_v8  ;;  %5889 = vmatpush.msra.mxu2 %v12863_v6  ;;  %v15503_v8 = vand.u32 4294901760, %v12980_v26  ;;  %v13026_v58 = vand.u32 4294901760, %v3670_v46 }
 0x3c6   :  { %5736 = vmatpush.msrb.mxu0 %v12809_v51  ;;  %5936 = vmatpush.msra.mxu3 %v12829_v25  ;;  %v5844_v19 = vand.u32 4294901760, %v5843_v10  ;;  %v4671_v39 = vadd.f32 %v4670_v23, %v4602_v45  ;;  %v3666_v23 = vld [vmem:[#allocation10 + $0x7a8] sm:$0xff]  ;;  %v4707_v45 = vpop.f32.mrf.mxu1 }
 0x3c7   :  { %5815 = vmatpush.msrb.mxu1 %v5814_v43  ;;  %5892 = vmatpush.msra.mxu2 %v12880_v54  ;;  %v3674_v43 = vld [vmem:[#allocation10 + $0x7e8] sm:$0xff]  ;;  %v5855_v22 = vsub.f32 %v12980_v26, %v15503_v8  ;;  %v13039_v1 = vand.u32 4294901760, %v3666_v23 }
 0x3c8   :  { %5738 = vmatpush.msrb.mxu0 %v12819_v13  ;;  %5938 = vmatpush.msra.mxu3 %v12840_v16  ;;  %v13018_v41 = vand.u32 4294901760, %v3674_v43  ;;  %v4708_v8 = vadd.f32 %v4707_v45, %v4671_v39  ;;  %v3654_v45 = vld [vmem:[#allocation10 + $0x748] sm:$0xff] }
 0x3c9   :  { %5821 = vmatpush.msrb.mxu1 %v5820_v50  ;;  %5895 = vmatpush.msra.mxu2 %v12891_v9  ;;  %v5849_v50 = vsub.f32 %v12968_v21, %v15504_v20 }
 0x3ca   :  { %5740 = vmatpush.msrb.mxu0 %v12829_v25  ;;  %5940 = vmatpush.msra.mxu3 %v12854_v17  ;;  %v13035_v20 = vsub.f32 %v3674_v43, %v13018_v41 }
 0x3cb   :  { %5827 = vmatpush.msrb.mxu1 %v5826_v29  ;;  %5898 = vmatpush.msra.mxu2 %v12908_v15  ;;  %v15508_v29 = vand.u32 4294901760, %v13002_v18  ;;  %v5850_v10 = vand.u32 4294901760, %v5849_v50 }
 0x3cc   :  { %5742 = vmatpush.msrb.mxu0 %v12840_v16  ;;  %5942 = vmatpush.msra.mxu3 %v12865_v34 }
 0x3cd   :  { %5833 = vmatpush.msrb.mxu1 %v5832_v57  ;;  %5901 = vmatpush.msra.mxu2 %v12920_v52  ;;  %v5861_v57 = vsub.f32 %v12992_v38, %v15505_v32  ;;  %v5867_v50 = vsub.f32 %v13002_v18, %v15508_v29  ;;  %v3662_v32 = vld [vmem:[#allocation10 + $0x788] sm:$0xff] }
 0x3ce   :  { %5744 = vmatpush.msrb.mxu0 %v12854_v17  ;;  %5944 = vmatpush.msra.mxu3 %v12882_v36  ;;  %v13047_v43 = vand.u32 4294901760, %v3662_v32 }
 0x3cf   :  { %5839 = vmatpush.msrb.mxu1 %v5838_v47  ;;  %5904 = vmatpush.msra.mxu2 %v12934_v30  ;;  %v5856_v47 = vand.u32 4294901760, %v5855_v22  ;;  %v5862_v39 = vand.u32 4294901760, %v5861_v57  ;;  %v4748_v22 = vpop.f32.mrf.mxu2  ;;  %v5868_v61 = vand.u32 4294901760, %v5867_v50  ;;  %v13060_v57 = vand.u32 4294901760, %v3654_v45  ;;  %v4849_v50 = vpop.f32.mrf.mxu3 }
 0x3d0   :  { %5746 = vmatpush.msrb.mxu0 %v12865_v34  ;;  %5946 = vmatpush.msra.mxu3 %v12896_v60  ;;  %v4749_v29 = vadd.f32 %v4748_v22, %v4708_v8  ;;  %v13065_v22 = vsub.f32 %v3662_v32, %v13047_v43  ;;  %v4942_v56 = vpop.f32.mrf.mxu1 }
 0x3d1   :  { %5845 = vmatpush.msrb.mxu1 %v5844_v19  ;;  %5907 = vmatpush.msra.mxu2 %v12944_v27  ;;  %v13043_v19 = vsub.f32 %v3670_v46, %v13026_v58  ;;  %v13056_v46 = vsub.f32 %v3666_v23, %v13039_v1 }
 0x3d2   :  { %5748 = vmatpush.msrb.mxu0 %v12882_v36  ;;  %5948 = vmatpush.msra.mxu3 %v12910_v63  ;;  %v4850_v0 = vadd.f32 %v4849_v50, %v4749_v29  ;;  %v13085_v50 = vsub.f32 %v3654_v45, %v13060_v57  ;;  %v3638_v45 = vld [vmem:[#allocation10 + $0x6c8] sm:$0xff] }
 0x3d3   :  { %5851 = vmatpush.msrb.mxu1 %v5850_v10  ;;  %5910 = vmatpush.msra.mxu2 %v12950_v40  ;;  %v15515_v10 = vand.u32 4294901760, %v13035_v20  ;;  %v15518_v8 = vand.u32 4294901760, %v13043_v19 }
 0x3d4   :  { %5750 = vmatpush.msrb.mxu0 %v12896_v60  ;;  %5950 = vmatpush.msra.mxu3 %v12922_v37  ;;  %15853 = vst [vmem:[#allocation44_spill] sm:$0xff] %v13085_v50 }
 0x3d5   :  { %5857 = vmatpush.msrb.mxu1 %v5856_v47  ;;  %5913 = vmatpush.msra.mxu2 %v12968_v21  ;;  %v3650_v47 = vld [vmem:[#allocation10 + $0x728] sm:$0xff]  ;;  %v6118_v23 = vsub.f32 %v13035_v20, %v15515_v10  ;;  %v6124_v29 = vsub.f32 %v13043_v19, %v15518_v8 }
 0x3d6   :  { %5752 = vmatpush.msrb.mxu0 %v12910_v63  ;;  %5952 = vmatpush.msra.mxu3 %v12925_v24  ;;  %v13077_v4 = vand.u32 4294901760, %v3650_v47  ;;  %v3642_v10 = vld [vmem:[#allocation10 + $0x6e8] sm:$0xff] }
 0x3d7   :  { %5863 = vmatpush.msrb.mxu1 %v5862_v39  ;;  %5916 = vmatpush.msra.mxu2 %v12980_v26  ;;  %v13072_v39 = vsub.f32 %v3658_v42, %v13051_v44  ;;  %v6119_v48 = vand.u32 4294901760, %v6118_v23  ;;  %v13103_v28 = vand.u32 4294901760, %v3642_v10 }
 0x3d8   :  { %5754 = vmatpush.msrb.mxu0 %v12922_v37  ;;  %5954 = vmatpush.msra.mxu3 %v12946_v11  ;;  %v5011_v7 = vpop.f32.mrf.mxu2  ;;  %v13101_v53 = vsub.f32 %v3650_v47, %v13077_v4 }
 0x3d9   :  { %5869 = vmatpush.msrb.mxu1 %v5868_v61  ;;  %5919 = vmatpush.msra.mxu2 %v12992_v38  ;;  %15851 = vst [vmem:[#allocation26_spill] sm:$0xff] %v13072_v39  ;;  %v15852_v61 = vld [vmem:[#allocation37_spill] sm:$0xff]  ;;  %v13126_v2 = vsub.f32 %v3642_v10, %v13103_v28 }
 0x3da   :  { %5756 = vmatpush.msrb.mxu0 %v12925_v24  ;;  %5956 = vmatpush.msra.mxu3 %v12958_v12  ;;  %v4903_v32 = vpop.f32.mrf.mxu0 }
 0x3db   :  { %5871 = vmatmul.f32.vlgmr.msrb.gmra.mxu1 %v15852_v61  ;;  %5922 = vmatpush.msra.mxu2 %v13002_v18  ;;  %v4904_v42 = vadd.f32 %v4903_v32, %v4850_v0  ;;  %v15856_v0 = vld [vmem:[#allocation23_spill] sm:$0xff]  ;;  %v13116_v18 = vand.u32 4294901760, %v3638_v45 }
 0x3dc   :  { %6038 = vmatpush.msra.mxu1 %v12802_v3  ;;  %5758 = vmatpush.msrb.mxu0 %v12946_v11  ;;  %v15855_v3 = vand.u32 4294901760, %v13056_v46 }
 0x3dd   :  { %5958 = vmatpush.msra.mxu3 %v12970_v49  ;;  %5925 = vmatmul.f32.vlgmr.msra.gmra.mxu2 %v15854_v33  ;;  %v4943_v8 = vadd.f32 %v4942_v56, %v4904_v42  ;;  %v6125_v56 = vand.u32 4294901760, %v6124_v29  ;;  %v3634_v42 = vld [vmem:[#allocation10 + $0x6a8] sm:$0xff]  ;;  %v5048_v33 = vpop.f32.mrf.mxu3  ;;  %v13138_v10 = vsub.f32 %v3638_v45, %v13116_v18 }
 0x3de   :  { %6040 = vmatpush.msra.mxu1 %v12809_v51  ;;  %6075 = vmatpush.msrb.mxu2 %v13018_v41  ;;  %v6130_v32 = vsub.f32 %v13056_v46, %v15855_v3  ;;  %v15857_v3 = vand.u32 4294901760, %v13065_v22  ;;  %v3630_v51 = vld [vmem:[#allocation10 + $0x688] sm:$0xff] }
 0x3df   :  { %5760 = vmatpush.msrb.mxu0 %v12958_v12  ;;  %5960 = vmatpush.msra.mxu3 %v12982_v55  ;;  %v5012_v23 = vadd.f32 %v5011_v7, %v4943_v8  ;;  %v15858_v8 = vand.u32 4294901760, %v13072_v39  ;;  %v3618_v45 = vld [vmem:[#allocation10 + $0x628] sm:$0xff] }
 0x3e0   :  { %5964 = vmatmul.f32.vlgmr.msra.gmra.mxu3 %v15856_v0  ;;  %6042 = vmatpush.msra.mxu1 %v12819_v13  ;;  %v6136_v47 = vsub.f32 %v13065_v22, %v15857_v3  ;;  %v6131_v13 = vand.u32 4294901760, %v6130_v32  ;;  %v13128_v0 = vand.u32 4294901760, %v3634_v42  ;;  %v13140_v3 = vand.u32 4294901760, %v3630_v51 }
 0x3e1   :  { %6077 = vmatpush.msrb.mxu2 %v13026_v58  ;;  %6120 = vmatpush.msrb.mxu3 %v6119_v48  ;;  %v5049_v7 = vadd.f32 %v5048_v33, %v5012_v23  ;;  %v6142_v29 = vsub.f32 %v13072_v39, %v15858_v8  ;;  %v15859_v33 = vand.u32 4294901760, %v13085_v50  ;;  %v3626_v8 = vld [vmem:[#allocation10 + $0x668] sm:$0xff] }
 0x3e2   :  { %5762 = vmatpush.msrb.mxu0 %v12970_v49  ;;  %6044 = vmatpush.msra.mxu1 %v12829_v25  ;;  %v6137_v25 = vand.u32 4294901760, %v6136_v47  ;;  %v15860_v39 = vld [vmem:[#allocation20_spill] sm:$0xff]  ;;  %v13151_v32 = vsub.f32 %v3634_v42, %v13128_v0  ;;  %v13164_v42 = vsub.f32 %v3630_v51, %v13140_v3 }
 0x3e3   :  { %6079 = vmatpush.msrb.mxu2 %v13039_v1  ;;  %6126 = vmatpush.msrb.mxu3 %v6125_v56  ;;  %v9143_v48 = vmax.f32 %v5049_v7, 0.0  ;;  %v6148_v23 = vsub.f32 %v13085_v50, %v15859_v33  ;;  %v6143_v56 = vand.u32 4294901760, %v6142_v29  ;;  %v3622_v7 = vld [vmem:[#allocation10 + $0x648] sm:$0xff]  ;;  %v15861_v33 = vand.u32 4294901760, %v12817_v62 }
 0x3e4   :  { %5764 = vmatpush.msrb.mxu0 %v12982_v55  ;;  %6046 = vmatpush.msra.mxu1 %v12840_v16  ;;  %v15862_v16 = vand.u32 4294901760, %v13101_v53  ;;  %v13153_v50 = vand.u32 4294901760, %v3626_v8  ;;  %v15863_v62 = vand.u32 4294901760, %v12827_v59  ;;  %v15865_v59 = vand.u32 4294901760, %v12838_v14 }
 0x3e5   :  { %5770 = vmatmul.f32.vlgmr.msrb.gmra.mxu0 %v15860_v39  ;;  %6081 = vmatpush.msrb.mxu2 %v13047_v43  ;;  %9147 = vst [vmem:[#allocation14] sm:$0xff] %v9143_v48  ;;  %v6149_v29 = vand.u32 4294901760, %v6148_v23  ;;  %v15866_v23 = vand.u32 4294901760, %v13126_v2  ;;  %v15867_v14 = vand.u32 4294901760, %v12849_v35  ;;  %v15868_v35 = vand.u32 4294901760, %v12863_v6  ;;  %v3499_v39 = vld [vmem:[#allocation10 + $0x270] sm:$0xff] }
 0x3e6   :  { %5971 = vmatpush.msra.mxu0 %v15861_v33  ;;  %6132 = vmatpush.msrb.mxu3 %v6131_v13  ;;  %v6154_v47 = vsub.f32 %v13101_v53, %v15862_v16  ;;  %v15864_v13 = vand.u32 4294901760, %v13114_v5  ;;  %v6171_v33 = vand.u32 4294901760, %v13138_v10  ;;  %v13166_v16 = vand.u32 4294901760, %v3622_v7 }
 0x3e7   :  { %6048 = vmatpush.msra.mxu1 %v12854_v17  ;;  %6083 = vmatpush.msrb.mxu2 %v13051_v44  ;;  %v13177_v51 = vsub.f32 %v3626_v8, %v13153_v50 }
 0x3e8   :  { %5975 = vmatpush.msra.mxu0 %v15863_v62  ;;  %6138 = vmatpush.msrb.mxu3 %v6137_v25  ;;  %v6160_v48 = vsub.f32 %v13114_v5, %v15864_v13  ;;  %v6155_v17 = vand.u32 4294901760, %v6154_v47  ;;  %v6166_v25 = vsub.f32 %v13126_v2, %v15866_v23  ;;  %v6177_v62 = vand.u32 4294901760, %v13151_v32  ;;  %v3614_v13 = vld [vmem:[#allocation10 + $0x608] sm:$0xff] }
 0x3e9   :  { %6050 = vmatpush.msra.mxu1 %v12865_v34  ;;  %6085 = vmatpush.msrb.mxu2 %v13060_v57  ;;  %v13181_v34 = vand.u32 4294901760, %v3618_v45  ;;  %v6172_v47 = vsub.f32 %v13138_v10, %v6171_v33  ;;  %v13190_v8 = vsub.f32 %v3622_v7, %v13166_v16  ;;  %v6189_v23 = vand.u32 4294901760, %v13177_v51 }
 0x3ea   :  { %5979 = vmatpush.msra.mxu0 %v15865_v59  ;;  %6144 = vmatpush.msrb.mxu3 %v6143_v56  ;;  %v6161_v56 = vand.u32 4294901760, %v6160_v48  ;;  %v6183_v59 = vand.u32 4294901760, %v13164_v42  ;;  %v6178_v48 = vsub.f32 %v13151_v32, %v6177_v62  ;;  %v15869_v7 = vand.u32 4294901760, %v12880_v54 }
 0x3eb   :  { %6052 = vmatpush.msra.mxu1 %v12882_v36  ;;  %6087 = vmatpush.msrb.mxu2 %v13077_v4  ;;  %v13194_v36 = vand.u32 4294901760, %v3614_v13  ;;  %v6173_v6 = vand.u32 4294901760, %v6172_v47 }
 0x3ec   :  { %5983 = vmatpush.msra.mxu0 %v15867_v14  ;;  %6150 = vmatpush.msrb.mxu3 %v6149_v29  ;;  %v6167_v29 = vand.u32 4294901760, %v6166_v25  ;;  %v6195_v25 = vand.u32 4294901760, %v13190_v8  ;;  %v6179_v54 = vand.u32 4294901760, %v6178_v48  ;;  %v6190_v14 = vsub.f32 %v13177_v51, %v6189_v23 }
 0x3ed   :  { %6054 = vmatpush.msra.mxu1 %v12896_v60  ;;  %6089 = vmatpush.msrb.mxu2 %v13090_v31  ;;  %v13205_v60 = vsub.f32 %v3618_v45, %v13181_v34  ;;  %v15870_v45 = vand.u32 4294901760, %v12891_v9  ;;  %v15875_v48 = vand.u32 4294901760, %v12950_v40  ;;  %v15879_v40 = vand.u32 4294901760, %v12980_v26  ;;  %v15884_v26 = vld [vmem:[#allocation27_spill] sm:$0xff] }
 0x3ee   :  { %5987 = vmatpush.msra.mxu0 %v15868_v35  ;;  %6156 = vmatpush.msrb.mxu3 %v6155_v17  ;;  %v6184_v17 = vsub.f32 %v13164_v42, %v6183_v59  ;;  %v6196_v9 = vsub.f32 %v13190_v8, %v6195_v25  ;;  %v6191_v35 = vand.u32 4294901760, %v6190_v14  ;;  %v15886_v14 = vand.u32 4294901760, %v13065_v22 }
 0x3ef   :  { %6056 = vmatpush.msra.mxu1 %v12910_v63  ;;  %6091 = vmatpush.msrb.mxu2 %v13103_v28  ;;  %v13216_v63 = vsub.f32 %v3614_v13, %v13194_v36 }
 0x3f0   :  { %5991 = vmatpush.msra.mxu0 %v15869_v7  ;;  %6162 = vmatpush.msrb.mxu3 %v6161_v56  ;;  %v15871_v56 = vand.u32 4294901760, %v12908_v15  ;;  %v6185_v13 = vand.u32 4294901760, %v6184_v17  ;;  %v15877_v7 = vld [vmem:[#allocation39_spill] sm:$0xff]  ;;  %v15881_v17 = vand.u32 4294901760, %v13043_v19 }
 0x3f1   :  { %6058 = vmatpush.msra.mxu1 %v12922_v37  ;;  %6093 = vmatpush.msrb.mxu2 %v13116_v18  ;;  %v6201_v37 = vand.u32 4294901760, %v13205_v60  ;;  %v6207_v47 = vand.u32 4294901760, %v13216_v63 }
 0x3f2   :  { %5995 = vmatpush.msra.mxu0 %v15870_v45  ;;  %6168 = vmatpush.msrb.mxu3 %v6167_v29  ;;  %v15873_v29 = vand.u32 4294901760, %v12934_v30  ;;  %v15883_v45 = vand.u32 4294901760, %v13056_v46 }
 0x3f3   :  { %6060 = vmatpush.msra.mxu1 %v12925_v24  ;;  %6095 = vmatpush.msrb.mxu2 %v13128_v0  ;;  %v15872_v24 = vand.u32 4294901760, %v12920_v52  ;;  %v6202_v15 = vsub.f32 %v13205_v60, %v6201_v37  ;;  %v6208_v52 = vsub.f32 %v13216_v63, %v6207_v47 }
 0x3f4   :  { %5999 = vmatpush.msra.mxu0 %v15871_v56  ;;  %6174 = vmatpush.msrb.mxu3 %v6173_v6  ;;  %v15880_v6 = vld [vmem:[#allocation42_spill] sm:$0xff]  ;;  %v15889_v56 = vld [vmem:[#allocation44_spill] sm:$0xff] }
 0x3f5   :  { %6062 = vmatpush.msra.mxu1 %v12946_v11  ;;  %6097 = vmatpush.msrb.mxu2 %v13140_v3  ;;  %v6197_v11 = vand.u32 4294901760, %v6196_v9  ;;  %v6203_v30 = vand.u32 4294901760, %v6202_v15  ;;  %v3479_v9 = vld [vmem:[#allocation10 + $0x1d0] sm:$0xff] }
 0x3f6   :  { %6003 = vmatpush.msra.mxu0 %v15872_v24  ;;  %6180 = vmatpush.msrb.mxu3 %v6179_v54  ;;  %v15885_v54 = vand.u32 4294901760, %v15884_v26 }
 0x3f7   :  { %6064 = vmatpush.msra.mxu1 %v12958_v12  ;;  %6099 = vmatpush.msrb.mxu2 %v13153_v50  ;;  %v15874_v12 = vand.u32 4294901760, %v12944_v27  ;;  %v15876_v27 = vand.u32 4294901760, %v12968_v21  ;;  %v15882_v21 = vand.u32 4294901760, %v12992_v38  ;;  %v15887_v38 = vld [vmem:[#allocation26_spill] sm:$0xff] }
 0x3f8   :  { %6007 = vmatpush.msra.mxu0 %v15873_v29  ;;  %6186 = vmatpush.msrb.mxu3 %v6185_v13  ;;  %v15890_v13 = vand.u32 4294901760, %v15889_v56 }
 0x3f9   :  { %6066 = vmatpush.msra.mxu1 %v12970_v49  ;;  %6101 = vmatpush.msrb.mxu2 %v13166_v16  ;;  %v6209_v49 = vand.u32 4294901760, %v6208_v52  ;;  %v3463_v52 = vld [vmem:[#allocation10 + $0x150] sm:$0xff] }
 0x3fa   :  { %6011 = vmatpush.msra.mxu0 %v15874_v12  ;;  %6192 = vmatpush.msrb.mxu3 %v6191_v35  ;;  %v3459_v12 = vld [vmem:[#allocation10 + $0x130] sm:$0xff] }
 0x3fb   :  { %6068 = vmatpush.msra.mxu1 %v12982_v55  ;;  %6103 = vmatpush.msrb.mxu2 %v13181_v34  ;;  %v15878_v55 = vand.u32 4294901760, %v13035_v20 }
 0x3fc   :  { %6015 = vmatpush.msra.mxu0 %v15875_v48  ;;  %6198 = vmatpush.msrb.mxu3 %v6197_v11  ;;  %v13357_v48 = vand.u32 4294901760, %v3459_v12 }
 0x3fd   :  { %6070 = vmatmul.f32.vlgmr.msra.gmra.mxu1 %v15852_v61  ;;  %6105 = vmatpush.msrb.mxu2 %v13194_v36 }
 0x3fe   :  { %6271 = vmatpush.msrb.mxu1 %v13018_v41  ;;  %6019 = vmatpush.msra.mxu0 %v15876_v27 }
 0x3ff   :  { %6204 = vmatpush.msrb.mxu3 %v6203_v30  ;;  %6111 = vmatmul.f32.vlgmr.msrb.gmra.mxu2 %v15877_v7  ;;  %v3455_v30 = vld [vmem:[#allocation10 + $0x110] sm:$0xff] }
 0x400   :  { %6273 = vmatpush.msrb.mxu1 %v13026_v58  ;;  %6312 = vmatpush.msra.mxu2 %v15878_v55  ;;  %v13383_v55 = vsub.f32 %v3459_v12, %v13357_v48  ;;  %v3503_v7 = vld [vmem:[#allocation10 + $0x290] sm:$0xff] }
 0x401   :  { %6023 = vmatpush.msra.mxu0 %v15879_v40  ;;  %6210 = vmatpush.msrb.mxu3 %v6209_v49  ;;  %v3451_v49 = vld [vmem:[#allocation10 + $0xf0] sm:$0xff] }
 0x402   :  { %6212 = vmatmul.f32.vlgmr.msrb.gmra.mxu3 %v15880_v6  ;;  %6275 = vmatpush.msrb.mxu1 %v13039_v1  ;;  %v3447_v40 = vld [vmem:[#allocation10 + $0xd0] sm:$0xff] }
 0x403   :  { %6316 = vmatpush.msra.mxu2 %v15881_v17  ;;  %6379 = vmatpush.msra.mxu3 %v13018_v41  ;;  %v15888_v41 = vand.u32 4294901760, %v15887_v38  ;;  %v13402_v26 = vand.u32 4294901760, %v3447_v40 }
 0x404   :  { %6027 = vmatpush.msra.mxu0 %v15882_v21  ;;  %6277 = vmatpush.msrb.mxu1 %v13047_v43  ;;  %v3443_v21 = vld [vmem:[#allocation10 + $0xb0] sm:$0xff] }
 0x405   :  { %6320 = vmatpush.msra.mxu2 %v15883_v45  ;;  %6381 = vmatpush.msra.mxu3 %v13026_v58  ;;  %v3483_v58 = vld [vmem:[#allocation10 + $0x1f0] sm:$0xff]  ;;  %v15894_v45 = vld [vmem:[#allocation24_spill] sm:$0xff] }
 0x406   :  { %6031 = vmatpush.msra.mxu0 %v15885_v54  ;;  %6279 = vmatpush.msrb.mxu1 %v13051_v44  ;;  %v15535_v54 = vand.u32 4294901760, %v13383_v55 }
 0x407   :  { %6033 = vmatmul.f32.vlgmr.msra.gmra.mxu0 %v15852_v61  ;;  %6324 = vmatpush.msra.mxu2 %v15886_v14  ;;  %v3439_v14 = vld [vmem:[#allocation10 + $0x90] sm:$0xff] }
 0x408   :  { %6218 = vmatpush.msrb.mxu0 %v13035_v20  ;;  %6383 = vmatpush.msra.mxu3 %v13039_v1  ;;  %v13294_v1 = vand.u32 4294901760, %v3483_v58  ;;  %v15891_v20 = vand.u32 4294901760, %v13101_v53  ;;  %v15905_v61 = vld [vmem:[#allocation33_spill] sm:$0xff] }
 0x409   :  { %6281 = vmatpush.msrb.mxu1 %v13060_v57  ;;  %6328 = vmatpush.msra.mxu2 %v15888_v41 }
 0x40a   :  { %6221 = vmatpush.msrb.mxu0 %v13043_v19  ;;  %6385 = vmatpush.msra.mxu3 %v13047_v43  ;;  %v3475_v19 = vld [vmem:[#allocation10 + $0x1b0] sm:$0xff]  ;;  %v13301_v43 = vand.u32 4294901760, %v3479_v9  ;;  %v13309_v24 = vsub.f32 %v3483_v58, %v13294_v1 }
 0x40b   :  { %6283 = vmatpush.msrb.mxu1 %v13077_v4  ;;  %6332 = vmatpush.msra.mxu2 %v15890_v13  ;;  %v13311_v35 = vand.u32 4294901760, %v3475_v19  ;;  %v3435_v58 = vld [vmem:[#allocation10 + $0x70] sm:$0xff]  ;;  %v13426_v13 = vand.u32 4294901760, %v3439_v14 }
 0x40c   :  { %6224 = vmatpush.msrb.mxu0 %v13056_v46  ;;  %6387 = vmatpush.msra.mxu3 %v13051_v44  ;;  %v15892_v46 = vand.u32 4294901760, %v13114_v5  ;;  %v3471_v44 = vld [vmem:[#allocation10 + $0x190] sm:$0xff]  ;;  %v13319_v15 = vsub.f32 %v3479_v9, %v13301_v43 }
 0x40d   :  { %6285 = vmatpush.msrb.mxu1 %v13090_v31  ;;  %6336 = vmatpush.msra.mxu2 %v15891_v20  ;;  %v13321_v29 = vand.u32 4294901760, %v3471_v44  ;;  %v13330_v11 = vsub.f32 %v3475_v19, %v13311_v35  ;;  %v6495_v20 = vsub.f32 %v13383_v55, %v15535_v54  ;;  %v13448_v12 = vsub.f32 %v3439_v14, %v13426_v13  ;;  %v3519_v54 = vld [vmem:[#allocation10 + $0x310] sm:$0xff] }
 0x40e   :  { %6227 = vmatpush.msrb.mxu0 %v13065_v22  ;;  %6389 = vmatpush.msra.mxu3 %v13060_v57  ;;  %v15893_v57 = vand.u32 4294901760, %v13126_v2  ;;  %v3467_v22 = vld [vmem:[#allocation10 + $0x170] sm:$0xff] }
 0x40f   :  { %6287 = vmatpush.msrb.mxu1 %v13103_v28  ;;  %6340 = vmatpush.msra.mxu2 %v15892_v46  ;;  %v13438_v46 = vand.u32 4294901760, %v3435_v58 }
 0x410   :  { %6230 = vmatpush.msrb.mxu0 %v15887_v38  ;;  %6391 = vmatpush.msra.mxu3 %v13077_v4  ;;  %v15542_v4 = vand.u32 4294901760, %v13309_v24  ;;  %v13414_v38 = vand.u32 4294901760, %v3443_v21 }
 0x411   :  { %6289 = vmatpush.msrb.mxu1 %v13116_v18  ;;  %6344 = vmatpush.msra.mxu2 %v15893_v57  ;;  %v3427_v57 = vld [vmem:[#allocation10 + $0x30] sm:$0xff] }
 0x412   :  { %6233 = vmatpush.msrb.mxu0 %v15889_v56  ;;  %6393 = vmatpush.msra.mxu3 %v13090_v31  ;;  %v13332_v31 = vand.u32 4294901760, %v3467_v22  ;;  %v13424_v56 = vsub.f32 %v3447_v40, %v13402_v26  ;;  %v13436_v19 = vsub.f32 %v3443_v21, %v13414_v38  ;;  %v13462_v40 = vand.u32 4294901760, %v3427_v57 }
 0x413   :  { %6291 = vmatpush.msrb.mxu1 %v13128_v0  ;;  %6348 = vmatpush.msra.mxu2 %v6171_v33  ;;  %v13346_v33 = vand.u32 4294901760, %v3463_v52 }
 0x414   :  { %6236 = vmatpush.msrb.mxu0 %v13101_v53  ;;  %6395 = vmatpush.msra.mxu3 %v13103_v28  ;;  %v15541_v28 = vand.u32 4294901760, %v13319_v15  ;;  %v13341_v53 = vsub.f32 %v3471_v44, %v13321_v29 }
 0x415   :  { %6293 = vmatpush.msrb.mxu1 %v13140_v3  ;;  %6352 = vmatpush.msra.mxu2 %v6177_v62  ;;  %v13355_v62 = vsub.f32 %v3467_v22, %v13332_v31 }
 0x416   :  { %6239 = vmatpush.msrb.mxu0 %v13114_v5  ;;  %6397 = vmatpush.msra.mxu3 %v13116_v18  ;;  %v6459_v5 = vsub.f32 %v13309_v24, %v15542_v4  ;;  %v15540_v18 = vand.u32 4294901760, %v13330_v11 }
 0x417   :  { %6295 = vmatpush.msrb.mxu1 %v13153_v50  ;;  %6356 = vmatpush.msra.mxu2 %v6183_v59  ;;  %v13368_v59 = vand.u32 4294901760, %v3455_v30  ;;  %v15537_v27 = vand.u32 4294901760, %v13355_v62 }
 0x418   :  { %6242 = vmatpush.msrb.mxu0 %v13126_v2  ;;  %6399 = vmatpush.msra.mxu3 %v13128_v0  ;;  %v6465_v0 = vsub.f32 %v13319_v15, %v15541_v28  ;;  %v15539_v2 = vand.u32 4294901760, %v13341_v53  ;;  %v15899_v28 = vld [vmem:[#allocation47_spill] sm:$0xff] }
 0x419   :  { %6297 = vmatpush.msrb.mxu1 %v13166_v16  ;;  %6360 = vmatpush.msra.mxu2 %v6189_v23  ;;  %v13374_v23 = vsub.f32 %v3463_v52, %v13346_v33  ;;  %v13396_v17 = vsub.f32 %v3455_v30, %v13368_v59  ;;  %v15532_v52 = vand.u32 4294901760, %v13424_v56 }
 0x41a   :  { %6245 = vmatpush.msrb.mxu0 %v13138_v10  ;;  %6401 = vmatpush.msra.mxu3 %v13140_v3  ;;  %v6460_v3 = vand.u32 4294901760, %v6459_v5  ;;  %v6471_v10 = vsub.f32 %v13330_v11, %v15540_v18  ;;  %v3423_v5 = vld [vmem:[#allocation10 + $0x10] sm:$0xff]  ;;  %v13582_v18 = vand.u32 4294901760, %v3519_v54 }
 0x41b   :  { %6299 = vmatpush.msrb.mxu1 %v13181_v34  ;;  %6364 = vmatpush.msra.mxu2 %v6195_v25  ;;  %v13388_v25 = vand.u32 4294901760, %v3451_v49  ;;  %v15534_v41 = vand.u32 4294901760, %v13396_v17 }
 0x41c   :  { %6248 = vmatpush.msrb.mxu0 %v13151_v32  ;;  %6403 = vmatpush.msra.mxu3 %v13153_v50  ;;  %v6466_v50 = vand.u32 4294901760, %v6465_v0  ;;  %v6477_v32 = vsub.f32 %v13341_v53, %v15539_v2  ;;  %v15895_v0 = vld [vmem:[#allocation43_spill] sm:$0xff] }
 0x41d   :  { %6301 = vmatpush.msrb.mxu1 %v13194_v36  ;;  %6368 = vmatpush.msra.mxu2 %v6201_v37  ;;  %v15536_v37 = vand.u32 4294901760, %v13374_v23  ;;  %v6501_v44 = vsub.f32 %v13396_v17, %v15534_v41  ;;  %v3523_v41 = vld [vmem:[#allocation10 + $0x330] sm:$0xff] }
 0x41e   :  { %6251 = vmatpush.msrb.mxu0 %v13164_v42  ;;  %6405 = vmatpush.msra.mxu3 %v13166_v16  ;;  %v6472_v42 = vand.u32 4294901760, %v6471_v10  ;;  %v6483_v16 = vsub.f32 %v13355_v62, %v15537_v27  ;;  %v13460_v10 = vsub.f32 %v3435_v58, %v13438_v46  ;;  %v13484_v58 = vsub.f32 %v3427_v57, %v13462_v40 }
 0x41f   :  { %6305 = vmatmul.f32.vlgmr.msrb.gmra.mxu1 %v15894_v45  ;;  %6372 = vmatpush.msra.mxu2 %v6207_v47  ;;  %v13412_v47 = vsub.f32 %v3451_v49, %v13388_v25  ;;  %v13569_v27 = vand.u32 4294901760, %v3523_v41 }
 0x420   :  { %6461 = vmatpush.msra.mxu1 %v6460_v3  ;;  %6254 = vmatpush.msrb.mxu0 %v13177_v51  ;;  %v6478_v51 = vand.u32 4294901760, %v6477_v32  ;;  %v6484_v9 = vand.u32 4294901760, %v6483_v16  ;;  %v15530_v3 = vand.u32 4294901760, %v13436_v19  ;;  %v15528_v32 = vand.u32 4294901760, %v13448_v12 }
 0x421   :  { %6407 = vmatpush.msra.mxu3 %v13181_v34  ;;  %6374 = vmatmul.f32.vlgmr.msra.gmra.mxu2 %v15880_v6  ;;  %v6489_v34 = vsub.f32 %v13374_v23, %v15536_v37  ;;  %v13593_v2 = vsub.f32 %v3523_v41, %v13569_v27  ;;  %v13606_v41 = vsub.f32 %v3519_v54, %v13582_v18 }
 0x422   :  { %6467 = vmatpush.msra.mxu1 %v6466_v50  ;;  %6559 = vmatpush.msrb.mxu2 %v13309_v24  ;;  %v6513_v50 = vsub.f32 %v13424_v56, %v15532_v52  ;;  %v6519_v14 = vsub.f32 %v13436_v19, %v15530_v3  ;;  %v3531_v3 = vld [vmem:[#allocation10 + $0x370] sm:$0xff] }
 0x423   :  { %6257 = vmatpush.msrb.mxu0 %v13190_v8  ;;  %6409 = vmatpush.msra.mxu3 %v13194_v36  ;;  %v3431_v8 = vld [vmem:[#allocation10 + $0x50] sm:$0xff]  ;;  %v15533_v36 = vand.u32 4294901760, %v13412_v47  ;;  %v6490_v22 = vand.u32 4294901760, %v6489_v34 }
 0x424   :  { %6411 = vmatmul.f32.vlgmr.msra.gmra.mxu3 %v15880_v6  ;;  %6473 = vmatpush.msra.mxu1 %v6472_v42  ;;  %v13450_v30 = vand.u32 4294901760, %v3431_v8  ;;  %v13474_v42 = vand.u32 4294901760, %v3423_v5  ;;  %v6514_v34 = vand.u32 4294901760, %v6513_v50  ;;  %v6520_v57 = vand.u32 4294901760, %v6519_v14 }
 0x425   :  { %6562 = vmatpush.msrb.mxu2 %v13319_v15  ;;  %6612 = vmatpush.msrb.mxu3 %v13294_v1  ;;  %v6507_v49 = vsub.f32 %v13412_v47, %v15533_v36 }
 0x426   :  { %6260 = vmatpush.msrb.mxu0 %v13205_v60  ;;  %6479 = vmatpush.msra.mxu1 %v6478_v51  ;;  %v6496_v60 = vand.u32 4294901760, %v6495_v20  ;;  %v13472_v21 = vsub.f32 %v3431_v8, %v13450_v30  ;;  %v15526_v51 = vand.u32 4294901760, %v13460_v10  ;;  %v13494_v8 = vsub.f32 %v3423_v5, %v13474_v42  ;;  %v3543_v5 = vld [vmem:[#allocation10 + $0x3d0] sm:$0xff] }
 0x427   :  { %6565 = vmatpush.msrb.mxu2 %v13330_v11  ;;  %6614 = vmatpush.msrb.mxu3 %v13301_v43  ;;  %v6508_v16 = vand.u32 4294901760, %v6507_v49 }
 0x428   :  { %6263 = vmatpush.msrb.mxu0 %v13216_v63  ;;  %6485 = vmatpush.msra.mxu1 %v6484_v9  ;;  %v6502_v63 = vand.u32 4294901760, %v6501_v44  ;;  %v6525_v9 = vsub.f32 %v13448_v12, %v15528_v32  ;;  %v15527_v20 = vand.u32 4294901760, %v13472_v21  ;;  %v3547_v44 = vld [vmem:[#allocation10 + $0x3f0] sm:$0xff]  ;;  %v15531_v50 = vand.u32 4294901760, %v13494_v8 }
 0x429   :  { %6266 = vmatmul.f32.vlgmr.msrb.gmra.mxu0 %v15895_v0  ;;  %6568 = vmatpush.msrb.mxu2 %v13341_v53  ;;  %v3535_v32 = vld [vmem:[#allocation10 + $0x390] sm:$0xff] }
 0x42a   :  { %6416 = vmatpush.msra.mxu0 %v13294_v1  ;;  %6616 = vmatpush.msrb.mxu3 %v13311_v35  ;;  %v6526_v49 = vand.u32 4294901760, %v6525_v9  ;;  %v13518_v9 = vand.u32 4294901760, %v3543_v5 }
 0x42b   :  { %6491 = vmatpush.msra.mxu1 %v6490_v22  ;;  %6571 = vmatpush.msrb.mxu2 %v13355_v62  ;;  %v6531_v22 = vsub.f32 %v13460_v10, %v15526_v51  ;;  %v3539_v51 = vld [vmem:[#allocation10 + $0x3b0] sm:$0xff] }
 0x42c   :  { %6418 = vmatpush.msra.mxu0 %v13301_v43  ;;  %6618 = vmatpush.msrb.mxu3 %v13321_v29 }
 0x42d   :  { %6497 = vmatpush.msra.mxu1 %v6496_v60  ;;  %6574 = vmatpush.msrb.mxu2 %v13374_v23  ;;  %v15529_v60 = vand.u32 4294901760, %v13484_v58  ;;  %v6532_v14 = vand.u32 4294901760, %v6531_v22 }
 0x42e   :  { %6420 = vmatpush.msra.mxu0 %v13311_v35  ;;  %6620 = vmatpush.msrb.mxu3 %v13332_v31 }
 0x42f   :  { %6503 = vmatpush.msra.mxu1 %v6502_v63  ;;  %6577 = vmatpush.msrb.mxu2 %v13383_v55  ;;  %v6537_v63 = vsub.f32 %v13472_v21, %v15527_v20 }
 0x430   :  { %6422 = vmatpush.msra.mxu0 %v13321_v29  ;;  %6622 = vmatpush.msrb.mxu3 %v13346_v33 }
 0x431   :  { %6509 = vmatpush.msra.mxu1 %v6508_v16  ;;  %6580 = vmatpush.msrb.mxu2 %v13396_v17  ;;  %v13510_v16 = vand.u32 4294901760, %v3547_v44  ;;  %v6538_v20 = vand.u32 4294901760, %v6537_v63  ;;  %v13535_v63 = vsub.f32 %v3543_v5, %v13518_v9 }
 0x432   :  { %6424 = vmatpush.msra.mxu0 %v13332_v31  ;;  %6624 = vmatpush.msrb.mxu3 %v13357_v48 }
 0x433   :  { %6515 = vmatpush.msra.mxu1 %v6514_v34  ;;  %6583 = vmatpush.msrb.mxu2 %v13412_v47  ;;  %v6543_v34 = vsub.f32 %v13484_v58, %v15529_v60  ;;  %v13527_v22 = vsub.f32 %v3547_v44, %v13510_v16  ;;  %v13531_v60 = vand.u32 4294901760, %v3539_v51  ;;  %v13539_v44 = vand.u32 4294901760, %v3535_v32 }
 0x434   :  { %6426 = vmatpush.msra.mxu0 %v13346_v33  ;;  %6626 = vmatpush.msrb.mxu3 %v13368_v59 }
 0x435   :  { %6521 = vmatpush.msra.mxu1 %v6520_v57  ;;  %6586 = vmatpush.msrb.mxu2 %v13424_v56  ;;  %v6549_v57 = vsub.f32 %v13494_v8, %v15531_v50  ;;  %v3527_v50 = vld [vmem:[#allocation10 + $0x350] sm:$0xff]  ;;  %v15538_v36 = vand.u32 4294901760, %v13527_v22  ;;  %v13548_v5 = vsub.f32 %v3539_v51, %v13531_v60 }
 0x436   :  { %6428 = vmatpush.msra.mxu0 %v13357_v48  ;;  %6628 = vmatpush.msrb.mxu3 %v13388_v25 }
 0x437   :  { %6527 = vmatpush.msra.mxu1 %v6526_v49  ;;  %6589 = vmatpush.msrb.mxu2 %v13436_v19  ;;  %v6544_v49 = vand.u32 4294901760, %v6543_v34  ;;  %v6550_v52 = vand.u32 4294901760, %v6549_v57  ;;  %v15543_v34 = vand.u32 4294901760, %v13535_v63  ;;  %v13557_v57 = vsub.f32 %v3535_v32, %v13539_v44  ;;  %v15897_v32 = vld [vmem:[#allocation46_spill] sm:$0xff] }
 0x438   :  { %6430 = vmatpush.msra.mxu0 %v13368_v59  ;;  %6630 = vmatpush.msrb.mxu3 %v13402_v26  ;;  %v6800_v51 = vsub.f32 %v13527_v22, %v15538_v36  ;;  %v3515_v36 = vld [vmem:[#allocation10 + $0x2f0] sm:$0xff] }
 0x439   :  { %6533 = vmatpush.msra.mxu1 %v6532_v14  ;;  %6592 = vmatpush.msrb.mxu2 %v13448_v12  ;;  %v13543_v14 = vand.u32 4294901760, %v3531_v3  ;;  %v13595_v0 = vand.u32 4294901760, %v3515_v36  ;;  %v15902_v45 = vand.u32 4294901760, %v13557_v57 }
 0x43a   :  { %6432 = vmatpush.msra.mxu0 %v13388_v25  ;;  %6632 = vmatpush.msrb.mxu3 %v13414_v38  ;;  %v6801_v4 = vand.u32 4294901760, %v6800_v51 }
 0x43b   :  { %6539 = vmatpush.msra.mxu1 %v6538_v20  ;;  %6595 = vmatpush.msrb.mxu2 %v13460_v10  ;;  %v13552_v20 = vand.u32 4294901760, %v3527_v50  ;;  %v13618_v54 = vsub.f32 %v3515_v36, %v13595_v0 }
 0x43c   :  { %6434 = vmatpush.msra.mxu0 %v13402_v26  ;;  %6634 = vmatpush.msrb.mxu3 %v13426_v13 }
 0x43d   :  { %6545 = vmatpush.msra.mxu1 %v6544_v49  ;;  %6598 = vmatpush.msrb.mxu2 %v13472_v21  ;;  %v13564_v49 = vsub.f32 %v3531_v3, %v13543_v14  ;;  %v13577_v3 = vsub.f32 %v3527_v50, %v13552_v20 }
 0x43e   :  { %6436 = vmatpush.msra.mxu0 %v13414_v38  ;;  %6636 = vmatpush.msrb.mxu3 %v13438_v46 }
 0x43f   :  { %6551 = vmatpush.msra.mxu1 %v6550_v52  ;;  %6601 = vmatpush.msrb.mxu2 %v13484_v58  ;;  %15896 = vst [vmem:[#allocation28_spill] sm:$0xff] %v13564_v49  ;;  %v6806_v52 = vsub.f32 %v13535_v63, %v15543_v34  ;;  %v3511_v34 = vld [vmem:[#allocation10 + $0x2d0] sm:$0xff] }
 0x440   :  { %6438 = vmatpush.msra.mxu0 %v13426_v13  ;;  %6638 = vmatpush.msrb.mxu3 %v13450_v30  ;;  %15898 = vst [vmem:[#allocation45_spill] sm:$0xff] %v13577_v3  ;;  %v13608_v6 = vand.u32 4294901760, %v3511_v34 }
 0x441   :  { %6553 = vmatmul.f32.vlgmr.msra.gmra.mxu1 %v15897_v32  ;;  %6604 = vmatpush.msrb.mxu2 %v13494_v8  ;;  %v6807_v51 = vand.u32 4294901760, %v6806_v52  ;;  %v15903_v52 = vand.u32 4294901760, %v13564_v49 }
 0x442   :  { %6720 = vmatpush.msrb.mxu1 %v13294_v1  ;;  %6440 = vmatpush.msra.mxu0 %v13438_v46  ;;  %v15900_v1 = vand.u32 4294901760, %v13548_v5  ;;  %v13630_v36 = vsub.f32 %v3511_v34, %v13608_v6 }
 0x443   :  { %6640 = vmatpush.msrb.mxu3 %v13462_v40  ;;  %6607 = vmatmul.f32.vlgmr.msrb.gmra.mxu2 %v15899_v28  ;;  %v3507_v28 = vld [vmem:[#allocation10 + $0x2b0] sm:$0xff]  ;;  %v6824_v37 = vsub.f32 %v13564_v49, %v15903_v52 }
 0x444   :  { %6722 = vmatpush.msrb.mxu1 %v13301_v43  ;;  %6757 = vmatpush.msra.mxu2 %v13510_v16  ;;  %v6812_v50 = vsub.f32 %v13548_v5, %v15900_v1  ;;  %v15901_v43 = vld [vmem:[#allocation48_spill] sm:$0xff]  ;;  %v6818_v1 = vsub.f32 %v13557_v57, %v15902_v45  ;;  %v13632_v45 = vand.u32 4294901760, %v3503_v7  ;;  %v3495_v49 = vld [vmem:[#allocation10 + $0x250] sm:$0xff] }
 0x445   :  { %6442 = vmatpush.msra.mxu0 %v13450_v30  ;;  %6642 = vmatpush.msrb.mxu3 %v13474_v42 }
 0x446   :  { %6646 = vmatmul.f32.vlgmr.msrb.gmra.mxu3 %v15901_v43  ;;  %6724 = vmatpush.msrb.mxu1 %v13311_v35  ;;  %v6813_v35 = vand.u32 4294901760, %v6812_v50  ;;  %v13620_v43 = vand.u32 4294901760, %v3507_v28  ;;  %v13658_v50 = vand.u32 4294901760, %v3495_v49 }
 0x447   :  { %6759 = vmatpush.msra.mxu2 %v13518_v9  ;;  %6802 = vmatpush.msra.mxu3 %v6801_v4  ;;  %v15904_v4 = vand.u32 4294901760, %v13577_v3 }
 0x448   :  { %6444 = vmatpush.msra.mxu0 %v13462_v40  ;;  %6726 = vmatpush.msrb.mxu1 %v13321_v29  ;;  %v6819_v29 = vand.u32 4294901760, %v6818_v1  ;;  %v13643_v34 = vsub.f32 %v3507_v28, %v13620_v43  ;;  %v13656_v28 = vsub.f32 %v3503_v7, %v13632_v45 }
 0x449   :  { %6761 = vmatpush.msra.mxu2 %v13531_v60  ;;  %6808 = vmatpush.msra.mxu3 %v6807_v51  ;;  %v6830_v52 = vsub.f32 %v13577_v3, %v15904_v4  ;;  %v6825_v51 = vand.u32 4294901760, %v6824_v37  ;;  %v15906_v4 = vand.u32 4294901760, %v13309_v24  ;;  %v13645_v3 = vand.u32 4294901760, %v3499_v39 }
 0x44a   :  { %6446 = vmatpush.msra.mxu0 %v13474_v42  ;;  %6728 = vmatpush.msrb.mxu1 %v13332_v31  ;;  %v15907_v31 = vand.u32 4294901760, %v13593_v2  ;;  %v15908_v24 = vand.u32 4294901760, %v13319_v15  ;;  %v15910_v15 = vand.u32 4294901760, %v13330_v11  ;;  %v15912_v11 = vand.u32 4294901760, %v13341_v53 }
 0x44b   :  { %6452 = vmatmul.f32.vlgmr.msra.gmra.mxu0 %v15905_v61  ;;  %6763 = vmatpush.msra.mxu2 %v13539_v44  ;;  %v6831_v37 = vand.u32 4294901760, %v6830_v52  ;;  %v3491_v61 = vld [vmem:[#allocation10 + $0x230] sm:$0xff]  ;;  %v15911_v52 = vand.u32 4294901760, %v13618_v54  ;;  %v13669_v7 = vsub.f32 %v3499_v39, %v13645_v3  ;;  %v13682_v39 = vsub.f32 %v3495_v49, %v13658_v50 }
 0x44c   :  { %6653 = vmatpush.msrb.mxu0 %v15906_v4  ;;  %6814 = vmatpush.msra.mxu3 %v6813_v35  ;;  %v6836_v1 = vsub.f32 %v13593_v2, %v15907_v31  ;;  %v15909_v35 = vand.u32 4294901760, %v13606_v41  ;;  %v6853_v31 = vand.u32 4294901760, %v13630_v36  ;;  %v15913_v53 = vand.u32 4294901760, %v13355_v62 }
 0x44d   :  { %6730 = vmatpush.msrb.mxu1 %v13346_v33  ;;  %6765 = vmatpush.msra.mxu2 %v13543_v14  ;;  %v15914_v49 = vand.u32 4294901760, %v13374_v23 }
 0x44e   :  { %6657 = vmatpush.msrb.mxu0 %v15908_v24  ;;  %6820 = vmatpush.msra.mxu3 %v6819_v29  ;;  %v6842_v4 = vsub.f32 %v13606_v41, %v15909_v35  ;;  %v6837_v33 = vand.u32 4294901760, %v6836_v1  ;;  %v6848_v29 = vsub.f32 %v13618_v54, %v15911_v52  ;;  %v6859_v24 = vand.u32 4294901760, %v13643_v34  ;;  %v3487_v35 = vld [vmem:[#allocation10 + $0x210] sm:$0xff] }
 0x44f   :  { %6732 = vmatpush.msrb.mxu1 %v13357_v48  ;;  %6767 = vmatpush.msra.mxu2 %v13552_v20  ;;  %v13673_v48 = vand.u32 4294901760, %v3491_v61  ;;  %v6854_v1 = vsub.f32 %v13630_v36, %v6853_v31  ;;  %v6871_v52 = vand.u32 4294901760, %v13669_v7 }
 0x450   :  { %6661 = vmatpush.msrb.mxu0 %v15910_v15  ;;  %6826 = vmatpush.msra.mxu3 %v6825_v51  ;;  %v6843_v51 = vand.u32 4294901760, %v6842_v4  ;;  %v6865_v15 = vand.u32 4294901760, %v13656_v28  ;;  %v6860_v4 = vsub.f32 %v13643_v34, %v6859_v24 }
 0x451   :  { %6734 = vmatpush.msrb.mxu1 %v13368_v59  ;;  %6769 = vmatpush.msra.mxu2 %v13569_v27  ;;  %v13686_v59 = vand.u32 4294901760, %v3487_v35  ;;  %v6855_v62 = vand.u32 4294901760, %v6854_v1 }
 0x452   :  { %6665 = vmatpush.msrb.mxu0 %v15912_v11  ;;  %6832 = vmatpush.msra.mxu3 %v6831_v37  ;;  %v6849_v37 = vand.u32 4294901760, %v6848_v29  ;;  %v6877_v29 = vand.u32 4294901760, %v13682_v39  ;;  %v6861_v23 = vand.u32 4294901760, %v6860_v4  ;;  %v6872_v11 = vsub.f32 %v13669_v7, %v6871_v52  ;;  %v5089_v4 = vpop.f32.mrf.mxu0 }
 0x453   :  { %6736 = vmatpush.msrb.mxu1 %v13388_v25  ;;  %6771 = vmatpush.msra.mxu2 %v13582_v18  ;;  %v13697_v25 = vsub.f32 %v3491_v61, %v13673_v48  ;;  %v15915_v61 = vand.u32 4294901760, %v13383_v55 }
 0x454   :  { %6669 = vmatpush.msrb.mxu0 %v15913_v53  ;;  %6838 = vmatpush.msra.mxu3 %v6837_v33  ;;  %v6866_v33 = vsub.f32 %v13656_v28, %v6865_v15  ;;  %v6878_v55 = vsub.f32 %v13682_v39, %v6877_v29 }
 0x455   :  { %6738 = vmatpush.msrb.mxu1 %v13402_v26  ;;  %6773 = vmatpush.msra.mxu2 %v13595_v0  ;;  %v13708_v26 = vsub.f32 %v3487_v35, %v13686_v59 }
 0x456   :  { %6673 = vmatpush.msrb.mxu0 %v15914_v49  ;;  %6844 = vmatpush.msra.mxu3 %v6843_v51  ;;  %v15916_v51 = vand.u32 4294901760, %v13396_v17  ;;  %v6867_v35 = vand.u32 4294901760, %v6866_v33  ;;  %v15917_v17 = vand.u32 4294901760, %v13412_v47  ;;  %v15918_v49 = vand.u32 4294901760, %v13424_v56 }
 0x457   :  { %6740 = vmatpush.msrb.mxu1 %v13414_v38  ;;  %6775 = vmatpush.msra.mxu2 %v13608_v6  ;;  %v6883_v38 = vand.u32 4294901760, %v13697_v25  ;;  %v6889_v1 = vand.u32 4294901760, %v13708_v26  ;;  %v15919_v33 = vand.u32 4294901760, %v13436_v19  ;;  %v15921_v19 = vand.u32 4294901760, %v13460_v10 }
 0x458   :  { %6677 = vmatpush.msrb.mxu0 %v15915_v61  ;;  %6850 = vmatpush.msra.mxu3 %v6849_v37  ;;  %v6873_v37 = vand.u32 4294901760, %v6872_v11  ;;  %v15920_v61 = vand.u32 4294901760, %v13448_v12  ;;  %v15923_v12 = vand.u32 4294901760, %v13527_v22  ;;  %v15926_v10 = vand.u32 4294901760, %v13535_v63 }
 0x459   :  { %6742 = vmatpush.msrb.mxu1 %v13426_v13  ;;  %6777 = vmatpush.msra.mxu2 %v13620_v43  ;;  %v9194_v13 = vld [vmem:[%s15340_s9] sm:$0xf]  ;;  %v6890_v47 = vsub.f32 %v13708_v26, %v6889_v1 }
 0x45a   :  { %6681 = vmatpush.msrb.mxu0 %v15916_v51  ;;  %6856 = vmatpush.msra.mxu3 %v6855_v62  ;;  %v3680_v53 = vperm.slane %v9194_v13, 1  ;;  %v6879_v62 = vand.u32 4294901760, %v6878_v55  ;;  %v5244_v51 = vpop.f32.mrf.mxu2  ;;  %v15925_v13 = vld [vmem:[#allocation32_spill] sm:$0xff] }
 0x45b   :  { %6744 = vmatpush.msrb.mxu1 %v13438_v46  ;;  %6779 = vmatpush.msra.mxu2 %v13632_v45  ;;  %v6884_v46 = vsub.f32 %v13697_v25, %v6883_v38 }
 0x45c   :  { %6685 = vmatpush.msrb.mxu0 %v15917_v17  ;;  %6862 = vmatpush.msra.mxu3 %v6861_v23  ;;  %v6891_v23 = vand.u32 4294901760, %v6890_v47  ;;  %v5283_v17 = vpop.f32.mrf.mxu3  ;;  %v15933_v47 = vld [vmem:[#allocation45_spill] sm:$0xff] }
 0x45d   :  { %6746 = vmatpush.msrb.mxu1 %v13450_v30  ;;  %6781 = vmatpush.msra.mxu2 %v13645_v3  ;;  %v5090_v30 = vadd.f32 %v5089_v4, %v3680_v53  ;;  %v6885_v56 = vand.u32 4294901760, %v6884_v46  ;;  %v15927_v53 = vand.u32 4294901760, %v13484_v58  ;;  %v15929_v46 = vand.u32 4294901760, %v13494_v8 }
 0x45e   :  { %6689 = vmatpush.msrb.mxu0 %v15918_v49  ;;  %6868 = vmatpush.msra.mxu3 %v6867_v35  ;;  %v15924_v35 = vand.u32 4294901760, %v13472_v21  ;;  %v15928_v21 = vand.u32 4294901760, %v13548_v5  ;;  %v15930_v58 = vand.u32 4294901760, %v13557_v57  ;;  %v15931_v49 = vld [vmem:[#allocation28_spill] sm:$0xff] }
 0x45f   :  { %6748 = vmatpush.msrb.mxu1 %v13462_v40  ;;  %6783 = vmatpush.msra.mxu2 %v13658_v50  ;;  %v5190_v40 = vpop.f32.mrf.mxu1 }
 0x460   :  { %6693 = vmatpush.msrb.mxu0 %v15919_v33  ;;  %6874 = vmatpush.msra.mxu3 %v6873_v37  ;;  %v5191_v11 = vadd.f32 %v5190_v40, %v5090_v30  ;;  %v5352_v37 = vpop.f32.mrf.mxu0  ;;  %v15934_v30 = vand.u32 4294901760, %v15933_v47  ;;  %v3607_v33 = vld [vmem:[#allocation10 + $0x5d0] sm:$0xff] }
 0x461   :  { %6750 = vmatpush.msrb.mxu1 %v13474_v42  ;;  %6785 = vmatpush.msra.mxu2 %v13673_v48  ;;  %v15922_v42 = vld [vmem:[#allocation22_spill] sm:$0xff] }
 0x462   :  { %6697 = vmatpush.msrb.mxu0 %v15920_v61  ;;  %6880 = vmatpush.msra.mxu3 %v6879_v62  ;;  %v5245_v55 = vadd.f32 %v5244_v51, %v5191_v11  ;;  %v3611_v62 = vld [vmem:[#allocation10 + $0x5f0] sm:$0xff]  ;;  %v5430_v61 = vpop.f32.mrf.mxu2 }
 0x463   :  { %6752 = vmatmul.f32.vlgmr.msrb.gmra.mxu1 %v15897_v32  ;;  %6787 = vmatpush.msra.mxu2 %v13686_v59  ;;  %v3595_v11 = vld [vmem:[#allocation10 + $0x570] sm:$0xff] }
 0x464   :  { %6953 = vmatpush.msra.mxu1 %v13510_v16  ;;  %6701 = vmatpush.msrb.mxu0 %v15921_v19  ;;  %v5284_v4 = vadd.f32 %v5283_v17, %v5245_v55  ;;  %v3587_v17 = vld [vmem:[#allocation10 + $0x530] sm:$0xff] }
 0x465   :  { %6886 = vmatpush.msra.mxu3 %v6885_v56  ;;  %6793 = vmatmul.f32.vlgmr.msra.gmra.mxu2 %v15922_v42  ;;  %v13796_v56 = vand.u32 4294901760, %v3607_v33 }
 0x466   :  { %6955 = vmatpush.msra.mxu1 %v13518_v9  ;;  %6994 = vmatpush.msrb.mxu2 %v15923_v12 }
 0x467   :  { %6705 = vmatpush.msrb.mxu0 %v15924_v35  ;;  %6892 = vmatpush.msra.mxu3 %v6891_v23  ;;  %v5389_v8 = vpop.f32.mrf.mxu1  ;;  %v13814_v19 = vsub.f32 %v3607_v33, %v13796_v56  ;;  %v15938_v33 = vld [vmem:[#allocation35_spill] sm:$0xff] }
 0x468   :  { %6894 = vmatmul.f32.vlgmr.msra.gmra.mxu3 %v15925_v13  ;;  %6957 = vmatpush.msra.mxu1 %v13531_v60  ;;  %v5585_v51 = vpop.f32.mrf.mxu0 }
 0x469   :  { %6998 = vmatpush.msrb.mxu2 %v15926_v10  ;;  %7061 = vmatpush.msrb.mxu3 %v13510_v16  ;;  %v5353_v16 = vadd.f32 %v5352_v37, %v5284_v4  ;;  %v13827_v10 = vand.u32 4294901760, %v3595_v11  ;;  %v3583_v4 = vld [vmem:[#allocation10 + $0x510] sm:$0xff] }
 0x46a   :  { %6709 = vmatpush.msrb.mxu0 %v15927_v53  ;;  %6959 = vmatpush.msra.mxu1 %v13539_v44  ;;  %v3591_v53 = vld [vmem:[#allocation10 + $0x550] sm:$0xff] }
 0x46b   :  { %7002 = vmatpush.msrb.mxu2 %v15928_v21  ;;  %7063 = vmatpush.msrb.mxu3 %v13518_v9  ;;  %v15932_v9 = vand.u32 4294901760, %v15931_v49  ;;  %v13841_v37 = vand.u32 4294901760, %v3591_v53  ;;  %v13852_v21 = vand.u32 4294901760, %v3587_v17 }
 0x46c   :  { %6713 = vmatpush.msrb.mxu0 %v15929_v46  ;;  %6961 = vmatpush.msra.mxu1 %v13543_v14 }
 0x46d   :  { %6715 = vmatmul.f32.vlgmr.msrb.gmra.mxu0 %v15897_v32  ;;  %7006 = vmatpush.msrb.mxu2 %v15930_v58  ;;  %v3579_v58 = vld [vmem:[#allocation10 + $0x4f0] sm:$0xff] }
 0x46e   :  { %6900 = vmatpush.msra.mxu0 %v13527_v22  ;;  %7065 = vmatpush.msrb.mxu3 %v13531_v60  ;;  %v5390_v22 = vadd.f32 %v5389_v8, %v5353_v16  ;;  %v13789_v60 = vand.u32 4294901760, %v3611_v62  ;;  %v13867_v16 = vsub.f32 %v3591_v53, %v13841_v37 }
 0x46f   :  { %6963 = vmatpush.msra.mxu1 %v13552_v20  ;;  %7010 = vmatpush.msrb.mxu2 %v15932_v9  ;;  %v5624_v46 = vpop.f32.mrf.mxu1  ;;  %v13878_v9 = vsub.f32 %v3587_v17, %v13852_v21 }
 0x470   :  { %6903 = vmatpush.msra.mxu0 %v13535_v63  ;;  %7067 = vmatpush.msrb.mxu3 %v13539_v44  ;;  %v15935_v63 = vand.u32 4294901760, %v13593_v2  ;;  %v3603_v44 = vld [vmem:[#allocation10 + $0x5b0] sm:$0xff]  ;;  %v5431_v40 = vadd.f32 %v5430_v61, %v5390_v22  ;;  %v13804_v23 = vsub.f32 %v3611_v62, %v13789_v60  ;;  %v5693_v62 = vpop.f32.mrf.mxu2 }
 0x471   :  { %6965 = vmatpush.msra.mxu1 %v13569_v27  ;;  %7014 = vmatpush.msrb.mxu2 %v15934_v30  ;;  %v3571_v30 = vld [vmem:[#allocation10 + $0x4b0] sm:$0xff]  ;;  %v15559_v61 = vand.u32 4294901760, %v13878_v9 }
 0x472   :  { %6906 = vmatpush.msra.mxu0 %v13548_v5  ;;  %7069 = vmatpush.msrb.mxu3 %v13543_v14  ;;  %v15936_v5 = vand.u32 4294901760, %v13606_v41  ;;  %v3599_v14 = vld [vmem:[#allocation10 + $0x590] sm:$0xff]  ;;  %v15566_v55 = vand.u32 4294901760, %v13804_v23 }
 0x473   :  { %6967 = vmatpush.msra.mxu1 %v13582_v18  ;;  %7018 = vmatpush.msrb.mxu2 %v15935_v63  ;;  %v13816_v12 = vand.u32 4294901760, %v3599_v14 }
 0x474   :  { %6909 = vmatpush.msra.mxu0 %v13557_v57  ;;  %7071 = vmatpush.msrb.mxu3 %v13552_v20  ;;  %v13806_v57 = vand.u32 4294901760, %v3603_v44  ;;  %v15937_v20 = vand.u32 4294901760, %v13618_v54 }
 0x475   :  { %6969 = vmatpush.msra.mxu1 %v13595_v0  ;;  %7022 = vmatpush.msrb.mxu2 %v15936_v5 }
 0x476   :  { %6912 = vmatpush.msra.mxu0 %v15931_v49  ;;  %7073 = vmatpush.msrb.mxu3 %v13569_v27  ;;  %v5531_v27 = vpop.f32.mrf.mxu3 }
 0x477   :  { %6971 = vmatpush.msra.mxu1 %v13608_v6  ;;  %7026 = vmatpush.msrb.mxu2 %v15937_v20  ;;  %v5532_v35 = vadd.f32 %v5531_v27, %v5431_v40  ;;  %v13909_v40 = vand.u32 4294901760, %v3571_v30  ;;  %v3563_v27 = vld [vmem:[#allocation10 + $0x470] sm:$0xff] }
 0x478   :  { %6915 = vmatpush.msra.mxu0 %v15933_v47  ;;  %7075 = vmatpush.msrb.mxu3 %v13582_v18  ;;  %v13825_v18 = vsub.f32 %v3603_v44, %v13806_v57 }
 0x479   :  { %6973 = vmatpush.msra.mxu1 %v13620_v43  ;;  %7030 = vmatpush.msrb.mxu2 %v6853_v31  ;;  %v5586_v31 = vadd.f32 %v5585_v51, %v5532_v35 }
 0x47a   :  { %6918 = vmatpush.msra.mxu0 %v13593_v2  ;;  %7077 = vmatpush.msrb.mxu3 %v13595_v0  ;;  %v15565_v2 = vand.u32 4294901760, %v13814_v19  ;;  %v13836_v0 = vsub.f32 %v3599_v14, %v13816_v12 }
 0x47b   :  { %6975 = vmatpush.msra.mxu1 %v13632_v45  ;;  %7034 = vmatpush.msrb.mxu2 %v6859_v24  ;;  %v13850_v24 = vsub.f32 %v3595_v11, %v13827_v10 }
 0x47c   :  { %6921 = vmatpush.msra.mxu0 %v13606_v41  ;;  %7079 = vmatpush.msrb.mxu3 %v13608_v6  ;;  %v7141_v6 = vsub.f32 %v13804_v23, %v15566_v55  ;;  %v15563_v41 = vand.u32 4294901760, %v13825_v18 }
 0x47d   :  { %6977 = vmatpush.msra.mxu1 %v13645_v3  ;;  %7038 = vmatpush.msrb.mxu2 %v6865_v15  ;;  %v15562_v15 = vand.u32 4294901760, %v13836_v0  ;;  %v15561_v49 = vand.u32 4294901760, %v13850_v24 }
 0x47e   :  { %6924 = vmatpush.msra.mxu0 %v13618_v54  ;;  %7081 = vmatpush.msrb.mxu3 %v13620_v43  ;;  %v5625_v54 = vadd.f32 %v5624_v46, %v5586_v31  ;;  %v7147_v43 = vsub.f32 %v13814_v19, %v15565_v2  ;;  %v5730_v5 = vpop.f32.mrf.mxu3  ;;  %v3559_v31 = vld [vmem:[#allocation10 + $0x450] sm:$0xff] }
 0x47f   :  { %6979 = vmatpush.msra.mxu1 %v13658_v50  ;;  %7042 = vmatpush.msrb.mxu2 %v6871_v52  ;;  %v13869_v52 = vand.u32 4294901760, %v3583_v4  ;;  %v7159_v47 = vsub.f32 %v13836_v0, %v15562_v15  ;;  %v7165_v44 = vsub.f32 %v13850_v24, %v15561_v49  ;;  %v3647_v49 = vld [vmem:[#allocation10 + $0x710] sm:$0xff] }
 0x480   :  { %6927 = vmatpush.msra.mxu0 %v13630_v36  ;;  %7083 = vmatpush.msrb.mxu3 %v13632_v45  ;;  %v7142_v45 = vand.u32 4294901760, %v7141_v6  ;;  %v7153_v36 = vsub.f32 %v13825_v18, %v15563_v41  ;;  %v7148_v8 = vand.u32 4294901760, %v7147_v43  ;;  %v13931_v6 = vsub.f32 %v3571_v30, %v13909_v40  ;;  %v5872_v43 = vpop.f32.mrf.mxu1 }
 0x481   :  { %6981 = vmatpush.msra.mxu1 %v13673_v48  ;;  %7046 = vmatpush.msrb.mxu2 %v6877_v29  ;;  %v3575_v29 = vld [vmem:[#allocation10 + $0x4d0] sm:$0xff]  ;;  %v13895_v22 = vsub.f32 %v3583_v4, %v13869_v52  ;;  %v7166_v17 = vand.u32 4294901760, %v7165_v44  ;;  %v13933_v4 = vand.u32 4294901760, %v3563_v27  ;;  %v5926_v44 = vpop.f32.mrf.mxu2  ;;  %v14077_v15 = vand.u32 4294901760, %v3647_v49 }
 0x482   :  { %6930 = vmatpush.msra.mxu0 %v13643_v34  ;;  %7085 = vmatpush.msrb.mxu3 %v13645_v3  ;;  %v13883_v34 = vand.u32 4294901760, %v3579_v58  ;;  %v5694_v3 = vadd.f32 %v5693_v62, %v5625_v54  ;;  %v13897_v63 = vand.u32 4294901760, %v3575_v29  ;;  %v3555_v54 = vld [vmem:[#allocation10 + $0x430] sm:$0xff]  ;;  %v15551_v30 = vand.u32 4294901760, %v13931_v6 }
 0x483   :  { %6983 = vmatpush.msra.mxu1 %v13686_v59  ;;  %7050 = vmatpush.msrb.mxu2 %v6883_v38  ;;  %v15560_v38 = vand.u32 4294901760, %v13867_v16  ;;  %v15558_v51 = vand.u32 4294901760, %v13895_v22  ;;  %v14101_v32 = vsub.f32 %v3647_v49, %v14077_v15 }
 0x484   :  { %6933 = vmatpush.msra.mxu0 %v13656_v28  ;;  %7087 = vmatpush.msrb.mxu3 %v13658_v50  ;;  %v3567_v28 = vld [vmem:[#allocation10 + $0x490] sm:$0xff]  ;;  %v7154_v50 = vand.u32 4294901760, %v7153_v36  ;;  %v13907_v14 = vsub.f32 %v3579_v58, %v13883_v34  ;;  %v5731_v20 = vadd.f32 %v5730_v5, %v5694_v3  ;;  %v13921_v35 = vsub.f32 %v3575_v29, %v13897_v63 }
 0x485   :  { %6987 = vmatmul.f32.vlgmr.msra.gmra.mxu1 %v15938_v33  ;;  %7054 = vmatpush.msrb.mxu2 %v6889_v1  ;;  %v5771_v1 = vpop.f32.mrf.mxu0  ;;  %v13912_v11 = vand.u32 4294901760, %v3567_v28  ;;  %v13945_v29 = vand.u32 4294901760, %v3559_v31  ;;  %v3551_v3 = vld [vmem:[#allocation10 + $0x410] sm:$0xff] }
 0x486   :  { %7143 = vmatpush.msrb.mxu1 %v7142_v45  ;;  %6936 = vmatpush.msra.mxu0 %v13669_v7  ;;  %v7160_v7 = vand.u32 4294901760, %v7159_v47  ;;  %v5772_v53 = vadd.f32 %v5771_v1, %v5731_v20  ;;  %v7183_v45 = vsub.f32 %v13895_v22, %v15558_v51  ;;  %v15555_v36 = vand.u32 4294901760, %v13921_v35 }
 0x487   :  { %7089 = vmatpush.msrb.mxu3 %v13673_v48  ;;  %7056 = vmatmul.f32.vlgmr.msrb.gmra.mxu2 %v15925_v13  ;;  %v7171_v48 = vsub.f32 %v13867_v16, %v15560_v38  ;;  %v13937_v46 = vsub.f32 %v3567_v28, %v13912_v11  ;;  %v13955_v28 = vsub.f32 %v3563_v27, %v13933_v4 }
 0x488   :  { %7149 = vmatpush.msrb.mxu1 %v7148_v8  ;;  %7241 = vmatpush.msra.mxu2 %v13804_v23  ;;  %v15939_v8 = vld [vmem:[#allocation34_spill] sm:$0xff]  ;;  %v7184_v5 = vand.u32 4294901760, %v7183_v45  ;;  %v7195_v1 = vsub.f32 %v13921_v35, %v15555_v36  ;;  %v13967_v20 = vsub.f32 %v3559_v31, %v13945_v29 }
 0x489   :  { %6939 = vmatpush.msra.mxu0 %v13682_v39  ;;  %7091 = vmatpush.msrb.mxu3 %v13686_v59  ;;  %v7177_v39 = vsub.f32 %v13878_v9, %v15559_v61  ;;  %v15556_v59 = vand.u32 4294901760, %v13907_v14  ;;  %v7172_v58 = vand.u32 4294901760, %v7171_v48 }
 0x48a   :  { %7093 = vmatmul.f32.vlgmr.msrb.gmra.mxu3 %v15925_v13  ;;  %7155 = vmatpush.msrb.mxu1 %v7154_v50  ;;  %v13957_v50 = vand.u32 4294901760, %v3555_v54 }
 0x48b   :  { %7244 = vmatpush.msra.mxu2 %v13814_v19  ;;  %7294 = vmatpush.msra.mxu3 %v13789_v60  ;;  %v7178_v62 = vand.u32 4294901760, %v7177_v39  ;;  %v7189_v47 = vsub.f32 %v13907_v14, %v15556_v59  ;;  %v3659_v59 = vld [vmem:[#allocation10 + $0x770] sm:$0xff] }
 0x48c   :  { %6942 = vmatpush.msra.mxu0 %v13697_v25  ;;  %7161 = vmatpush.msrb.mxu1 %v7160_v7  ;;  %v5873_v25 = vadd.f32 %v5872_v43, %v5772_v53  ;;  %v13969_v7 = vand.u32 4294901760, %v3551_v3  ;;  %v7201_v53 = vsub.f32 %v13931_v6, %v15551_v30  ;;  %v13979_v39 = vsub.f32 %v3555_v54, %v13957_v50 }
 0x48d   :  { %7247 = vmatpush.msra.mxu2 %v13825_v18  ;;  %7296 = vmatpush.msra.mxu3 %v13796_v56  ;;  %v7190_v48 = vand.u32 4294901760, %v7189_v47  ;;  %v7196_v43 = vand.u32 4294901760, %v7195_v1  ;;  %v6034_v54 = vpop.f32.mrf.mxu0  ;;  %v14038_v61 = vand.u32 4294901760, %v3659_v59 }
 0x48e   :  { %6945 = vmatpush.msra.mxu0 %v13708_v26  ;;  %7167 = vmatpush.msrb.mxu1 %v7166_v17  ;;  %v15550_v26 = vand.u32 4294901760, %v13937_v46  ;;  %v5927_v27 = vadd.f32 %v5926_v44, %v5873_v25  ;;  %v15553_v17 = vand.u32 4294901760, %v13955_v28  ;;  %v13989_v45 = vsub.f32 %v3551_v3, %v13969_v7  ;;  %v5965_v25 = vpop.f32.mrf.mxu3 }
 0x48f   :  { %6948 = vmatmul.f32.vlgmr.msra.gmra.mxu0 %v15939_v8  ;;  %7250 = vmatpush.msra.mxu2 %v13836_v0  ;;  %v7202_v44 = vand.u32 4294901760, %v7201_v53  ;;  %v15554_v1 = vand.u32 4294901760, %v13979_v39  ;;  %v15944_v8 = vld [vmem:[#allocation38_spill] sm:$0xff] }
 0x490   :  { %7098 = vmatpush.msrb.mxu0 %v13789_v60  ;;  %7298 = vmatpush.msra.mxu3 %v13806_v57  ;;  %v7207_v31 = vsub.f32 %v13937_v46, %v15550_v26  ;;  %15940 = vst [vmem:[#allocation31_spill] sm:$0xff] %v13989_v45  ;;  %v5966_v47 = vadd.f32 %v5965_v25, %v5927_v27  ;;  %v3671_v26 = vld [vmem:[#allocation10 + $0x7d0] sm:$0xff] }
 0x491   :  { %7173 = vmatpush.msrb.mxu1 %v7172_v58  ;;  %7253 = vmatpush.msra.mxu2 %v13850_v24  ;;  %v15552_v58 = vand.u32 4294901760, %v13967_v20  ;;  %v14013_v25 = vand.u32 4294901760, %v3671_v26 }
 0x492   :  { %7100 = vmatpush.msrb.mxu0 %v13796_v56  ;;  %7300 = vmatpush.msra.mxu3 %v13816_v12  ;;  %v7208_v3 = vand.u32 4294901760, %v7207_v31  ;;  %v6035_v30 = vadd.f32 %v6034_v54, %v5966_v47  ;;  %v3667_v54 = vld [vmem:[#allocation10 + $0x7b0] sm:$0xff]  ;;  %v6071_v47 = vpop.f32.mrf.mxu1 }
 0x493   :  { %7179 = vmatpush.msrb.mxu1 %v7178_v62  ;;  %7256 = vmatpush.msra.mxu2 %v13867_v16  ;;  %v3675_v62 = vld [vmem:[#allocation10 + $0x7f0] sm:$0xff]  ;;  %v7219_v27 = vsub.f32 %v13967_v20, %v15552_v58  ;;  %v14026_v36 = vand.u32 4294901760, %v3667_v54 }
 0x494   :  { %7102 = vmatpush.msrb.mxu0 %v13806_v57  ;;  %7302 = vmatpush.msra.mxu3 %v13827_v10  ;;  %v14005_v53 = vand.u32 4294901760, %v3675_v62  ;;  %v6072_v58 = vadd.f32 %v6071_v47, %v6035_v30  ;;  %v3655_v47 = vld [vmem:[#allocation10 + $0x750] sm:$0xff] }
 0x495   :  { %7185 = vmatpush.msrb.mxu1 %v7184_v5  ;;  %7259 = vmatpush.msra.mxu2 %v13878_v9  ;;  %v7213_v5 = vsub.f32 %v13955_v28, %v15553_v17 }
 0x496   :  { %7104 = vmatpush.msrb.mxu0 %v13816_v12  ;;  %7304 = vmatpush.msra.mxu3 %v13841_v37  ;;  %v14022_v17 = vsub.f32 %v3675_v62, %v14005_v53 }
 0x497   :  { %7191 = vmatpush.msrb.mxu1 %v7190_v48  ;;  %7262 = vmatpush.msra.mxu2 %v13895_v22  ;;  %v15557_v48 = vand.u32 4294901760, %v13989_v45  ;;  %v7214_v31 = vand.u32 4294901760, %v7213_v5 }
 0x498   :  { %7106 = vmatpush.msrb.mxu0 %v13827_v10  ;;  %7306 = vmatpush.msra.mxu3 %v13852_v21 }
 0x499   :  { %7197 = vmatpush.msrb.mxu1 %v7196_v43  ;;  %7265 = vmatpush.msra.mxu2 %v13907_v14  ;;  %v7225_v43 = vsub.f32 %v13979_v39, %v15554_v1  ;;  %v7231_v5 = vsub.f32 %v13989_v45, %v15557_v48  ;;  %v3663_v1 = vld [vmem:[#allocation10 + $0x790] sm:$0xff] }
 0x49a   :  { %7108 = vmatpush.msrb.mxu0 %v13841_v37  ;;  %7308 = vmatpush.msra.mxu3 %v13869_v52  ;;  %v14034_v62 = vand.u32 4294901760, %v3663_v1 }
 0x49b   :  { %7203 = vmatpush.msrb.mxu1 %v7202_v44  ;;  %7268 = vmatpush.msra.mxu2 %v13921_v35  ;;  %v7220_v44 = vand.u32 4294901760, %v7219_v27  ;;  %v7226_v30 = vand.u32 4294901760, %v7225_v43  ;;  %v6112_v27 = vpop.f32.mrf.mxu2  ;;  %v7232_v51 = vand.u32 4294901760, %v7231_v5  ;;  %v14047_v43 = vand.u32 4294901760, %v3655_v47  ;;  %v6213_v5 = vpop.f32.mrf.mxu3 }
 0x49c   :  { %7110 = vmatpush.msrb.mxu0 %v13852_v21  ;;  %7310 = vmatpush.msra.mxu3 %v13883_v34  ;;  %v6113_v48 = vadd.f32 %v6112_v27, %v6072_v58  ;;  %v14052_v27 = vsub.f32 %v3663_v1, %v14034_v62  ;;  %v6306_v2 = vpop.f32.mrf.mxu1 }
 0x49d   :  { %7209 = vmatpush.msrb.mxu1 %v7208_v3  ;;  %7271 = vmatpush.msra.mxu2 %v13931_v6  ;;  %v14030_v3 = vsub.f32 %v3671_v26, %v14013_v25  ;;  %v14043_v26 = vsub.f32 %v3667_v54, %v14026_v36 }
 0x49e   :  { %7112 = vmatpush.msrb.mxu0 %v13869_v52  ;;  %7312 = vmatpush.msra.mxu3 %v13897_v63  ;;  %v6214_v38 = vadd.f32 %v6213_v5, %v6113_v48  ;;  %v14072_v5 = vsub.f32 %v3655_v47, %v14047_v43  ;;  %v3639_v47 = vld [vmem:[#allocation10 + $0x6d0] sm:$0xff] }
 0x49f   :  { %7215 = vmatpush.msrb.mxu1 %v7214_v31  ;;  %7274 = vmatpush.msra.mxu2 %v13937_v46  ;;  %v15564_v31 = vand.u32 4294901760, %v14022_v17  ;;  %v15567_v58 = vand.u32 4294901760, %v14030_v3 }
 0x4a0   :  { %7114 = vmatpush.msrb.mxu0 %v13883_v34  ;;  %7314 = vmatpush.msra.mxu3 %v13909_v40  ;;  %15943 = vst [vmem:[#allocation21_spill] sm:$0xff] %v14072_v5 }
 0x4a1   :  { %7221 = vmatpush.msrb.mxu1 %v7220_v44  ;;  %7277 = vmatpush.msra.mxu2 %v13955_v28  ;;  %v3651_v44 = vld [vmem:[#allocation10 + $0x730] sm:$0xff]  ;;  %v7482_v54 = vsub.f32 %v14022_v17, %v15564_v31  ;;  %v7488_v48 = vsub.f32 %v14030_v3, %v15567_v58 }
 0x4a2   :  { %7116 = vmatpush.msrb.mxu0 %v13897_v63  ;;  %7316 = vmatpush.msra.mxu3 %v13912_v11  ;;  %v14064_v41 = vand.u32 4294901760, %v3651_v44  ;;  %v3643_v31 = vld [vmem:[#allocation10 + $0x6f0] sm:$0xff] }
 0x4a3   :  { %7227 = vmatpush.msrb.mxu1 %v7226_v30  ;;  %7280 = vmatpush.msra.mxu2 %v13967_v20  ;;  %v14059_v30 = vsub.f32 %v3659_v59, %v14038_v61  ;;  %v7483_v33 = vand.u32 4294901760, %v7482_v54  ;;  %v14090_v42 = vand.u32 4294901760, %v3643_v31 }
 0x4a4   :  { %7118 = vmatpush.msrb.mxu0 %v13909_v40  ;;  %7318 = vmatpush.msra.mxu3 %v13933_v4  ;;  %v6375_v55 = vpop.f32.mrf.mxu2  ;;  %v14088_v13 = vsub.f32 %v3651_v44, %v14064_v41 }
 0x4a5   :  { %7233 = vmatpush.msrb.mxu1 %v7232_v51  ;;  %7283 = vmatpush.msra.mxu2 %v13979_v39  ;;  %15941 = vst [vmem:[#allocation30_spill] sm:$0xff] %v14059_v30  ;;  %v15942_v51 = vld [vmem:[#allocation37_spill] sm:$0xff]  ;;  %v14113_v49 = vsub.f32 %v3643_v31, %v14090_v42 }
 0x4a6   :  { %7120 = vmatpush.msrb.mxu0 %v13912_v11  ;;  %7320 = vmatpush.msra.mxu3 %v13945_v29  ;;  %v6267_v1 = vpop.f32.mrf.mxu0 }
 0x4a7   :  { %7235 = vmatmul.f32.vlgmr.msrb.gmra.mxu1 %v15942_v51  ;;  %7286 = vmatpush.msra.mxu2 %v13989_v45  ;;  %v6268_v59 = vadd.f32 %v6267_v1, %v6214_v38  ;;  %v15946_v38 = vld [vmem:[#allocation23_spill] sm:$0xff]  ;;  %v14103_v45 = vand.u32 4294901760, %v3639_v47 }
 0x4a8   :  { %7402 = vmatpush.msra.mxu1 %v13789_v60  ;;  %7122 = vmatpush.msrb.mxu0 %v13933_v4  ;;  %v15945_v60 = vand.u32 4294901760, %v14043_v26 }
 0x4a9   :  { %7322 = vmatpush.msra.mxu3 %v13957_v50  ;;  %7289 = vmatmul.f32.vlgmr.msra.gmra.mxu2 %v15944_v8  ;;  %v6307_v58 = vadd.f32 %v6306_v2, %v6268_v59  ;;  %v7489_v2 = vand.u32 4294901760, %v7488_v48  ;;  %v3635_v59 = vld [vmem:[#allocation10 + $0x6b0] sm:$0xff]  ;;  %v6412_v8 = vpop.f32.mrf.mxu3  ;;  %v14125_v31 = vsub.f32 %v3639_v47, %v14103_v45 }
 0x4aa   :  { %7404 = vmatpush.msra.mxu1 %v13796_v56  ;;  %7439 = vmatpush.msrb.mxu2 %v14005_v53  ;;  %v7494_v1 = vsub.f32 %v14043_v26, %v15945_v60  ;;  %v15947_v60 = vand.u32 4294901760, %v14052_v27  ;;  %v3631_v56 = vld [vmem:[#allocation10 + $0x690] sm:$0xff] }
 0x4ab   :  { %7124 = vmatpush.msrb.mxu0 %v13945_v29  ;;  %7324 = vmatpush.msra.mxu3 %v13969_v7  ;;  %v6376_v54 = vadd.f32 %v6375_v55, %v6307_v58  ;;  %v15948_v58 = vand.u32 4294901760, %v14059_v30  ;;  %v3619_v47 = vld [vmem:[#allocation10 + $0x630] sm:$0xff] }
 0x4ac   :  { %7328 = vmatmul.f32.vlgmr.msra.gmra.mxu3 %v15946_v38  ;;  %7406 = vmatpush.msra.mxu1 %v13806_v57  ;;  %v7500_v44 = vsub.f32 %v14052_v27, %v15947_v60  ;;  %v7495_v57 = vand.u32 4294901760, %v7494_v1  ;;  %v14115_v38 = vand.u32 4294901760, %v3635_v59  ;;  %v14127_v60 = vand.u32 4294901760, %v3631_v56 }
 0x4ad   :  { %7441 = vmatpush.msrb.mxu2 %v14013_v25  ;;  %7484 = vmatpush.msrb.mxu3 %v7483_v33  ;;  %v6413_v55 = vadd.f32 %v6412_v8, %v6376_v54  ;;  %v7506_v48 = vsub.f32 %v14059_v30, %v15948_v58  ;;  %v15949_v8 = vand.u32 4294901760, %v14072_v5  ;;  %v3627_v58 = vld [vmem:[#allocation10 + $0x670] sm:$0xff]  ;;  %v15950_v30 = vld [vmem:[#allocation20_spill] sm:$0xff] }
 0x4ae   :  { %7126 = vmatpush.msrb.mxu0 %v13957_v50  ;;  %7408 = vmatpush.msra.mxu1 %v13816_v12  ;;  %v7501_v12 = vand.u32 4294901760, %v7500_v44  ;;  %v14138_v1 = vsub.f32 %v3635_v59, %v14115_v38  ;;  %v14151_v59 = vsub.f32 %v3631_v56, %v14127_v60 }
 0x4af   :  { %7443 = vmatpush.msrb.mxu2 %v14026_v36  ;;  %7490 = vmatpush.msrb.mxu3 %v7489_v2  ;;  %v9144_v33 = vmax.f32 %v6413_v55, 0.0  ;;  %v7512_v54 = vsub.f32 %v14072_v5, %v15949_v8  ;;  %v7507_v2 = vand.u32 4294901760, %v7506_v48  ;;  %v3623_v55 = vld [vmem:[#allocation10 + $0x650] sm:$0xff]  ;;  %v15951_v8 = vand.u32 4294901760, %v13804_v23 }
 0x4b0   :  { %7128 = vmatpush.msrb.mxu0 %v13969_v7  ;;  %7410 = vmatpush.msra.mxu1 %v13827_v10  ;;  %v15952_v10 = vand.u32 4294901760, %v14088_v13  ;;  %v14140_v5 = vand.u32 4294901760, %v3627_v58  ;;  %v15953_v23 = vand.u32 4294901760, %v13814_v19  ;;  %v15955_v19 = vand.u32 4294901760, %v13825_v18 }
 0x4b1   :  { %7134 = vmatmul.f32.vlgmr.msrb.gmra.mxu0 %v15950_v30  ;;  %7445 = vmatpush.msrb.mxu2 %v14034_v62  ;;  %9148 = vst [vmem:[#allocation14 + $0x8] sm:$0xff] %v9144_v33  ;;  %v7513_v48 = vand.u32 4294901760, %v7512_v54  ;;  %v15956_v54 = vand.u32 4294901760, %v14113_v49  ;;  %v15957_v18 = vand.u32 4294901760, %v13836_v0  ;;  %v15958_v0 = vand.u32 4294901760, %v13850_v24  ;;  %v3500_v30 = vld [vmem:[#allocation10 + $0x278] sm:$0xff] }
 0x4b2   :  { %7335 = vmatpush.msra.mxu0 %v15951_v8  ;;  %7496 = vmatpush.msrb.mxu3 %v7495_v57  ;;  %v7518_v44 = vsub.f32 %v14088_v13, %v15952_v10  ;;  %v15954_v57 = vand.u32 4294901760, %v14101_v32  ;;  %v7535_v8 = vand.u32 4294901760, %v14125_v31  ;;  %v14153_v10 = vand.u32 4294901760, %v3623_v55 }
 0x4b3   :  { %7412 = vmatpush.msra.mxu1 %v13841_v37  ;;  %7447 = vmatpush.msrb.mxu2 %v14038_v61  ;;  %v14164_v56 = vsub.f32 %v3627_v58, %v14140_v5 }
 0x4b4   :  { %7339 = vmatpush.msra.mxu0 %v15953_v23  ;;  %7502 = vmatpush.msrb.mxu3 %v7501_v12  ;;  %v7524_v33 = vsub.f32 %v14101_v32, %v15954_v57  ;;  %v7519_v37 = vand.u32 4294901760, %v7518_v44  ;;  %v7530_v12 = vsub.f32 %v14113_v49, %v15956_v54  ;;  %v7541_v23 = vand.u32 4294901760, %v14138_v1  ;;  %v3615_v57 = vld [vmem:[#allocation10 + $0x610] sm:$0xff] }
 0x4b5   :  { %7414 = vmatpush.msra.mxu1 %v13852_v21  ;;  %7449 = vmatpush.msrb.mxu2 %v14047_v43  ;;  %v14168_v21 = vand.u32 4294901760, %v3619_v47  ;;  %v7536_v44 = vsub.f32 %v14125_v31, %v7535_v8  ;;  %v14177_v58 = vsub.f32 %v3623_v55, %v14153_v10  ;;  %v7553_v54 = vand.u32 4294901760, %v14164_v56 }
 0x4b6   :  { %7343 = vmatpush.msra.mxu0 %v15955_v19  ;;  %7508 = vmatpush.msrb.mxu3 %v7507_v2  ;;  %v7525_v2 = vand.u32 4294901760, %v7524_v33  ;;  %v7547_v19 = vand.u32 4294901760, %v14151_v59  ;;  %v7542_v33 = vsub.f32 %v14138_v1, %v7541_v23  ;;  %v15959_v55 = vand.u32 4294901760, %v13867_v16 }
 0x4b7   :  { %7416 = vmatpush.msra.mxu1 %v13869_v52  ;;  %7451 = vmatpush.msrb.mxu2 %v14064_v41  ;;  %v14181_v52 = vand.u32 4294901760, %v3615_v57  ;;  %v7537_v24 = vand.u32 4294901760, %v7536_v44 }
 0x4b8   :  { %7347 = vmatpush.msra.mxu0 %v15957_v18  ;;  %7514 = vmatpush.msrb.mxu3 %v7513_v48  ;;  %v7531_v48 = vand.u32 4294901760, %v7530_v12  ;;  %v7559_v12 = vand.u32 4294901760, %v14177_v58  ;;  %v7543_v16 = vand.u32 4294901760, %v7542_v33  ;;  %v7554_v18 = vsub.f32 %v14164_v56, %v7553_v54 }
 0x4b9   :  { %7418 = vmatpush.msra.mxu1 %v13883_v34  ;;  %7453 = vmatpush.msrb.mxu2 %v14077_v15  ;;  %v14192_v34 = vsub.f32 %v3619_v47, %v14168_v21  ;;  %v15960_v47 = vand.u32 4294901760, %v13878_v9  ;;  %v15965_v33 = vand.u32 4294901760, %v13937_v46  ;;  %v15969_v46 = vand.u32 4294901760, %v13967_v20  ;;  %v15974_v20 = vld [vmem:[#allocation31_spill] sm:$0xff] }
 0x4ba   :  { %7351 = vmatpush.msra.mxu0 %v15958_v0  ;;  %7520 = vmatpush.msrb.mxu3 %v7519_v37  ;;  %v7548_v37 = vsub.f32 %v14151_v59, %v7547_v19  ;;  %v7560_v9 = vsub.f32 %v14177_v58, %v7559_v12  ;;  %v7555_v0 = vand.u32 4294901760, %v7554_v18  ;;  %v15976_v18 = vand.u32 4294901760, %v14052_v27 }
 0x4bb   :  { %7420 = vmatpush.msra.mxu1 %v13897_v63  ;;  %7455 = vmatpush.msrb.mxu2 %v14090_v42  ;;  %v14203_v63 = vsub.f32 %v3615_v57, %v14181_v52 }
 0x4bc   :  { %7355 = vmatpush.msra.mxu0 %v15959_v55  ;;  %7526 = vmatpush.msrb.mxu3 %v7525_v2  ;;  %v15961_v2 = vand.u32 4294901760, %v13895_v22  ;;  %v7549_v57 = vand.u32 4294901760, %v7548_v37  ;;  %v15967_v55 = vld [vmem:[#allocation39_spill] sm:$0xff]  ;;  %v15971_v37 = vand.u32 4294901760, %v14030_v3 }
 0x4bd   :  { %7422 = vmatpush.msra.mxu1 %v13909_v40  ;;  %7457 = vmatpush.msrb.mxu2 %v14103_v45  ;;  %v7565_v40 = vand.u32 4294901760, %v14192_v34  ;;  %v7571_v44 = vand.u32 4294901760, %v14203_v63 }
 0x4be   :  { %7359 = vmatpush.msra.mxu0 %v15960_v47  ;;  %7532 = vmatpush.msrb.mxu3 %v7531_v48  ;;  %v15963_v48 = vand.u32 4294901760, %v13921_v35  ;;  %v15973_v47 = vand.u32 4294901760, %v14043_v26 }
 0x4bf   :  { %7424 = vmatpush.msra.mxu1 %v13912_v11  ;;  %7459 = vmatpush.msrb.mxu2 %v14115_v38  ;;  %v15962_v11 = vand.u32 4294901760, %v13907_v14  ;;  %v7566_v22 = vsub.f32 %v14192_v34, %v7565_v40  ;;  %v7572_v14 = vsub.f32 %v14203_v63, %v7571_v44 }
 0x4c0   :  { %7363 = vmatpush.msra.mxu0 %v15961_v2  ;;  %7538 = vmatpush.msrb.mxu3 %v7537_v24  ;;  %v15970_v24 = vld [vmem:[#allocation42_spill] sm:$0xff]  ;;  %v15979_v2 = vld [vmem:[#allocation21_spill] sm:$0xff] }
 0x4c1   :  { %7426 = vmatpush.msra.mxu1 %v13933_v4  ;;  %7461 = vmatpush.msrb.mxu2 %v14127_v60  ;;  %v7561_v4 = vand.u32 4294901760, %v7560_v9  ;;  %v7567_v35 = vand.u32 4294901760, %v7566_v22  ;;  %v3480_v9 = vld [vmem:[#allocation10 + $0x1d8] sm:$0xff] }
 0x4c2   :  { %7367 = vmatpush.msra.mxu0 %v15962_v11  ;;  %7544 = vmatpush.msrb.mxu3 %v7543_v16  ;;  %v15975_v16 = vand.u32 4294901760, %v15974_v20 }
 0x4c3   :  { %7428 = vmatpush.msra.mxu1 %v13945_v29  ;;  %7463 = vmatpush.msrb.mxu2 %v14140_v5  ;;  %v15964_v29 = vand.u32 4294901760, %v13931_v6  ;;  %v15966_v6 = vand.u32 4294901760, %v13955_v28  ;;  %v15972_v28 = vand.u32 4294901760, %v13979_v39  ;;  %v15977_v39 = vld [vmem:[#allocation30_spill] sm:$0xff] }
 0x4c4   :  { %7371 = vmatpush.msra.mxu0 %v15963_v48  ;;  %7550 = vmatpush.msrb.mxu3 %v7549_v57  ;;  %v15980_v57 = vand.u32 4294901760, %v15979_v2 }
 0x4c5   :  { %7430 = vmatpush.msra.mxu1 %v13957_v50  ;;  %7465 = vmatpush.msrb.mxu2 %v14153_v10  ;;  %v7573_v50 = vand.u32 4294901760, %v7572_v14  ;;  %v3464_v14 = vld [vmem:[#allocation10 + $0x158] sm:$0xff] }
 0x4c6   :  { %7375 = vmatpush.msra.mxu0 %v15964_v29  ;;  %7556 = vmatpush.msrb.mxu3 %v7555_v0  ;;  %v3460_v29 = vld [vmem:[#allocation10 + $0x138] sm:$0xff] }
 0x4c7   :  { %7432 = vmatpush.msra.mxu1 %v13969_v7  ;;  %7467 = vmatpush.msrb.mxu2 %v14168_v21  ;;  %v15968_v7 = vand.u32 4294901760, %v14022_v17 }
 0x4c8   :  { %7379 = vmatpush.msra.mxu0 %v15965_v33  ;;  %7562 = vmatpush.msrb.mxu3 %v7561_v4  ;;  %v14344_v33 = vand.u32 4294901760, %v3460_v29 }
 0x4c9   :  { %7434 = vmatmul.f32.vlgmr.msra.gmra.mxu1 %v15942_v51  ;;  %7469 = vmatpush.msrb.mxu2 %v14181_v52 }
 0x4ca   :  { %7635 = vmatpush.msrb.mxu1 %v14005_v53  ;;  %7383 = vmatpush.msra.mxu0 %v15966_v6 }
 0x4cb   :  { %7568 = vmatpush.msrb.mxu3 %v7567_v35  ;;  %7475 = vmatmul.f32.vlgmr.msrb.gmra.mxu2 %v15967_v55  ;;  %v3456_v35 = vld [vmem:[#allocation10 + $0x118] sm:$0xff] }
 0x4cc   :  { %7637 = vmatpush.msrb.mxu1 %v14013_v25  ;;  %7676 = vmatpush.msra.mxu2 %v15968_v7  ;;  %v14370_v7 = vsub.f32 %v3460_v29, %v14344_v33  ;;  %v3504_v55 = vld [vmem:[#allocation10 + $0x298] sm:$0xff] }
 0x4cd   :  { %7387 = vmatpush.msra.mxu0 %v15969_v46  ;;  %7574 = vmatpush.msrb.mxu3 %v7573_v50  ;;  %v3452_v50 = vld [vmem:[#allocation10 + $0xf8] sm:$0xff] }
 0x4ce   :  { %7576 = vmatmul.f32.vlgmr.msrb.gmra.mxu3 %v15970_v24  ;;  %7639 = vmatpush.msrb.mxu1 %v14026_v36  ;;  %v3448_v46 = vld [vmem:[#allocation10 + $0xd8] sm:$0xff] }
 0x4cf   :  { %7680 = vmatpush.msra.mxu2 %v15971_v37  ;;  %7743 = vmatpush.msra.mxu3 %v14005_v53  ;;  %v15978_v53 = vand.u32 4294901760, %v15977_v39  ;;  %v14389_v20 = vand.u32 4294901760, %v3448_v46 }
 0x4d0   :  { %7391 = vmatpush.msra.mxu0 %v15972_v28  ;;  %7641 = vmatpush.msrb.mxu1 %v14034_v62  ;;  %v3444_v28 = vld [vmem:[#allocation10 + $0xb8] sm:$0xff] }
 0x4d1   :  { %7684 = vmatpush.msra.mxu2 %v15973_v47  ;;  %7745 = vmatpush.msra.mxu3 %v14013_v25  ;;  %v3484_v25 = vld [vmem:[#allocation10 + $0x1f8] sm:$0xff]  ;;  %v15984_v47 = vld [vmem:[#allocation24_spill] sm:$0xff] }
 0x4d2   :  { %7395 = vmatpush.msra.mxu0 %v15975_v16  ;;  %7643 = vmatpush.msrb.mxu1 %v14038_v61  ;;  %v15584_v16 = vand.u32 4294901760, %v14370_v7 }
 0x4d3   :  { %7397 = vmatmul.f32.vlgmr.msra.gmra.mxu0 %v15942_v51  ;;  %7688 = vmatpush.msra.mxu2 %v15976_v18  ;;  %v3440_v18 = vld [vmem:[#allocation10 + $0x98] sm:$0xff]  ;;  %v15995_v51 = vld [vmem:[#allocation33_spill] sm:$0xff] }
 0x4d4   :  { %7582 = vmatpush.msrb.mxu0 %v14022_v17  ;;  %7747 = vmatpush.msra.mxu3 %v14026_v36  ;;  %v14281_v36 = vand.u32 4294901760, %v3484_v25  ;;  %v15981_v17 = vand.u32 4294901760, %v14088_v13 }
 0x4d5   :  { %7645 = vmatpush.msrb.mxu1 %v14047_v43  ;;  %7692 = vmatpush.msra.mxu2 %v15978_v53 }
 0x4d6   :  { %7585 = vmatpush.msrb.mxu0 %v14030_v3  ;;  %7749 = vmatpush.msra.mxu3 %v14034_v62  ;;  %v3476_v3 = vld [vmem:[#allocation10 + $0x1b8] sm:$0xff]  ;;  %v14288_v62 = vand.u32 4294901760, %v3480_v9  ;;  %v14296_v11 = vsub.f32 %v3484_v25, %v14281_v36 }
 0x4d7   :  { %7647 = vmatpush.msrb.mxu1 %v14064_v41  ;;  %7696 = vmatpush.msra.mxu2 %v15980_v57  ;;  %v14298_v0 = vand.u32 4294901760, %v3476_v3  ;;  %v3436_v25 = vld [vmem:[#allocation10 + $0x78] sm:$0xff]  ;;  %v14413_v57 = vand.u32 4294901760, %v3440_v18 }
 0x4d8   :  { %7588 = vmatpush.msrb.mxu0 %v14043_v26  ;;  %7751 = vmatpush.msra.mxu3 %v14038_v61  ;;  %v15982_v26 = vand.u32 4294901760, %v14101_v32  ;;  %v3472_v61 = vld [vmem:[#allocation10 + $0x198] sm:$0xff]  ;;  %v14306_v22 = vsub.f32 %v3480_v9, %v14288_v62 }
 0x4d9   :  { %7649 = vmatpush.msrb.mxu1 %v14077_v15  ;;  %7700 = vmatpush.msra.mxu2 %v15981_v17  ;;  %v14308_v48 = vand.u32 4294901760, %v3472_v61  ;;  %v14317_v4 = vsub.f32 %v3476_v3, %v14298_v0  ;;  %v7859_v17 = vsub.f32 %v14370_v7, %v15584_v16  ;;  %v14435_v29 = vsub.f32 %v3440_v18, %v14413_v57  ;;  %v3520_v16 = vld [vmem:[#allocation10 + $0x318] sm:$0xff] }
 0x4da   :  { %7591 = vmatpush.msrb.mxu0 %v14052_v27  ;;  %7753 = vmatpush.msra.mxu3 %v14047_v43  ;;  %v15983_v43 = vand.u32 4294901760, %v14113_v49  ;;  %v3468_v27 = vld [vmem:[#allocation10 + $0x178] sm:$0xff] }
 0x4db   :  { %7651 = vmatpush.msrb.mxu1 %v14090_v42  ;;  %7704 = vmatpush.msra.mxu2 %v15982_v26  ;;  %v14425_v26 = vand.u32 4294901760, %v3436_v25 }
 0x4dc   :  { %7594 = vmatpush.msrb.mxu0 %v15977_v39  ;;  %7755 = vmatpush.msra.mxu3 %v14064_v41  ;;  %v15591_v41 = vand.u32 4294901760, %v14296_v11  ;;  %v14401_v39 = vand.u32 4294901760, %v3444_v28 }
 0x4dd   :  { %7653 = vmatpush.msrb.mxu1 %v14103_v45  ;;  %7708 = vmatpush.msra.mxu2 %v15983_v43  ;;  %v3428_v43 = vld [vmem:[#allocation10 + $0x38] sm:$0xff] }
 0x4de   :  { %7597 = vmatpush.msrb.mxu0 %v15979_v2  ;;  %7757 = vmatpush.msra.mxu3 %v14077_v15  ;;  %v14319_v15 = vand.u32 4294901760, %v3468_v27  ;;  %v14411_v2 = vsub.f32 %v3448_v46, %v14389_v20  ;;  %v14423_v3 = vsub.f32 %v3444_v28, %v14401_v39  ;;  %v14449_v46 = vand.u32 4294901760, %v3428_v43 }
 0x4df   :  { %7655 = vmatpush.msrb.mxu1 %v14115_v38  ;;  %7712 = vmatpush.msra.mxu2 %v7535_v8  ;;  %v14333_v8 = vand.u32 4294901760, %v3464_v14 }
 0x4e0   :  { %7600 = vmatpush.msrb.mxu0 %v14088_v13  ;;  %7759 = vmatpush.msra.mxu3 %v14090_v42  ;;  %v15590_v42 = vand.u32 4294901760, %v14306_v22  ;;  %v14328_v13 = vsub.f32 %v3472_v61, %v14308_v48 }
 0x4e1   :  { %7657 = vmatpush.msrb.mxu1 %v14127_v60  ;;  %7716 = vmatpush.msra.mxu2 %v7541_v23  ;;  %v14342_v23 = vsub.f32 %v3468_v27, %v14319_v15 }
 0x4e2   :  { %7603 = vmatpush.msrb.mxu0 %v14101_v32  ;;  %7761 = vmatpush.msra.mxu3 %v14103_v45  ;;  %v7823_v32 = vsub.f32 %v14296_v11, %v15591_v41  ;;  %v15589_v45 = vand.u32 4294901760, %v14317_v4 }
 0x4e3   :  { %7659 = vmatpush.msrb.mxu1 %v14140_v5  ;;  %7720 = vmatpush.msra.mxu2 %v7547_v19  ;;  %v14355_v19 = vand.u32 4294901760, %v3456_v35  ;;  %v15586_v6 = vand.u32 4294901760, %v14342_v23 }
 0x4e4   :  { %7606 = vmatpush.msrb.mxu0 %v14113_v49  ;;  %7763 = vmatpush.msra.mxu3 %v14115_v38  ;;  %v7829_v38 = vsub.f32 %v14306_v22, %v15590_v42  ;;  %v15588_v49 = vand.u32 4294901760, %v14328_v13  ;;  %v15989_v42 = vld [vmem:[#allocation47_spill] sm:$0xff] }
 0x4e5   :  { %7661 = vmatpush.msrb.mxu1 %v14153_v10  ;;  %7724 = vmatpush.msra.mxu2 %v7553_v54  ;;  %v14361_v54 = vsub.f32 %v3464_v14, %v14333_v8  ;;  %v14383_v37 = vsub.f32 %v3456_v35, %v14355_v19  ;;  %v15581_v14 = vand.u32 4294901760, %v14411_v2 }
 0x4e6   :  { %7609 = vmatpush.msrb.mxu0 %v14125_v31  ;;  %7765 = vmatpush.msra.mxu3 %v14127_v60  ;;  %v7824_v60 = vand.u32 4294901760, %v7823_v32  ;;  %v7835_v31 = vsub.f32 %v14317_v4, %v15589_v45  ;;  %v3424_v32 = vld [vmem:[#allocation10 + $0x18] sm:$0xff]  ;;  %v14569_v45 = vand.u32 4294901760, %v3520_v16 }
 0x4e7   :  { %7663 = vmatpush.msrb.mxu1 %v14168_v21  ;;  %7728 = vmatpush.msra.mxu2 %v7559_v12  ;;  %v14375_v12 = vand.u32 4294901760, %v3452_v50  ;;  %v15583_v53 = vand.u32 4294901760, %v14383_v37 }
 0x4e8   :  { %7612 = vmatpush.msrb.mxu0 %v14138_v1  ;;  %7767 = vmatpush.msra.mxu3 %v14140_v5  ;;  %v7830_v5 = vand.u32 4294901760, %v7829_v38  ;;  %v7841_v1 = vsub.f32 %v14328_v13, %v15588_v49  ;;  %v15985_v38 = vld [vmem:[#allocation43_spill] sm:$0xff] }
 0x4e9   :  { %7665 = vmatpush.msrb.mxu1 %v14181_v52  ;;  %7732 = vmatpush.msra.mxu2 %v7565_v40  ;;  %v15585_v40 = vand.u32 4294901760, %v14361_v54  ;;  %v7865_v61 = vsub.f32 %v14383_v37, %v15583_v53  ;;  %v3524_v53 = vld [vmem:[#allocation10 + $0x338] sm:$0xff] }
 0x4ea   :  { %7615 = vmatpush.msrb.mxu0 %v14151_v59  ;;  %7769 = vmatpush.msra.mxu3 %v14153_v10  ;;  %v7836_v59 = vand.u32 4294901760, %v7835_v31  ;;  %v7847_v10 = vsub.f32 %v14342_v23, %v15586_v6  ;;  %v14447_v31 = vsub.f32 %v3436_v25, %v14425_v26  ;;  %v14471_v25 = vsub.f32 %v3428_v43, %v14449_v46 }
 0x4eb   :  { %7669 = vmatmul.f32.vlgmr.msrb.gmra.mxu1 %v15984_v47  ;;  %7736 = vmatpush.msra.mxu2 %v7571_v44  ;;  %v14399_v44 = vsub.f32 %v3452_v50, %v14375_v12  ;;  %v14556_v6 = vand.u32 4294901760, %v3524_v53 }
 0x4ec   :  { %7825 = vmatpush.msra.mxu1 %v7824_v60  ;;  %7618 = vmatpush.msrb.mxu0 %v14164_v56  ;;  %v7842_v56 = vand.u32 4294901760, %v7841_v1  ;;  %v7848_v9 = vand.u32 4294901760, %v7847_v10  ;;  %v15579_v60 = vand.u32 4294901760, %v14423_v3  ;;  %v15577_v1 = vand.u32 4294901760, %v14435_v29 }
 0x4ed   :  { %7771 = vmatpush.msra.mxu3 %v14168_v21  ;;  %7738 = vmatmul.f32.vlgmr.msra.gmra.mxu2 %v15970_v24  ;;  %v7853_v21 = vsub.f32 %v14361_v54, %v15585_v40  ;;  %v14580_v49 = vsub.f32 %v3524_v53, %v14556_v6  ;;  %v3508_v40 = vld [vmem:[#allocation10 + $0x2b8] sm:$0xff]  ;;  %v14593_v53 = vsub.f32 %v3520_v16, %v14569_v45 }
 0x4ee   :  { %7831 = vmatpush.msra.mxu1 %v7830_v5  ;;  %7923 = vmatpush.msrb.mxu2 %v14296_v11  ;;  %v7877_v5 = vsub.f32 %v14411_v2, %v15581_v14  ;;  %v7883_v18 = vsub.f32 %v14423_v3, %v15579_v60  ;;  %v3532_v60 = vld [vmem:[#allocation10 + $0x378] sm:$0xff] }
 0x4ef   :  { %7621 = vmatpush.msrb.mxu0 %v14177_v58  ;;  %7773 = vmatpush.msra.mxu3 %v14181_v52  ;;  %v3432_v58 = vld [vmem:[#allocation10 + $0x58] sm:$0xff]  ;;  %v15582_v52 = vand.u32 4294901760, %v14399_v44  ;;  %v7854_v27 = vand.u32 4294901760, %v7853_v21 }
 0x4f0   :  { %7775 = vmatmul.f32.vlgmr.msra.gmra.mxu3 %v15970_v24  ;;  %7837 = vmatpush.msra.mxu1 %v7836_v59  ;;  %v14437_v35 = vand.u32 4294901760, %v3432_v58  ;;  %v14461_v59 = vand.u32 4294901760, %v3424_v32  ;;  %v7878_v21 = vand.u32 4294901760, %v7877_v5  ;;  %v7884_v43 = vand.u32 4294901760, %v7883_v18 }
 0x4f1   :  { %7926 = vmatpush.msrb.mxu2 %v14306_v22  ;;  %7976 = vmatpush.msrb.mxu3 %v14281_v36  ;;  %v7871_v50 = vsub.f32 %v14399_v44, %v15582_v52 }
 0x4f2   :  { %7624 = vmatpush.msrb.mxu0 %v14192_v34  ;;  %7843 = vmatpush.msra.mxu1 %v7842_v56  ;;  %v7860_v34 = vand.u32 4294901760, %v7859_v17  ;;  %v14459_v28 = vsub.f32 %v3432_v58, %v14437_v35  ;;  %v15575_v56 = vand.u32 4294901760, %v14447_v31  ;;  %v14481_v58 = vsub.f32 %v3424_v32, %v14461_v59  ;;  %v3544_v32 = vld [vmem:[#allocation10 + $0x3d8] sm:$0xff] }
 0x4f3   :  { %7929 = vmatpush.msrb.mxu2 %v14317_v4  ;;  %7978 = vmatpush.msrb.mxu3 %v14288_v62  ;;  %v7872_v10 = vand.u32 4294901760, %v7871_v50 }
 0x4f4   :  { %7627 = vmatpush.msrb.mxu0 %v14203_v63  ;;  %7849 = vmatpush.msra.mxu1 %v7848_v9  ;;  %v7866_v63 = vand.u32 4294901760, %v7865_v61  ;;  %v7889_v9 = vsub.f32 %v14435_v29, %v15577_v1  ;;  %v15576_v17 = vand.u32 4294901760, %v14459_v28  ;;  %v3548_v61 = vld [vmem:[#allocation10 + $0x3f8] sm:$0xff]  ;;  %v15580_v5 = vand.u32 4294901760, %v14481_v58 }
 0x4f5   :  { %7630 = vmatmul.f32.vlgmr.msrb.gmra.mxu0 %v15985_v38  ;;  %7932 = vmatpush.msrb.mxu2 %v14328_v13  ;;  %v3536_v1 = vld [vmem:[#allocation10 + $0x398] sm:$0xff] }
 0x4f6   :  { %7780 = vmatpush.msra.mxu0 %v14281_v36  ;;  %7980 = vmatpush.msrb.mxu3 %v14298_v0  ;;  %v7890_v50 = vand.u32 4294901760, %v7889_v9  ;;  %v14505_v9 = vand.u32 4294901760, %v3544_v32 }
 0x4f7   :  { %7855 = vmatpush.msra.mxu1 %v7854_v27  ;;  %7935 = vmatpush.msrb.mxu2 %v14342_v23  ;;  %v7895_v27 = vsub.f32 %v14447_v31, %v15575_v56  ;;  %v3540_v56 = vld [vmem:[#allocation10 + $0x3b8] sm:$0xff] }
 0x4f8   :  { %7782 = vmatpush.msra.mxu0 %v14288_v62  ;;  %7982 = vmatpush.msrb.mxu3 %v14308_v48 }
 0x4f9   :  { %7861 = vmatpush.msra.mxu1 %v7860_v34  ;;  %7938 = vmatpush.msrb.mxu2 %v14361_v54  ;;  %v15578_v34 = vand.u32 4294901760, %v14471_v25  ;;  %v7896_v18 = vand.u32 4294901760, %v7895_v27 }
 0x4fa   :  { %7784 = vmatpush.msra.mxu0 %v14298_v0  ;;  %7984 = vmatpush.msrb.mxu3 %v14319_v15 }
 0x4fb   :  { %7867 = vmatpush.msra.mxu1 %v7866_v63  ;;  %7941 = vmatpush.msrb.mxu2 %v14370_v7  ;;  %v7901_v63 = vsub.f32 %v14459_v28, %v15576_v17 }
 0x4fc   :  { %7786 = vmatpush.msra.mxu0 %v14308_v48  ;;  %7986 = vmatpush.msrb.mxu3 %v14333_v8 }
 0x4fd   :  { %7873 = vmatpush.msra.mxu1 %v7872_v10  ;;  %7944 = vmatpush.msrb.mxu2 %v14383_v37  ;;  %v14497_v10 = vand.u32 4294901760, %v3548_v61  ;;  %v7902_v17 = vand.u32 4294901760, %v7901_v63  ;;  %v14522_v63 = vsub.f32 %v3544_v32, %v14505_v9 }
 0x4fe   :  { %7788 = vmatpush.msra.mxu0 %v14319_v15  ;;  %7988 = vmatpush.msrb.mxu3 %v14344_v33 }
 0x4ff   :  { %7879 = vmatpush.msra.mxu1 %v7878_v21  ;;  %7947 = vmatpush.msrb.mxu2 %v14399_v44  ;;  %v7907_v21 = vsub.f32 %v14471_v25, %v15578_v34  ;;  %v14514_v27 = vsub.f32 %v3548_v61, %v14497_v10  ;;  %v14518_v34 = vand.u32 4294901760, %v3540_v56  ;;  %v14526_v61 = vand.u32 4294901760, %v3536_v1 }
 0x500   :  { %7790 = vmatpush.msra.mxu0 %v14333_v8  ;;  %7990 = vmatpush.msrb.mxu3 %v14355_v19 }
 0x501   :  { %7885 = vmatpush.msra.mxu1 %v7884_v43  ;;  %7950 = vmatpush.msrb.mxu2 %v14411_v2  ;;  %v7913_v43 = vsub.f32 %v14481_v58, %v15580_v5  ;;  %v3528_v5 = vld [vmem:[#allocation10 + $0x358] sm:$0xff]  ;;  %v15587_v52 = vand.u32 4294901760, %v14514_v27  ;;  %v14535_v32 = vsub.f32 %v3540_v56, %v14518_v34 }
 0x502   :  { %7792 = vmatpush.msra.mxu0 %v14344_v33  ;;  %7992 = vmatpush.msrb.mxu3 %v14375_v12 }
 0x503   :  { %7891 = vmatpush.msra.mxu1 %v7890_v50  ;;  %7953 = vmatpush.msrb.mxu2 %v14423_v3  ;;  %v7908_v50 = vand.u32 4294901760, %v7907_v21  ;;  %v7914_v14 = vand.u32 4294901760, %v7913_v43  ;;  %v15592_v21 = vand.u32 4294901760, %v14522_v63  ;;  %v14544_v43 = vsub.f32 %v3536_v1, %v14526_v61  ;;  %v15987_v1 = vld [vmem:[#allocation46_spill] sm:$0xff] }
 0x504   :  { %7794 = vmatpush.msra.mxu0 %v14355_v19  ;;  %7994 = vmatpush.msrb.mxu3 %v14389_v20  ;;  %v8164_v56 = vsub.f32 %v14514_v27, %v15587_v52  ;;  %v3516_v52 = vld [vmem:[#allocation10 + $0x2f8] sm:$0xff] }
 0x505   :  { %7897 = vmatpush.msra.mxu1 %v7896_v18  ;;  %7956 = vmatpush.msrb.mxu2 %v14435_v29  ;;  %v14530_v18 = vand.u32 4294901760, %v3532_v60  ;;  %v14582_v38 = vand.u32 4294901760, %v3516_v52  ;;  %v15992_v47 = vand.u32 4294901760, %v14544_v43 }
 0x506   :  { %7796 = vmatpush.msra.mxu0 %v14375_v12  ;;  %7996 = vmatpush.msrb.mxu3 %v14401_v39  ;;  %v8165_v41 = vand.u32 4294901760, %v8164_v56 }
 0x507   :  { %7903 = vmatpush.msra.mxu1 %v7902_v17  ;;  %7959 = vmatpush.msrb.mxu2 %v14447_v31  ;;  %v14539_v17 = vand.u32 4294901760, %v3528_v5  ;;  %v14605_v16 = vsub.f32 %v3516_v52, %v14582_v38 }
 0x508   :  { %7798 = vmatpush.msra.mxu0 %v14389_v20  ;;  %7998 = vmatpush.msrb.mxu3 %v14413_v57 }
 0x509   :  { %7909 = vmatpush.msra.mxu1 %v7908_v50  ;;  %7962 = vmatpush.msrb.mxu2 %v14459_v28  ;;  %v14551_v50 = vsub.f32 %v3532_v60, %v14530_v18  ;;  %v14564_v60 = vsub.f32 %v3528_v5, %v14539_v17 }
 0x50a   :  { %7800 = vmatpush.msra.mxu0 %v14401_v39  ;;  %8000 = vmatpush.msrb.mxu3 %v14425_v26 }
 0x50b   :  { %7915 = vmatpush.msra.mxu1 %v7914_v14  ;;  %7965 = vmatpush.msrb.mxu2 %v14471_v25  ;;  %15986 = vst [vmem:[#allocation25_spill] sm:$0xff] %v14551_v50  ;;  %v8170_v14 = vsub.f32 %v14522_v63, %v15592_v21  ;;  %v3512_v21 = vld [vmem:[#allocation10 + $0x2d8] sm:$0xff] }
 0x50c   :  { %7802 = vmatpush.msra.mxu0 %v14413_v57  ;;  %8002 = vmatpush.msrb.mxu3 %v14437_v35  ;;  %15988 = vst [vmem:[#allocation36_spill] sm:$0xff] %v14564_v60  ;;  %v14595_v24 = vand.u32 4294901760, %v3512_v21 }
 0x50d   :  { %7917 = vmatmul.f32.vlgmr.msra.gmra.mxu1 %v15987_v1  ;;  %7968 = vmatpush.msrb.mxu2 %v14481_v58 }
 0x50e   :  { %8084 = vmatpush.msrb.mxu1 %v14281_v36  ;;  %7804 = vmatpush.msra.mxu0 %v14425_v26  ;;  %v15990_v36 = vand.u32 4294901760, %v14535_v32  ;;  %v14617_v52 = vsub.f32 %v3512_v21, %v14595_v24 }
 0x50f   :  { %8004 = vmatpush.msrb.mxu3 %v14449_v46  ;;  %7971 = vmatmul.f32.vlgmr.msrb.gmra.mxu2 %v15989_v42  ;;  %v8171_v42 = vand.u32 4294901760, %v8170_v14  ;;  %v15993_v14 = vand.u32 4294901760, %v14551_v50 }
 0x510   :  { %8086 = vmatpush.msrb.mxu1 %v14288_v62  ;;  %8121 = vmatpush.msra.mxu2 %v14497_v10  ;;  %v8176_v5 = vsub.f32 %v14535_v32, %v15990_v36  ;;  %v15991_v62 = vld [vmem:[#allocation48_spill] sm:$0xff]  ;;  %v8182_v36 = vsub.f32 %v14544_v43, %v15992_v47  ;;  %v14619_v47 = vand.u32 4294901760, %v3504_v55 }
 0x511   :  { %7806 = vmatpush.msra.mxu0 %v14437_v35  ;;  %8006 = vmatpush.msrb.mxu3 %v14461_v59  ;;  %v8188_v56 = vsub.f32 %v14551_v50, %v15993_v14  ;;  %v3496_v50 = vld [vmem:[#allocation10 + $0x258] sm:$0xff] }
 0x512   :  { %8010 = vmatmul.f32.vlgmr.msrb.gmra.mxu3 %v15991_v62  ;;  %8088 = vmatpush.msrb.mxu1 %v14298_v0  ;;  %v8177_v0 = vand.u32 4294901760, %v8176_v5  ;;  %v14607_v62 = vand.u32 4294901760, %v3508_v40  ;;  %v3492_v5 = vld [vmem:[#allocation10 + $0x238] sm:$0xff] }
 0x513   :  { %8123 = vmatpush.msra.mxu2 %v14505_v9  ;;  %8166 = vmatpush.msra.mxu3 %v8165_v41  ;;  %v15994_v41 = vand.u32 4294901760, %v14564_v60 }
 0x514   :  { %7808 = vmatpush.msra.mxu0 %v14449_v46  ;;  %8090 = vmatpush.msrb.mxu1 %v14308_v48  ;;  %v8183_v48 = vand.u32 4294901760, %v8182_v36  ;;  %v14630_v21 = vsub.f32 %v3508_v40, %v14607_v62  ;;  %v14643_v40 = vsub.f32 %v3504_v55, %v14619_v47 }
 0x515   :  { %8125 = vmatpush.msra.mxu2 %v14518_v34  ;;  %8172 = vmatpush.msra.mxu3 %v8171_v42  ;;  %v8194_v14 = vsub.f32 %v14564_v60, %v15994_v41  ;;  %v8189_v42 = vand.u32 4294901760, %v8188_v56  ;;  %v15996_v41 = vand.u32 4294901760, %v14296_v11  ;;  %v14632_v60 = vand.u32 4294901760, %v3500_v30 }
 0x516   :  { %7810 = vmatpush.msra.mxu0 %v14461_v59  ;;  %8092 = vmatpush.msrb.mxu1 %v14319_v15  ;;  %v15997_v15 = vand.u32 4294901760, %v14580_v49  ;;  %v15998_v11 = vand.u32 4294901760, %v14306_v22  ;;  %v15999_v56 = vand.u32 4294901760, %v14593_v53  ;;  %v16000_v22 = vand.u32 4294901760, %v14317_v4 }
 0x517   :  { %7816 = vmatmul.f32.vlgmr.msra.gmra.mxu0 %v15995_v51  ;;  %8127 = vmatpush.msra.mxu2 %v14526_v61  ;;  %v8195_v51 = vand.u32 4294901760, %v8194_v14  ;;  %v16001_v14 = vand.u32 4294901760, %v14605_v16  ;;  %v14656_v55 = vsub.f32 %v3500_v30, %v14632_v60  ;;  %v16002_v4 = vand.u32 4294901760, %v14328_v13 }
 0x518   :  { %8017 = vmatpush.msrb.mxu0 %v15996_v41  ;;  %8178 = vmatpush.msra.mxu3 %v8177_v0  ;;  %v8200_v36 = vsub.f32 %v14580_v49, %v15997_v15  ;;  %v8206_v0 = vsub.f32 %v14593_v53, %v15999_v56  ;;  %v8217_v41 = vand.u32 4294901760, %v14617_v52  ;;  %v14645_v15 = vand.u32 4294901760, %v3496_v50  ;;  %v3488_v56 = vld [vmem:[#allocation10 + $0x218] sm:$0xff] }
 0x519   :  { %8094 = vmatpush.msrb.mxu1 %v14333_v8  ;;  %8129 = vmatpush.msra.mxu2 %v14530_v18  ;;  %v16003_v13 = vand.u32 4294901760, %v14342_v23 }
 0x51a   :  { %8021 = vmatpush.msrb.mxu0 %v15998_v11  ;;  %8184 = vmatpush.msra.mxu3 %v8183_v48  ;;  %v8201_v8 = vand.u32 4294901760, %v8200_v36  ;;  %v8212_v48 = vsub.f32 %v14605_v16, %v16001_v14  ;;  %v8223_v11 = vand.u32 4294901760, %v14630_v21  ;;  %v8218_v36 = vsub.f32 %v14617_v52, %v8217_v41 }
 0x51b   :  { %8096 = vmatpush.msrb.mxu1 %v14344_v33  ;;  %8131 = vmatpush.msra.mxu2 %v14539_v17  ;;  %v14660_v33 = vand.u32 4294901760, %v3492_v5  ;;  %v14669_v30 = vsub.f32 %v3496_v50, %v14645_v15  ;;  %v8235_v14 = vand.u32 4294901760, %v14656_v55  ;;  %v16004_v50 = vand.u32 4294901760, %v14361_v54 }
 0x51c   :  { %8025 = vmatpush.msrb.mxu0 %v16000_v22  ;;  %8190 = vmatpush.msra.mxu3 %v8189_v42  ;;  %v8207_v42 = vand.u32 4294901760, %v8206_v0  ;;  %v8229_v22 = vand.u32 4294901760, %v14643_v40  ;;  %v8224_v0 = vsub.f32 %v14630_v21, %v8223_v11  ;;  %v8219_v23 = vand.u32 4294901760, %v8218_v36 }
 0x51d   :  { %8098 = vmatpush.msrb.mxu1 %v14355_v19  ;;  %8133 = vmatpush.msra.mxu2 %v14556_v6  ;;  %v14673_v19 = vand.u32 4294901760, %v3488_v56 }
 0x51e   :  { %8029 = vmatpush.msrb.mxu0 %v16002_v4  ;;  %8196 = vmatpush.msra.mxu3 %v8195_v51  ;;  %v8213_v51 = vand.u32 4294901760, %v8212_v48  ;;  %v8241_v48 = vand.u32 4294901760, %v14669_v30  ;;  %v8225_v54 = vand.u32 4294901760, %v8224_v0  ;;  %v8236_v4 = vsub.f32 %v14656_v55, %v8235_v14  ;;  %v6453_v0 = vpop.f32.mrf.mxu0 }
 0x51f   :  { %8100 = vmatpush.msrb.mxu1 %v14375_v12  ;;  %8135 = vmatpush.msra.mxu2 %v14569_v45  ;;  %v14684_v12 = vsub.f32 %v3492_v5, %v14660_v33  ;;  %v16005_v5 = vand.u32 4294901760, %v14370_v7 }
 0x520   :  { %8033 = vmatpush.msrb.mxu0 %v16003_v13  ;;  %8202 = vmatpush.msra.mxu3 %v8201_v8  ;;  %v8230_v8 = vsub.f32 %v14643_v40, %v8229_v22  ;;  %v8242_v7 = vsub.f32 %v14669_v30, %v8241_v48 }
 0x521   :  { %8102 = vmatpush.msrb.mxu1 %v14389_v20  ;;  %8137 = vmatpush.msra.mxu2 %v14582_v38  ;;  %v14695_v20 = vsub.f32 %v3488_v56, %v14673_v19 }
 0x522   :  { %8037 = vmatpush.msrb.mxu0 %v16004_v50  ;;  %8208 = vmatpush.msra.mxu3 %v8207_v42  ;;  %v16006_v42 = vand.u32 4294901760, %v14383_v37  ;;  %v8231_v56 = vand.u32 4294901760, %v8230_v8  ;;  %v16007_v37 = vand.u32 4294901760, %v14399_v44  ;;  %v16008_v50 = vand.u32 4294901760, %v14411_v2 }
 0x523   :  { %8104 = vmatpush.msrb.mxu1 %v14401_v39  ;;  %8139 = vmatpush.msra.mxu2 %v14595_v24  ;;  %v8247_v39 = vand.u32 4294901760, %v14684_v12  ;;  %v8253_v36 = vand.u32 4294901760, %v14695_v20  ;;  %v16009_v8 = vand.u32 4294901760, %v14423_v3  ;;  %v16011_v3 = vand.u32 4294901760, %v14447_v31 }
 0x524   :  { %8041 = vmatpush.msrb.mxu0 %v16005_v5  ;;  %8214 = vmatpush.msra.mxu3 %v8213_v51  ;;  %v8237_v51 = vand.u32 4294901760, %v8236_v4  ;;  %v16010_v5 = vand.u32 4294901760, %v14435_v29  ;;  %v16013_v29 = vand.u32 4294901760, %v14514_v27  ;;  %v16016_v31 = vand.u32 4294901760, %v14522_v63 }
 0x525   :  { %8106 = vmatpush.msrb.mxu1 %v14413_v57  ;;  %8141 = vmatpush.msra.mxu2 %v14607_v62  ;;  %v9195_v57 = vld [vmem:[%s15340_s9] sm:$0xf]  ;;  %v8254_v44 = vsub.f32 %v14695_v20, %v8253_v36 }
 0x526   :  { %8045 = vmatpush.msrb.mxu0 %v16006_v42  ;;  %8220 = vmatpush.msra.mxu3 %v8219_v23  ;;  %v3681_v13 = vperm.slane %v9195_v57, 2  ;;  %v8243_v23 = vand.u32 4294901760, %v8242_v7  ;;  %v6608_v42 = vpop.f32.mrf.mxu2  ;;  %v16015_v57 = vld [vmem:[#allocation32_spill] sm:$0xff] }
 0x527   :  { %8108 = vmatpush.msrb.mxu1 %v14425_v26  ;;  %8143 = vmatpush.msra.mxu2 %v14619_v47  ;;  %v8248_v26 = vsub.f32 %v14684_v12, %v8247_v39 }
 0x528   :  { %8049 = vmatpush.msrb.mxu0 %v16007_v37  ;;  %8226 = vmatpush.msra.mxu3 %v8225_v54  ;;  %v8255_v54 = vand.u32 4294901760, %v8254_v44  ;;  %v6647_v37 = vpop.f32.mrf.mxu3 }
 0x529   :  { %8110 = vmatpush.msrb.mxu1 %v14437_v35  ;;  %8145 = vmatpush.msra.mxu2 %v14632_v60  ;;  %v6454_v35 = vadd.f32 %v6453_v0, %v3681_v13  ;;  %v8249_v2 = vand.u32 4294901760, %v8248_v26  ;;  %v16017_v13 = vand.u32 4294901760, %v14471_v25  ;;  %v16019_v26 = vand.u32 4294901760, %v14481_v58 }
 0x52a   :  { %8053 = vmatpush.msrb.mxu0 %v16008_v50  ;;  %8232 = vmatpush.msra.mxu3 %v8231_v56  ;;  %v16014_v56 = vand.u32 4294901760, %v14459_v28  ;;  %v16018_v28 = vand.u32 4294901760, %v14535_v32  ;;  %v16020_v25 = vand.u32 4294901760, %v14544_v43  ;;  %v16021_v50 = vld [vmem:[#allocation25_spill] sm:$0xff] }
 0x52b   :  { %8112 = vmatpush.msrb.mxu1 %v14449_v46  ;;  %8147 = vmatpush.msra.mxu2 %v14645_v15  ;;  %v6554_v46 = vpop.f32.mrf.mxu1 }
 0x52c   :  { %8057 = vmatpush.msrb.mxu0 %v16009_v8  ;;  %8238 = vmatpush.msra.mxu3 %v8237_v51  ;;  %v6555_v4 = vadd.f32 %v6554_v46, %v6454_v35  ;;  %v6716_v51 = vpop.f32.mrf.mxu0  ;;  %v3608_v35 = vld [vmem:[#allocation10 + $0x5d8] sm:$0xff] }
 0x52d   :  { %8114 = vmatpush.msrb.mxu1 %v14461_v59  ;;  %8149 = vmatpush.msra.mxu2 %v14660_v33  ;;  %v16012_v59 = vld [vmem:[#allocation22_spill] sm:$0xff]  ;;  %v14783_v8 = vand.u32 4294901760, %v3608_v35 }
 0x52e   :  { %8061 = vmatpush.msrb.mxu0 %v16010_v5  ;;  %8244 = vmatpush.msra.mxu3 %v8243_v23  ;;  %v6609_v7 = vadd.f32 %v6608_v42, %v6555_v4  ;;  %v3612_v23 = vld [vmem:[#allocation10 + $0x5f8] sm:$0xff] }
 0x52f   :  { %8116 = vmatmul.f32.vlgmr.msrb.gmra.mxu1 %v15987_v1  ;;  %8151 = vmatpush.msra.mxu2 %v14673_v19  ;;  %v14801_v4 = vsub.f32 %v3608_v35, %v14783_v8 }
 0x530   :  { %8317 = vmatpush.msra.mxu1 %v14497_v10  ;;  %8065 = vmatpush.msrb.mxu0 %v16011_v3  ;;  %v6648_v0 = vadd.f32 %v6647_v37, %v6609_v7  ;;  %v3592_v7 = vld [vmem:[#allocation10 + $0x558] sm:$0xff] }
 0x531   :  { %8250 = vmatpush.msra.mxu3 %v8249_v2  ;;  %8157 = vmatmul.f32.vlgmr.msra.gmra.mxu2 %v16012_v59  ;;  %v6794_v2 = vpop.f32.mrf.mxu2 }
 0x532   :  { %8319 = vmatpush.msra.mxu1 %v14505_v9  ;;  %8358 = vmatpush.msrb.mxu2 %v16013_v29 }
 0x533   :  { %8069 = vmatpush.msrb.mxu0 %v16014_v56  ;;  %8256 = vmatpush.msra.mxu3 %v8255_v54  ;;  %v6753_v58 = vpop.f32.mrf.mxu1  ;;  %v3596_v54 = vld [vmem:[#allocation10 + $0x578] sm:$0xff] }
 0x534   :  { %8258 = vmatmul.f32.vlgmr.msra.gmra.mxu3 %v16015_v57  ;;  %8321 = vmatpush.msra.mxu1 %v14518_v34  ;;  %v6949_v59 = vpop.f32.mrf.mxu0  ;;  %v14814_v56 = vand.u32 4294901760, %v3596_v54 }
 0x535   :  { %8362 = vmatpush.msrb.mxu2 %v16016_v31  ;;  %8425 = vmatpush.msrb.mxu3 %v14497_v10  ;;  %v6717_v10 = vadd.f32 %v6716_v51, %v6648_v0  ;;  %v3588_v31 = vld [vmem:[#allocation10 + $0x538] sm:$0xff] }
 0x536   :  { %8073 = vmatpush.msrb.mxu0 %v16017_v13  ;;  %8323 = vmatpush.msra.mxu1 %v14526_v61  ;;  %v14828_v13 = vand.u32 4294901760, %v3592_v7  ;;  %v14839_v37 = vand.u32 4294901760, %v3588_v31  ;;  %v3584_v51 = vld [vmem:[#allocation10 + $0x518] sm:$0xff] }
 0x537   :  { %8366 = vmatpush.msrb.mxu2 %v16018_v28  ;;  %8427 = vmatpush.msrb.mxu3 %v14505_v9  ;;  %v16022_v9 = vand.u32 4294901760, %v16021_v50  ;;  %v3580_v0 = vld [vmem:[#allocation10 + $0x4f8] sm:$0xff] }
 0x538   :  { %8077 = vmatpush.msrb.mxu0 %v16019_v26  ;;  %8325 = vmatpush.msra.mxu1 %v14530_v18  ;;  %v14854_v26 = vsub.f32 %v3592_v7, %v14828_v13  ;;  %v3560_v7 = vld [vmem:[#allocation10 + $0x458] sm:$0xff] }
 0x539   :  { %8079 = vmatmul.f32.vlgmr.msrb.gmra.mxu0 %v15987_v1  ;;  %8370 = vmatpush.msrb.mxu2 %v16020_v25  ;;  %v16023_v1 = vld [vmem:[#allocation36_spill] sm:$0xff] }
 0x53a   :  { %8264 = vmatpush.msra.mxu0 %v14514_v27  ;;  %8429 = vmatpush.msrb.mxu3 %v14518_v34  ;;  %v16024_v44 = vand.u32 4294901760, %v16023_v1  ;;  %v6754_v27 = vadd.f32 %v6753_v58, %v6717_v10  ;;  %v14776_v34 = vand.u32 4294901760, %v3612_v23  ;;  %v14865_v10 = vsub.f32 %v3588_v31, %v14839_v37  ;;  %v3572_v58 = vld [vmem:[#allocation10 + $0x4b8] sm:$0xff] }
 0x53b   :  { %8327 = vmatpush.msra.mxu1 %v14539_v17  ;;  %8374 = vmatpush.msrb.mxu2 %v16022_v9  ;;  %v6988_v28 = vpop.f32.mrf.mxu1 }
 0x53c   :  { %8267 = vmatpush.msra.mxu0 %v14522_v63  ;;  %8431 = vmatpush.msrb.mxu3 %v14526_v61  ;;  %v16025_v63 = vand.u32 4294901760, %v14580_v49  ;;  %v3604_v61 = vld [vmem:[#allocation10 + $0x5b8] sm:$0xff]  ;;  %v6795_v5 = vadd.f32 %v6794_v2, %v6754_v27  ;;  %v14791_v46 = vsub.f32 %v3612_v23, %v14776_v34 }
 0x53d   :  { %8329 = vmatpush.msra.mxu1 %v14556_v6  ;;  %8378 = vmatpush.msrb.mxu2 %v16024_v44 }
 0x53e   :  { %8270 = vmatpush.msra.mxu0 %v14535_v32  ;;  %8433 = vmatpush.msrb.mxu3 %v14530_v18  ;;  %v16026_v32 = vand.u32 4294901760, %v14593_v53  ;;  %v3600_v18 = vld [vmem:[#allocation10 + $0x598] sm:$0xff]  ;;  %v15616_v42 = vand.u32 4294901760, %v14791_v46 }
 0x53f   :  { %8331 = vmatpush.msra.mxu1 %v14569_v45  ;;  %8382 = vmatpush.msrb.mxu2 %v16025_v63  ;;  %v14803_v3 = vand.u32 4294901760, %v3600_v18  ;;  %v15609_v63 = vand.u32 4294901760, %v14865_v10 }
 0x540   :  { %8273 = vmatpush.msra.mxu0 %v14544_v43  ;;  %8435 = vmatpush.msrb.mxu3 %v14539_v17  ;;  %v14793_v43 = vand.u32 4294901760, %v3604_v61  ;;  %v16027_v17 = vand.u32 4294901760, %v14605_v16 }
 0x541   :  { %8333 = vmatpush.msra.mxu1 %v14582_v38  ;;  %8386 = vmatpush.msrb.mxu2 %v16026_v32  ;;  %v14896_v32 = vand.u32 4294901760, %v3572_v58 }
 0x542   :  { %8276 = vmatpush.msra.mxu0 %v16021_v50  ;;  %8437 = vmatpush.msrb.mxu3 %v14556_v6  ;;  %v6895_v6 = vpop.f32.mrf.mxu3  ;;  %v7057_v50 = vpop.f32.mrf.mxu2 }
 0x543   :  { %8335 = vmatpush.msra.mxu1 %v14595_v24  ;;  %8390 = vmatpush.msrb.mxu2 %v16027_v17  ;;  %v6896_v29 = vadd.f32 %v6895_v6, %v6795_v5  ;;  %v3564_v17 = vld [vmem:[#allocation10 + $0x478] sm:$0xff]  ;;  %v14918_v31 = vsub.f32 %v3572_v58, %v14896_v32 }
 0x544   :  { %8279 = vmatpush.msra.mxu0 %v16023_v1  ;;  %8439 = vmatpush.msrb.mxu3 %v14569_v45  ;;  %v14812_v45 = vsub.f32 %v3604_v61, %v14793_v43  ;;  %v16028_v1 = vld [vmem:[#allocation35_spill] sm:$0xff] }
 0x545   :  { %8337 = vmatpush.msra.mxu1 %v14607_v62  ;;  %8394 = vmatpush.msrb.mxu2 %v8217_v41  ;;  %v6950_v41 = vadd.f32 %v6949_v59, %v6896_v29 }
 0x546   :  { %8282 = vmatpush.msra.mxu0 %v14580_v49  ;;  %8441 = vmatpush.msrb.mxu3 %v14582_v38  ;;  %v15615_v49 = vand.u32 4294901760, %v14801_v4  ;;  %v14823_v38 = vsub.f32 %v3600_v18, %v14803_v3 }
 0x547   :  { %8339 = vmatpush.msra.mxu1 %v14619_v47  ;;  %8398 = vmatpush.msrb.mxu2 %v8223_v11  ;;  %v14837_v11 = vsub.f32 %v3596_v54, %v14814_v56 }
 0x548   :  { %8285 = vmatpush.msra.mxu0 %v14593_v53  ;;  %8443 = vmatpush.msrb.mxu3 %v14595_v24  ;;  %v8505_v24 = vsub.f32 %v14791_v46, %v15616_v42  ;;  %v15613_v53 = vand.u32 4294901760, %v14812_v45 }
 0x549   :  { %8341 = vmatpush.msra.mxu1 %v14632_v60  ;;  %8402 = vmatpush.msrb.mxu2 %v8229_v22  ;;  %v15612_v22 = vand.u32 4294901760, %v14823_v38  ;;  %v15611_v25 = vand.u32 4294901760, %v14837_v11 }
 0x54a   :  { %8288 = vmatpush.msra.mxu0 %v14605_v16  ;;  %8445 = vmatpush.msrb.mxu3 %v14607_v62  ;;  %v6989_v16 = vadd.f32 %v6988_v28, %v6950_v41  ;;  %v8511_v62 = vsub.f32 %v14801_v4, %v15615_v49  ;;  %v7094_v61 = vpop.f32.mrf.mxu3  ;;  %v14920_v41 = vand.u32 4294901760, %v3564_v17  ;;  %v7290_v58 = vpop.f32.mrf.mxu2 }
 0x54b   :  { %8343 = vmatpush.msra.mxu1 %v14645_v15  ;;  %8406 = vmatpush.msrb.mxu2 %v8235_v14  ;;  %v14856_v14 = vand.u32 4294901760, %v3584_v51  ;;  %v8523_v23 = vsub.f32 %v14823_v38, %v15612_v22  ;;  %v8529_v27 = vsub.f32 %v14837_v11, %v15611_v25  ;;  %v16034_v22 = vld [vmem:[#allocation38_spill] sm:$0xff] }
 0x54c   :  { %8291 = vmatpush.msra.mxu0 %v14617_v52  ;;  %8447 = vmatpush.msrb.mxu3 %v14619_v47  ;;  %v8506_v47 = vand.u32 4294901760, %v8505_v24  ;;  %v8517_v52 = vsub.f32 %v14812_v45, %v15613_v53  ;;  %v8512_v9 = vand.u32 4294901760, %v8511_v62  ;;  %v3556_v24 = vld [vmem:[#allocation10 + $0x438] sm:$0xff] }
 0x54d   :  { %8345 = vmatpush.msra.mxu1 %v14660_v33  ;;  %8410 = vmatpush.msrb.mxu2 %v8241_v48  ;;  %v3576_v48 = vld [vmem:[#allocation10 + $0x4d8] sm:$0xff]  ;;  %v14882_v44 = vsub.f32 %v3584_v51, %v14856_v14  ;;  %v8530_v29 = vand.u32 4294901760, %v8529_v27  ;;  %v7236_v51 = vpop.f32.mrf.mxu1 }
 0x54e   :  { %8294 = vmatpush.msra.mxu0 %v14630_v21  ;;  %8449 = vmatpush.msrb.mxu3 %v14632_v60  ;;  %v14870_v21 = vand.u32 4294901760, %v3580_v0  ;;  %v7058_v60 = vadd.f32 %v7057_v50, %v6989_v16  ;;  %v14884_v35 = vand.u32 4294901760, %v3576_v48 }
 0x54f   :  { %8347 = vmatpush.msra.mxu1 %v14673_v19  ;;  %8414 = vmatpush.msrb.mxu2 %v8247_v39  ;;  %v15610_v39 = vand.u32 4294901760, %v14854_v26  ;;  %v15607_v54 = vand.u32 4294901760, %v14882_v44 }
 0x550   :  { %8297 = vmatpush.msra.mxu0 %v14643_v40  ;;  %8451 = vmatpush.msrb.mxu3 %v14645_v15  ;;  %v3568_v40 = vld [vmem:[#allocation10 + $0x498] sm:$0xff]  ;;  %v8518_v15 = vand.u32 4294901760, %v8517_v52  ;;  %v14894_v2 = vsub.f32 %v3580_v0, %v14870_v21  ;;  %v7095_v18 = vadd.f32 %v7094_v61, %v7058_v60  ;;  %v14908_v6 = vsub.f32 %v3576_v48, %v14884_v35 }
 0x551   :  { %8351 = vmatmul.f32.vlgmr.msra.gmra.mxu1 %v16028_v1  ;;  %8418 = vmatpush.msrb.mxu2 %v8253_v36  ;;  %v7135_v36 = vpop.f32.mrf.mxu0  ;;  %v14899_v5 = vand.u32 4294901760, %v3568_v40  ;;  %v8547_v16 = vsub.f32 %v14882_v44, %v15607_v54  ;;  %v14932_v0 = vand.u32 4294901760, %v3560_v7  ;;  %v3552_v52 = vld [vmem:[#allocation10 + $0x418] sm:$0xff]  ;;  %v15604_v60 = vand.u32 4294901760, %v14918_v31 }
 0x552   :  { %8507 = vmatpush.msrb.mxu1 %v8506_v47  ;;  %8300 = vmatpush.msra.mxu0 %v14656_v55  ;;  %v8524_v55 = vand.u32 4294901760, %v8523_v23  ;;  %v7136_v59 = vadd.f32 %v7135_v36, %v7095_v18  ;;  %v15605_v62 = vand.u32 4294901760, %v14908_v6  ;;  %v16029_v48 = vld [vmem:[#allocation34_spill] sm:$0xff]  ;;  %v14944_v23 = vand.u32 4294901760, %v3556_v24 }
 0x553   :  { %8453 = vmatpush.msrb.mxu3 %v14660_v33  ;;  %8420 = vmatmul.f32.vlgmr.msrb.gmra.mxu2 %v16015_v57  ;;  %v8535_v33 = vsub.f32 %v14854_v26, %v15610_v39  ;;  %v8548_v1 = vand.u32 4294901760, %v8547_v16  ;;  %v14956_v27 = vand.u32 4294901760, %v3552_v52  ;;  %v8565_v18 = vsub.f32 %v14918_v31, %v15604_v60 }
 0x554   :  { %8513 = vmatpush.msrb.mxu1 %v8512_v9  ;;  %8605 = vmatpush.msra.mxu2 %v14791_v46  ;;  %v14942_v9 = vsub.f32 %v3564_v17, %v14920_v41  ;;  %v14966_v17 = vsub.f32 %v3556_v24, %v14944_v23 }
 0x555   :  { %8303 = vmatpush.msra.mxu0 %v14669_v30  ;;  %8455 = vmatpush.msrb.mxu3 %v14673_v19  ;;  %v8541_v30 = vsub.f32 %v14865_v10, %v15609_v63  ;;  %v15606_v19 = vand.u32 4294901760, %v14894_v2  ;;  %v8536_v28 = vand.u32 4294901760, %v8535_v33  ;;  %v8566_v16 = vand.u32 4294901760, %v8565_v18 }
 0x556   :  { %8457 = vmatmul.f32.vlgmr.msrb.gmra.mxu3 %v16015_v57  ;;  %8519 = vmatpush.msrb.mxu1 %v8518_v15  ;;  %v14924_v57 = vsub.f32 %v3568_v40, %v14899_v5  ;;  %v8559_v40 = vsub.f32 %v14908_v6, %v15605_v62  ;;  %v14954_v15 = vsub.f32 %v3560_v7, %v14932_v0  ;;  %v7329_v7 = vpop.f32.mrf.mxu3  ;;  %v3648_v62 = vld [vmem:[#allocation10 + $0x718] sm:$0xff] }
 0x557   :  { %8608 = vmatpush.msra.mxu2 %v14801_v4  ;;  %8658 = vmatpush.msra.mxu3 %v14776_v34  ;;  %v8542_v47 = vand.u32 4294901760, %v8541_v30  ;;  %v8553_v50 = vsub.f32 %v14894_v2, %v15606_v19  ;;  %v14976_v30 = vsub.f32 %v3552_v52, %v14956_v27  ;;  %v15064_v25 = vand.u32 4294901760, %v3648_v62 }
 0x558   :  { %8306 = vmatpush.msra.mxu0 %v14684_v12  ;;  %8525 = vmatpush.msrb.mxu1 %v8524_v55  ;;  %v7237_v12 = vadd.f32 %v7236_v51, %v7136_v59  ;;  %v15602_v55 = vand.u32 4294901760, %v14942_v9  ;;  %v8560_v59 = vand.u32 4294901760, %v8559_v40  ;;  %v3676_v51 = vld [vmem:[#allocation10 + $0x7f8] sm:$0xff] }
 0x559   :  { %8611 = vmatpush.msra.mxu2 %v14812_v45  ;;  %8660 = vmatpush.msra.mxu3 %v14783_v8  ;;  %v8554_v36 = vand.u32 4294901760, %v8553_v50  ;;  %16030 = vst [vmem:[#allocation40_spill] sm:$0xff] %v14976_v30  ;;  %v7398_v24 = vpop.f32.mrf.mxu0  ;;  %v14992_v40 = vand.u32 4294901760, %v3676_v51 }
 0x55a   :  { %8309 = vmatpush.msra.mxu0 %v14695_v20  ;;  %8531 = vmatpush.msrb.mxu1 %v8530_v29  ;;  %v15603_v20 = vand.u32 4294901760, %v14924_v57  ;;  %v7291_v61 = vadd.f32 %v7290_v58, %v7237_v12  ;;  %v15600_v29 = vand.u32 4294901760, %v14954_v15  ;;  %v8577_v12 = vsub.f32 %v14942_v9, %v15602_v55 }
 0x55b   :  { %8312 = vmatmul.f32.vlgmr.msra.gmra.mxu0 %v16029_v48  ;;  %8614 = vmatpush.msra.mxu2 %v14823_v38  ;;  %v3672_v48 = vld [vmem:[#allocation10 + $0x7d8] sm:$0xff] }
 0x55c   :  { %8462 = vmatpush.msrb.mxu0 %v14776_v34  ;;  %8662 = vmatpush.msra.mxu3 %v14793_v43  ;;  %v8571_v33 = vsub.f32 %v14924_v57, %v15603_v20  ;;  %v8583_v58 = vsub.f32 %v14954_v15, %v15600_v29  ;;  %v15000_v18 = vand.u32 4294901760, %v3672_v48  ;;  %v3660_v29 = vld [vmem:[#allocation10 + $0x778] sm:$0xff] }
 0x55d   :  { %8537 = vmatpush.msrb.mxu1 %v8536_v28  ;;  %8617 = vmatpush.msra.mxu2 %v14837_v11  ;;  %v7330_v28 = vadd.f32 %v7329_v7, %v7291_v61  ;;  %v8578_v61 = vand.u32 4294901760, %v8577_v12  ;;  %v3664_v12 = vld [vmem:[#allocation10 + $0x798] sm:$0xff]  ;;  %v15025_v20 = vand.u32 4294901760, %v3660_v29 }
 0x55e   :  { %8464 = vmatpush.msrb.mxu0 %v14783_v8  ;;  %8664 = vmatpush.msra.mxu3 %v14803_v3  ;;  %v8572_v52 = vand.u32 4294901760, %v8571_v33  ;;  %v3668_v33 = vld [vmem:[#allocation10 + $0x7b8] sm:$0xff] }
 0x55f   :  { %8543 = vmatpush.msrb.mxu1 %v8542_v47  ;;  %8620 = vmatpush.msra.mxu2 %v14854_v26  ;;  %v15599_v47 = vand.u32 4294901760, %v14966_v17  ;;  %v7399_v50 = vadd.f32 %v7398_v24, %v7330_v28  ;;  %v8584_v24 = vand.u32 4294901760, %v8583_v58  ;;  %v7476_v58 = vpop.f32.mrf.mxu2 }
 0x560   :  { %8466 = vmatpush.msrb.mxu0 %v14793_v43  ;;  %8666 = vmatpush.msra.mxu3 %v14814_v56 }
 0x561   :  { %8549 = vmatpush.msrb.mxu1 %v8548_v1  ;;  %8623 = vmatpush.msra.mxu2 %v14865_v10  ;;  %v15601_v1 = vand.u32 4294901760, %v14976_v30 }
 0x562   :  { %8468 = vmatpush.msrb.mxu0 %v14803_v3  ;;  %8668 = vmatpush.msra.mxu3 %v14828_v13 }
 0x563   :  { %8555 = vmatpush.msrb.mxu1 %v8554_v36  ;;  %8626 = vmatpush.msra.mxu2 %v14882_v44  ;;  %v8589_v36 = vsub.f32 %v14966_v17, %v15599_v47  ;;  %v8595_v28 = vsub.f32 %v14976_v30, %v15601_v1  ;;  %v15013_v47 = vand.u32 4294901760, %v3668_v33 }
 0x564   :  { %8470 = vmatpush.msrb.mxu0 %v14814_v56  ;;  %8670 = vmatpush.msra.mxu3 %v14839_v37 }
 0x565   :  { %8561 = vmatpush.msrb.mxu1 %v8560_v59  ;;  %8629 = vmatpush.msra.mxu2 %v14894_v2  ;;  %v7435_v59 = vpop.f32.mrf.mxu1  ;;  %v8596_v55 = vand.u32 4294901760, %v8595_v28  ;;  %v7577_v28 = vpop.f32.mrf.mxu3 }
 0x566   :  { %8472 = vmatpush.msrb.mxu0 %v14828_v13  ;;  %8672 = vmatpush.msra.mxu3 %v14856_v14  ;;  %v7436_v7 = vadd.f32 %v7435_v59, %v7399_v50  ;;  %v15017_v50 = vsub.f32 %v3672_v48, %v15000_v18  ;;  %v3656_v59 = vld [vmem:[#allocation10 + $0x758] sm:$0xff]  ;;  %v15030_v48 = vsub.f32 %v3668_v33, %v15013_v47 }
 0x567   :  { %8567 = vmatpush.msrb.mxu1 %v8566_v16  ;;  %8632 = vmatpush.msra.mxu2 %v14908_v6  ;;  %v15009_v16 = vsub.f32 %v3676_v51, %v14992_v40  ;;  %v15021_v51 = vand.u32 4294901760, %v3664_v12 }
 0x568   :  { %8474 = vmatpush.msrb.mxu0 %v14839_v37  ;;  %8674 = vmatpush.msra.mxu3 %v14870_v21  ;;  %v7477_v1 = vadd.f32 %v7476_v58, %v7436_v7  ;;  %v15034_v7 = vand.u32 4294901760, %v3656_v59  ;;  %v15617_v19 = vand.u32 4294901760, %v15030_v48 }
 0x569   :  { %8573 = vmatpush.msrb.mxu1 %v8572_v52  ;;  %8635 = vmatpush.msra.mxu2 %v14918_v31  ;;  %v8590_v52 = vand.u32 4294901760, %v8589_v36  ;;  %v15614_v36 = vand.u32 4294901760, %v15017_v50  ;;  %v15039_v58 = vsub.f32 %v3664_v12, %v15021_v51 }
 0x56a   :  { %8476 = vmatpush.msrb.mxu0 %v14856_v14  ;;  %8676 = vmatpush.msra.mxu3 %v14884_v35  ;;  %v7578_v60 = vadd.f32 %v7577_v28, %v7477_v1  ;;  %v15059_v28 = vsub.f32 %v3656_v59, %v15034_v7  ;;  %v3640_v59 = vld [vmem:[#allocation10 + $0x6d8] sm:$0xff] }
 0x56b   :  { %8579 = vmatpush.msrb.mxu1 %v8578_v61  ;;  %8638 = vmatpush.msra.mxu2 %v14924_v57  ;;  %v15608_v61 = vand.u32 4294901760, %v15009_v16  ;;  %v8852_v1 = vsub.f32 %v15017_v50, %v15614_v36  ;;  %v15619_v39 = vand.u32 4294901760, %v15039_v58 }
 0x56c   :  { %8478 = vmatpush.msrb.mxu0 %v14870_v21  ;;  %8678 = vmatpush.msra.mxu3 %v14896_v32  ;;  %16033 = vst [vmem:[#allocation29_spill] sm:$0xff] %v15059_v28 }
 0x56d   :  { %8585 = vmatpush.msrb.mxu1 %v8584_v24  ;;  %8641 = vmatpush.msra.mxu2 %v14942_v9  ;;  %v3652_v24 = vld [vmem:[#allocation10 + $0x738] sm:$0xff]  ;;  %v8846_v33 = vsub.f32 %v15009_v16, %v15608_v61  ;;  %v7670_v63 = vpop.f32.mrf.mxu1 }
 0x56e   :  { %8480 = vmatpush.msrb.mxu0 %v14884_v35  ;;  %8680 = vmatpush.msra.mxu3 %v14899_v5  ;;  %v15051_v54 = vand.u32 4294901760, %v3652_v24  ;;  %v3644_v61 = vld [vmem:[#allocation10 + $0x6f8] sm:$0xff] }
 0x56f   :  { %8591 = vmatpush.msrb.mxu1 %v8590_v52  ;;  %8644 = vmatpush.msra.mxu2 %v14954_v15  ;;  %v15046_v52 = vsub.f32 %v3660_v29, %v15025_v20  ;;  %v8847_v53 = vand.u32 4294901760, %v8846_v33  ;;  %v15077_v42 = vand.u32 4294901760, %v3644_v61  ;;  %v3636_v33 = vld [vmem:[#allocation10 + $0x6b8] sm:$0xff] }
 0x570   :  { %8482 = vmatpush.msrb.mxu0 %v14896_v32  ;;  %8682 = vmatpush.msra.mxu3 %v14920_v41  ;;  %v15075_v49 = vsub.f32 %v3652_v24, %v15051_v54  ;;  %v8864_v24 = vsub.f32 %v15039_v58, %v15619_v39 }
 0x571   :  { %8597 = vmatpush.msrb.mxu1 %v8596_v55  ;;  %8647 = vmatpush.msra.mxu2 %v14966_v17  ;;  %16031 = vst [vmem:[#allocation41_spill] sm:$0xff] %v15046_v52  ;;  %v16032_v55 = vld [vmem:[#allocation37_spill] sm:$0xff] }
 0x572   :  { %8484 = vmatpush.msrb.mxu0 %v14899_v5  ;;  %8684 = vmatpush.msra.mxu3 %v14932_v0  ;;  %v7631_v12 = vpop.f32.mrf.mxu0 }
 0x573   :  { %8599 = vmatmul.f32.vlgmr.msrb.gmra.mxu1 %v16032_v55  ;;  %8650 = vmatpush.msra.mxu2 %v14976_v30  ;;  %v7632_v29 = vadd.f32 %v7631_v12, %v7578_v60  ;;  %v7739_v12 = vpop.f32.mrf.mxu2  ;;  %v15088_v60 = vsub.f32 %v3648_v62, %v15064_v25  ;;  %v15090_v30 = vand.u32 4294901760, %v3640_v59  ;;  %v15100_v62 = vsub.f32 %v3644_v61, %v15077_v42 }
 0x574   :  { %8766 = vmatpush.msra.mxu1 %v14776_v34  ;;  %8486 = vmatpush.msrb.mxu0 %v14920_v41  ;;  %v8858_v34 = vsub.f32 %v15030_v48, %v15617_v19  ;;  %v7776_v19 = vpop.f32.mrf.mxu3 }
 0x575   :  { %8686 = vmatpush.msra.mxu3 %v14944_v23  ;;  %8653 = vmatmul.f32.vlgmr.msra.gmra.mxu2 %v16034_v22  ;;  %v7671_v36 = vadd.f32 %v7670_v63, %v7632_v29  ;;  %v8853_v22 = vand.u32 4294901760, %v8852_v1  ;;  %v16035_v29 = vld [vmem:[#allocation23_spill] sm:$0xff]  ;;  %v16036_v1 = vand.u32 4294901760, %v15046_v52  ;;  %v15112_v61 = vsub.f32 %v3640_v59, %v15090_v30 }
 0x576   :  { %8768 = vmatpush.msra.mxu1 %v14783_v8  ;;  %8803 = vmatpush.msrb.mxu2 %v14992_v40  ;;  %v15102_v8 = vand.u32 4294901760, %v3636_v33  ;;  %v8893_v59 = vand.u32 4294901760, %v15100_v62 }
 0x577   :  { %8488 = vmatpush.msrb.mxu0 %v14932_v0  ;;  %8688 = vmatpush.msra.mxu3 %v14956_v27  ;;  %v7740_v63 = vadd.f32 %v7739_v12, %v7671_v36  ;;  %v8870_v12 = vsub.f32 %v15046_v52, %v16036_v1  ;;  %v3628_v1 = vld [vmem:[#allocation10 + $0x678] sm:$0xff]  ;;  %v16038_v52 = vld [vmem:[#allocation20_spill] sm:$0xff] }
 0x578   :  { %8692 = vmatmul.f32.vlgmr.msra.gmra.mxu3 %v16035_v29  ;;  %8770 = vmatpush.msra.mxu1 %v14793_v43  ;;  %v3632_v29 = vld [vmem:[#allocation10 + $0x698] sm:$0xff]  ;;  %v8859_v43 = vand.u32 4294901760, %v8858_v34  ;;  %v15125_v34 = vsub.f32 %v3636_v33, %v15102_v8 }
 0x579   :  { %8805 = vmatpush.msrb.mxu2 %v15000_v18  ;;  %8848 = vmatpush.msrb.mxu3 %v8847_v53  ;;  %v7777_v36 = vadd.f32 %v7776_v19, %v7740_v63  ;;  %v16037_v19 = vand.u32 4294901760, %v15059_v28  ;;  %v15114_v39 = vand.u32 4294901760, %v3632_v29 }
 0x57a   :  { %8490 = vmatpush.msrb.mxu0 %v14944_v23  ;;  %8772 = vmatpush.msra.mxu1 %v14803_v3  ;;  %v8865_v3 = vand.u32 4294901760, %v8864_v24 }
 0x57b   :  { %8807 = vmatpush.msrb.mxu2 %v15013_v47  ;;  %8854 = vmatpush.msrb.mxu3 %v8853_v22  ;;  %v9145_v53 = vmax.f32 %v7777_v36, 0.0  ;;  %v8876_v63 = vsub.f32 %v15059_v28, %v16037_v19  ;;  %v8871_v22 = vand.u32 4294901760, %v8870_v12  ;;  %v3624_v36 = vld [vmem:[#allocation10 + $0x658] sm:$0xff]  ;;  %v16039_v19 = vand.u32 4294901760, %v14791_v46 }
 0x57c   :  { %8492 = vmatpush.msrb.mxu0 %v14956_v27  ;;  %8774 = vmatpush.msra.mxu1 %v14814_v56  ;;  %v16040_v56 = vand.u32 4294901760, %v15075_v49  ;;  %v15127_v28 = vand.u32 4294901760, %v3628_v1  ;;  %v16041_v46 = vand.u32 4294901760, %v14801_v4  ;;  %v16042_v12 = vand.u32 4294901760, %v15088_v60 }
 0x57d   :  { %8498 = vmatmul.f32.vlgmr.msrb.gmra.mxu0 %v16038_v52  ;;  %8809 = vmatpush.msrb.mxu2 %v15021_v51  ;;  %9149 = vst [vmem:[#allocation14 + $0x10] sm:$0xff] %v9145_v53  ;;  %v8877_v52 = vand.u32 4294901760, %v8876_v63  ;;  %v8899_v53 = vand.u32 4294901760, %v15112_v61  ;;  %v15138_v33 = vsub.f32 %v3632_v29, %v15114_v39  ;;  %v16043_v4 = vand.u32 4294901760, %v14812_v45 }
 0x57e   :  { %8699 = vmatpush.msra.mxu0 %v16039_v19  ;;  %8860 = vmatpush.msrb.mxu3 %v8859_v43  ;;  %v8882_v24 = vsub.f32 %v15075_v49, %v16040_v56  ;;  %v8888_v43 = vsub.f32 %v15088_v60, %v16042_v12  ;;  %v15140_v19 = vand.u32 4294901760, %v3624_v36  ;;  %v3620_v56 = vld [vmem:[#allocation10 + $0x638] sm:$0xff]  ;;  %v8894_v63 = vsub.f32 %v15100_v62, %v8893_v59 }
 0x57f   :  { %8776 = vmatpush.msra.mxu1 %v14828_v13  ;;  %8811 = vmatpush.msrb.mxu2 %v15025_v20  ;;  %v15151_v29 = vsub.f32 %v3628_v1, %v15127_v28  ;;  %v16044_v45 = vand.u32 4294901760, %v14823_v38  ;;  %v8911_v12 = vand.u32 4294901760, %v15138_v33  ;;  %v16045_v38 = vand.u32 4294901760, %v14837_v11 }
 0x580   :  { %8703 = vmatpush.msra.mxu0 %v16041_v46  ;;  %8866 = vmatpush.msrb.mxu3 %v8865_v3  ;;  %v8883_v13 = vand.u32 4294901760, %v8882_v24  ;;  %v8905_v3 = vand.u32 4294901760, %v15125_v34  ;;  %v3616_v46 = vld [vmem:[#allocation10 + $0x618] sm:$0xff]  ;;  %v8900_v24 = vsub.f32 %v15112_v61, %v8899_v53  ;;  %v15164_v1 = vsub.f32 %v3624_v36, %v15140_v19 }
 0x581   :  { %8778 = vmatpush.msra.mxu1 %v14839_v37  ;;  %8813 = vmatpush.msrb.mxu2 %v15034_v7  ;;  %v15155_v37 = vand.u32 4294901760, %v3620_v56  ;;  %v16046_v36 = vand.u32 4294901760, %v14854_v26 }
 0x582   :  { %8707 = vmatpush.msra.mxu0 %v16043_v4  ;;  %8872 = vmatpush.msrb.mxu3 %v8871_v22  ;;  %v8889_v22 = vand.u32 4294901760, %v8888_v43  ;;  %v8906_v43 = vsub.f32 %v15125_v34, %v8905_v3  ;;  %v8917_v4 = vand.u32 4294901760, %v15151_v29  ;;  %v8901_v11 = vand.u32 4294901760, %v8900_v24 }
 0x583   :  { %8780 = vmatpush.msra.mxu1 %v14856_v14  ;;  %8815 = vmatpush.msrb.mxu2 %v15051_v54  ;;  %v15168_v14 = vand.u32 4294901760, %v3616_v46 }
 0x584   :  { %8711 = vmatpush.msra.mxu0 %v16044_v45  ;;  %8878 = vmatpush.msrb.mxu3 %v8877_v52  ;;  %v8895_v52 = vand.u32 4294901760, %v8894_v63  ;;  %v8923_v63 = vand.u32 4294901760, %v15164_v1  ;;  %v8907_v26 = vand.u32 4294901760, %v8906_v43  ;;  %v8918_v45 = vsub.f32 %v15151_v29, %v8917_v4 }
 0x585   :  { %8782 = vmatpush.msra.mxu1 %v14870_v21  ;;  %8817 = vmatpush.msrb.mxu2 %v15064_v25  ;;  %v15179_v21 = vsub.f32 %v3620_v56, %v15155_v37  ;;  %v16047_v56 = vand.u32 4294901760, %v14865_v10  ;;  %v16052_v43 = vand.u32 4294901760, %v14924_v57  ;;  %v16056_v57 = vand.u32 4294901760, %v14954_v15  ;;  %v16061_v15 = vld [vmem:[#allocation40_spill] sm:$0xff] }
 0x586   :  { %8715 = vmatpush.msra.mxu0 %v16045_v38  ;;  %8884 = vmatpush.msrb.mxu3 %v8883_v13  ;;  %v8912_v13 = vsub.f32 %v15138_v33, %v8911_v12  ;;  %v8924_v10 = vsub.f32 %v15164_v1, %v8923_v63  ;;  %v8919_v38 = vand.u32 4294901760, %v8918_v45  ;;  %v16063_v45 = vand.u32 4294901760, %v15039_v58 }
 0x587   :  { %8784 = vmatpush.msra.mxu1 %v14884_v35  ;;  %8819 = vmatpush.msrb.mxu2 %v15077_v42  ;;  %v15190_v35 = vsub.f32 %v3616_v46, %v15168_v14 }
 0x588   :  { %8719 = vmatpush.msra.mxu0 %v16046_v36  ;;  %8890 = vmatpush.msrb.mxu3 %v8889_v22  ;;  %v16048_v22 = vand.u32 4294901760, %v14882_v44  ;;  %v8913_v46 = vand.u32 4294901760, %v8912_v13  ;;  %v16054_v36 = vld [vmem:[#allocation39_spill] sm:$0xff]  ;;  %v16058_v13 = vand.u32 4294901760, %v15017_v50 }
 0x589   :  { %8786 = vmatpush.msra.mxu1 %v14896_v32  ;;  %8821 = vmatpush.msrb.mxu2 %v15090_v30  ;;  %v8929_v32 = vand.u32 4294901760, %v15179_v21  ;;  %v8935_v24 = vand.u32 4294901760, %v15190_v35 }
 0x58a   :  { %8723 = vmatpush.msra.mxu0 %v16047_v56  ;;  %8896 = vmatpush.msrb.mxu3 %v8895_v52  ;;  %v16050_v52 = vand.u32 4294901760, %v14908_v6  ;;  %v16060_v56 = vand.u32 4294901760, %v15030_v48 }
 0x58b   :  { %8788 = vmatpush.msra.mxu1 %v14899_v5  ;;  %8823 = vmatpush.msrb.mxu2 %v15102_v8  ;;  %v16049_v5 = vand.u32 4294901760, %v14894_v2  ;;  %v8930_v44 = vsub.f32 %v15179_v21, %v8929_v32  ;;  %v8936_v2 = vsub.f32 %v15190_v35, %v8935_v24 }
 0x58c   :  { %8727 = vmatpush.msra.mxu0 %v16048_v22  ;;  %8902 = vmatpush.msrb.mxu3 %v8901_v11  ;;  %v16057_v11 = vld [vmem:[#allocation42_spill] sm:$0xff] }
 0x58d   :  { %8790 = vmatpush.msra.mxu1 %v14920_v41  ;;  %8825 = vmatpush.msrb.mxu2 %v15114_v39  ;;  %v8925_v41 = vand.u32 4294901760, %v8924_v10  ;;  %v8931_v6 = vand.u32 4294901760, %v8930_v44 }
 0x58e   :  { %8731 = vmatpush.msra.mxu0 %v16049_v5  ;;  %8908 = vmatpush.msrb.mxu3 %v8907_v26  ;;  %v16062_v26 = vand.u32 4294901760, %v16061_v15 }
 0x58f   :  { %8792 = vmatpush.msra.mxu1 %v14932_v0  ;;  %8827 = vmatpush.msrb.mxu2 %v15127_v28  ;;  %v16051_v0 = vand.u32 4294901760, %v14918_v31  ;;  %v16053_v31 = vand.u32 4294901760, %v14942_v9  ;;  %v16059_v9 = vand.u32 4294901760, %v14966_v17  ;;  %v16064_v17 = vld [vmem:[#allocation41_spill] sm:$0xff] }
 0x590   :  { %8735 = vmatpush.msra.mxu0 %v16050_v52  ;;  %8914 = vmatpush.msrb.mxu3 %v8913_v46 }
 0x591   :  { %8794 = vmatpush.msra.mxu1 %v14944_v23  ;;  %8829 = vmatpush.msrb.mxu2 %v15140_v19  ;;  %v8937_v23 = vand.u32 4294901760, %v8936_v2 }
 0x592   :  { %8739 = vmatpush.msra.mxu0 %v16051_v0  ;;  %8920 = vmatpush.msrb.mxu3 %v8919_v38 }
 0x593   :  { %8796 = vmatpush.msra.mxu1 %v14956_v27  ;;  %8831 = vmatpush.msrb.mxu2 %v15155_v37  ;;  %v16055_v27 = vand.u32 4294901760, %v15009_v16 }
 0x594   :  { %8743 = vmatpush.msra.mxu0 %v16052_v43  ;;  %8926 = vmatpush.msrb.mxu3 %v8925_v41 }
 0x595   :  { %8798 = vmatmul.f32.vlgmr.msra.gmra.mxu1 %v16032_v55  ;;  %8833 = vmatpush.msrb.mxu2 %v15168_v14 }
 0x596   :  { %8999 = vmatpush.msrb.mxu1 %v14992_v40  ;;  %8747 = vmatpush.msra.mxu0 %v16053_v31 }
 0x597   :  { %8932 = vmatpush.msrb.mxu3 %v8931_v6  ;;  %8839 = vmatmul.f32.vlgmr.msrb.gmra.mxu2 %v16054_v36 }
 0x598   :  { %9001 = vmatpush.msrb.mxu1 %v15000_v18  ;;  %9040 = vmatpush.msra.mxu2 %v16055_v27 }
 0x599   :  { %8751 = vmatpush.msra.mxu0 %v16056_v57  ;;  %8938 = vmatpush.msrb.mxu3 %v8937_v23 }
 0x59a   :  { %8940 = vmatmul.f32.vlgmr.msrb.gmra.mxu3 %v16057_v11  ;;  %9003 = vmatpush.msrb.mxu1 %v15013_v47 }
 0x59b   :  { %9044 = vmatpush.msra.mxu2 %v16058_v13  ;;  %9107 = vmatpush.msra.mxu3 %v14992_v40  ;;  %v16065_v40 = vand.u32 4294901760, %v16064_v17 }
 0x59c   :  { %8755 = vmatpush.msra.mxu0 %v16059_v9  ;;  %9005 = vmatpush.msrb.mxu1 %v15021_v51 }
 0x59d   :  { %9048 = vmatpush.msra.mxu2 %v16060_v56  ;;  %9109 = vmatpush.msra.mxu3 %v15000_v18  ;;  %v16066_v18 = vld [vmem:[#allocation29_spill] sm:$0xff] }
 0x59e   :  { %8759 = vmatpush.msra.mxu0 %v16062_v26  ;;  %9007 = vmatpush.msrb.mxu1 %v15025_v20 }
 0x59f   :  { %8761 = vmatmul.f32.vlgmr.msra.gmra.mxu0 %v16032_v55  ;;  %9052 = vmatpush.msra.mxu2 %v16063_v45  ;;  %v16067_v55 = vand.u32 4294901760, %v16066_v18 }
 0x5a0   :  { %8946 = vmatpush.msrb.mxu0 %v15009_v16  ;;  %9111 = vmatpush.msra.mxu3 %v15013_v47  ;;  %v16068_v47 = vand.u32 4294901760, %v15075_v49  ;;  %v16069_v16 = vand.u32 4294901760, %v15088_v60 }
 0x5a1   :  { %9009 = vmatpush.msrb.mxu1 %v15034_v7  ;;  %9056 = vmatpush.msra.mxu2 %v16065_v40 }
 0x5a2   :  { %8949 = vmatpush.msrb.mxu0 %v15017_v50  ;;  %9113 = vmatpush.msra.mxu3 %v15021_v51  ;;  %v7972_v51 = vpop.f32.mrf.mxu2 }
 0x5a3   :  { %9011 = vmatpush.msrb.mxu1 %v15051_v54  ;;  %9060 = vmatpush.msra.mxu2 %v16067_v55 }
 0x5a4   :  { %8952 = vmatpush.msrb.mxu0 %v15030_v48  ;;  %9115 = vmatpush.msra.mxu3 %v15025_v20 }
 0x5a5   :  { %9013 = vmatpush.msrb.mxu1 %v15064_v25  ;;  %9064 = vmatpush.msra.mxu2 %v16068_v47 }
 0x5a6   :  { %8955 = vmatpush.msrb.mxu0 %v15039_v58  ;;  %9117 = vmatpush.msra.mxu3 %v15034_v7  ;;  %v8011_v7 = vpop.f32.mrf.mxu3 }
 0x5a7   :  { %9015 = vmatpush.msrb.mxu1 %v15077_v42  ;;  %9068 = vmatpush.msra.mxu2 %v16069_v16 }
 0x5a8   :  { %8958 = vmatpush.msrb.mxu0 %v16064_v17  ;;  %9119 = vmatpush.msra.mxu3 %v15051_v54  ;;  %v7817_v54 = vpop.f32.mrf.mxu0 }
 0x5a9   :  { %9017 = vmatpush.msrb.mxu1 %v15090_v30  ;;  %9072 = vmatpush.msra.mxu2 %v8893_v59 }
 0x5aa   :  { %8961 = vmatpush.msrb.mxu0 %v16066_v18  ;;  %9121 = vmatpush.msra.mxu3 %v15064_v25  ;;  %v9196_v25 = vld [vmem:[%s15340_s9] sm:$0xf]  ;;  %s9415_s9 = smov [#allocation14]  }
 0x5ab   :  { %9019 = vmatpush.msrb.mxu1 %v15102_v8  ;;  %9076 = vmatpush.msra.mxu2 %v8899_v53  ;;  %s9156_s13 = sshll.u32 %s9415_s9, 4  ;;  %s9157_s13 = int_to_ptr.vmem [resolvable:$true] %s9156_s13 }
 0x5ac   :  { %8964 = vmatpush.msrb.mxu0 %v15075_v49  ;;  %9123 = vmatpush.msra.mxu3 %v15077_v42  ;;  %v16070_v42 = vld [vmem:[#allocation24_spill] sm:$0xff]  ;;  %v16071_v49 = vld [vmem:[#allocation43_spill] sm:$0xff] }
 0x5ad   :  { %9021 = vmatpush.msrb.mxu1 %v15114_v39  ;;  %9080 = vmatpush.msra.mxu2 %v8905_v3 }
 0x5ae   :  { %8967 = vmatpush.msrb.mxu0 %v15088_v60  ;;  %9125 = vmatpush.msra.mxu3 %v15090_v30  ;;  %v7918_v30 = vpop.f32.mrf.mxu1 }
 0x5af   :  { %9023 = vmatpush.msrb.mxu1 %v15127_v28  ;;  %9084 = vmatpush.msra.mxu2 %v8911_v12 }
 0x5b0   :  { %8970 = vmatpush.msrb.mxu0 %v15100_v62  ;;  %9127 = vmatpush.msra.mxu3 %v15102_v8 }
 0x5b1   :  { %9025 = vmatpush.msrb.mxu1 %v15140_v19  ;;  %9088 = vmatpush.msra.mxu2 %v8917_v4 }
 0x5b2   :  { %8973 = vmatpush.msrb.mxu0 %v15112_v61  ;;  %9129 = vmatpush.msra.mxu3 %v15114_v39  ;;  %v3682_v39 = vperm.slane %v9196_v25, 3 }
 0x5b3   :  { %9027 = vmatpush.msrb.mxu1 %v15155_v37  ;;  %9092 = vmatpush.msra.mxu2 %v8923_v63 }
 0x5b4   :  { %8976 = vmatpush.msrb.mxu0 %v15125_v34  ;;  %9131 = vmatpush.msra.mxu3 %v15127_v28  ;;  %v7818_v20 = vadd.f32 %v7817_v54, %v3682_v39  ;;  %v8158_v34 = vpop.f32.mrf.mxu2 }
 0x5b5   :  { %9029 = vmatpush.msrb.mxu1 %v15168_v14  ;;  %9096 = vmatpush.msra.mxu2 %v8929_v32 }
 0x5b6   :  { %8979 = vmatpush.msrb.mxu0 %v15138_v33  ;;  %9133 = vmatpush.msra.mxu3 %v15140_v19  ;;  %v7919_v50 = vadd.f32 %v7918_v30, %v7818_v20  ;;  %v8080_v58 = vpop.f32.mrf.mxu0  ;;  %v8117_v8 = vpop.f32.mrf.mxu1 }
 0x5b7   :  { %9033 = vmatmul.f32.vlgmr.msrb.gmra.mxu1 %v16070_v42  ;;  %9100 = vmatpush.msra.mxu2 %v8935_v24  ;;  %v8259_v59 = vpop.f32.mrf.mxu3 }
 0x5b8   :  { %8982 = vmatpush.msrb.mxu0 %v15151_v29  ;;  %9135 = vmatpush.msra.mxu3 %v15155_v37  ;;  %v7973_v48 = vadd.f32 %v7972_v51, %v7919_v50 }
 0x5b9   :  { %9102 = vmatmul.f32.vlgmr.msra.gmra.mxu2 %v16057_v11 }
 0x5ba   :  { %8985 = vmatpush.msrb.mxu0 %v15164_v1  ;;  %9137 = vmatpush.msra.mxu3 %v15168_v14  ;;  %v8012_v28 = vadd.f32 %v8011_v7, %v7973_v48 }
 0x5bb   :  { %9139 = vmatmul.f32.vlgmr.msra.gmra.mxu3 %v16057_v11 }
 0x5bc   :  { %8988 = vmatpush.msrb.mxu0 %v15179_v21  ;;  %v8081_v60 = vadd.f32 %v8080_v58, %v8012_v28 }
 0x5be   :  { %8991 = vmatpush.msrb.mxu0 %v15190_v35  ;;  %v8118_v62 = vadd.f32 %v8117_v8, %v8081_v60 }
 0x5bf   :  { %8994 = vmatmul.f32.vlgmr.msrb.gmra.mxu0 %v16071_v49 }
 0x5c0   :  { %v8159_v61 = vadd.f32 %v8158_v34, %v8118_v62 }
 0x5c2   :  { %v8260_v33 = vadd.f32 %v8259_v59, %v8159_v61 }
 0x5ce   :  { %v8352_v3 = vpop.f32.mrf.mxu1 }
 0x5d6   :  { %v8421_v37 = vpop.f32.mrf.mxu2 }
 0x5d8   :  { %v8313_v53 = vpop.f32.mrf.mxu0 }
 0x5d9   :  { %v8314_v19 = vadd.f32 %v8313_v53, %v8260_v33  ;;  %v8458_v1 = vpop.f32.mrf.mxu3 }
 0x5db   :  { %v8353_v29 = vadd.f32 %v8352_v3, %v8314_v19 }
 0x5dd   :  { %v8422_v12 = vadd.f32 %v8421_v37, %v8353_v29 }
 0x5df   :  { %v8459_v4 = vadd.f32 %v8458_v1, %v8422_v12 }
 0x5f0   :  { %v8600_v63 = vpop.f32.mrf.mxu1 }
 0x5f8   :  { %v8654_v32 = vpop.f32.mrf.mxu2 }
 0x5fa   :  { %v8499_v14 = vpop.f32.mrf.mxu0 }
 0x5fb   :  { %v8500_v21 = vadd.f32 %v8499_v14, %v8459_v4  ;;  %v8693_v46 = vpop.f32.mrf.mxu3 }
 0x5fd   :  { %v8601_v35 = vadd.f32 %v8600_v63, %v8500_v21 }
 0x5ff   :  { %v8655_v22 = vadd.f32 %v8654_v32, %v8601_v35 }
 0x601   :  { %v8694_v24 = vadd.f32 %v8693_v46, %v8655_v22 }
 0x612   :  { %v8799_v38 = vpop.f32.mrf.mxu1 }
 0x61a   :  { %v8840_v52 = vpop.f32.mrf.mxu2 }
 0x61c   :  { %v8762_v10 = vpop.f32.mrf.mxu0 }
 0x61d   :  { %v8763_v5 = vadd.f32 %v8762_v10, %v8694_v24  ;;  %v8941_v2 = vpop.f32.mrf.mxu3 }
 0x61f   :  { %v8800_v44 = vadd.f32 %v8799_v38, %v8763_v5 }
 0x621   :  { %v8841_v41 = vadd.f32 %v8840_v52, %v8800_v44 }
 0x623   :  { %v8942_v0 = vadd.f32 %v8941_v2, %v8841_v41 }
 0x634   :  { %v9034_v23 = vpop.f32.mrf.mxu1 }
 0x63c   :  { %v8995_v6 = vpop.f32.mrf.mxu0  ;;  %v9103_v36 = vpop.f32.mrf.mxu2 }
 0x63d   :  { %v8996_v43 = vadd.f32 %v8995_v6, %v8942_v0 }
 0x63e   :  { %v9140_v57 = vpop.f32.mrf.mxu3 }
 0x63f   :  { %v9035_v31 = vadd.f32 %v9034_v23, %v8996_v43 }
 0x641   :  { %v9104_v27 = vadd.f32 %v9103_v36, %v9035_v31 }
 0x643   :  { %v9141_v11 = vadd.f32 %v9140_v57, %v9104_v27 }
 0x645   :  { %v9146_v13 = vmax.f32 %v9141_v11, 0.0 }
 0x647   :  { %9150 = vst [vmem:[#allocation14 + $0x18] sm:$0xff] %v9146_v13 }
 0x648   :  { %9161 = dma.vmem_to_hbm [thread:$0]  %s9157_s13, 512, %s9159_s21, [#allocation4]  }
 0x649   :  { %9397 = dma.done.wait [#allocation4], 512  }
 0x64a   :  { %9398 = vsyncadd [#allocation4], 4294966784 }
 0x64b   :  { %9166 = vsyncpa [#allocation3], 1 }
 0x64c   :  { %9167 = vsyncpa [#allocation6], 1 }
 0x64d   :  { %9168 = vsyncpa [#allocation9], 1 }
 0x64e   :  { %9169 = vsyncpa [#allocation12], 1 }
 0x64f   :  { %9170 = vsyncpa [#allocation4], 1 }

</bundles_post_ra>
